<compile_context>
chip_gen: v7x
topology: tpu7x:2x2x1
jax: 0.10.0
libtpu: 0.0.40
codegen_flags: <defaults>
</compile_context>

<pallas_src>
import functools

import jax
import jax.numpy as jnp
from jax.experimental import pallas as pl
from jax.experimental.pallas import tpu as pltpu


# --------------------------------------------------------------------------
# Config / parameters (deterministic, synthetic backbone)
# --------------------------------------------------------------------------

CFG = dict(in_ch=3, img=16, patch=4, d_model=256, n_heads=2, d_mlp=512,
           d_feat=1024, d_fundus=768, d_fc_hidden=64, classes=4)

PRED_PAD = 128    # lane-dense padding for the `classes`-wide classifier output
FC_HID_PAD = 128  # lane-dense padding for the 64-wide fc hidden layer


def init_params(key):
    c = CFG
    patch_dim = c["in_ch"] * c["patch"] * c["patch"]
    T = (c["img"] // c["patch"]) ** 2
    D = c["d_model"]

    def w(key, shape, scale=0.02):
        return (scale * jax.random.normal(key, shape)).astype(jnp.float32)

    keys = iter(jax.random.split(key, 16))
    p = {
        # backbone (synthetic stand-in for fundus_build_model)
        "w_embed": w(next(keys), (patch_dim, D)), "b_embed": jnp.zeros((D,), jnp.float32),
        "pos_emb": w(next(keys), (T, D)),
        "ln1_g": jnp.ones((D,), jnp.float32), "ln1_b": jnp.zeros((D,), jnp.float32),
        "w_qkv": w(next(keys), (D, 3 * D)), "b_qkv": jnp.zeros((3 * D,), jnp.float32),
        "w_proj": w(next(keys), (D, D)), "b_proj": jnp.zeros((D,), jnp.float32),
        "ln2_g": jnp.ones((D,), jnp.float32), "ln2_b": jnp.zeros((D,), jnp.float32),
        "w_mlp1": w(next(keys), (D, c["d_mlp"])), "b_mlp1": jnp.zeros((c["d_mlp"],), jnp.float32),
        "w_mlp2": w(next(keys), (c["d_mlp"], D)), "b_mlp2": jnp.zeros((D,), jnp.float32),
        "lnf_g": jnp.ones((D,), jnp.float32), "lnf_b": jnp.zeros((D,), jnp.float32),
        "w_head": w(next(keys), (D, c["d_feat"])), "b_head": jnp.zeros((c["d_feat"],), jnp.float32),
        # fc_fundus: ReLU -> Linear(1024, 768) -> ReLU
        "w_fundus": w(next(keys), (c["d_feat"], c["d_fundus"])),
        "b_fundus": jnp.zeros((c["d_fundus"],), jnp.float32),
        # fc: ReLU -> Linear(1024, 64) -> ReLU -> Linear(64, classes)
        "w_fc1": w(next(keys), (c["d_feat"], c["d_fc_hidden"])),
        "b_fc1": jnp.zeros((c["d_fc_hidden"],), jnp.float32),
        "w_fc2": w(next(keys), (c["d_fc_hidden"], c["classes"])),
        "b_fc2": jnp.zeros((c["classes"],), jnp.float32),
    }
    return p


# --------------------------------------------------------------------------
# Host-side packing of tiny bias / LayerNorm vectors into ONE lane-dense array
# --------------------------------------------------------------------------

def _pack_vectors(named):
    """Pack 1-D f32 vectors into one (1, total) array.

    Every segment starts on a 128-lane boundary so in-kernel static slices are
    whole-vreg selects (no lane rotation)."""
    parts, offsets, off = [], {}, 0
    for name, v in named:
        v = jnp.asarray(v, jnp.float32).reshape(-1)
        size = int(v.shape[0])
        pad = (-size) % 128
        if pad:
            v = jnp.concatenate([v, jnp.zeros((pad,), jnp.float32)])
        offsets[name] = (off, size)
        parts.append(v)
        off += size + pad
    return jnp.concatenate(parts).reshape(1, off), offsets


# --------------------------------------------------------------------------
# The single fused Pallas kernel
# --------------------------------------------------------------------------

def _fused_kernel(
    # activations / packed vectors (f32)
    patches_ref, pos_ref, vec_ref,
    # small/medium weights auto-piped to VMEM (bf16)
    w_embed_ref, w_qkv_ref, w_proj_ref, w_mlp1_ref, w_mlp2_ref, w_fc2_ref,
    # large head weights left in HBM (streamed manually, bf16)
    w_head_hbm, w_fundus_hbm, w_fc1_hbm,
    # outputs
    pred_ref, backbone_ref,
    # scratch
    w_head_vmem, w_fundus_vmem, w_fc1_vmem, dma_sem,
    *, B, T, nH, dh, vec_off,
):
    f32, bf16 = jnp.float32, jnp.bfloat16
    D = nH * dh

    # -- start streaming the big head weights now; they are only needed after
    #    the encoder block, so their HBM->VMEM DMA overlaps the compute below.
    cp_head = pltpu.make_async_copy(w_head_hbm, w_head_vmem, dma_sem.at[0])
    cp_fundus = pltpu.make_async_copy(w_fundus_hbm, w_fundus_vmem, dma_sem.at[1])
    cp_fc1 = pltpu.make_async_copy(w_fc1_hbm, w_fc1_vmem, dma_sem.at[2])
    cp_head.start()
    cp_fundus.start()
    cp_fc1.start()

    def vec(name):
        off, size = vec_off[name]
        return vec_ref[:, off:off + size]          # (1, size) f32, 128-aligned

    def ln(x, g, b, eps=1e-5):
        mu = jnp.mean(x, axis=-1, keepdims=True)
        var = jnp.mean(jnp.square(x - mu), axis=-1, keepdims=True)
        return (x - mu) * jax.lax.rsqrt(var + eps) * g + b

    def mxu(a, w):                                  # bf16 x bf16 -> f32 acc
        return jnp.dot(a.astype(bf16), w, preferred_element_type=f32)

    # ---- patch embed + positional embedding (pos broadcast in-kernel) ----
    pos = jnp.broadcast_to(pos_ref[...][None], (B, T, D)).reshape(B * T, D)
    tok = mxu(patches_ref[...], w_embed_ref[...]) + vec("b_embed") + pos

    # ---- encoder block: fused-QKV multi-head self-attention (pre-LN) ----
    h1 = ln(tok, vec("ln1_g"), vec("ln1_b"))
    qkv = mxu(h1, w_qkv_ref[...]) + vec("b_qkv")     # one (D, 3D) matmul
    scale = 1.0 / (dh ** 0.5)
    o_heads = []
    for hd in range(nH):                             # static unroll; dh == 128
        q = qkv[:, 0 * D + hd * dh: 0 * D + (hd + 1) * dh].reshape(B, T, dh)
        k = qkv[:, 1 * D + hd * dh: 1 * D + (hd + 1) * dh].reshape(B, T, dh)
        v = qkv[:, 2 * D + hd * dh: 2 * D + (hd + 1) * dh].reshape(B, T, dh)
        s = jnp.einsum("bqd,bkd->bqk", q.astype(bf16), k.astype(bf16),
                       preferred_element_type=f32) * scale
        s = s - jnp.max(s, axis=-1, keepdims=True)
        p = jnp.exp(s)
        p = p / jnp.sum(p, axis=-1, keepdims=True)   # exact softmax (review)
        o = jnp.einsum("bqk,bkd->bqd", p.astype(bf16), v.astype(bf16),
                       preferred_element_type=f32)
        o_heads.append(o.reshape(B * T, dh))
    attn = jnp.concatenate(o_heads, axis=-1)         # (B*T, D), lane-aligned
    tok = tok + mxu(attn, w_proj_ref[...]) + vec("b_proj")   # one projection

    # ---- encoder block: MLP (pre-LN) ----
    # TODO(synk): PyTorch nn.GELU defaults to exact erf; the tanh approximation
    # is used here (backbone is synthetic, erf parity not required).
    h2 = ln(tok, vec("ln2_g"), vec("ln2_b"))
    m = jax.nn.gelu(mxu(h2, w_mlp1_ref[...]) + vec("b_mlp1"), approximate=True)
    tok = tok + mxu(m, w_mlp2_ref[...]) + vec("b_mlp2")

    # ---- final LN -> mean pool over tokens -> 1024-d backbone feature ----
    hf = ln(tok, vec("lnf_g"), vec("lnf_b"))                     # (B*T, D)
    pooled = jnp.sum(hf.reshape(B, T, D), axis=1) * (1.0 / T)    # (B, D)

    cp_head.wait()
    feat = mxu(pooled, w_head_vmem[...]) + vec("b_head")         # (B, 1024)

    # shared ReLU on the backbone feature (used by both heads)
    feat_r = jnp.maximum(feat, 0.0)

    # fc_fundus: ReLU -> Linear(1024, 768) -> ReLU
    cp_fundus.wait()
    fundus = jnp.maximum(mxu(feat_r, w_fundus_vmem[...]) + vec("b_fundus"), 0.0)
    backbone_ref[...] = fundus.astype(backbone_ref.dtype)

    # fc: ReLU -> Linear(1024, 64) -> ReLU -> Linear(64, classes)
    # (hidden and output lane-padded to 128; padded rows/cols are zero so the
    #  result is unchanged and the final store is lane-dense)
    cp_fc1.wait()
    hh = jnp.maximum(mxu(feat_r, w_fc1_vmem[...]) + vec("b_fc1"), 0.0)  # (B,128)
    pred = mxu(hh, w_fc2_ref[...]) + vec("b_fc2")                       # (B,128)
    pred_ref[...] = pred.astype(pred_ref.dtype)


def _full_spec(shape):
    zeros = (0,) * len(shape)
    return pl.BlockSpec(shape, lambda i, z=zeros: z)


# --------------------------------------------------------------------------
# Forward pass (one pallas_call)
# --------------------------------------------------------------------------

def twoD_transformer_forward(params, X, y):
    """Mirrors twoD_transformer.forward(X, y) -> (pred, backboneout_1)."""
    del y  # only used by the (training-time) CE loss, not in forward
    x_img = X[0]
    c = CFG
    B, C, H, W = x_img.shape
    pz, D, nH = c["patch"], c["d_model"], c["n_heads"]
    dh = D // nH
    ph, pw = H // pz, W // pz
    T = ph * pw
    BT = B * T
    classes = c["classes"]
    bf16 = jnp.bfloat16

    # --- wrapper-side layout glue (pure reshapes / cheap pads & casts) ---
    # patchify: NCHW -> (B*T, C*p*p)
    patches = x_img.reshape(B, C, ph, pz, pw, pz)
    patches = patches.transpose(0, 2, 4, 1, 3, 5).reshape(BT, C * pz * pz)

    # lane-pad the tiny fc head so every in-kernel matmul / store is lane-dense
    w_fc1p = jnp.zeros((c["d_feat"], FC_HID_PAD), jnp.float32)
    w_fc1p = w_fc1p.at[:, :c["d_fc_hidden"]].set(params["w_fc1"])
    b_fc1p = jnp.zeros((FC_HID_PAD,), jnp.float32).at[:c["d_fc_hidden"]].set(params["b_fc1"])
    w_fc2p = jnp.zeros((FC_HID_PAD, PRED_PAD), jnp.float32)
    w_fc2p = w_fc2p.at[:c["d_fc_hidden"], :classes].set(params["w_fc2"])
    b_fc2p = jnp.zeros((PRED_PAD,), jnp.float32).at[:classes].set(params["b_fc2"])

    # pack all tiny bias / LayerNorm vectors into ONE lane-dense array
    vec_packed, vec_off = _pack_vectors([
        ("b_embed", params["b_embed"]),
        ("ln1_g", params["ln1_g"]), ("ln1_b", params["ln1_b"]),
        ("b_qkv", params["b_qkv"]), ("b_proj", params["b_proj"]),
        ("ln2_g", params["ln2_g"]), ("ln2_b", params["ln2_b"]),
        ("b_mlp1", params["b_mlp1"]), ("b_mlp2", params["b_mlp2"]),
        ("lnf_g", params["lnf_g"]), ("lnf_b", params["lnf_b"]),
        ("b_head", params["b_head"]), ("b_fundus", params["b_fundus"]),
        ("b_fc1", b_fc1p), ("b_fc2", b_fc2p),
    ])

    # all weight matrices travel HBM->VMEM as bfloat16 (f32 accumulation in-kernel)
    auto_inputs = [
        patches, params["pos_emb"], vec_packed,
        params["w_embed"].astype(bf16), params["w_qkv"].astype(bf16),
        params["w_proj"].astype(bf16), params["w_mlp1"].astype(bf16),
        params["w_mlp2"].astype(bf16), w_fc2p.astype(bf16),
    ]
    hbm_inputs = [params["w_head"].astype(bf16),
                  params["w_fundus"].astype(bf16),
                  w_fc1p.astype(bf16)]

    kernel = functools.partial(_fused_kernel, B=B, T=T, nH=nH, dh=dh,
                               vec_off=vec_off)
    pred_pad, backboneout_1 = pl.pallas_call(
        kernel,
        out_shape=(jax.ShapeDtypeStruct((B, PRED_PAD), jnp.float32),
                   jax.ShapeDtypeStruct((B, c["d_fundus"]), jnp.float32)),
        grid=(1,),
        in_specs=[_full_spec(a.shape) for a in auto_inputs]
                 + [pl.BlockSpec(memory_space=pl.ANY) for _ in hbm_inputs],
        out_specs=(_full_spec((B, PRED_PAD)),
                   _full_spec((B, c["d_fundus"]))),
        scratch_shapes=[
            pltpu.VMEM((D, c["d_feat"]), bf16),               # w_head
            pltpu.VMEM((c["d_feat"], c["d_fundus"]), bf16),   # w_fundus
            pltpu.VMEM((c["d_feat"], FC_HID_PAD), bf16),      # w_fc1 (padded)
            pltpu.SemaphoreType.DMA((3,)),
        ],
        compiler_params=pltpu.CompilerParams(
            dimension_semantics=("arbitrary",)),
    )(*auto_inputs, *hbm_inputs)

    pred = pred_pad[:, :classes]
    return pred, backboneout_1


# --------------------------------------------------------------------------
# Demo
# --------------------------------------------------------------------------

if __name__ == "__main__":
    key = jax.random.PRNGKey(0)
    k_param, k_x, k_y = jax.random.split(key, 3)

    params = init_params(k_param)

    B = 2
    x_img = jax.random.normal(k_x, (B, CFG["in_ch"], CFG["img"], CFG["img"]),
                              dtype=jnp.float32)
    y = jax.random.randint(k_y, (B,), 0, CFG["classes"])
    X = [x_img]  # single (fundus) modality

    fwd = jax.jit(lambda p, x0, yy: twoD_transformer_forward(p, [x0], yy))
    pred, backboneout_1 = fwd(params, x_img, y)
    jax.block_until_ready((pred, backboneout_1))

    assert pred.shape == (B, CFG["classes"])
    assert backboneout_1.shape == (B, CFG["d_fundus"])
    assert bool(jnp.all(jnp.isfinite(pred))) and bool(jnp.all(jnp.isfinite(backboneout_1)))
    print("KERNEL_OK")
</pallas_src>

<mosaic_0001>
module attributes {stable_mosaic.version = 11 : i64} {
  func.func @_fused_kernel(%arg0: i32, %arg1: memref<32x48xf32, #tpu.memory_space<vmem>>, %arg2: memref<16x256xf32, #tpu.memory_space<vmem>>, %arg3: memref<1x5632xf32, #tpu.memory_space<vmem>>, %arg4: memref<48x256xbf16, #tpu.memory_space<vmem>>, %arg5: memref<256x768xbf16, #tpu.memory_space<vmem>>, %arg6: memref<256x256xbf16, #tpu.memory_space<vmem>>, %arg7: memref<256x512xbf16, #tpu.memory_space<vmem>>, %arg8: memref<512x256xbf16, #tpu.memory_space<vmem>>, %arg9: memref<128x128xbf16, #tpu.memory_space<vmem>>, %arg10: memref<256x1024xbf16, #tpu.memory_space<any>>, %arg11: memref<1024x768xbf16, #tpu.memory_space<any>>, %arg12: memref<1024x128xbf16, #tpu.memory_space<any>>, %arg13: memref<2x128xf32, #tpu.memory_space<vmem>>, %arg14: memref<2x768xf32, #tpu.memory_space<vmem>>, %arg15: memref<256x1024xbf16, #tpu.memory_space<vmem>>, %arg16: memref<1024x768xbf16, #tpu.memory_space<vmem>>, %arg17: memref<1024x128xbf16, #tpu.memory_space<vmem>>, %arg18: memref<3x!tpu.dma_semaphore, #tpu.memory_space<semaphore_mem>>) attributes {dimension_semantics = [#tpu.dimension_semantics<arbitrary>], iteration_bounds = array<i64: 1>, scalar_prefetch = 0 : i64, scratch_operands = 4 : i64, tpu.core_type = #tpu.core_type<tc>, window_params = [{pipeline_mode = #tpu.pipeline_mode<synchronous>, transform_indices = @transform_0, window_bounds = array<i64: 32, 48>}, {pipeline_mode = #tpu.pipeline_mode<synchronous>, transform_indices = @transform_1, window_bounds = array<i64: 16, 256>}, {pipeline_mode = #tpu.pipeline_mode<synchronous>, transform_indices = @transform_2, window_bounds = array<i64: 1, 5632>}, {pipeline_mode = #tpu.pipeline_mode<synchronous>, transform_indices = @transform_3, window_bounds = array<i64: 48, 256>}, {pipeline_mode = #tpu.pipeline_mode<synchronous>, transform_indices = @transform_4, window_bounds = array<i64: 256, 768>}, {pipeline_mode = #tpu.pipeline_mode<synchronous>, transform_indices = @transform_5, window_bounds = array<i64: 256, 256>}, {pipeline_mode = #tpu.pipeline_mode<synchronous>, transform_indices = @transform_6, window_bounds = array<i64: 256, 512>}, {pipeline_mode = #tpu.pipeline_mode<synchronous>, transform_indices = @transform_7, window_bounds = array<i64: 512, 256>}, {pipeline_mode = #tpu.pipeline_mode<synchronous>, transform_indices = @transform_8, window_bounds = array<i64: 128, 128>}, {}, {}, {}, {pipeline_mode = #tpu.pipeline_mode<synchronous>, transform_indices = @transform_12, window_bounds = array<i64: 2, 128>}, {pipeline_mode = #tpu.pipeline_mode<synchronous>, transform_indices = @transform_13, window_bounds = array<i64: 2, 768>}]} {
    %c0_i32 = arith.constant 0 : i32
    %0 = tpu.memref_slice %arg18[%c0_i32] : memref<3x!tpu.dma_semaphore, #tpu.memory_space<semaphore_mem>> -> memref<1x!tpu.dma_semaphore, #tpu.memory_space<semaphore_mem>>
    %1 = tpu.memref_squeeze %0 : memref<1x!tpu.dma_semaphore, #tpu.memory_space<semaphore_mem>> -> memref<!tpu.dma_semaphore, #tpu.memory_space<semaphore_mem>>
    tpu.enqueue_dma source(%arg10 : memref<256x1024xbf16, #tpu.memory_space<any>>) target(%arg15 : memref<256x1024xbf16, #tpu.memory_space<vmem>>) target_semaphore(%1 : memref<!tpu.dma_semaphore, #tpu.memory_space<semaphore_mem>>)
    %c1_i32 = arith.constant 1 : i32
    %2 = tpu.memref_slice %arg18[%c1_i32] : memref<3x!tpu.dma_semaphore, #tpu.memory_space<semaphore_mem>> -> memref<1x!tpu.dma_semaphore, #tpu.memory_space<semaphore_mem>>
    %3 = tpu.memref_squeeze %2 : memref<1x!tpu.dma_semaphore, #tpu.memory_space<semaphore_mem>> -> memref<!tpu.dma_semaphore, #tpu.memory_space<semaphore_mem>>
    tpu.enqueue_dma source(%arg11 : memref<1024x768xbf16, #tpu.memory_space<any>>) target(%arg16 : memref<1024x768xbf16, #tpu.memory_space<vmem>>) target_semaphore(%3 : memref<!tpu.dma_semaphore, #tpu.memory_space<semaphore_mem>>)
    %c2_i32 = arith.constant 2 : i32
    %4 = tpu.memref_slice %arg18[%c2_i32] : memref<3x!tpu.dma_semaphore, #tpu.memory_space<semaphore_mem>> -> memref<1x!tpu.dma_semaphore, #tpu.memory_space<semaphore_mem>>
    %5 = tpu.memref_squeeze %4 : memref<1x!tpu.dma_semaphore, #tpu.memory_space<semaphore_mem>> -> memref<!tpu.dma_semaphore, #tpu.memory_space<semaphore_mem>>
    tpu.enqueue_dma source(%arg12 : memref<1024x128xbf16, #tpu.memory_space<any>>) target(%arg17 : memref<1024x128xbf16, #tpu.memory_space<vmem>>) target_semaphore(%5 : memref<!tpu.dma_semaphore, #tpu.memory_space<semaphore_mem>>)
    %c0 = arith.constant 0 : index
    %c0_0 = arith.constant 0 : index
    %6 = vector.load %arg2[%c0, %c0_0] : memref<16x256xf32, #tpu.memory_space<vmem>>, vector<16x256xf32>
    %7 = vector.shape_cast %6 : vector<16x256xf32> to vector<1x16x256xf32>
    %8 = vector.shape_cast %7 : vector<1x16x256xf32> to vector<1x16x256xf32>
    %9 = vector.broadcast %8 : vector<1x16x256xf32> to vector<2x16x256xf32>
    %10 = vector.shape_cast %9 : vector<2x16x256xf32> to vector<32x256xf32>
    %c0_1 = arith.constant 0 : index
    %c0_2 = arith.constant 0 : index
    %11 = vector.load %arg1[%c0_1, %c0_2] : memref<32x48xf32, #tpu.memory_space<vmem>>, vector<32x48xf32>
    %c0_3 = arith.constant 0 : index
    %c0_4 = arith.constant 0 : index
    %12 = vector.load %arg4[%c0_3, %c0_4] : memref<48x256xbf16, #tpu.memory_space<vmem>>, vector<48x256xbf16>
    %13 = arith.truncf %11 : vector<32x48xf32> to vector<32x48xbf16>
    %cst = arith.constant dense<0.000000e+00> : vector<32x256xf32>
    %14 = tpu.matmul %13, %12, %cst {dimension_numbers = #tpu.dot_dimension_numbers<[1], [0], [0], [1], [0, 0, 1, 1], [], []>} : vector<32x48xbf16>, vector<48x256xbf16>, vector<32x256xf32> -> vector<32x256xf32>
    %c0_5 = arith.constant 0 : index
    %c0_6 = arith.constant 0 : index
    %15 = vector.load %arg3[%c0_5, %c0_6] : memref<1x5632xf32, #tpu.memory_space<vmem>>, vector<1x256xf32>
    %16 = vector.broadcast %15 : vector<1x256xf32> to vector<32x256xf32>
    %17 = arith.addf %14, %16 : vector<32x256xf32>
    %18 = arith.addf %17, %10 : vector<32x256xf32>
    %c0_7 = arith.constant 0 : index
    %c256 = arith.constant 256 : index
    %19 = vector.load %arg3[%c0_7, %c256] : memref<1x5632xf32, #tpu.memory_space<vmem>>, vector<1x256xf32>
    %c0_8 = arith.constant 0 : index
    %c512 = arith.constant 512 : index
    %20 = vector.load %arg3[%c0_8, %c512] : memref<1x5632xf32, #tpu.memory_space<vmem>>, vector<1x256xf32>
    %cst_9 = arith.constant dense<0.000000e+00> : vector<32xf32>
    %21 = vector.multi_reduction <add>, %18, %cst_9 [1] : vector<32x256xf32> to vector<32xf32>
    %22 = vector.shape_cast %21 : vector<32xf32> to vector<32x1xf32>
    %cst_10 = arith.constant 2.560000e+02 : f32
    %23 = vector.broadcast %cst_10 : f32 to vector<32x1xf32>
    %24 = arith.divf %22, %23 : vector<32x1xf32>
    %25 = vector.broadcast %24 : vector<32x1xf32> to vector<32x256xf32>
    %26 = arith.subf %18, %25 : vector<32x256xf32>
    %27 = arith.mulf %26, %26 : vector<32x256xf32>
    %cst_11 = arith.constant dense<0.000000e+00> : vector<32xf32>
    %28 = vector.multi_reduction <add>, %27, %cst_11 [1] : vector<32x256xf32> to vector<32xf32>
    %29 = vector.shape_cast %28 : vector<32xf32> to vector<32x1xf32>
    %cst_12 = arith.constant 2.560000e+02 : f32
    %30 = vector.broadcast %cst_12 : f32 to vector<32x1xf32>
    %31 = arith.divf %29, %30 : vector<32x1xf32>
    %32 = vector.broadcast %24 : vector<32x1xf32> to vector<32x256xf32>
    %33 = arith.subf %18, %32 : vector<32x256xf32>
    %cst_13 = arith.constant 9.99999974E-6 : f32
    %34 = vector.broadcast %cst_13 : f32 to vector<32x1xf32>
    %35 = arith.addf %31, %34 : vector<32x1xf32>
    %36 = math.rsqrt %35 : vector<32x1xf32>
    %37 = vector.broadcast %36 : vector<32x1xf32> to vector<32x256xf32>
    %38 = arith.mulf %33, %37 : vector<32x256xf32>
    %39 = vector.broadcast %19 : vector<1x256xf32> to vector<32x256xf32>
    %40 = arith.mulf %38, %39 : vector<32x256xf32>
    %41 = vector.broadcast %20 : vector<1x256xf32> to vector<32x256xf32>
    %42 = arith.addf %40, %41 : vector<32x256xf32>
    %c0_14 = arith.constant 0 : index
    %c0_15 = arith.constant 0 : index
    %43 = vector.load %arg5[%c0_14, %c0_15] : memref<256x768xbf16, #tpu.memory_space<vmem>>, vector<256x768xbf16>
    %44 = arith.truncf %42 : vector<32x256xf32> to vector<32x256xbf16>
    %cst_16 = arith.constant dense<0.000000e+00> : vector<32x768xf32>
    %45 = tpu.matmul %44, %43, %cst_16 {dimension_numbers = #tpu.dot_dimension_numbers<[1], [0], [0], [1], [0, 0, 1, 1], [], []>} : vector<32x256xbf16>, vector<256x768xbf16>, vector<32x768xf32> -> vector<32x768xf32>
    %c0_17 = arith.constant 0 : index
    %c768 = arith.constant 768 : index
    %46 = vector.load %arg3[%c0_17, %c768] : memref<1x5632xf32, #tpu.memory_space<vmem>>, vector<1x768xf32>
    %47 = vector.broadcast %46 : vector<1x768xf32> to vector<32x768xf32>
    %48 = arith.addf %45, %47 : vector<32x768xf32>
    %49 = vector.extract_strided_slice %48 {offsets = [0, 0], sizes = [32, 128], strides = [1, 1]} : vector<32x768xf32> to vector<32x128xf32>
    %50 = vector.shape_cast %49 : vector<32x128xf32> to vector<2x16x128xf32>
    %51 = vector.extract_strided_slice %48 {offsets = [0, 256], sizes = [32, 128], strides = [1, 1]} : vector<32x768xf32> to vector<32x128xf32>
    %52 = vector.shape_cast %51 : vector<32x128xf32> to vector<2x16x128xf32>
    %53 = vector.extract_strided_slice %48 {offsets = [0, 512], sizes = [32, 128], strides = [1, 1]} : vector<32x768xf32> to vector<32x128xf32>
    %54 = vector.shape_cast %53 : vector<32x128xf32> to vector<2x16x128xf32>
    %55 = arith.truncf %50 : vector<2x16x128xf32> to vector<2x16x128xbf16>
    %56 = arith.truncf %52 : vector<2x16x128xf32> to vector<2x16x128xbf16>
    "tpu.trace_start"() <{level = 10 : i32, message = "bqd,bkd->bqk"}> : () -> ()
    %cst_18 = arith.constant dense<0.000000e+00> : vector<2x16x16xf32>
    %57 = tpu.matmul %55, %56, %cst_18 {dimension_numbers = #tpu.dot_dimension_numbers<[2], [2], [1], [1], [0, 0, 0, 1, 1, 1], [0], [0]>} : vector<2x16x128xbf16>, vector<2x16x128xbf16>, vector<2x16x16xf32> -> vector<2x16x16xf32>
    "tpu.trace_stop"() : () -> ()
    %cst_19 = arith.constant 0.0883883461 : f32
    %58 = vector.broadcast %cst_19 : f32 to vector<2x16x16xf32>
    %59 = arith.mulf %57, %58 : vector<2x16x16xf32>
    %cst_20 = arith.constant dense<0xFF800000> : vector<2x16xf32>
    %60 = vector.multi_reduction <maximumf>, %59, %cst_20 [2] : vector<2x16x16xf32> to vector<2x16xf32>
    %61 = vector.shape_cast %60 : vector<2x16xf32> to vector<2x16x1xf32>
    %62 = vector.broadcast %61 : vector<2x16x1xf32> to vector<2x16x16xf32>
    %63 = arith.subf %59, %62 : vector<2x16x16xf32>
    %64 = math.exp %63 : vector<2x16x16xf32>
    %cst_21 = arith.constant dense<0.000000e+00> : vector<2x16xf32>
    %65 = vector.multi_reduction <add>, %64, %cst_21 [2] : vector<2x16x16xf32> to vector<2x16xf32>
    %66 = vector.shape_cast %65 : vector<2x16xf32> to vector<2x16x1xf32>
    %67 = vector.broadcast %66 : vector<2x16x1xf32> to vector<2x16x16xf32>
    %68 = arith.divf %64, %67 : vector<2x16x16xf32>
    %69 = arith.truncf %68 : vector<2x16x16xf32> to vector<2x16x16xbf16>
    %70 = arith.truncf %54 : vector<2x16x128xf32> to vector<2x16x128xbf16>
    "tpu.trace_start"() <{level = 10 : i32, message = "bqk,bkd->bqd"}> : () -> ()
    %cst_22 = arith.constant dense<0.000000e+00> : vector<2x16x128xf32>
    %71 = tpu.matmul %69, %70, %cst_22 {dimension_numbers = #tpu.dot_dimension_numbers<[2], [1], [1], [2], [0, 0, 0, 1, 1, 2], [0], [0]>} : vector<2x16x16xbf16>, vector<2x16x128xbf16>, vector<2x16x128xf32> -> vector<2x16x128xf32>
    "tpu.trace_stop"() : () -> ()
    %72 = vector.shape_cast %71 : vector<2x16x128xf32> to vector<32x128xf32>
    %73 = vector.extract_strided_slice %48 {offsets = [0, 128], sizes = [32, 128], strides = [1, 1]} : vector<32x768xf32> to vector<32x128xf32>
    %74 = vector.shape_cast %73 : vector<32x128xf32> to vector<2x16x128xf32>
    %75 = vector.extract_strided_slice %48 {offsets = [0, 384], sizes = [32, 128], strides = [1, 1]} : vector<32x768xf32> to vector<32x128xf32>
    %76 = vector.shape_cast %75 : vector<32x128xf32> to vector<2x16x128xf32>
    %77 = vector.extract_strided_slice %48 {offsets = [0, 640], sizes = [32, 128], strides = [1, 1]} : vector<32x768xf32> to vector<32x128xf32>
    %78 = vector.shape_cast %77 : vector<32x128xf32> to vector<2x16x128xf32>
    %79 = arith.truncf %74 : vector<2x16x128xf32> to vector<2x16x128xbf16>
    %80 = arith.truncf %76 : vector<2x16x128xf32> to vector<2x16x128xbf16>
    "tpu.trace_start"() <{level = 10 : i32, message = "bqd,bkd->bqk"}> : () -> ()
    %cst_23 = arith.constant dense<0.000000e+00> : vector<2x16x16xf32>
    %81 = tpu.matmul %79, %80, %cst_23 {dimension_numbers = #tpu.dot_dimension_numbers<[2], [2], [1], [1], [0, 0, 0, 1, 1, 1], [0], [0]>} : vector<2x16x128xbf16>, vector<2x16x128xbf16>, vector<2x16x16xf32> -> vector<2x16x16xf32>
    "tpu.trace_stop"() : () -> ()
    %cst_24 = arith.constant 0.0883883461 : f32
    %82 = vector.broadcast %cst_24 : f32 to vector<2x16x16xf32>
    %83 = arith.mulf %81, %82 : vector<2x16x16xf32>
    %cst_25 = arith.constant dense<0xFF800000> : vector<2x16xf32>
    %84 = vector.multi_reduction <maximumf>, %83, %cst_25 [2] : vector<2x16x16xf32> to vector<2x16xf32>
    %85 = vector.shape_cast %84 : vector<2x16xf32> to vector<2x16x1xf32>
    %86 = vector.broadcast %85 : vector<2x16x1xf32> to vector<2x16x16xf32>
    %87 = arith.subf %83, %86 : vector<2x16x16xf32>
    %88 = math.exp %87 : vector<2x16x16xf32>
    %cst_26 = arith.constant dense<0.000000e+00> : vector<2x16xf32>
    %89 = vector.multi_reduction <add>, %88, %cst_26 [2] : vector<2x16x16xf32> to vector<2x16xf32>
    %90 = vector.shape_cast %89 : vector<2x16xf32> to vector<2x16x1xf32>
    %91 = vector.broadcast %90 : vector<2x16x1xf32> to vector<2x16x16xf32>
    %92 = arith.divf %88, %91 : vector<2x16x16xf32>
    %93 = arith.truncf %92 : vector<2x16x16xf32> to vector<2x16x16xbf16>
    %94 = arith.truncf %78 : vector<2x16x128xf32> to vector<2x16x128xbf16>
    "tpu.trace_start"() <{level = 10 : i32, message = "bqk,bkd->bqd"}> : () -> ()
    %cst_27 = arith.constant dense<0.000000e+00> : vector<2x16x128xf32>
    %95 = tpu.matmul %93, %94, %cst_27 {dimension_numbers = #tpu.dot_dimension_numbers<[2], [1], [1], [2], [0, 0, 0, 1, 1, 2], [0], [0]>} : vector<2x16x16xbf16>, vector<2x16x128xbf16>, vector<2x16x128xf32> -> vector<2x16x128xf32>
    "tpu.trace_stop"() : () -> ()
    %96 = vector.shape_cast %95 : vector<2x16x128xf32> to vector<32x128xf32>
    %97 = tpu.concatenate %72, %96 in 1 : vector<32x128xf32>, vector<32x128xf32> -> vector<32x256xf32>
    %c0_28 = arith.constant 0 : index
    %c0_29 = arith.constant 0 : index
    %98 = vector.load %arg6[%c0_28, %c0_29] : memref<256x256xbf16, #tpu.memory_space<vmem>>, vector<256x256xbf16>
    %99 = arith.truncf %97 : vector<32x256xf32> to vector<32x256xbf16>
    %cst_30 = arith.constant dense<0.000000e+00> : vector<32x256xf32>
    %100 = tpu.matmul %99, %98, %cst_30 {dimension_numbers = #tpu.dot_dimension_numbers<[1], [0], [0], [1], [0, 0, 1, 1], [], []>} : vector<32x256xbf16>, vector<256x256xbf16>, vector<32x256xf32> -> vector<32x256xf32>
    %101 = arith.addf %18, %100 : vector<32x256xf32>
    %c0_31 = arith.constant 0 : index
    %c1536 = arith.constant 1536 : index
    %102 = vector.load %arg3[%c0_31, %c1536] : memref<1x5632xf32, #tpu.memory_space<vmem>>, vector<1x256xf32>
    %103 = vector.broadcast %102 : vector<1x256xf32> to vector<32x256xf32>
    %104 = arith.addf %101, %103 : vector<32x256xf32>
    %c0_32 = arith.constant 0 : index
    %c1792 = arith.constant 1792 : index
    %105 = vector.load %arg3[%c0_32, %c1792] : memref<1x5632xf32, #tpu.memory_space<vmem>>, vector<1x256xf32>
    %c0_33 = arith.constant 0 : index
    %c2048 = arith.constant 2048 : index
    %106 = vector.load %arg3[%c0_33, %c2048] : memref<1x5632xf32, #tpu.memory_space<vmem>>, vector<1x256xf32>
    %cst_34 = arith.constant dense<0.000000e+00> : vector<32xf32>
    %107 = vector.multi_reduction <add>, %104, %cst_34 [1] : vector<32x256xf32> to vector<32xf32>
    %108 = vector.shape_cast %107 : vector<32xf32> to vector<32x1xf32>
    %cst_35 = arith.constant 2.560000e+02 : f32
    %109 = vector.broadcast %cst_35 : f32 to vector<32x1xf32>
    %110 = arith.divf %108, %109 : vector<32x1xf32>
    %111 = vector.broadcast %110 : vector<32x1xf32> to vector<32x256xf32>
    %112 = arith.subf %104, %111 : vector<32x256xf32>
    %113 = arith.mulf %112, %112 : vector<32x256xf32>
    %cst_36 = arith.constant dense<0.000000e+00> : vector<32xf32>
    %114 = vector.multi_reduction <add>, %113, %cst_36 [1] : vector<32x256xf32> to vector<32xf32>
    %115 = vector.shape_cast %114 : vector<32xf32> to vector<32x1xf32>
    %cst_37 = arith.constant 2.560000e+02 : f32
    %116 = vector.broadcast %cst_37 : f32 to vector<32x1xf32>
    %117 = arith.divf %115, %116 : vector<32x1xf32>
    %118 = vector.broadcast %110 : vector<32x1xf32> to vector<32x256xf32>
    %119 = arith.subf %104, %118 : vector<32x256xf32>
    %cst_38 = arith.constant 9.99999974E-6 : f32
    %120 = vector.broadcast %cst_38 : f32 to vector<32x1xf32>
    %121 = arith.addf %117, %120 : vector<32x1xf32>
    %122 = math.rsqrt %121 : vector<32x1xf32>
    %123 = vector.broadcast %122 : vector<32x1xf32> to vector<32x256xf32>
    %124 = arith.mulf %119, %123 : vector<32x256xf32>
    %125 = vector.broadcast %105 : vector<1x256xf32> to vector<32x256xf32>
    %126 = arith.mulf %124, %125 : vector<32x256xf32>
    %127 = vector.broadcast %106 : vector<1x256xf32> to vector<32x256xf32>
    %128 = arith.addf %126, %127 : vector<32x256xf32>
    %c0_39 = arith.constant 0 : index
    %c0_40 = arith.constant 0 : index
    %129 = vector.load %arg7[%c0_39, %c0_40] : memref<256x512xbf16, #tpu.memory_space<vmem>>, vector<256x512xbf16>
    %130 = arith.truncf %128 : vector<32x256xf32> to vector<32x256xbf16>
    %cst_41 = arith.constant dense<0.000000e+00> : vector<32x512xf32>
    %131 = tpu.matmul %130, %129, %cst_41 {dimension_numbers = #tpu.dot_dimension_numbers<[1], [0], [0], [1], [0, 0, 1, 1], [], []>} : vector<32x256xbf16>, vector<256x512xbf16>, vector<32x512xf32> -> vector<32x512xf32>
    %c0_42 = arith.constant 0 : index
    %c2304 = arith.constant 2304 : index
    %132 = vector.load %arg3[%c0_42, %c2304] : memref<1x5632xf32, #tpu.memory_space<vmem>>, vector<1x512xf32>
    %133 = vector.broadcast %132 : vector<1x512xf32> to vector<32x512xf32>
    %134 = arith.addf %131, %133 : vector<32x512xf32>
    %135 = arith.mulf %134, %134 : vector<32x512xf32>
    %136 = arith.mulf %134, %135 : vector<32x512xf32>
    %cst_43 = arith.constant 4.471500e-02 : f32
    %137 = vector.broadcast %cst_43 : f32 to vector<32x512xf32>
    %138 = arith.mulf %137, %136 : vector<32x512xf32>
    %139 = arith.addf %134, %138 : vector<32x512xf32>
    %cst_44 = arith.constant 0.797884583 : f32
    %140 = vector.broadcast %cst_44 : f32 to vector<32x512xf32>
    %141 = arith.mulf %140, %139 : vector<32x512xf32>
    %142 = math.tanh %141 : vector<32x512xf32>
    %cst_45 = arith.constant 1.000000e+00 : f32
    %143 = vector.broadcast %cst_45 : f32 to vector<32x512xf32>
    %144 = arith.addf %143, %142 : vector<32x512xf32>
    %cst_46 = arith.constant 5.000000e-01 : f32
    %145 = vector.broadcast %cst_46 : f32 to vector<32x512xf32>
    %146 = arith.mulf %145, %144 : vector<32x512xf32>
    %147 = arith.mulf %134, %146 : vector<32x512xf32>
    %c0_47 = arith.constant 0 : index
    %c0_48 = arith.constant 0 : index
    %148 = vector.load %arg8[%c0_47, %c0_48] : memref<512x256xbf16, #tpu.memory_space<vmem>>, vector<512x256xbf16>
    %149 = arith.truncf %147 : vector<32x512xf32> to vector<32x512xbf16>
    %cst_49 = arith.constant dense<0.000000e+00> : vector<32x256xf32>
    %150 = tpu.matmul %149, %148, %cst_49 {dimension_numbers = #tpu.dot_dimension_numbers<[1], [0], [0], [1], [0, 0, 1, 1], [], []>} : vector<32x512xbf16>, vector<512x256xbf16>, vector<32x256xf32> -> vector<32x256xf32>
    %151 = arith.addf %104, %150 : vector<32x256xf32>
    %c0_50 = arith.constant 0 : index
    %c2816 = arith.constant 2816 : index
    %152 = vector.load %arg3[%c0_50, %c2816] : memref<1x5632xf32, #tpu.memory_space<vmem>>, vector<1x256xf32>
    %153 = vector.broadcast %152 : vector<1x256xf32> to vector<32x256xf32>
    %154 = arith.addf %151, %153 : vector<32x256xf32>
    %c0_51 = arith.constant 0 : index
    %c3072 = arith.constant 3072 : index
    %155 = vector.load %arg3[%c0_51, %c3072] : memref<1x5632xf32, #tpu.memory_space<vmem>>, vector<1x256xf32>
    %c0_52 = arith.constant 0 : index
    %c3328 = arith.constant 3328 : index
    %156 = vector.load %arg3[%c0_52, %c3328] : memref<1x5632xf32, #tpu.memory_space<vmem>>, vector<1x256xf32>
    %cst_53 = arith.constant dense<0.000000e+00> : vector<32xf32>
    %157 = vector.multi_reduction <add>, %154, %cst_53 [1] : vector<32x256xf32> to vector<32xf32>
    %158 = vector.shape_cast %157 : vector<32xf32> to vector<32x1xf32>
    %cst_54 = arith.constant 2.560000e+02 : f32
    %159 = vector.broadcast %cst_54 : f32 to vector<32x1xf32>
    %160 = arith.divf %158, %159 : vector<32x1xf32>
    %161 = vector.broadcast %160 : vector<32x1xf32> to vector<32x256xf32>
    %162 = arith.subf %154, %161 : vector<32x256xf32>
    %163 = arith.mulf %162, %162 : vector<32x256xf32>
    %cst_55 = arith.constant dense<0.000000e+00> : vector<32xf32>
    %164 = vector.multi_reduction <add>, %163, %cst_55 [1] : vector<32x256xf32> to vector<32xf32>
    %165 = vector.shape_cast %164 : vector<32xf32> to vector<32x1xf32>
    %cst_56 = arith.constant 2.560000e+02 : f32
    %166 = vector.broadcast %cst_56 : f32 to vector<32x1xf32>
    %167 = arith.divf %165, %166 : vector<32x1xf32>
    %168 = vector.broadcast %160 : vector<32x1xf32> to vector<32x256xf32>
    %169 = arith.subf %154, %168 : vector<32x256xf32>
    %cst_57 = arith.constant 9.99999974E-6 : f32
    %170 = vector.broadcast %cst_57 : f32 to vector<32x1xf32>
    %171 = arith.addf %167, %170 : vector<32x1xf32>
    %172 = math.rsqrt %171 : vector<32x1xf32>
    %173 = vector.broadcast %172 : vector<32x1xf32> to vector<32x256xf32>
    %174 = arith.mulf %169, %173 : vector<32x256xf32>
    %175 = vector.broadcast %155 : vector<1x256xf32> to vector<32x256xf32>
    %176 = arith.mulf %174, %175 : vector<32x256xf32>
    %177 = vector.broadcast %156 : vector<1x256xf32> to vector<32x256xf32>
    %178 = arith.addf %176, %177 : vector<32x256xf32>
    %179 = vector.shape_cast %178 : vector<32x256xf32> to vector<2x16x256xf32>
    %cst_58 = arith.constant dense<0.000000e+00> : vector<2x256xf32>
    %180 = vector.multi_reduction <add>, %179, %cst_58 [1] : vector<2x16x256xf32> to vector<2x256xf32>
    %cst_59 = arith.constant 6.250000e-02 : f32
    %181 = vector.broadcast %cst_59 : f32 to vector<2x256xf32>
    %182 = arith.mulf %180, %181 : vector<2x256xf32>
    %c0_i32_60 = arith.constant 0 : i32
    %183 = tpu.memref_slice %arg18[%c0_i32_60] : memref<3x!tpu.dma_semaphore, #tpu.memory_space<semaphore_mem>> -> memref<1x!tpu.dma_semaphore, #tpu.memory_space<semaphore_mem>>
    %184 = tpu.memref_squeeze %183 : memref<1x!tpu.dma_semaphore, #tpu.memory_space<semaphore_mem>> -> memref<!tpu.dma_semaphore, #tpu.memory_space<semaphore_mem>>
    tpu.wait_dma2 semaphore(%184 : memref<!tpu.dma_semaphore, #tpu.memory_space<semaphore_mem>>) src(%arg10 : memref<256x1024xbf16, #tpu.memory_space<any>>) dst(%arg15 : memref<256x1024xbf16, #tpu.memory_space<vmem>>)
    %c0_61 = arith.constant 0 : index
    %c0_62 = arith.constant 0 : index
    %185 = vector.load %arg15[%c0_61, %c0_62] : memref<256x1024xbf16, #tpu.memory_space<vmem>>, vector<256x1024xbf16>
    %186 = arith.truncf %182 : vector<2x256xf32> to vector<2x256xbf16>
    %cst_63 = arith.constant dense<0.000000e+00> : vector<2x1024xf32>
    %187 = tpu.matmul %186, %185, %cst_63 {dimension_numbers = #tpu.dot_dimension_numbers<[1], [0], [0], [1], [0, 0, 1, 1], [], []>} : vector<2x256xbf16>, vector<256x1024xbf16>, vector<2x1024xf32> -> vector<2x1024xf32>
    %c0_64 = arith.constant 0 : index
    %c3584 = arith.constant 3584 : index
    %188 = vector.load %arg3[%c0_64, %c3584] : memref<1x5632xf32, #tpu.memory_space<vmem>>, vector<1x1024xf32>
    %189 = vector.broadcast %188 : vector<1x1024xf32> to vector<2x1024xf32>
    %190 = arith.addf %187, %189 : vector<2x1024xf32>
    %cst_65 = arith.constant 0.000000e+00 : f32
    %191 = vector.broadcast %cst_65 : f32 to vector<2x1024xf32>
    %192 = arith.maximumf %190, %191 : vector<2x1024xf32>
    %c1_i32_66 = arith.constant 1 : i32
    %193 = tpu.memref_slice %arg18[%c1_i32_66] : memref<3x!tpu.dma_semaphore, #tpu.memory_space<semaphore_mem>> -> memref<1x!tpu.dma_semaphore, #tpu.memory_space<semaphore_mem>>
    %194 = tpu.memref_squeeze %193 : memref<1x!tpu.dma_semaphore, #tpu.memory_space<semaphore_mem>> -> memref<!tpu.dma_semaphore, #tpu.memory_space<semaphore_mem>>
    tpu.wait_dma2 semaphore(%194 : memref<!tpu.dma_semaphore, #tpu.memory_space<semaphore_mem>>) src(%arg11 : memref<1024x768xbf16, #tpu.memory_space<any>>) dst(%arg16 : memref<1024x768xbf16, #tpu.memory_space<vmem>>)
    %c0_67 = arith.constant 0 : index
    %c0_68 = arith.constant 0 : index
    %195 = vector.load %arg16[%c0_67, %c0_68] : memref<1024x768xbf16, #tpu.memory_space<vmem>>, vector<1024x768xbf16>
    %196 = arith.truncf %192 : vector<2x1024xf32> to vector<2x1024xbf16>
    %cst_69 = arith.constant dense<0.000000e+00> : vector<2x768xf32>
    %197 = tpu.matmul %196, %195, %cst_69 {dimension_numbers = #tpu.dot_dimension_numbers<[1], [0], [0], [1], [0, 0, 1, 1], [], []>} : vector<2x1024xbf16>, vector<1024x768xbf16>, vector<2x768xf32> -> vector<2x768xf32>
    %c0_70 = arith.constant 0 : index
    %c4608 = arith.constant 4608 : index
    %198 = vector.load %arg3[%c0_70, %c4608] : memref<1x5632xf32, #tpu.memory_space<vmem>>, vector<1x768xf32>
    %199 = vector.broadcast %198 : vector<1x768xf32> to vector<2x768xf32>
    %200 = arith.addf %197, %199 : vector<2x768xf32>
    %cst_71 = arith.constant 0.000000e+00 : f32
    %201 = vector.broadcast %cst_71 : f32 to vector<2x768xf32>
    %202 = arith.maximumf %200, %201 : vector<2x768xf32>
    %c0_72 = arith.constant 0 : index
    %c0_73 = arith.constant 0 : index
    %203 = vector.load %arg14[%c0_72, %c0_73] : memref<2x768xf32, #tpu.memory_space<vmem>>, vector<2x768xf32>
    tpu.vector_store %arg14[%c0_72, %c0_73], %202 {strides = array<i32>} : memref<2x768xf32, #tpu.memory_space<vmem>>, vector<2x768xf32>,
    %c2_i32_74 = arith.constant 2 : i32
    %204 = tpu.memref_slice %arg18[%c2_i32_74] : memref<3x!tpu.dma_semaphore, #tpu.memory_space<semaphore_mem>> -> memref<1x!tpu.dma_semaphore, #tpu.memory_space<semaphore_mem>>
    %205 = tpu.memref_squeeze %204 : memref<1x!tpu.dma_semaphore, #tpu.memory_space<semaphore_mem>> -> memref<!tpu.dma_semaphore, #tpu.memory_space<semaphore_mem>>
    tpu.wait_dma2 semaphore(%205 : memref<!tpu.dma_semaphore, #tpu.memory_space<semaphore_mem>>) src(%arg12 : memref<1024x128xbf16, #tpu.memory_space<any>>) dst(%arg17 : memref<1024x128xbf16, #tpu.memory_space<vmem>>)
    %c0_75 = arith.constant 0 : index
    %c0_76 = arith.constant 0 : index
    %206 = vector.load %arg17[%c0_75, %c0_76] : memref<1024x128xbf16, #tpu.memory_space<vmem>>, vector<1024x128xbf16>
    %207 = arith.truncf %192 : vector<2x1024xf32> to vector<2x1024xbf16>
    %cst_77 = arith.constant dense<0.000000e+00> : vector<2x128xf32>
    %208 = tpu.matmul %207, %206, %cst_77 {dimension_numbers = #tpu.dot_dimension_numbers<[1], [0], [0], [1], [0, 0, 1, 1], [], []>} : vector<2x1024xbf16>, vector<1024x128xbf16>, vector<2x128xf32> -> vector<2x128xf32>
    %c0_78 = arith.constant 0 : index
    %c5376 = arith.constant 5376 : index
    %209 = vector.load %arg3[%c0_78, %c5376] : memref<1x5632xf32, #tpu.memory_space<vmem>>, vector<1x128xf32>
    %210 = vector.broadcast %209 : vector<1x128xf32> to vector<2x128xf32>
    %211 = arith.addf %208, %210 : vector<2x128xf32>
    %cst_79 = arith.constant 0.000000e+00 : f32
    %212 = vector.broadcast %cst_79 : f32 to vector<2x128xf32>
    %213 = arith.maximumf %211, %212 : vector<2x128xf32>
    %c0_80 = arith.constant 0 : index
    %c0_81 = arith.constant 0 : index
    %214 = vector.load %arg9[%c0_80, %c0_81] : memref<128x128xbf16, #tpu.memory_space<vmem>>, vector<128x128xbf16>
    %215 = arith.truncf %213 : vector<2x128xf32> to vector<2x128xbf16>
    %cst_82 = arith.constant dense<0.000000e+00> : vector<2x128xf32>
    %216 = tpu.matmul %215, %214, %cst_82 {dimension_numbers = #tpu.dot_dimension_numbers<[1], [0], [0], [1], [0, 0, 1, 1], [], []>} : vector<2x128xbf16>, vector<128x128xbf16>, vector<2x128xf32> -> vector<2x128xf32>
    %c0_83 = arith.constant 0 : index
    %c5504 = arith.constant 5504 : index
    %217 = vector.load %arg3[%c0_83, %c5504] : memref<1x5632xf32, #tpu.memory_space<vmem>>, vector<1x128xf32>
    %218 = vector.broadcast %217 : vector<1x128xf32> to vector<2x128xf32>
    %219 = arith.addf %216, %218 : vector<2x128xf32>
    %c0_84 = arith.constant 0 : index
    %c0_85 = arith.constant 0 : index
    %220 = vector.load %arg13[%c0_84, %c0_85] : memref<2x128xf32, #tpu.memory_space<vmem>>, vector<2x128xf32>
    tpu.vector_store %arg13[%c0_84, %c0_85], %219 {strides = array<i32>} : memref<2x128xf32, #tpu.memory_space<vmem>>, vector<2x128xf32>,
    return
  }
  func.func @transform_0(%arg0: i32) -> (i32, i32) {
    %c0_i32 = arith.constant 0 : i32
    %c0_i32_0 = arith.constant 0 : i32
    %c0_i32_1 = arith.constant 0 : i32
    return %c0_i32, %c0_i32_0 : i32, i32
  }
  func.func @transform_1(%arg0: i32) -> (i32, i32) {
    %c0_i32 = arith.constant 0 : i32
    %c0_i32_0 = arith.constant 0 : i32
    %c0_i32_1 = arith.constant 0 : i32
    return %c0_i32, %c0_i32_0 : i32, i32
  }
  func.func @transform_2(%arg0: i32) -> (i32, i32) {
    %c0_i32 = arith.constant 0 : i32
    %c0_i32_0 = arith.constant 0 : i32
    %c0_i32_1 = arith.constant 0 : i32
    return %c0_i32, %c0_i32_0 : i32, i32
  }
  func.func @transform_3(%arg0: i32) -> (i32, i32) {
    %c0_i32 = arith.constant 0 : i32
    %c0_i32_0 = arith.constant 0 : i32
    %c0_i32_1 = arith.constant 0 : i32
    return %c0_i32, %c0_i32_0 : i32, i32
  }
  func.func @transform_4(%arg0: i32) -> (i32, i32) {
    %c0_i32 = arith.constant 0 : i32
    %c0_i32_0 = arith.constant 0 : i32
    %c0_i32_1 = arith.constant 0 : i32
    return %c0_i32, %c0_i32_0 : i32, i32
  }
  func.func @transform_5(%arg0: i32) -> (i32, i32) {
    %c0_i32 = arith.constant 0 : i32
    %c0_i32_0 = arith.constant 0 : i32
    %c0_i32_1 = arith.constant 0 : i32
    return %c0_i32, %c0_i32_0 : i32, i32
  }
  func.func @transform_6(%arg0: i32) -> (i32, i32) {
    %c0_i32 = arith.constant 0 : i32
    %c0_i32_0 = arith.constant 0 : i32
    %c0_i32_1 = arith.constant 0 : i32
    return %c0_i32, %c0_i32_0 : i32, i32
  }
  func.func @transform_7(%arg0: i32) -> (i32, i32) {
    %c0_i32 = arith.constant 0 : i32
    %c0_i32_0 = arith.constant 0 : i32
    %c0_i32_1 = arith.constant 0 : i32
    return %c0_i32, %c0_i32_0 : i32, i32
  }
  func.func @transform_8(%arg0: i32) -> (i32, i32) {
    %c0_i32 = arith.constant 0 : i32
    %c0_i32_0 = arith.constant 0 : i32
    %c0_i32_1 = arith.constant 0 : i32
    return %c0_i32, %c0_i32_0 : i32, i32
  }
  func.func @transform_12(%arg0: i32) -> (i32, i32) {
    %c0_i32 = arith.constant 0 : i32
    %c0_i32_0 = arith.constant 0 : i32
    %c0_i32_1 = arith.constant 0 : i32
    return %c0_i32, %c0_i32_0 : i32, i32
  }
  func.func @transform_13(%arg0: i32) -> (i32, i32) {
    %c0_i32 = arith.constant 0 : i32
    %c0_i32_0 = arith.constant 0 : i32
    %c0_i32_1 = arith.constant 0 : i32
    return %c0_i32, %c0_i32_0 : i32, i32
  }
}

</mosaic_0001>

<bundles_post_ra>
// kernel: custom-call
= control target key start
LH: loop header
LB: loop body
LE: loop exit
PB: predicated region body
PF: predicated region fallthrough
CT: control target
= control target key end

     0   :  { %s6_s0 = inlined_call_operand.vmem [shape: f32[5632], index: 0, kind: output, shape index: {}]  }

// kernel: _lambda_.1
= control target key start
LH: loop header
LB: loop body
LE: loop exit
PB: predicated region body
PF: predicated region fallthrough
CT: control target
= control target key end

     0   :  { %19 = vsyncpa [#allocation7], 0  ;;  %s18362_s0 = inlined_call_operand.vmem [shape: f32[32,48], index: 0, kind: input, shape index: {}]   ;;  %s18363_s1 = inlined_call_operand.vmem [shape: f32[16,256], index: 1, kind: input, shape index: {}]   ;;  %s18364_s2 = inlined_call_operand.vmem [shape: f32[1,5632], index: 2, kind: input, shape index: {}]   ;;  %s18365_s3 = inlined_call_operand.vmem [shape: bf16[48,256], index: 3, kind: input, shape index: {}]   ;;  %s18366_s4 = inlined_call_operand.vmem [shape: bf16[256,768], index: 4, kind: input, shape index: {}]   ;;  %s18367_s5 = inlined_call_operand.vmem [shape: bf16[256,256], index: 5, kind: input, shape index: {}]   ;;  %s18368_s6 = inlined_call_operand.vmem [shape: bf16[256,512], index: 6, kind: input, shape index: {}]   ;;  %s18369_s7 = inlined_call_operand.vmem [shape: bf16[512,256], index: 7, kind: input, shape index: {}]   ;;  %s18370_s8 = inlined_call_operand.vmem [shape: bf16[128,128], index: 8, kind: input, shape index: {}]   ;;  %s18371_s9 = inlined_call_operand.vmem [shape: bf16[256,1024], index: 9, kind: input, shape index: {}]   ;;  %s18372_s10 = inlined_call_operand.vmem [shape: bf16[1024,768], index: 10, kind: input, shape index: {}]   ;;  %s18373_s11 = inlined_call_operand.vmem [shape: bf16[1024,128], index: 11, kind: input, shape index: {}]   ;;  %s18374_s12 = inlined_call_operand.hbm [shape: f32[2,128], index: 12, kind: output, shape index: {0}]   ;;  %s18375_s13 = inlined_call_operand.hbm [shape: f32[2,768], index: 13, kind: output, shape index: {1}]  }
   0x1   :  { %20 = vsyncpa [#allocation9], 0  ;;  %v57_v0 = vld [vmem:[%s18371_s9] sm:$0xf]  ;;  %v61_v2 = vld [vmem:[%s18371_s9 + $0x4] sm:$0xf] }
   0x2   :  { %v59_v1 = vld [vmem:[%s18371_s9 + $0x20] sm:$0xf]  ;;  %58 = vst [vmem:[#allocation2] sm:$0xf] %v57_v0  ;;  %v63_v3 = vld [vmem:[%s18371_s9 + $0x24] sm:$0xf] }
   0x3   :  { %60 = vst [vmem:[#allocation2 + $0x4] sm:$0xf] %v59_v1  ;;  %v65_v4 = vld [vmem:[%s18371_s9 + $0x8] sm:$0xf]  ;;  %62 = vst [vmem:[#allocation2 + $0x8] sm:$0xf] %v61_v2 }
   0x4   :  { %64 = vst [vmem:[#allocation2 + $0xc] sm:$0xf] %v63_v3  ;;  %66 = vst [vmem:[#allocation2 + $0x10] sm:$0xf] %v65_v4  ;;  %v67_v5 = vld [vmem:[%s18371_s9 + $0x28] sm:$0xf] }
   0x5   :  { %v69_v6 = vld [vmem:[%s18371_s9 + $0xc] sm:$0xf]  ;;  %68 = vst [vmem:[#allocation2 + $0x14] sm:$0xf] %v67_v5  ;;  %v73_v8 = vld [vmem:[%s18371_s9 + $0x10] sm:$0xf] }
   0x6   :  { %v71_v7 = vld [vmem:[%s18371_s9 + $0x2c] sm:$0xf]  ;;  %70 = vst [vmem:[#allocation2 + $0x18] sm:$0xf] %v69_v6  ;;  %v75_v9 = vld [vmem:[%s18371_s9 + $0x30] sm:$0xf] }
   0x7   :  { %72 = vst [vmem:[#allocation2 + $0x1c] sm:$0xf] %v71_v7  ;;  %v77_v10 = vld [vmem:[%s18371_s9 + $0x14] sm:$0xf]  ;;  %74 = vst [vmem:[#allocation2 + $0x20] sm:$0xf] %v73_v8 }
   0x8   :  { %76 = vst [vmem:[#allocation2 + $0x24] sm:$0xf] %v75_v9  ;;  %78 = vst [vmem:[#allocation2 + $0x28] sm:$0xf] %v77_v10  ;;  %v79_v11 = vld [vmem:[%s18371_s9 + $0x34] sm:$0xf] }
   0x9   :  { %v81_v12 = vld [vmem:[%s18371_s9 + $0x18] sm:$0xf]  ;;  %80 = vst [vmem:[#allocation2 + $0x2c] sm:$0xf] %v79_v11  ;;  %v85_v14 = vld [vmem:[%s18371_s9 + $0x1c] sm:$0xf] }
   0xa   :  { %v83_v13 = vld [vmem:[%s18371_s9 + $0x38] sm:$0xf]  ;;  %82 = vst [vmem:[#allocation2 + $0x30] sm:$0xf] %v81_v12  ;;  %v87_v15 = vld [vmem:[%s18371_s9 + $0x3c] sm:$0xff]  }
   0xb   :  { %84 = vst [vmem:[#allocation2 + $0x34] sm:$0xf] %v83_v13  ;;  %v91_v16 = vld [vmem:[%s18371_s9 + $0x60] sm:$0xf]  ;;  %86 = vst [vmem:[#allocation2 + $0x38] sm:$0xf] %v85_v14 }
   0xc   :  { %88 = vst [vmem:[#allocation2 + $0x3c] sm:$0xff] %v87_v15   ;;  %92 = vst [vmem:[#allocation2 + $0x44] sm:$0xf] %v91_v16  ;;  %v93_v17 = vld [vmem:[%s18371_s9 + $0x44] sm:$0xf]  ;;  %v119_v30 = vld [vmem:[%s18371_s9 + $0x7c] sm:$0xff]  }
   0xd   :  { %v95_v18 = vld [vmem:[%s18371_s9 + $0x64] sm:$0xf]  ;;  %v97_v19 = vld [vmem:[%s18371_s9 + $0x48] sm:$0xf]  ;;  %94 = vst [vmem:[#allocation2 + $0x48] sm:$0xf] %v93_v17 }
   0xe   :  { %96 = vst [vmem:[#allocation2 + $0x4c] sm:$0xf] %v95_v18  ;;  %98 = vst [vmem:[#allocation2 + $0x50] sm:$0xf] %v97_v19  ;;  %v99_v20 = vld [vmem:[%s18371_s9 + $0x68] sm:$0xf] }
   0xf   :  { %v101_v21 = vld [vmem:[%s18371_s9 + $0x4c] sm:$0xf]  ;;  %100 = vst [vmem:[#allocation2 + $0x54] sm:$0xf] %v99_v20  ;;  %v105_v23 = vld [vmem:[%s18371_s9 + $0x50] sm:$0xf] }
  0x10   :  { %v103_v22 = vld [vmem:[%s18371_s9 + $0x6c] sm:$0xf]  ;;  %102 = vst [vmem:[#allocation2 + $0x58] sm:$0xf] %v101_v21  ;;  %v107_v24 = vld [vmem:[%s18371_s9 + $0x70] sm:$0xf] }
  0x11   :  { %104 = vst [vmem:[#allocation2 + $0x5c] sm:$0xf] %v103_v22  ;;  %v109_v25 = vld [vmem:[%s18371_s9 + $0x54] sm:$0xf]  ;;  %106 = vst [vmem:[#allocation2 + $0x60] sm:$0xf] %v105_v23 }
  0x12   :  { %108 = vst [vmem:[#allocation2 + $0x64] sm:$0xf] %v107_v24  ;;  %110 = vst [vmem:[#allocation2 + $0x68] sm:$0xf] %v109_v25  ;;  %v111_v26 = vld [vmem:[%s18371_s9 + $0x74] sm:$0xf] }
  0x13   :  { %v113_v27 = vld [vmem:[%s18371_s9 + $0x58] sm:$0xf]  ;;  %112 = vst [vmem:[#allocation2 + $0x6c] sm:$0xf] %v111_v26  ;;  %v117_v29 = vld [vmem:[%s18371_s9 + $0x5c] sm:$0xf] }
  0x14   :  { %v115_v28 = vld [vmem:[%s18371_s9 + $0x78] sm:$0xf]  ;;  %114 = vst [vmem:[#allocation2 + $0x70] sm:$0xf] %v113_v27  ;;  %v123_v31 = vld [vmem:[%s18371_s9 + $0xa0] sm:$0xf] }
  0x15   :  { %116 = vst [vmem:[#allocation2 + $0x74] sm:$0xf] %v115_v28  ;;  %118 = vst [vmem:[#allocation2 + $0x78] sm:$0xf] %v117_v29  ;;  %v125_v32 = vld [vmem:[%s18371_s9 + $0x84] sm:$0xf] }
  0x16   :  { %120 = vst [vmem:[#allocation2 + $0x7c] sm:$0xff] %v119_v30   ;;  %124 = vst [vmem:[#allocation2 + $0x84] sm:$0xf] %v123_v31  ;;  %v127_v33 = vld [vmem:[%s18371_s9 + $0xa4] sm:$0xf]  ;;  %v151_v45 = vld [vmem:[%s18371_s9 + $0xbc] sm:$0xff]  }
  0x17   :  { %v129_v34 = vld [vmem:[%s18371_s9 + $0x88] sm:$0xf]  ;;  %126 = vst [vmem:[#allocation2 + $0x88] sm:$0xf] %v125_v32  ;;  %128 = vst [vmem:[#allocation2 + $0x8c] sm:$0xf] %v127_v33 }
  0x18   :  { %130 = vst [vmem:[#allocation2 + $0x90] sm:$0xf] %v129_v34  ;;  %v131_v35 = vld [vmem:[%s18371_s9 + $0xa8] sm:$0xf]  ;;  %v133_v36 = vld [vmem:[%s18371_s9 + $0x8c] sm:$0xf] }
  0x19   :  { %v135_v37 = vld [vmem:[%s18371_s9 + $0xac] sm:$0xf]  ;;  %132 = vst [vmem:[#allocation2 + $0x94] sm:$0xf] %v131_v35  ;;  %134 = vst [vmem:[#allocation2 + $0x98] sm:$0xf] %v133_v36 }
  0x1a   :  { %136 = vst [vmem:[#allocation2 + $0x9c] sm:$0xf] %v135_v37  ;;  %v137_v38 = vld [vmem:[%s18371_s9 + $0x90] sm:$0xf]  ;;  %v141_v40 = vld [vmem:[%s18371_s9 + $0x94] sm:$0xf] }
  0x1b   :  { %v139_v39 = vld [vmem:[%s18371_s9 + $0xb0] sm:$0xf]  ;;  %138 = vst [vmem:[#allocation2 + $0xa0] sm:$0xf] %v137_v38  ;;  %142 = vst [vmem:[#allocation2 + $0xa8] sm:$0xf] %v141_v40 }
  0x1c   :  { %140 = vst [vmem:[#allocation2 + $0xa4] sm:$0xf] %v139_v39  ;;  %v143_v41 = vld [vmem:[%s18371_s9 + $0xb4] sm:$0xf]  ;;  %v145_v42 = vld [vmem:[%s18371_s9 + $0x98] sm:$0xf] }
  0x1d   :  { %v147_v43 = vld [vmem:[%s18371_s9 + $0xb8] sm:$0xf]  ;;  %144 = vst [vmem:[#allocation2 + $0xac] sm:$0xf] %v143_v41  ;;  %146 = vst [vmem:[#allocation2 + $0xb0] sm:$0xf] %v145_v42 }
  0x1e   :  { %148 = vst [vmem:[#allocation2 + $0xb4] sm:$0xf] %v147_v43  ;;  %v149_v44 = vld [vmem:[%s18371_s9 + $0x9c] sm:$0xf]  ;;  %v155_v46 = vld [vmem:[%s18371_s9 + $0xe0] sm:$0xf] }
  0x1f   :  { %150 = vst [vmem:[#allocation2 + $0xb8] sm:$0xf] %v149_v44  ;;  %152 = vst [vmem:[#allocation2 + $0xbc] sm:$0xff] %v151_v45   ;;  %v157_v47 = vld [vmem:[%s18371_s9 + $0xc4] sm:$0xf]  ;;  %v183_v60 = vld [vmem:[%s18371_s9 + $0xfc] sm:$0xff]  }
  0x20   :  { %156 = vst [vmem:[#allocation2 + $0xc4] sm:$0xf] %v155_v46  ;;  %v159_v48 = vld [vmem:[%s18371_s9 + $0xe4] sm:$0xf]  ;;  %v161_v49 = vld [vmem:[%s18371_s9 + $0xc8] sm:$0xf] }
  0x21   :  { %158 = vst [vmem:[#allocation2 + $0xc8] sm:$0xf] %v157_v47  ;;  %160 = vst [vmem:[#allocation2 + $0xcc] sm:$0xf] %v159_v48  ;;  %v163_v50 = vld [vmem:[%s18371_s9 + $0xe8] sm:$0xf] }
  0x22   :  { %162 = vst [vmem:[#allocation2 + $0xd0] sm:$0xf] %v161_v49  ;;  %v165_v51 = vld [vmem:[%s18371_s9 + $0xcc] sm:$0xf]  ;;  %164 = vst [vmem:[#allocation2 + $0xd4] sm:$0xf] %v163_v50 }
  0x23   :  { %v167_v52 = vld [vmem:[%s18371_s9 + $0xec] sm:$0xf]  ;;  %166 = vst [vmem:[#allocation2 + $0xd8] sm:$0xf] %v165_v51  ;;  %v169_v53 = vld [vmem:[%s18371_s9 + $0xd0] sm:$0xf] }
  0x24   :  { %168 = vst [vmem:[#allocation2 + $0xdc] sm:$0xf] %v167_v52  ;;  %v171_v54 = vld [vmem:[%s18371_s9 + $0xf0] sm:$0xf]  ;;  %v173_v55 = vld [vmem:[%s18371_s9 + $0xd4] sm:$0xf] }
  0x25   :  { %170 = vst [vmem:[#allocation2 + $0xe0] sm:$0xf] %v169_v53  ;;  %172 = vst [vmem:[#allocation2 + $0xe4] sm:$0xf] %v171_v54  ;;  %v175_v56 = vld [vmem:[%s18371_s9 + $0xf4] sm:$0xf] }
  0x26   :  { %174 = vst [vmem:[#allocation2 + $0xe8] sm:$0xf] %v173_v55  ;;  %v177_v57 = vld [vmem:[%s18371_s9 + $0xd8] sm:$0xf]  ;;  %176 = vst [vmem:[#allocation2 + $0xec] sm:$0xf] %v175_v56 }
  0x27   :  { %v179_v58 = vld [vmem:[%s18371_s9 + $0xf8] sm:$0xf]  ;;  %178 = vst [vmem:[#allocation2 + $0xf0] sm:$0xf] %v177_v57  ;;  %v181_v59 = vld [vmem:[%s18371_s9 + $0xdc] sm:$0xf] }
  0x28   :  { %180 = vst [vmem:[#allocation2 + $0xf4] sm:$0xf] %v179_v58  ;;  %v187_v61 = vld [vmem:[%s18371_s9 + $0x120] sm:$0xf]  ;;  %182 = vst [vmem:[#allocation2 + $0xf8] sm:$0xf] %v181_v59 }
  0x29   :  { %184 = vst [vmem:[#allocation2 + $0xfc] sm:$0xff] %v183_v60   ;;  %188 = vst [vmem:[#allocation2 + $0x104] sm:$0xf] %v187_v61  ;;  %v189_v62 = vld [vmem:[%s18371_s9 + $0x104] sm:$0xf]  ;;  %v215_v11 = vld [vmem:[%s18371_s9 + $0x13c] sm:$0xff]  }
  0x2a   :  { %v191_v63 = vld [vmem:[%s18371_s9 + $0x124] sm:$0xf]  ;;  %v193_v0 = vld [vmem:[%s18371_s9 + $0x108] sm:$0xf]  ;;  %190 = vst [vmem:[#allocation2 + $0x108] sm:$0xf] %v189_v62 }
  0x2b   :  { %192 = vst [vmem:[#allocation2 + $0x10c] sm:$0xf] %v191_v63  ;;  %194 = vst [vmem:[#allocation2 + $0x110] sm:$0xf] %v193_v0  ;;  %v195_v1 = vld [vmem:[%s18371_s9 + $0x128] sm:$0xf] }
  0x2c   :  { %v197_v2 = vld [vmem:[%s18371_s9 + $0x10c] sm:$0xf]  ;;  %196 = vst [vmem:[#allocation2 + $0x114] sm:$0xf] %v195_v1  ;;  %v201_v4 = vld [vmem:[%s18371_s9 + $0x110] sm:$0xf] }
  0x2d   :  { %v199_v3 = vld [vmem:[%s18371_s9 + $0x12c] sm:$0xf]  ;;  %198 = vst [vmem:[#allocation2 + $0x118] sm:$0xf] %v197_v2  ;;  %v203_v5 = vld [vmem:[%s18371_s9 + $0x130] sm:$0xf] }
  0x2e   :  { %200 = vst [vmem:[#allocation2 + $0x11c] sm:$0xf] %v199_v3  ;;  %v205_v6 = vld [vmem:[%s18371_s9 + $0x114] sm:$0xf]  ;;  %202 = vst [vmem:[#allocation2 + $0x120] sm:$0xf] %v201_v4 }
  0x2f   :  { %204 = vst [vmem:[#allocation2 + $0x124] sm:$0xf] %v203_v5  ;;  %206 = vst [vmem:[#allocation2 + $0x128] sm:$0xf] %v205_v6  ;;  %v207_v7 = vld [vmem:[%s18371_s9 + $0x134] sm:$0xf] }
  0x30   :  { %v209_v8 = vld [vmem:[%s18371_s9 + $0x118] sm:$0xf]  ;;  %208 = vst [vmem:[#allocation2 + $0x12c] sm:$0xf] %v207_v7  ;;  %v213_v10 = vld [vmem:[%s18371_s9 + $0x11c] sm:$0xf] }
  0x31   :  { %v211_v9 = vld [vmem:[%s18371_s9 + $0x138] sm:$0xf]  ;;  %210 = vst [vmem:[#allocation2 + $0x130] sm:$0xf] %v209_v8  ;;  %v219_v12 = vld [vmem:[%s18371_s9 + $0x160] sm:$0xf] }
  0x32   :  { %212 = vst [vmem:[#allocation2 + $0x134] sm:$0xf] %v211_v9  ;;  %214 = vst [vmem:[#allocation2 + $0x138] sm:$0xf] %v213_v10  ;;  %v221_v13 = vld [vmem:[%s18371_s9 + $0x144] sm:$0xf] }
  0x33   :  { %216 = vst [vmem:[#allocation2 + $0x13c] sm:$0xff] %v215_v11   ;;  %220 = vst [vmem:[#allocation2 + $0x144] sm:$0xf] %v219_v12  ;;  %v223_v14 = vld [vmem:[%s18371_s9 + $0x164] sm:$0xf]  ;;  %v247_v26 = vld [vmem:[%s18371_s9 + $0x17c] sm:$0xff]  }
  0x34   :  { %v225_v15 = vld [vmem:[%s18371_s9 + $0x148] sm:$0xf]  ;;  %222 = vst [vmem:[#allocation2 + $0x148] sm:$0xf] %v221_v13  ;;  %224 = vst [vmem:[#allocation2 + $0x14c] sm:$0xf] %v223_v14 }
  0x35   :  { %226 = vst [vmem:[#allocation2 + $0x150] sm:$0xf] %v225_v15  ;;  %v227_v16 = vld [vmem:[%s18371_s9 + $0x168] sm:$0xf]  ;;  %v229_v17 = vld [vmem:[%s18371_s9 + $0x14c] sm:$0xf] }
  0x36   :  { %v231_v18 = vld [vmem:[%s18371_s9 + $0x16c] sm:$0xf]  ;;  %228 = vst [vmem:[#allocation2 + $0x154] sm:$0xf] %v227_v16  ;;  %230 = vst [vmem:[#allocation2 + $0x158] sm:$0xf] %v229_v17 }
  0x37   :  { %232 = vst [vmem:[#allocation2 + $0x15c] sm:$0xf] %v231_v18  ;;  %v233_v19 = vld [vmem:[%s18371_s9 + $0x150] sm:$0xf]  ;;  %v237_v21 = vld [vmem:[%s18371_s9 + $0x154] sm:$0xf] }
  0x38   :  { %v235_v20 = vld [vmem:[%s18371_s9 + $0x170] sm:$0xf]  ;;  %234 = vst [vmem:[#allocation2 + $0x160] sm:$0xf] %v233_v19  ;;  %238 = vst [vmem:[#allocation2 + $0x168] sm:$0xf] %v237_v21 }
  0x39   :  { %236 = vst [vmem:[#allocation2 + $0x164] sm:$0xf] %v235_v20  ;;  %v239_v22 = vld [vmem:[%s18371_s9 + $0x174] sm:$0xf]  ;;  %v241_v23 = vld [vmem:[%s18371_s9 + $0x158] sm:$0xf] }
  0x3a   :  { %v243_v24 = vld [vmem:[%s18371_s9 + $0x178] sm:$0xf]  ;;  %240 = vst [vmem:[#allocation2 + $0x16c] sm:$0xf] %v239_v22  ;;  %242 = vst [vmem:[#allocation2 + $0x170] sm:$0xf] %v241_v23 }
  0x3b   :  { %244 = vst [vmem:[#allocation2 + $0x174] sm:$0xf] %v243_v24  ;;  %v245_v25 = vld [vmem:[%s18371_s9 + $0x15c] sm:$0xf]  ;;  %v251_v27 = vld [vmem:[%s18371_s9 + $0x1a0] sm:$0xf] }
  0x3c   :  { %246 = vst [vmem:[#allocation2 + $0x178] sm:$0xf] %v245_v25  ;;  %248 = vst [vmem:[#allocation2 + $0x17c] sm:$0xff] %v247_v26   ;;  %v253_v28 = vld [vmem:[%s18371_s9 + $0x184] sm:$0xf]  ;;  %v279_v41 = vld [vmem:[%s18371_s9 + $0x1bc] sm:$0xff]  }
  0x3d   :  { %252 = vst [vmem:[#allocation2 + $0x184] sm:$0xf] %v251_v27  ;;  %v255_v29 = vld [vmem:[%s18371_s9 + $0x1a4] sm:$0xf]  ;;  %v257_v30 = vld [vmem:[%s18371_s9 + $0x188] sm:$0xf] }
  0x3e   :  { %254 = vst [vmem:[#allocation2 + $0x188] sm:$0xf] %v253_v28  ;;  %256 = vst [vmem:[#allocation2 + $0x18c] sm:$0xf] %v255_v29  ;;  %v259_v31 = vld [vmem:[%s18371_s9 + $0x1a8] sm:$0xf] }
  0x3f   :  { %258 = vst [vmem:[#allocation2 + $0x190] sm:$0xf] %v257_v30  ;;  %v261_v32 = vld [vmem:[%s18371_s9 + $0x18c] sm:$0xf]  ;;  %260 = vst [vmem:[#allocation2 + $0x194] sm:$0xf] %v259_v31 }
  0x40   :  { %v263_v33 = vld [vmem:[%s18371_s9 + $0x1ac] sm:$0xf]  ;;  %262 = vst [vmem:[#allocation2 + $0x198] sm:$0xf] %v261_v32  ;;  %v265_v34 = vld [vmem:[%s18371_s9 + $0x190] sm:$0xf] }
  0x41   :  { %264 = vst [vmem:[#allocation2 + $0x19c] sm:$0xf] %v263_v33  ;;  %v267_v35 = vld [vmem:[%s18371_s9 + $0x1b0] sm:$0xf]  ;;  %v269_v36 = vld [vmem:[%s18371_s9 + $0x194] sm:$0xf] }
  0x42   :  { %266 = vst [vmem:[#allocation2 + $0x1a0] sm:$0xf] %v265_v34  ;;  %268 = vst [vmem:[#allocation2 + $0x1a4] sm:$0xf] %v267_v35  ;;  %v271_v37 = vld [vmem:[%s18371_s9 + $0x1b4] sm:$0xf] }
  0x43   :  { %270 = vst [vmem:[#allocation2 + $0x1a8] sm:$0xf] %v269_v36  ;;  %v273_v38 = vld [vmem:[%s18371_s9 + $0x198] sm:$0xf]  ;;  %272 = vst [vmem:[#allocation2 + $0x1ac] sm:$0xf] %v271_v37 }
  0x44   :  { %v275_v39 = vld [vmem:[%s18371_s9 + $0x1b8] sm:$0xf]  ;;  %274 = vst [vmem:[#allocation2 + $0x1b0] sm:$0xf] %v273_v38  ;;  %v277_v40 = vld [vmem:[%s18371_s9 + $0x19c] sm:$0xf] }
  0x45   :  { %276 = vst [vmem:[#allocation2 + $0x1b4] sm:$0xf] %v275_v39  ;;  %v283_v42 = vld [vmem:[%s18371_s9 + $0x1e0] sm:$0xf]  ;;  %278 = vst [vmem:[#allocation2 + $0x1b8] sm:$0xf] %v277_v40 }
  0x46   :  { %280 = vst [vmem:[#allocation2 + $0x1bc] sm:$0xff] %v279_v41   ;;  %284 = vst [vmem:[#allocation2 + $0x1c4] sm:$0xf] %v283_v42  ;;  %v285_v43 = vld [vmem:[%s18371_s9 + $0x1c4] sm:$0xf]  ;;  %v311_v56 = vld [vmem:[%s18371_s9 + $0x1fc] sm:$0xff]  }
  0x47   :  { %v287_v44 = vld [vmem:[%s18371_s9 + $0x1e4] sm:$0xf]  ;;  %v289_v45 = vld [vmem:[%s18371_s9 + $0x1c8] sm:$0xf]  ;;  %286 = vst [vmem:[#allocation2 + $0x1c8] sm:$0xf] %v285_v43 }
  0x48   :  { %288 = vst [vmem:[#allocation2 + $0x1cc] sm:$0xf] %v287_v44  ;;  %290 = vst [vmem:[#allocation2 + $0x1d0] sm:$0xf] %v289_v45  ;;  %v291_v46 = vld [vmem:[%s18371_s9 + $0x1e8] sm:$0xf] }
  0x49   :  { %v293_v47 = vld [vmem:[%s18371_s9 + $0x1cc] sm:$0xf]  ;;  %292 = vst [vmem:[#allocation2 + $0x1d4] sm:$0xf] %v291_v46  ;;  %v297_v49 = vld [vmem:[%s18371_s9 + $0x1d0] sm:$0xf] }
  0x4a   :  { %v295_v48 = vld [vmem:[%s18371_s9 + $0x1ec] sm:$0xf]  ;;  %294 = vst [vmem:[#allocation2 + $0x1d8] sm:$0xf] %v293_v47  ;;  %v299_v50 = vld [vmem:[%s18371_s9 + $0x1f0] sm:$0xf] }
  0x4b   :  { %296 = vst [vmem:[#allocation2 + $0x1dc] sm:$0xf] %v295_v48  ;;  %v301_v51 = vld [vmem:[%s18371_s9 + $0x1d4] sm:$0xf]  ;;  %298 = vst [vmem:[#allocation2 + $0x1e0] sm:$0xf] %v297_v49 }
  0x4c   :  { %300 = vst [vmem:[#allocation2 + $0x1e4] sm:$0xf] %v299_v50  ;;  %302 = vst [vmem:[#allocation2 + $0x1e8] sm:$0xf] %v301_v51  ;;  %v303_v52 = vld [vmem:[%s18371_s9 + $0x1f4] sm:$0xf] }
  0x4d   :  { %v305_v53 = vld [vmem:[%s18371_s9 + $0x1d8] sm:$0xf]  ;;  %304 = vst [vmem:[#allocation2 + $0x1ec] sm:$0xf] %v303_v52  ;;  %v309_v55 = vld [vmem:[%s18371_s9 + $0x1dc] sm:$0xf] }
  0x4e   :  { %v307_v54 = vld [vmem:[%s18371_s9 + $0x1f8] sm:$0xf]  ;;  %306 = vst [vmem:[#allocation2 + $0x1f0] sm:$0xf] %v305_v53  ;;  %v315_v57 = vld [vmem:[%s18371_s9 + $0x220] sm:$0xf] }
  0x4f   :  { %308 = vst [vmem:[#allocation2 + $0x1f4] sm:$0xf] %v307_v54  ;;  %310 = vst [vmem:[#allocation2 + $0x1f8] sm:$0xf] %v309_v55  ;;  %v317_v58 = vld [vmem:[%s18371_s9 + $0x204] sm:$0xf] }
  0x50   :  { %312 = vst [vmem:[#allocation2 + $0x1fc] sm:$0xff] %v311_v56   ;;  %316 = vst [vmem:[#allocation2 + $0x204] sm:$0xf] %v315_v57  ;;  %v319_v59 = vld [vmem:[%s18371_s9 + $0x224] sm:$0xf]  ;;  %v343_v7 = vld [vmem:[%s18371_s9 + $0x23c] sm:$0xff]  }
  0x51   :  { %v321_v60 = vld [vmem:[%s18371_s9 + $0x208] sm:$0xf]  ;;  %318 = vst [vmem:[#allocation2 + $0x208] sm:$0xf] %v317_v58  ;;  %320 = vst [vmem:[#allocation2 + $0x20c] sm:$0xf] %v319_v59 }
  0x52   :  { %322 = vst [vmem:[#allocation2 + $0x210] sm:$0xf] %v321_v60  ;;  %v323_v61 = vld [vmem:[%s18371_s9 + $0x228] sm:$0xf]  ;;  %v325_v62 = vld [vmem:[%s18371_s9 + $0x20c] sm:$0xf] }
  0x53   :  { %v327_v63 = vld [vmem:[%s18371_s9 + $0x22c] sm:$0xf]  ;;  %324 = vst [vmem:[#allocation2 + $0x214] sm:$0xf] %v323_v61  ;;  %326 = vst [vmem:[#allocation2 + $0x218] sm:$0xf] %v325_v62 }
  0x54   :  { %328 = vst [vmem:[#allocation2 + $0x21c] sm:$0xf] %v327_v63  ;;  %v329_v0 = vld [vmem:[%s18371_s9 + $0x210] sm:$0xf]  ;;  %v333_v2 = vld [vmem:[%s18371_s9 + $0x214] sm:$0xf] }
  0x55   :  { %v331_v1 = vld [vmem:[%s18371_s9 + $0x230] sm:$0xf]  ;;  %330 = vst [vmem:[#allocation2 + $0x220] sm:$0xf] %v329_v0  ;;  %334 = vst [vmem:[#allocation2 + $0x228] sm:$0xf] %v333_v2 }
  0x56   :  { %332 = vst [vmem:[#allocation2 + $0x224] sm:$0xf] %v331_v1  ;;  %v335_v3 = vld [vmem:[%s18371_s9 + $0x234] sm:$0xf]  ;;  %v337_v4 = vld [vmem:[%s18371_s9 + $0x218] sm:$0xf] }
  0x57   :  { %v339_v5 = vld [vmem:[%s18371_s9 + $0x238] sm:$0xf]  ;;  %336 = vst [vmem:[#allocation2 + $0x22c] sm:$0xf] %v335_v3  ;;  %338 = vst [vmem:[#allocation2 + $0x230] sm:$0xf] %v337_v4 }
  0x58   :  { %340 = vst [vmem:[#allocation2 + $0x234] sm:$0xf] %v339_v5  ;;  %v341_v6 = vld [vmem:[%s18371_s9 + $0x21c] sm:$0xf]  ;;  %v347_v8 = vld [vmem:[%s18371_s9 + $0x260] sm:$0xf] }
  0x59   :  { %342 = vst [vmem:[#allocation2 + $0x238] sm:$0xf] %v341_v6  ;;  %344 = vst [vmem:[#allocation2 + $0x23c] sm:$0xff] %v343_v7   ;;  %v349_v9 = vld [vmem:[%s18371_s9 + $0x244] sm:$0xf]  ;;  %v375_v22 = vld [vmem:[%s18371_s9 + $0x27c] sm:$0xff]  }
  0x5a   :  { %348 = vst [vmem:[#allocation2 + $0x244] sm:$0xf] %v347_v8  ;;  %v351_v10 = vld [vmem:[%s18371_s9 + $0x264] sm:$0xf]  ;;  %v353_v11 = vld [vmem:[%s18371_s9 + $0x248] sm:$0xf] }
  0x5b   :  { %350 = vst [vmem:[#allocation2 + $0x248] sm:$0xf] %v349_v9  ;;  %352 = vst [vmem:[#allocation2 + $0x24c] sm:$0xf] %v351_v10  ;;  %v355_v12 = vld [vmem:[%s18371_s9 + $0x268] sm:$0xf] }
  0x5c   :  { %354 = vst [vmem:[#allocation2 + $0x250] sm:$0xf] %v353_v11  ;;  %v357_v13 = vld [vmem:[%s18371_s9 + $0x24c] sm:$0xf]  ;;  %356 = vst [vmem:[#allocation2 + $0x254] sm:$0xf] %v355_v12 }
  0x5d   :  { %v359_v14 = vld [vmem:[%s18371_s9 + $0x26c] sm:$0xf]  ;;  %358 = vst [vmem:[#allocation2 + $0x258] sm:$0xf] %v357_v13  ;;  %v361_v15 = vld [vmem:[%s18371_s9 + $0x250] sm:$0xf] }
  0x5e   :  { %360 = vst [vmem:[#allocation2 + $0x25c] sm:$0xf] %v359_v14  ;;  %v363_v16 = vld [vmem:[%s18371_s9 + $0x270] sm:$0xf]  ;;  %v365_v17 = vld [vmem:[%s18371_s9 + $0x254] sm:$0xf] }
  0x5f   :  { %362 = vst [vmem:[#allocation2 + $0x260] sm:$0xf] %v361_v15  ;;  %364 = vst [vmem:[#allocation2 + $0x264] sm:$0xf] %v363_v16  ;;  %v367_v18 = vld [vmem:[%s18371_s9 + $0x274] sm:$0xf] }
  0x60   :  { %366 = vst [vmem:[#allocation2 + $0x268] sm:$0xf] %v365_v17  ;;  %v369_v19 = vld [vmem:[%s18371_s9 + $0x258] sm:$0xf]  ;;  %368 = vst [vmem:[#allocation2 + $0x26c] sm:$0xf] %v367_v18 }
  0x61   :  { %v371_v20 = vld [vmem:[%s18371_s9 + $0x278] sm:$0xf]  ;;  %370 = vst [vmem:[#allocation2 + $0x270] sm:$0xf] %v369_v19  ;;  %v373_v21 = vld [vmem:[%s18371_s9 + $0x25c] sm:$0xf] }
  0x62   :  { %372 = vst [vmem:[#allocation2 + $0x274] sm:$0xf] %v371_v20  ;;  %v379_v23 = vld [vmem:[%s18371_s9 + $0x2a0] sm:$0xf]  ;;  %374 = vst [vmem:[#allocation2 + $0x278] sm:$0xf] %v373_v21 }
  0x63   :  { %376 = vst [vmem:[#allocation2 + $0x27c] sm:$0xff] %v375_v22   ;;  %380 = vst [vmem:[#allocation2 + $0x284] sm:$0xf] %v379_v23  ;;  %v381_v24 = vld [vmem:[%s18371_s9 + $0x284] sm:$0xf]  ;;  %v407_v37 = vld [vmem:[%s18371_s9 + $0x2bc] sm:$0xff]  }
  0x64   :  { %v383_v25 = vld [vmem:[%s18371_s9 + $0x2a4] sm:$0xf]  ;;  %v385_v26 = vld [vmem:[%s18371_s9 + $0x288] sm:$0xf]  ;;  %382 = vst [vmem:[#allocation2 + $0x288] sm:$0xf] %v381_v24 }
  0x65   :  { %384 = vst [vmem:[#allocation2 + $0x28c] sm:$0xf] %v383_v25  ;;  %386 = vst [vmem:[#allocation2 + $0x290] sm:$0xf] %v385_v26  ;;  %v387_v27 = vld [vmem:[%s18371_s9 + $0x2a8] sm:$0xf] }
  0x66   :  { %v389_v28 = vld [vmem:[%s18371_s9 + $0x28c] sm:$0xf]  ;;  %388 = vst [vmem:[#allocation2 + $0x294] sm:$0xf] %v387_v27  ;;  %v393_v30 = vld [vmem:[%s18371_s9 + $0x290] sm:$0xf] }
  0x67   :  { %v391_v29 = vld [vmem:[%s18371_s9 + $0x2ac] sm:$0xf]  ;;  %390 = vst [vmem:[#allocation2 + $0x298] sm:$0xf] %v389_v28  ;;  %v395_v31 = vld [vmem:[%s18371_s9 + $0x2b0] sm:$0xf] }
  0x68   :  { %392 = vst [vmem:[#allocation2 + $0x29c] sm:$0xf] %v391_v29  ;;  %v397_v32 = vld [vmem:[%s18371_s9 + $0x294] sm:$0xf]  ;;  %394 = vst [vmem:[#allocation2 + $0x2a0] sm:$0xf] %v393_v30 }
  0x69   :  { %396 = vst [vmem:[#allocation2 + $0x2a4] sm:$0xf] %v395_v31  ;;  %398 = vst [vmem:[#allocation2 + $0x2a8] sm:$0xf] %v397_v32  ;;  %v399_v33 = vld [vmem:[%s18371_s9 + $0x2b4] sm:$0xf] }
  0x6a   :  { %v401_v34 = vld [vmem:[%s18371_s9 + $0x298] sm:$0xf]  ;;  %400 = vst [vmem:[#allocation2 + $0x2ac] sm:$0xf] %v399_v33  ;;  %v405_v36 = vld [vmem:[%s18371_s9 + $0x29c] sm:$0xf] }
  0x6b   :  { %v403_v35 = vld [vmem:[%s18371_s9 + $0x2b8] sm:$0xf]  ;;  %402 = vst [vmem:[#allocation2 + $0x2b0] sm:$0xf] %v401_v34  ;;  %v411_v38 = vld [vmem:[%s18371_s9 + $0x2e0] sm:$0xf] }
  0x6c   :  { %404 = vst [vmem:[#allocation2 + $0x2b4] sm:$0xf] %v403_v35  ;;  %406 = vst [vmem:[#allocation2 + $0x2b8] sm:$0xf] %v405_v36  ;;  %v413_v39 = vld [vmem:[%s18371_s9 + $0x2c4] sm:$0xf] }
  0x6d   :  { %408 = vst [vmem:[#allocation2 + $0x2bc] sm:$0xff] %v407_v37   ;;  %412 = vst [vmem:[#allocation2 + $0x2c4] sm:$0xf] %v411_v38  ;;  %v415_v40 = vld [vmem:[%s18371_s9 + $0x2e4] sm:$0xf]  ;;  %v439_v52 = vld [vmem:[%s18371_s9 + $0x2fc] sm:$0xff]  }
  0x6e   :  { %v417_v41 = vld [vmem:[%s18371_s9 + $0x2c8] sm:$0xf]  ;;  %414 = vst [vmem:[#allocation2 + $0x2c8] sm:$0xf] %v413_v39  ;;  %416 = vst [vmem:[#allocation2 + $0x2cc] sm:$0xf] %v415_v40 }
  0x6f   :  { %418 = vst [vmem:[#allocation2 + $0x2d0] sm:$0xf] %v417_v41  ;;  %v419_v42 = vld [vmem:[%s18371_s9 + $0x2e8] sm:$0xf]  ;;  %v421_v43 = vld [vmem:[%s18371_s9 + $0x2cc] sm:$0xf] }
  0x70   :  { %v423_v44 = vld [vmem:[%s18371_s9 + $0x2ec] sm:$0xf]  ;;  %420 = vst [vmem:[#allocation2 + $0x2d4] sm:$0xf] %v419_v42  ;;  %422 = vst [vmem:[#allocation2 + $0x2d8] sm:$0xf] %v421_v43 }
  0x71   :  { %424 = vst [vmem:[#allocation2 + $0x2dc] sm:$0xf] %v423_v44  ;;  %v425_v45 = vld [vmem:[%s18371_s9 + $0x2d0] sm:$0xf]  ;;  %v429_v47 = vld [vmem:[%s18371_s9 + $0x2d4] sm:$0xf] }
  0x72   :  { %v427_v46 = vld [vmem:[%s18371_s9 + $0x2f0] sm:$0xf]  ;;  %426 = vst [vmem:[#allocation2 + $0x2e0] sm:$0xf] %v425_v45  ;;  %430 = vst [vmem:[#allocation2 + $0x2e8] sm:$0xf] %v429_v47 }
  0x73   :  { %428 = vst [vmem:[#allocation2 + $0x2e4] sm:$0xf] %v427_v46  ;;  %v431_v48 = vld [vmem:[%s18371_s9 + $0x2f4] sm:$0xf]  ;;  %v433_v49 = vld [vmem:[%s18371_s9 + $0x2d8] sm:$0xf] }
  0x74   :  { %v435_v50 = vld [vmem:[%s18371_s9 + $0x2f8] sm:$0xf]  ;;  %432 = vst [vmem:[#allocation2 + $0x2ec] sm:$0xf] %v431_v48  ;;  %434 = vst [vmem:[#allocation2 + $0x2f0] sm:$0xf] %v433_v49 }
  0x75   :  { %436 = vst [vmem:[#allocation2 + $0x2f4] sm:$0xf] %v435_v50  ;;  %v437_v51 = vld [vmem:[%s18371_s9 + $0x2dc] sm:$0xf]  ;;  %v443_v53 = vld [vmem:[%s18371_s9 + $0x320] sm:$0xf] }
  0x76   :  { %438 = vst [vmem:[#allocation2 + $0x2f8] sm:$0xf] %v437_v51  ;;  %440 = vst [vmem:[#allocation2 + $0x2fc] sm:$0xff] %v439_v52   ;;  %v445_v54 = vld [vmem:[%s18371_s9 + $0x304] sm:$0xf]  ;;  %v471_v3 = vld [vmem:[%s18371_s9 + $0x33c] sm:$0xff]  }
  0x77   :  { %444 = vst [vmem:[#allocation2 + $0x304] sm:$0xf] %v443_v53  ;;  %v447_v55 = vld [vmem:[%s18371_s9 + $0x324] sm:$0xf]  ;;  %v449_v56 = vld [vmem:[%s18371_s9 + $0x308] sm:$0xf] }
  0x78   :  { %446 = vst [vmem:[#allocation2 + $0x308] sm:$0xf] %v445_v54  ;;  %448 = vst [vmem:[#allocation2 + $0x30c] sm:$0xf] %v447_v55  ;;  %v451_v57 = vld [vmem:[%s18371_s9 + $0x328] sm:$0xf] }
  0x79   :  { %450 = vst [vmem:[#allocation2 + $0x310] sm:$0xf] %v449_v56  ;;  %v453_v58 = vld [vmem:[%s18371_s9 + $0x30c] sm:$0xf]  ;;  %452 = vst [vmem:[#allocation2 + $0x314] sm:$0xf] %v451_v57 }
  0x7a   :  { %v455_v59 = vld [vmem:[%s18371_s9 + $0x32c] sm:$0xf]  ;;  %454 = vst [vmem:[#allocation2 + $0x318] sm:$0xf] %v453_v58  ;;  %v457_v60 = vld [vmem:[%s18371_s9 + $0x310] sm:$0xf] }
  0x7b   :  { %456 = vst [vmem:[#allocation2 + $0x31c] sm:$0xf] %v455_v59  ;;  %v459_v61 = vld [vmem:[%s18371_s9 + $0x330] sm:$0xf]  ;;  %v461_v62 = vld [vmem:[%s18371_s9 + $0x314] sm:$0xf] }
  0x7c   :  { %458 = vst [vmem:[#allocation2 + $0x320] sm:$0xf] %v457_v60  ;;  %460 = vst [vmem:[#allocation2 + $0x324] sm:$0xf] %v459_v61  ;;  %v463_v63 = vld [vmem:[%s18371_s9 + $0x334] sm:$0xf] }
  0x7d   :  { %462 = vst [vmem:[#allocation2 + $0x328] sm:$0xf] %v461_v62  ;;  %v465_v0 = vld [vmem:[%s18371_s9 + $0x318] sm:$0xf]  ;;  %464 = vst [vmem:[#allocation2 + $0x32c] sm:$0xf] %v463_v63 }
  0x7e   :  { %v467_v1 = vld [vmem:[%s18371_s9 + $0x338] sm:$0xf]  ;;  %466 = vst [vmem:[#allocation2 + $0x330] sm:$0xf] %v465_v0  ;;  %v469_v2 = vld [vmem:[%s18371_s9 + $0x31c] sm:$0xf] }
  0x7f   :  { %468 = vst [vmem:[#allocation2 + $0x334] sm:$0xf] %v467_v1  ;;  %v475_v4 = vld [vmem:[%s18371_s9 + $0x360] sm:$0xf]  ;;  %470 = vst [vmem:[#allocation2 + $0x338] sm:$0xf] %v469_v2 }
  0x80   :  { %472 = vst [vmem:[#allocation2 + $0x33c] sm:$0xff] %v471_v3   ;;  %476 = vst [vmem:[#allocation2 + $0x344] sm:$0xf] %v475_v4  ;;  %v477_v5 = vld [vmem:[%s18371_s9 + $0x344] sm:$0xf]  ;;  %v503_v18 = vld [vmem:[%s18371_s9 + $0x37c] sm:$0xff]  }
  0x81   :  { %v479_v6 = vld [vmem:[%s18371_s9 + $0x364] sm:$0xf]  ;;  %v481_v7 = vld [vmem:[%s18371_s9 + $0x348] sm:$0xf]  ;;  %478 = vst [vmem:[#allocation2 + $0x348] sm:$0xf] %v477_v5 }
  0x82   :  { %480 = vst [vmem:[#allocation2 + $0x34c] sm:$0xf] %v479_v6  ;;  %482 = vst [vmem:[#allocation2 + $0x350] sm:$0xf] %v481_v7  ;;  %v483_v8 = vld [vmem:[%s18371_s9 + $0x368] sm:$0xf] }
  0x83   :  { %v485_v9 = vld [vmem:[%s18371_s9 + $0x34c] sm:$0xf]  ;;  %484 = vst [vmem:[#allocation2 + $0x354] sm:$0xf] %v483_v8  ;;  %v489_v11 = vld [vmem:[%s18371_s9 + $0x350] sm:$0xf] }
  0x84   :  { %v487_v10 = vld [vmem:[%s18371_s9 + $0x36c] sm:$0xf]  ;;  %486 = vst [vmem:[#allocation2 + $0x358] sm:$0xf] %v485_v9  ;;  %v491_v12 = vld [vmem:[%s18371_s9 + $0x370] sm:$0xf] }
  0x85   :  { %488 = vst [vmem:[#allocation2 + $0x35c] sm:$0xf] %v487_v10  ;;  %v493_v13 = vld [vmem:[%s18371_s9 + $0x354] sm:$0xf]  ;;  %490 = vst [vmem:[#allocation2 + $0x360] sm:$0xf] %v489_v11 }
  0x86   :  { %492 = vst [vmem:[#allocation2 + $0x364] sm:$0xf] %v491_v12  ;;  %494 = vst [vmem:[#allocation2 + $0x368] sm:$0xf] %v493_v13  ;;  %v495_v14 = vld [vmem:[%s18371_s9 + $0x374] sm:$0xf] }
  0x87   :  { %v497_v15 = vld [vmem:[%s18371_s9 + $0x358] sm:$0xf]  ;;  %496 = vst [vmem:[#allocation2 + $0x36c] sm:$0xf] %v495_v14  ;;  %v501_v17 = vld [vmem:[%s18371_s9 + $0x35c] sm:$0xf] }
  0x88   :  { %v499_v16 = vld [vmem:[%s18371_s9 + $0x378] sm:$0xf]  ;;  %498 = vst [vmem:[#allocation2 + $0x370] sm:$0xf] %v497_v15  ;;  %v507_v19 = vld [vmem:[%s18371_s9 + $0x3a0] sm:$0xf] }
  0x89   :  { %500 = vst [vmem:[#allocation2 + $0x374] sm:$0xf] %v499_v16  ;;  %502 = vst [vmem:[#allocation2 + $0x378] sm:$0xf] %v501_v17  ;;  %v509_v20 = vld [vmem:[%s18371_s9 + $0x384] sm:$0xf] }
  0x8a   :  { %504 = vst [vmem:[#allocation2 + $0x37c] sm:$0xff] %v503_v18   ;;  %508 = vst [vmem:[#allocation2 + $0x384] sm:$0xf] %v507_v19  ;;  %v511_v21 = vld [vmem:[%s18371_s9 + $0x3a4] sm:$0xf]  ;;  %v535_v33 = vld [vmem:[%s18371_s9 + $0x3bc] sm:$0xff]  }
  0x8b   :  { %v513_v22 = vld [vmem:[%s18371_s9 + $0x388] sm:$0xf]  ;;  %510 = vst [vmem:[#allocation2 + $0x388] sm:$0xf] %v509_v20  ;;  %512 = vst [vmem:[#allocation2 + $0x38c] sm:$0xf] %v511_v21 }
  0x8c   :  { %514 = vst [vmem:[#allocation2 + $0x390] sm:$0xf] %v513_v22  ;;  %v515_v23 = vld [vmem:[%s18371_s9 + $0x3a8] sm:$0xf]  ;;  %v517_v24 = vld [vmem:[%s18371_s9 + $0x38c] sm:$0xf] }
  0x8d   :  { %v519_v25 = vld [vmem:[%s18371_s9 + $0x3ac] sm:$0xf]  ;;  %516 = vst [vmem:[#allocation2 + $0x394] sm:$0xf] %v515_v23  ;;  %518 = vst [vmem:[#allocation2 + $0x398] sm:$0xf] %v517_v24 }
  0x8e   :  { %520 = vst [vmem:[#allocation2 + $0x39c] sm:$0xf] %v519_v25  ;;  %v521_v26 = vld [vmem:[%s18371_s9 + $0x390] sm:$0xf]  ;;  %v525_v28 = vld [vmem:[%s18371_s9 + $0x394] sm:$0xf] }
  0x8f   :  { %v523_v27 = vld [vmem:[%s18371_s9 + $0x3b0] sm:$0xf]  ;;  %522 = vst [vmem:[#allocation2 + $0x3a0] sm:$0xf] %v521_v26  ;;  %526 = vst [vmem:[#allocation2 + $0x3a8] sm:$0xf] %v525_v28 }
  0x90   :  { %524 = vst [vmem:[#allocation2 + $0x3a4] sm:$0xf] %v523_v27  ;;  %v527_v29 = vld [vmem:[%s18371_s9 + $0x3b4] sm:$0xf]  ;;  %v529_v30 = vld [vmem:[%s18371_s9 + $0x398] sm:$0xf] }
  0x91   :  { %v531_v31 = vld [vmem:[%s18371_s9 + $0x3b8] sm:$0xf]  ;;  %528 = vst [vmem:[#allocation2 + $0x3ac] sm:$0xf] %v527_v29  ;;  %530 = vst [vmem:[#allocation2 + $0x3b0] sm:$0xf] %v529_v30 }
  0x92   :  { %532 = vst [vmem:[#allocation2 + $0x3b4] sm:$0xf] %v531_v31  ;;  %v533_v32 = vld [vmem:[%s18371_s9 + $0x39c] sm:$0xf]  ;;  %v539_v34 = vld [vmem:[%s18371_s9 + $0x3e0] sm:$0xf] }
  0x93   :  { %534 = vst [vmem:[#allocation2 + $0x3b8] sm:$0xf] %v533_v32  ;;  %536 = vst [vmem:[#allocation2 + $0x3bc] sm:$0xff] %v535_v33   ;;  %v541_v35 = vld [vmem:[%s18371_s9 + $0x3c4] sm:$0xf] }
  0x94   :  { %540 = vst [vmem:[#allocation2 + $0x3c4] sm:$0xf] %v539_v34  ;;  %v543_v36 = vld [vmem:[%s18371_s9 + $0x3e4] sm:$0xf]  ;;  %v545_v37 = vld [vmem:[%s18371_s9 + $0x3c8] sm:$0xf] }
  0x95   :  { %542 = vst [vmem:[#allocation2 + $0x3c8] sm:$0xf] %v541_v35  ;;  %544 = vst [vmem:[#allocation2 + $0x3cc] sm:$0xf] %v543_v36  ;;  %v547_v38 = vld [vmem:[%s18371_s9 + $0x3e8] sm:$0xf] }
  0x96   :  { %546 = vst [vmem:[#allocation2 + $0x3d0] sm:$0xf] %v545_v37  ;;  %v549_v39 = vld [vmem:[%s18371_s9 + $0x3cc] sm:$0xf]  ;;  %548 = vst [vmem:[#allocation2 + $0x3d4] sm:$0xf] %v547_v38 }
  0x97   :  { %v551_v40 = vld [vmem:[%s18371_s9 + $0x3ec] sm:$0xf]  ;;  %550 = vst [vmem:[#allocation2 + $0x3d8] sm:$0xf] %v549_v39  ;;  %v553_v41 = vld [vmem:[%s18371_s9 + $0x3d0] sm:$0xf] }
  0x98   :  { %552 = vst [vmem:[#allocation2 + $0x3dc] sm:$0xf] %v551_v40  ;;  %v555_v42 = vld [vmem:[%s18371_s9 + $0x3f0] sm:$0xf]  ;;  %v557_v43 = vld [vmem:[%s18371_s9 + $0x3d4] sm:$0xf] }
  0x99   :  { %554 = vst [vmem:[#allocation2 + $0x3e0] sm:$0xf] %v553_v41  ;;  %556 = vst [vmem:[#allocation2 + $0x3e4] sm:$0xf] %v555_v42  ;;  %v559_v44 = vld [vmem:[%s18371_s9 + $0x3f4] sm:$0xf] }
  0x9a   :  { %558 = vst [vmem:[#allocation2 + $0x3e8] sm:$0xf] %v557_v43  ;;  %v561_v45 = vld [vmem:[%s18371_s9 + $0x3d8] sm:$0xf]  ;;  %560 = vst [vmem:[#allocation2 + $0x3ec] sm:$0xf] %v559_v44 }
  0x9b   :  { %v563_v46 = vld [vmem:[%s18371_s9 + $0x3f8] sm:$0xf]  ;;  %562 = vst [vmem:[#allocation2 + $0x3f0] sm:$0xf] %v561_v45  ;;  %v565_v47 = vld [vmem:[%s18371_s9 + $0x3dc] sm:$0xf] }
  0x9c   :  { %564 = vst [vmem:[#allocation2 + $0x3f4] sm:$0xf] %v563_v46  ;;  %v567_v48 = vld [vmem:[%s18371_s9 + $0x3fc] sm:$0xf]  ;;  %566 = vst [vmem:[#allocation2 + $0x3f8] sm:$0xf] %v565_v47 }
  0x9d   :  { %568 = vst [vmem:[#allocation2 + $0x3fc] sm:$0xf] %v567_v48 }
  0x9e   :  { %1111 = vsyncadd [#allocation5], 16384  ;;  %v1130_v49 = vld [vmem:[%s18372_s10] sm:$0xf]  ;;  %v1132_v50 = vld [vmem:[%s18372_s10 + $0x18] sm:$0xf] }
  0x9f   :  { %1131 = vst [vmem:[#allocation3] sm:$0xf] %v1130_v49  ;;  %1133 = vst [vmem:[#allocation3 + $0x4] sm:$0xf] %v1132_v50  ;;  %v1134_v51 = vld [vmem:[%s18372_s10 + $0x4] sm:$0xf] }
  0xa0   :  { %v1136_v52 = vld [vmem:[%s18372_s10 + $0x1c] sm:$0xf]  ;;  %v1138_v53 = vld [vmem:[%s18372_s10 + $0x8] sm:$0xf]  ;;  %1135 = vst [vmem:[#allocation3 + $0x8] sm:$0xf] %v1134_v51 }
  0xa1   :  { %1137 = vst [vmem:[#allocation3 + $0xc] sm:$0xf] %v1136_v52  ;;  %1139 = vst [vmem:[#allocation3 + $0x10] sm:$0xf] %v1138_v53  ;;  %v1140_v54 = vld [vmem:[%s18372_s10 + $0x20] sm:$0xf] }
  0xa2   :  { %v1142_v55 = vld [vmem:[%s18372_s10 + $0xc] sm:$0xf]  ;;  %v1144_v56 = vld [vmem:[%s18372_s10 + $0x24] sm:$0xf]  ;;  %1141 = vst [vmem:[#allocation3 + $0x14] sm:$0xf] %v1140_v54 }
  0xa3   :  { %1143 = vst [vmem:[#allocation3 + $0x18] sm:$0xf] %v1142_v55  ;;  %1145 = vst [vmem:[#allocation3 + $0x1c] sm:$0xf] %v1144_v56  ;;  %v1146_v57 = vld [vmem:[%s18372_s10 + $0x10] sm:$0xf] }
  0xa4   :  { %v1148_v58 = vld [vmem:[%s18372_s10 + $0x28] sm:$0xf]  ;;  %v1150_v59 = vld [vmem:[%s18372_s10 + $0x14] sm:$0xf]  ;;  %1147 = vst [vmem:[#allocation3 + $0x20] sm:$0xf] %v1146_v57 }
  0xa5   :  { %1149 = vst [vmem:[#allocation3 + $0x24] sm:$0xf] %v1148_v58  ;;  %1151 = vst [vmem:[#allocation3 + $0x28] sm:$0xf] %v1150_v59  ;;  %v1152_v60 = vld [vmem:[%s18372_s10 + $0x2c] sm:$0xff]   ;;  %v1176_v7 = vld [vmem:[%s18372_s10 + $0x5c] sm:$0xff]  }
  0xa6   :  { %v1156_v61 = vld [vmem:[%s18372_s10 + $0x48] sm:$0xf]  ;;  %v1158_v62 = vld [vmem:[%s18372_s10 + $0x34] sm:$0xf]  ;;  %1153 = vst [vmem:[#allocation3 + $0x2c] sm:$0xff] %v1152_v60   ;;  %1177 = vst [vmem:[#allocation3 + $0x5c] sm:$0xff] %v1176_v7  }
  0xa7   :  { %1157 = vst [vmem:[#allocation3 + $0x34] sm:$0xf] %v1156_v61  ;;  %1159 = vst [vmem:[#allocation3 + $0x38] sm:$0xf] %v1158_v62  ;;  %v1160_v63 = vld [vmem:[%s18372_s10 + $0x4c] sm:$0xf] }
  0xa8   :  { %v1162_v0 = vld [vmem:[%s18372_s10 + $0x38] sm:$0xf]  ;;  %v1164_v1 = vld [vmem:[%s18372_s10 + $0x50] sm:$0xf]  ;;  %1161 = vst [vmem:[#allocation3 + $0x3c] sm:$0xf] %v1160_v63 }
  0xa9   :  { %1163 = vst [vmem:[#allocation3 + $0x40] sm:$0xf] %v1162_v0  ;;  %1165 = vst [vmem:[#allocation3 + $0x44] sm:$0xf] %v1164_v1  ;;  %v1166_v2 = vld [vmem:[%s18372_s10 + $0x3c] sm:$0xf] }
  0xaa   :  { %v1168_v3 = vld [vmem:[%s18372_s10 + $0x54] sm:$0xf]  ;;  %v1170_v4 = vld [vmem:[%s18372_s10 + $0x40] sm:$0xf]  ;;  %1167 = vst [vmem:[#allocation3 + $0x48] sm:$0xf] %v1166_v2 }
  0xab   :  { %1169 = vst [vmem:[#allocation3 + $0x4c] sm:$0xf] %v1168_v3  ;;  %1171 = vst [vmem:[#allocation3 + $0x50] sm:$0xf] %v1170_v4  ;;  %v1172_v5 = vld [vmem:[%s18372_s10 + $0x58] sm:$0xf] }
  0xac   :  { %v1174_v6 = vld [vmem:[%s18372_s10 + $0x44] sm:$0xf]  ;;  %1173 = vst [vmem:[#allocation3 + $0x54] sm:$0xf] %v1172_v5  ;;  %v1180_v8 = vld [vmem:[%s18372_s10 + $0x78] sm:$0xf] }
  0xad   :  { %1175 = vst [vmem:[#allocation3 + $0x58] sm:$0xf] %v1174_v6  ;;  %v1182_v9 = vld [vmem:[%s18372_s10 + $0x64] sm:$0xf]  ;;  %v1184_v10 = vld [vmem:[%s18372_s10 + $0x7c] sm:$0xf] }
  0xae   :  { %1181 = vst [vmem:[#allocation3 + $0x64] sm:$0xf] %v1180_v8  ;;  %1183 = vst [vmem:[#allocation3 + $0x68] sm:$0xf] %v1182_v9  ;;  %v1186_v11 = vld [vmem:[%s18372_s10 + $0x68] sm:$0xf] }
  0xaf   :  { %1185 = vst [vmem:[#allocation3 + $0x6c] sm:$0xf] %v1184_v10  ;;  %v1188_v12 = vld [vmem:[%s18372_s10 + $0x80] sm:$0xf]  ;;  %v1190_v13 = vld [vmem:[%s18372_s10 + $0x6c] sm:$0xf] }
  0xb0   :  { %1187 = vst [vmem:[#allocation3 + $0x70] sm:$0xf] %v1186_v11  ;;  %1189 = vst [vmem:[#allocation3 + $0x74] sm:$0xf] %v1188_v12  ;;  %v1192_v14 = vld [vmem:[%s18372_s10 + $0x84] sm:$0xf] }
  0xb1   :  { %1191 = vst [vmem:[#allocation3 + $0x78] sm:$0xf] %v1190_v13  ;;  %v1194_v15 = vld [vmem:[%s18372_s10 + $0x70] sm:$0xf]  ;;  %v1196_v16 = vld [vmem:[%s18372_s10 + $0x88] sm:$0xf] }
  0xb2   :  { %1193 = vst [vmem:[#allocation3 + $0x7c] sm:$0xf] %v1192_v14  ;;  %1195 = vst [vmem:[#allocation3 + $0x80] sm:$0xf] %v1194_v15  ;;  %v1198_v17 = vld [vmem:[%s18372_s10 + $0x74] sm:$0xf] }
  0xb3   :  { %1197 = vst [vmem:[#allocation3 + $0x84] sm:$0xf] %v1196_v16  ;;  %v1200_v18 = vld [vmem:[%s18372_s10 + $0x8c] sm:$0xff]   ;;  %v1204_v19 = vld [vmem:[%s18372_s10 + $0xa8] sm:$0xf]  ;;  %v1224_v29 = vld [vmem:[%s18372_s10 + $0xbc] sm:$0xff]  }
  0xb4   :  { %1199 = vst [vmem:[#allocation3 + $0x88] sm:$0xf] %v1198_v17  ;;  %1201 = vst [vmem:[#allocation3 + $0x8c] sm:$0xff] %v1200_v18   ;;  %v1206_v20 = vld [vmem:[%s18372_s10 + $0x94] sm:$0xf]  ;;  %v1248_v40 = vld [vmem:[%s18372_s10 + $0xec] sm:$0xff]  }
  0xb5   :  { %1205 = vst [vmem:[#allocation3 + $0x94] sm:$0xf] %v1204_v19  ;;  %v1208_v21 = vld [vmem:[%s18372_s10 + $0xac] sm:$0xf]  ;;  %v1210_v22 = vld [vmem:[%s18372_s10 + $0x98] sm:$0xf] }
  0xb6   :  { %1207 = vst [vmem:[#allocation3 + $0x98] sm:$0xf] %v1206_v20  ;;  %1209 = vst [vmem:[#allocation3 + $0x9c] sm:$0xf] %v1208_v21  ;;  %v1212_v23 = vld [vmem:[%s18372_s10 + $0xb0] sm:$0xf] }
  0xb7   :  { %1211 = vst [vmem:[#allocation3 + $0xa0] sm:$0xf] %v1210_v22  ;;  %v1214_v24 = vld [vmem:[%s18372_s10 + $0x9c] sm:$0xf]  ;;  %v1216_v25 = vld [vmem:[%s18372_s10 + $0xb4] sm:$0xf] }
  0xb8   :  { %1213 = vst [vmem:[#allocation3 + $0xa4] sm:$0xf] %v1212_v23  ;;  %1215 = vst [vmem:[#allocation3 + $0xa8] sm:$0xf] %v1214_v24  ;;  %v1218_v26 = vld [vmem:[%s18372_s10 + $0xa0] sm:$0xf] }
  0xb9   :  { %1217 = vst [vmem:[#allocation3 + $0xac] sm:$0xf] %v1216_v25  ;;  %v1220_v27 = vld [vmem:[%s18372_s10 + $0xb8] sm:$0xf]  ;;  %v1222_v28 = vld [vmem:[%s18372_s10 + $0xa4] sm:$0xf] }
  0xba   :  { %1219 = vst [vmem:[#allocation3 + $0xb0] sm:$0xf] %v1218_v26  ;;  %1221 = vst [vmem:[#allocation3 + $0xb4] sm:$0xf] %v1220_v27  ;;  %v1228_v30 = vld [vmem:[%s18372_s10 + $0xd8] sm:$0xf] }
  0xbb   :  { %1223 = vst [vmem:[#allocation3 + $0xb8] sm:$0xf] %v1222_v28  ;;  %v1230_v31 = vld [vmem:[%s18372_s10 + $0xc4] sm:$0xf]  ;;  %1225 = vst [vmem:[#allocation3 + $0xbc] sm:$0xff] %v1224_v29   ;;  %v1272_v51 = vld [vmem:[%s18372_s10 + $0x11c] sm:$0xff]  }
  0xbc   :  { %1229 = vst [vmem:[#allocation3 + $0xc4] sm:$0xf] %v1228_v30  ;;  %1231 = vst [vmem:[#allocation3 + $0xc8] sm:$0xf] %v1230_v31  ;;  %v1232_v32 = vld [vmem:[%s18372_s10 + $0xdc] sm:$0xf] }
  0xbd   :  { %v1234_v33 = vld [vmem:[%s18372_s10 + $0xc8] sm:$0xf]  ;;  %v1236_v34 = vld [vmem:[%s18372_s10 + $0xe0] sm:$0xf]  ;;  %1233 = vst [vmem:[#allocation3 + $0xcc] sm:$0xf] %v1232_v32 }
  0xbe   :  { %1235 = vst [vmem:[#allocation3 + $0xd0] sm:$0xf] %v1234_v33  ;;  %1237 = vst [vmem:[#allocation3 + $0xd4] sm:$0xf] %v1236_v34  ;;  %v1238_v35 = vld [vmem:[%s18372_s10 + $0xcc] sm:$0xf] }
  0xbf   :  { %v1240_v36 = vld [vmem:[%s18372_s10 + $0xe4] sm:$0xf]  ;;  %v1242_v37 = vld [vmem:[%s18372_s10 + $0xd0] sm:$0xf]  ;;  %1239 = vst [vmem:[#allocation3 + $0xd8] sm:$0xf] %v1238_v35 }
  0xc0   :  { %1241 = vst [vmem:[#allocation3 + $0xdc] sm:$0xf] %v1240_v36  ;;  %1243 = vst [vmem:[#allocation3 + $0xe0] sm:$0xf] %v1242_v37  ;;  %v1244_v38 = vld [vmem:[%s18372_s10 + $0xe8] sm:$0xf] }
  0xc1   :  { %v1246_v39 = vld [vmem:[%s18372_s10 + $0xd4] sm:$0xf]  ;;  %1245 = vst [vmem:[#allocation3 + $0xe4] sm:$0xf] %v1244_v38  ;;  %1249 = vst [vmem:[#allocation3 + $0xec] sm:$0xff] %v1248_v40   ;;  %v1296_v62 = vld [vmem:[%s18372_s10 + $0x14c] sm:$0xff]  }
  0xc2   :  { %1247 = vst [vmem:[#allocation3 + $0xe8] sm:$0xf] %v1246_v39  ;;  %v1252_v41 = vld [vmem:[%s18372_s10 + $0x108] sm:$0xf]  ;;  %v1254_v42 = vld [vmem:[%s18372_s10 + $0xf4] sm:$0xf] }
  0xc3   :  { %v1256_v43 = vld [vmem:[%s18372_s10 + $0x10c] sm:$0xf]  ;;  %1253 = vst [vmem:[#allocation3 + $0xf4] sm:$0xf] %v1252_v41  ;;  %1255 = vst [vmem:[#allocation3 + $0xf8] sm:$0xf] %v1254_v42 }
  0xc4   :  { %1257 = vst [vmem:[#allocation3 + $0xfc] sm:$0xf] %v1256_v43  ;;  %v1258_v44 = vld [vmem:[%s18372_s10 + $0xf8] sm:$0xf]  ;;  %v1260_v45 = vld [vmem:[%s18372_s10 + $0x110] sm:$0xf] }
  0xc5   :  { %v1262_v46 = vld [vmem:[%s18372_s10 + $0xfc] sm:$0xf]  ;;  %1259 = vst [vmem:[#allocation3 + $0x100] sm:$0xf] %v1258_v44  ;;  %1261 = vst [vmem:[#allocation3 + $0x104] sm:$0xf] %v1260_v45 }
  0xc6   :  { %1263 = vst [vmem:[#allocation3 + $0x108] sm:$0xf] %v1262_v46  ;;  %v1264_v47 = vld [vmem:[%s18372_s10 + $0x114] sm:$0xf]  ;;  %v1266_v48 = vld [vmem:[%s18372_s10 + $0x100] sm:$0xf] }
  0xc7   :  { %v1268_v49 = vld [vmem:[%s18372_s10 + $0x118] sm:$0xf]  ;;  %1265 = vst [vmem:[#allocation3 + $0x10c] sm:$0xf] %v1264_v47  ;;  %1267 = vst [vmem:[#allocation3 + $0x110] sm:$0xf] %v1266_v48 }
  0xc8   :  { %1269 = vst [vmem:[#allocation3 + $0x114] sm:$0xf] %v1268_v49  ;;  %v1270_v50 = vld [vmem:[%s18372_s10 + $0x104] sm:$0xf]  ;;  %v1276_v52 = vld [vmem:[%s18372_s10 + $0x138] sm:$0xf] }
  0xc9   :  { %1271 = vst [vmem:[#allocation3 + $0x118] sm:$0xf] %v1270_v50  ;;  %1273 = vst [vmem:[#allocation3 + $0x11c] sm:$0xff] %v1272_v51   ;;  %v1278_v53 = vld [vmem:[%s18372_s10 + $0x124] sm:$0xf]  ;;  %v1320_v9 = vld [vmem:[%s18372_s10 + $0x17c] sm:$0xff]  }
  0xca   :  { %1277 = vst [vmem:[#allocation3 + $0x124] sm:$0xf] %v1276_v52  ;;  %v1280_v54 = vld [vmem:[%s18372_s10 + $0x13c] sm:$0xf]  ;;  %v1282_v55 = vld [vmem:[%s18372_s10 + $0x128] sm:$0xf] }
  0xcb   :  { %1279 = vst [vmem:[#allocation3 + $0x128] sm:$0xf] %v1278_v53  ;;  %1281 = vst [vmem:[#allocation3 + $0x12c] sm:$0xf] %v1280_v54  ;;  %v1284_v56 = vld [vmem:[%s18372_s10 + $0x140] sm:$0xf] }
  0xcc   :  { %1283 = vst [vmem:[#allocation3 + $0x130] sm:$0xf] %v1282_v55  ;;  %v1286_v57 = vld [vmem:[%s18372_s10 + $0x12c] sm:$0xf]  ;;  %v1288_v58 = vld [vmem:[%s18372_s10 + $0x144] sm:$0xf] }
  0xcd   :  { %1285 = vst [vmem:[#allocation3 + $0x134] sm:$0xf] %v1284_v56  ;;  %1287 = vst [vmem:[#allocation3 + $0x138] sm:$0xf] %v1286_v57  ;;  %v1290_v59 = vld [vmem:[%s18372_s10 + $0x130] sm:$0xf] }
  0xce   :  { %1289 = vst [vmem:[#allocation3 + $0x13c] sm:$0xf] %v1288_v58  ;;  %v1292_v60 = vld [vmem:[%s18372_s10 + $0x148] sm:$0xf]  ;;  %v1294_v61 = vld [vmem:[%s18372_s10 + $0x134] sm:$0xf] }
  0xcf   :  { %1291 = vst [vmem:[#allocation3 + $0x140] sm:$0xf] %v1290_v59  ;;  %1293 = vst [vmem:[#allocation3 + $0x144] sm:$0xf] %v1292_v60  ;;  %v1300_v63 = vld [vmem:[%s18372_s10 + $0x168] sm:$0xf] }
  0xd0   :  { %1295 = vst [vmem:[#allocation3 + $0x148] sm:$0xf] %v1294_v61  ;;  %v1302_v0 = vld [vmem:[%s18372_s10 + $0x154] sm:$0xf]  ;;  %1297 = vst [vmem:[#allocation3 + $0x14c] sm:$0xff] %v1296_v62   ;;  %v1344_v20 = vld [vmem:[%s18372_s10 + $0x1ac] sm:$0xff]  }
  0xd1   :  { %1301 = vst [vmem:[#allocation3 + $0x154] sm:$0xf] %v1300_v63  ;;  %1303 = vst [vmem:[#allocation3 + $0x158] sm:$0xf] %v1302_v0  ;;  %v1304_v1 = vld [vmem:[%s18372_s10 + $0x16c] sm:$0xf] }
  0xd2   :  { %v1306_v2 = vld [vmem:[%s18372_s10 + $0x158] sm:$0xf]  ;;  %v1308_v3 = vld [vmem:[%s18372_s10 + $0x170] sm:$0xf]  ;;  %1305 = vst [vmem:[#allocation3 + $0x15c] sm:$0xf] %v1304_v1 }
  0xd3   :  { %1307 = vst [vmem:[#allocation3 + $0x160] sm:$0xf] %v1306_v2  ;;  %1309 = vst [vmem:[#allocation3 + $0x164] sm:$0xf] %v1308_v3  ;;  %v1310_v4 = vld [vmem:[%s18372_s10 + $0x15c] sm:$0xf] }
  0xd4   :  { %v1312_v5 = vld [vmem:[%s18372_s10 + $0x174] sm:$0xf]  ;;  %v1314_v6 = vld [vmem:[%s18372_s10 + $0x160] sm:$0xf]  ;;  %1311 = vst [vmem:[#allocation3 + $0x168] sm:$0xf] %v1310_v4 }
  0xd5   :  { %1313 = vst [vmem:[#allocation3 + $0x16c] sm:$0xf] %v1312_v5  ;;  %1315 = vst [vmem:[#allocation3 + $0x170] sm:$0xf] %v1314_v6  ;;  %v1316_v7 = vld [vmem:[%s18372_s10 + $0x178] sm:$0xf] }
  0xd6   :  { %v1318_v8 = vld [vmem:[%s18372_s10 + $0x164] sm:$0xf]  ;;  %1317 = vst [vmem:[#allocation3 + $0x174] sm:$0xf] %v1316_v7  ;;  %1321 = vst [vmem:[#allocation3 + $0x17c] sm:$0xff] %v1320_v9   ;;  %v1368_v31 = vld [vmem:[%s18372_s10 + $0x1dc] sm:$0xff]  }
  0xd7   :  { %1319 = vst [vmem:[#allocation3 + $0x178] sm:$0xf] %v1318_v8  ;;  %v1324_v10 = vld [vmem:[%s18372_s10 + $0x198] sm:$0xf]  ;;  %v1326_v11 = vld [vmem:[%s18372_s10 + $0x184] sm:$0xf] }
  0xd8   :  { %v1328_v12 = vld [vmem:[%s18372_s10 + $0x19c] sm:$0xf]  ;;  %1325 = vst [vmem:[#allocation3 + $0x184] sm:$0xf] %v1324_v10  ;;  %1327 = vst [vmem:[#allocation3 + $0x188] sm:$0xf] %v1326_v11 }
  0xd9   :  { %1329 = vst [vmem:[#allocation3 + $0x18c] sm:$0xf] %v1328_v12  ;;  %v1330_v13 = vld [vmem:[%s18372_s10 + $0x188] sm:$0xf]  ;;  %v1332_v14 = vld [vmem:[%s18372_s10 + $0x1a0] sm:$0xf] }
  0xda   :  { %v1334_v15 = vld [vmem:[%s18372_s10 + $0x18c] sm:$0xf]  ;;  %1331 = vst [vmem:[#allocation3 + $0x190] sm:$0xf] %v1330_v13  ;;  %1333 = vst [vmem:[#allocation3 + $0x194] sm:$0xf] %v1332_v14 }
  0xdb   :  { %1335 = vst [vmem:[#allocation3 + $0x198] sm:$0xf] %v1334_v15  ;;  %v1336_v16 = vld [vmem:[%s18372_s10 + $0x1a4] sm:$0xf]  ;;  %v1338_v17 = vld [vmem:[%s18372_s10 + $0x190] sm:$0xf] }
  0xdc   :  { %v1340_v18 = vld [vmem:[%s18372_s10 + $0x1a8] sm:$0xf]  ;;  %1337 = vst [vmem:[#allocation3 + $0x19c] sm:$0xf] %v1336_v16  ;;  %1339 = vst [vmem:[#allocation3 + $0x1a0] sm:$0xf] %v1338_v17 }
  0xdd   :  { %1341 = vst [vmem:[#allocation3 + $0x1a4] sm:$0xf] %v1340_v18  ;;  %v1342_v19 = vld [vmem:[%s18372_s10 + $0x194] sm:$0xf]  ;;  %v1348_v21 = vld [vmem:[%s18372_s10 + $0x1c8] sm:$0xf] }
  0xde   :  { %1343 = vst [vmem:[#allocation3 + $0x1a8] sm:$0xf] %v1342_v19  ;;  %1345 = vst [vmem:[#allocation3 + $0x1ac] sm:$0xff] %v1344_v20   ;;  %v1350_v22 = vld [vmem:[%s18372_s10 + $0x1b4] sm:$0xf]  ;;  %v1392_v42 = vld [vmem:[%s18372_s10 + $0x20c] sm:$0xff]  }
  0xdf   :  { %1349 = vst [vmem:[#allocation3 + $0x1b4] sm:$0xf] %v1348_v21  ;;  %v1352_v23 = vld [vmem:[%s18372_s10 + $0x1cc] sm:$0xf]  ;;  %v1354_v24 = vld [vmem:[%s18372_s10 + $0x1b8] sm:$0xf] }
  0xe0   :  { %1351 = vst [vmem:[#allocation3 + $0x1b8] sm:$0xf] %v1350_v22  ;;  %1353 = vst [vmem:[#allocation3 + $0x1bc] sm:$0xf] %v1352_v23  ;;  %v1356_v25 = vld [vmem:[%s18372_s10 + $0x1d0] sm:$0xf] }
  0xe1   :  { %1355 = vst [vmem:[#allocation3 + $0x1c0] sm:$0xf] %v1354_v24  ;;  %v1358_v26 = vld [vmem:[%s18372_s10 + $0x1bc] sm:$0xf]  ;;  %v1360_v27 = vld [vmem:[%s18372_s10 + $0x1d4] sm:$0xf] }
  0xe2   :  { %1357 = vst [vmem:[#allocation3 + $0x1c4] sm:$0xf] %v1356_v25  ;;  %1359 = vst [vmem:[#allocation3 + $0x1c8] sm:$0xf] %v1358_v26  ;;  %v1362_v28 = vld [vmem:[%s18372_s10 + $0x1c0] sm:$0xf] }
  0xe3   :  { %1361 = vst [vmem:[#allocation3 + $0x1cc] sm:$0xf] %v1360_v27  ;;  %v1364_v29 = vld [vmem:[%s18372_s10 + $0x1d8] sm:$0xf]  ;;  %v1366_v30 = vld [vmem:[%s18372_s10 + $0x1c4] sm:$0xf] }
  0xe4   :  { %1363 = vst [vmem:[#allocation3 + $0x1d0] sm:$0xf] %v1362_v28  ;;  %1365 = vst [vmem:[#allocation3 + $0x1d4] sm:$0xf] %v1364_v29  ;;  %v1372_v32 = vld [vmem:[%s18372_s10 + $0x1f8] sm:$0xf] }
  0xe5   :  { %1367 = vst [vmem:[#allocation3 + $0x1d8] sm:$0xf] %v1366_v30  ;;  %v1374_v33 = vld [vmem:[%s18372_s10 + $0x1e4] sm:$0xf]  ;;  %1369 = vst [vmem:[#allocation3 + $0x1dc] sm:$0xff] %v1368_v31   ;;  %v1416_v53 = vld [vmem:[%s18372_s10 + $0x23c] sm:$0xff]  }
  0xe6   :  { %1373 = vst [vmem:[#allocation3 + $0x1e4] sm:$0xf] %v1372_v32  ;;  %1375 = vst [vmem:[#allocation3 + $0x1e8] sm:$0xf] %v1374_v33  ;;  %v1376_v34 = vld [vmem:[%s18372_s10 + $0x1fc] sm:$0xf] }
  0xe7   :  { %v1378_v35 = vld [vmem:[%s18372_s10 + $0x1e8] sm:$0xf]  ;;  %v1380_v36 = vld [vmem:[%s18372_s10 + $0x200] sm:$0xf]  ;;  %1377 = vst [vmem:[#allocation3 + $0x1ec] sm:$0xf] %v1376_v34 }
  0xe8   :  { %1379 = vst [vmem:[#allocation3 + $0x1f0] sm:$0xf] %v1378_v35  ;;  %1381 = vst [vmem:[#allocation3 + $0x1f4] sm:$0xf] %v1380_v36  ;;  %v1382_v37 = vld [vmem:[%s18372_s10 + $0x1ec] sm:$0xf] }
  0xe9   :  { %v1384_v38 = vld [vmem:[%s18372_s10 + $0x204] sm:$0xf]  ;;  %v1386_v39 = vld [vmem:[%s18372_s10 + $0x1f0] sm:$0xf]  ;;  %1383 = vst [vmem:[#allocation3 + $0x1f8] sm:$0xf] %v1382_v37 }
  0xea   :  { %1385 = vst [vmem:[#allocation3 + $0x1fc] sm:$0xf] %v1384_v38  ;;  %1387 = vst [vmem:[#allocation3 + $0x200] sm:$0xf] %v1386_v39  ;;  %v1388_v40 = vld [vmem:[%s18372_s10 + $0x208] sm:$0xf] }
  0xeb   :  { %v1390_v41 = vld [vmem:[%s18372_s10 + $0x1f4] sm:$0xf]  ;;  %1389 = vst [vmem:[#allocation3 + $0x204] sm:$0xf] %v1388_v40  ;;  %1393 = vst [vmem:[#allocation3 + $0x20c] sm:$0xff] %v1392_v42   ;;  %v1440_v0 = vld [vmem:[%s18372_s10 + $0x26c] sm:$0xff]  }
  0xec   :  { %1391 = vst [vmem:[#allocation3 + $0x208] sm:$0xf] %v1390_v41  ;;  %v1396_v43 = vld [vmem:[%s18372_s10 + $0x228] sm:$0xf]  ;;  %v1398_v44 = vld [vmem:[%s18372_s10 + $0x214] sm:$0xf] }
  0xed   :  { %v1400_v45 = vld [vmem:[%s18372_s10 + $0x22c] sm:$0xf]  ;;  %1397 = vst [vmem:[#allocation3 + $0x214] sm:$0xf] %v1396_v43  ;;  %1399 = vst [vmem:[#allocation3 + $0x218] sm:$0xf] %v1398_v44 }
  0xee   :  { %1401 = vst [vmem:[#allocation3 + $0x21c] sm:$0xf] %v1400_v45  ;;  %v1402_v46 = vld [vmem:[%s18372_s10 + $0x218] sm:$0xf]  ;;  %v1404_v47 = vld [vmem:[%s18372_s10 + $0x230] sm:$0xf] }
  0xef   :  { %v1406_v48 = vld [vmem:[%s18372_s10 + $0x21c] sm:$0xf]  ;;  %1403 = vst [vmem:[#allocation3 + $0x220] sm:$0xf] %v1402_v46  ;;  %1405 = vst [vmem:[#allocation3 + $0x224] sm:$0xf] %v1404_v47 }
  0xf0   :  { %1407 = vst [vmem:[#allocation3 + $0x228] sm:$0xf] %v1406_v48  ;;  %v1408_v49 = vld [vmem:[%s18372_s10 + $0x234] sm:$0xf]  ;;  %v1410_v50 = vld [vmem:[%s18372_s10 + $0x220] sm:$0xf] }
  0xf1   :  { %v1412_v51 = vld [vmem:[%s18372_s10 + $0x238] sm:$0xf]  ;;  %1409 = vst [vmem:[#allocation3 + $0x22c] sm:$0xf] %v1408_v49  ;;  %1411 = vst [vmem:[#allocation3 + $0x230] sm:$0xf] %v1410_v50 }
  0xf2   :  { %1413 = vst [vmem:[#allocation3 + $0x234] sm:$0xf] %v1412_v51  ;;  %v1414_v52 = vld [vmem:[%s18372_s10 + $0x224] sm:$0xf]  ;;  %v1420_v54 = vld [vmem:[%s18372_s10 + $0x258] sm:$0xf] }
  0xf3   :  { %1415 = vst [vmem:[#allocation3 + $0x238] sm:$0xf] %v1414_v52  ;;  %1417 = vst [vmem:[#allocation3 + $0x23c] sm:$0xff] %v1416_v53   ;;  %v1422_v55 = vld [vmem:[%s18372_s10 + $0x244] sm:$0xf]  ;;  %v1464_v11 = vld [vmem:[%s18372_s10 + $0x29c] sm:$0xff]  }
  0xf4   :  { %1421 = vst [vmem:[#allocation3 + $0x244] sm:$0xf] %v1420_v54  ;;  %v1424_v56 = vld [vmem:[%s18372_s10 + $0x25c] sm:$0xf]  ;;  %v1426_v57 = vld [vmem:[%s18372_s10 + $0x248] sm:$0xf] }
  0xf5   :  { %1423 = vst [vmem:[#allocation3 + $0x248] sm:$0xf] %v1422_v55  ;;  %1425 = vst [vmem:[#allocation3 + $0x24c] sm:$0xf] %v1424_v56  ;;  %v1428_v58 = vld [vmem:[%s18372_s10 + $0x260] sm:$0xf] }
  0xf6   :  { %1427 = vst [vmem:[#allocation3 + $0x250] sm:$0xf] %v1426_v57  ;;  %v1430_v59 = vld [vmem:[%s18372_s10 + $0x24c] sm:$0xf]  ;;  %v1432_v60 = vld [vmem:[%s18372_s10 + $0x264] sm:$0xf] }
  0xf7   :  { %1429 = vst [vmem:[#allocation3 + $0x254] sm:$0xf] %v1428_v58  ;;  %1431 = vst [vmem:[#allocation3 + $0x258] sm:$0xf] %v1430_v59  ;;  %v1434_v61 = vld [vmem:[%s18372_s10 + $0x250] sm:$0xf] }
  0xf8   :  { %1433 = vst [vmem:[#allocation3 + $0x25c] sm:$0xf] %v1432_v60  ;;  %v1436_v62 = vld [vmem:[%s18372_s10 + $0x268] sm:$0xf]  ;;  %v1438_v63 = vld [vmem:[%s18372_s10 + $0x254] sm:$0xf] }
  0xf9   :  { %1435 = vst [vmem:[#allocation3 + $0x260] sm:$0xf] %v1434_v61  ;;  %1437 = vst [vmem:[#allocation3 + $0x264] sm:$0xf] %v1436_v62  ;;  %v1444_v1 = vld [vmem:[%s18372_s10 + $0x288] sm:$0xf] }
  0xfa   :  { %1439 = vst [vmem:[#allocation3 + $0x268] sm:$0xf] %v1438_v63  ;;  %v1446_v2 = vld [vmem:[%s18372_s10 + $0x274] sm:$0xf]  ;;  %1441 = vst [vmem:[#allocation3 + $0x26c] sm:$0xff] %v1440_v0   ;;  %v1488_v22 = vld [vmem:[%s18372_s10 + $0x2cc] sm:$0xff]  }
  0xfb   :  { %1445 = vst [vmem:[#allocation3 + $0x274] sm:$0xf] %v1444_v1  ;;  %1447 = vst [vmem:[#allocation3 + $0x278] sm:$0xf] %v1446_v2  ;;  %v1448_v3 = vld [vmem:[%s18372_s10 + $0x28c] sm:$0xf] }
  0xfc   :  { %v1450_v4 = vld [vmem:[%s18372_s10 + $0x278] sm:$0xf]  ;;  %v1452_v5 = vld [vmem:[%s18372_s10 + $0x290] sm:$0xf]  ;;  %1449 = vst [vmem:[#allocation3 + $0x27c] sm:$0xf] %v1448_v3 }
  0xfd   :  { %1451 = vst [vmem:[#allocation3 + $0x280] sm:$0xf] %v1450_v4  ;;  %1453 = vst [vmem:[#allocation3 + $0x284] sm:$0xf] %v1452_v5  ;;  %v1454_v6 = vld [vmem:[%s18372_s10 + $0x27c] sm:$0xf] }
  0xfe   :  { %v1456_v7 = vld [vmem:[%s18372_s10 + $0x294] sm:$0xf]  ;;  %v1458_v8 = vld [vmem:[%s18372_s10 + $0x280] sm:$0xf]  ;;  %1455 = vst [vmem:[#allocation3 + $0x288] sm:$0xf] %v1454_v6 }
  0xff   :  { %1457 = vst [vmem:[#allocation3 + $0x28c] sm:$0xf] %v1456_v7  ;;  %1459 = vst [vmem:[#allocation3 + $0x290] sm:$0xf] %v1458_v8  ;;  %v1460_v9 = vld [vmem:[%s18372_s10 + $0x298] sm:$0xf] }
 0x100   :  { %v1462_v10 = vld [vmem:[%s18372_s10 + $0x284] sm:$0xf]  ;;  %1461 = vst [vmem:[#allocation3 + $0x294] sm:$0xf] %v1460_v9  ;;  %1465 = vst [vmem:[#allocation3 + $0x29c] sm:$0xff] %v1464_v11   ;;  %v1512_v33 = vld [vmem:[%s18372_s10 + $0x2fc] sm:$0xff]  }
 0x101   :  { %1463 = vst [vmem:[#allocation3 + $0x298] sm:$0xf] %v1462_v10  ;;  %v1468_v12 = vld [vmem:[%s18372_s10 + $0x2b8] sm:$0xf]  ;;  %v1470_v13 = vld [vmem:[%s18372_s10 + $0x2a4] sm:$0xf] }
 0x102   :  { %v1472_v14 = vld [vmem:[%s18372_s10 + $0x2bc] sm:$0xf]  ;;  %1469 = vst [vmem:[#allocation3 + $0x2a4] sm:$0xf] %v1468_v12  ;;  %1471 = vst [vmem:[#allocation3 + $0x2a8] sm:$0xf] %v1470_v13 }
 0x103   :  { %1473 = vst [vmem:[#allocation3 + $0x2ac] sm:$0xf] %v1472_v14  ;;  %v1474_v15 = vld [vmem:[%s18372_s10 + $0x2a8] sm:$0xf]  ;;  %v1476_v16 = vld [vmem:[%s18372_s10 + $0x2c0] sm:$0xf] }
 0x104   :  { %v1478_v17 = vld [vmem:[%s18372_s10 + $0x2ac] sm:$0xf]  ;;  %1475 = vst [vmem:[#allocation3 + $0x2b0] sm:$0xf] %v1474_v15  ;;  %1477 = vst [vmem:[#allocation3 + $0x2b4] sm:$0xf] %v1476_v16 }
 0x105   :  { %1479 = vst [vmem:[#allocation3 + $0x2b8] sm:$0xf] %v1478_v17  ;;  %v1480_v18 = vld [vmem:[%s18372_s10 + $0x2c4] sm:$0xf]  ;;  %v1482_v19 = vld [vmem:[%s18372_s10 + $0x2b0] sm:$0xf] }
 0x106   :  { %v1484_v20 = vld [vmem:[%s18372_s10 + $0x2c8] sm:$0xf]  ;;  %1481 = vst [vmem:[#allocation3 + $0x2bc] sm:$0xf] %v1480_v18  ;;  %1483 = vst [vmem:[#allocation3 + $0x2c0] sm:$0xf] %v1482_v19 }
 0x107   :  { %1485 = vst [vmem:[#allocation3 + $0x2c4] sm:$0xf] %v1484_v20  ;;  %v1486_v21 = vld [vmem:[%s18372_s10 + $0x2b4] sm:$0xf]  ;;  %v1492_v23 = vld [vmem:[%s18372_s10 + $0x2e8] sm:$0xf] }
 0x108   :  { %1487 = vst [vmem:[#allocation3 + $0x2c8] sm:$0xf] %v1486_v21  ;;  %1489 = vst [vmem:[#allocation3 + $0x2cc] sm:$0xff] %v1488_v22   ;;  %v1494_v24 = vld [vmem:[%s18372_s10 + $0x2d4] sm:$0xf]  ;;  %v1536_v44 = vld [vmem:[%s18372_s10 + $0x32c] sm:$0xff]  }
 0x109   :  { %1493 = vst [vmem:[#allocation3 + $0x2d4] sm:$0xf] %v1492_v23  ;;  %v1496_v25 = vld [vmem:[%s18372_s10 + $0x2ec] sm:$0xf]  ;;  %v1498_v26 = vld [vmem:[%s18372_s10 + $0x2d8] sm:$0xf] }
 0x10a   :  { %1495 = vst [vmem:[#allocation3 + $0x2d8] sm:$0xf] %v1494_v24  ;;  %1497 = vst [vmem:[#allocation3 + $0x2dc] sm:$0xf] %v1496_v25  ;;  %v1500_v27 = vld [vmem:[%s18372_s10 + $0x2f0] sm:$0xf] }
 0x10b   :  { %1499 = vst [vmem:[#allocation3 + $0x2e0] sm:$0xf] %v1498_v26  ;;  %v1502_v28 = vld [vmem:[%s18372_s10 + $0x2dc] sm:$0xf]  ;;  %v1504_v29 = vld [vmem:[%s18372_s10 + $0x2f4] sm:$0xf] }
 0x10c   :  { %1501 = vst [vmem:[#allocation3 + $0x2e4] sm:$0xf] %v1500_v27  ;;  %1503 = vst [vmem:[#allocation3 + $0x2e8] sm:$0xf] %v1502_v28  ;;  %v1506_v30 = vld [vmem:[%s18372_s10 + $0x2e0] sm:$0xf] }
 0x10d   :  { %1505 = vst [vmem:[#allocation3 + $0x2ec] sm:$0xf] %v1504_v29  ;;  %v1508_v31 = vld [vmem:[%s18372_s10 + $0x2f8] sm:$0xf]  ;;  %v1510_v32 = vld [vmem:[%s18372_s10 + $0x2e4] sm:$0xf] }
 0x10e   :  { %1507 = vst [vmem:[#allocation3 + $0x2f0] sm:$0xf] %v1506_v30  ;;  %1509 = vst [vmem:[#allocation3 + $0x2f4] sm:$0xf] %v1508_v31  ;;  %v1516_v34 = vld [vmem:[%s18372_s10 + $0x318] sm:$0xf] }
 0x10f   :  { %1511 = vst [vmem:[#allocation3 + $0x2f8] sm:$0xf] %v1510_v32  ;;  %v1518_v35 = vld [vmem:[%s18372_s10 + $0x304] sm:$0xf]  ;;  %1513 = vst [vmem:[#allocation3 + $0x2fc] sm:$0xff] %v1512_v33   ;;  %v1560_v55 = vld [vmem:[%s18372_s10 + $0x35c] sm:$0xff]  }
 0x110   :  { %1517 = vst [vmem:[#allocation3 + $0x304] sm:$0xf] %v1516_v34  ;;  %1519 = vst [vmem:[#allocation3 + $0x308] sm:$0xf] %v1518_v35  ;;  %v1520_v36 = vld [vmem:[%s18372_s10 + $0x31c] sm:$0xf] }
 0x111   :  { %v1522_v37 = vld [vmem:[%s18372_s10 + $0x308] sm:$0xf]  ;;  %v1524_v38 = vld [vmem:[%s18372_s10 + $0x320] sm:$0xf]  ;;  %1521 = vst [vmem:[#allocation3 + $0x30c] sm:$0xf] %v1520_v36 }
 0x112   :  { %1523 = vst [vmem:[#allocation3 + $0x310] sm:$0xf] %v1522_v37  ;;  %1525 = vst [vmem:[#allocation3 + $0x314] sm:$0xf] %v1524_v38  ;;  %v1526_v39 = vld [vmem:[%s18372_s10 + $0x30c] sm:$0xf] }
 0x113   :  { %v1528_v40 = vld [vmem:[%s18372_s10 + $0x324] sm:$0xf]  ;;  %v1530_v41 = vld [vmem:[%s18372_s10 + $0x310] sm:$0xf]  ;;  %1527 = vst [vmem:[#allocation3 + $0x318] sm:$0xf] %v1526_v39 }
 0x114   :  { %1529 = vst [vmem:[#allocation3 + $0x31c] sm:$0xf] %v1528_v40  ;;  %1531 = vst [vmem:[#allocation3 + $0x320] sm:$0xf] %v1530_v41  ;;  %v1532_v42 = vld [vmem:[%s18372_s10 + $0x328] sm:$0xf] }
 0x115   :  { %v1534_v43 = vld [vmem:[%s18372_s10 + $0x314] sm:$0xf]  ;;  %1533 = vst [vmem:[#allocation3 + $0x324] sm:$0xf] %v1532_v42  ;;  %1537 = vst [vmem:[#allocation3 + $0x32c] sm:$0xff] %v1536_v44   ;;  %v1584_v2 = vld [vmem:[%s18372_s10 + $0x38c] sm:$0xff]  }
 0x116   :  { %1535 = vst [vmem:[#allocation3 + $0x328] sm:$0xf] %v1534_v43  ;;  %v1540_v45 = vld [vmem:[%s18372_s10 + $0x348] sm:$0xf]  ;;  %v1542_v46 = vld [vmem:[%s18372_s10 + $0x334] sm:$0xf] }
 0x117   :  { %v1544_v47 = vld [vmem:[%s18372_s10 + $0x34c] sm:$0xf]  ;;  %1541 = vst [vmem:[#allocation3 + $0x334] sm:$0xf] %v1540_v45  ;;  %1543 = vst [vmem:[#allocation3 + $0x338] sm:$0xf] %v1542_v46 }
 0x118   :  { %1545 = vst [vmem:[#allocation3 + $0x33c] sm:$0xf] %v1544_v47  ;;  %v1546_v48 = vld [vmem:[%s18372_s10 + $0x338] sm:$0xf]  ;;  %v1548_v49 = vld [vmem:[%s18372_s10 + $0x350] sm:$0xf] }
 0x119   :  { %v1550_v50 = vld [vmem:[%s18372_s10 + $0x33c] sm:$0xf]  ;;  %1547 = vst [vmem:[#allocation3 + $0x340] sm:$0xf] %v1546_v48  ;;  %1549 = vst [vmem:[#allocation3 + $0x344] sm:$0xf] %v1548_v49 }
 0x11a   :  { %1551 = vst [vmem:[#allocation3 + $0x348] sm:$0xf] %v1550_v50  ;;  %v1552_v51 = vld [vmem:[%s18372_s10 + $0x354] sm:$0xf]  ;;  %v1554_v52 = vld [vmem:[%s18372_s10 + $0x340] sm:$0xf] }
 0x11b   :  { %v1556_v53 = vld [vmem:[%s18372_s10 + $0x358] sm:$0xf]  ;;  %1553 = vst [vmem:[#allocation3 + $0x34c] sm:$0xf] %v1552_v51  ;;  %1555 = vst [vmem:[#allocation3 + $0x350] sm:$0xf] %v1554_v52 }
 0x11c   :  { %1557 = vst [vmem:[#allocation3 + $0x354] sm:$0xf] %v1556_v53  ;;  %v1558_v54 = vld [vmem:[%s18372_s10 + $0x344] sm:$0xf]  ;;  %v1564_v56 = vld [vmem:[%s18372_s10 + $0x378] sm:$0xf] }
 0x11d   :  { %1559 = vst [vmem:[#allocation3 + $0x358] sm:$0xf] %v1558_v54  ;;  %1561 = vst [vmem:[#allocation3 + $0x35c] sm:$0xff] %v1560_v55   ;;  %v1566_v57 = vld [vmem:[%s18372_s10 + $0x364] sm:$0xf]  ;;  %v1608_v13 = vld [vmem:[%s18372_s10 + $0x3bc] sm:$0xff]  }
 0x11e   :  { %1565 = vst [vmem:[#allocation3 + $0x364] sm:$0xf] %v1564_v56  ;;  %v1568_v58 = vld [vmem:[%s18372_s10 + $0x37c] sm:$0xf]  ;;  %v1570_v59 = vld [vmem:[%s18372_s10 + $0x368] sm:$0xf] }
 0x11f   :  { %1567 = vst [vmem:[#allocation3 + $0x368] sm:$0xf] %v1566_v57  ;;  %1569 = vst [vmem:[#allocation3 + $0x36c] sm:$0xf] %v1568_v58  ;;  %v1572_v60 = vld [vmem:[%s18372_s10 + $0x380] sm:$0xf] }
 0x120   :  { %1571 = vst [vmem:[#allocation3 + $0x370] sm:$0xf] %v1570_v59  ;;  %v1574_v61 = vld [vmem:[%s18372_s10 + $0x36c] sm:$0xf]  ;;  %v1576_v62 = vld [vmem:[%s18372_s10 + $0x384] sm:$0xf] }
 0x121   :  { %1573 = vst [vmem:[#allocation3 + $0x374] sm:$0xf] %v1572_v60  ;;  %1575 = vst [vmem:[#allocation3 + $0x378] sm:$0xf] %v1574_v61  ;;  %v1578_v63 = vld [vmem:[%s18372_s10 + $0x370] sm:$0xf] }
 0x122   :  { %1577 = vst [vmem:[#allocation3 + $0x37c] sm:$0xf] %v1576_v62  ;;  %v1580_v0 = vld [vmem:[%s18372_s10 + $0x388] sm:$0xf]  ;;  %v1582_v1 = vld [vmem:[%s18372_s10 + $0x374] sm:$0xf] }
 0x123   :  { %1579 = vst [vmem:[#allocation3 + $0x380] sm:$0xf] %v1578_v63  ;;  %1581 = vst [vmem:[#allocation3 + $0x384] sm:$0xf] %v1580_v0  ;;  %v1588_v3 = vld [vmem:[%s18372_s10 + $0x3a8] sm:$0xf] }
 0x124   :  { %1583 = vst [vmem:[#allocation3 + $0x388] sm:$0xf] %v1582_v1  ;;  %v1590_v4 = vld [vmem:[%s18372_s10 + $0x394] sm:$0xf]  ;;  %1585 = vst [vmem:[#allocation3 + $0x38c] sm:$0xff] %v1584_v2   ;;  %v1632_v24 = vld [vmem:[%s18372_s10 + $0x3ec] sm:$0xff]  }
 0x125   :  { %1589 = vst [vmem:[#allocation3 + $0x394] sm:$0xf] %v1588_v3  ;;  %1591 = vst [vmem:[#allocation3 + $0x398] sm:$0xf] %v1590_v4  ;;  %v1592_v5 = vld [vmem:[%s18372_s10 + $0x3ac] sm:$0xf] }
 0x126   :  { %v1594_v6 = vld [vmem:[%s18372_s10 + $0x398] sm:$0xf]  ;;  %v1596_v7 = vld [vmem:[%s18372_s10 + $0x3b0] sm:$0xf]  ;;  %1593 = vst [vmem:[#allocation3 + $0x39c] sm:$0xf] %v1592_v5 }
 0x127   :  { %1595 = vst [vmem:[#allocation3 + $0x3a0] sm:$0xf] %v1594_v6  ;;  %1597 = vst [vmem:[#allocation3 + $0x3a4] sm:$0xf] %v1596_v7  ;;  %v1598_v8 = vld [vmem:[%s18372_s10 + $0x39c] sm:$0xf] }
 0x128   :  { %v1600_v9 = vld [vmem:[%s18372_s10 + $0x3b4] sm:$0xf]  ;;  %v1602_v10 = vld [vmem:[%s18372_s10 + $0x3a0] sm:$0xf]  ;;  %1599 = vst [vmem:[#allocation3 + $0x3a8] sm:$0xf] %v1598_v8 }
 0x129   :  { %1601 = vst [vmem:[#allocation3 + $0x3ac] sm:$0xf] %v1600_v9  ;;  %1603 = vst [vmem:[#allocation3 + $0x3b0] sm:$0xf] %v1602_v10  ;;  %v1604_v11 = vld [vmem:[%s18372_s10 + $0x3b8] sm:$0xf] }
 0x12a   :  { %v1606_v12 = vld [vmem:[%s18372_s10 + $0x3a4] sm:$0xf]  ;;  %1605 = vst [vmem:[#allocation3 + $0x3b4] sm:$0xf] %v1604_v11  ;;  %1609 = vst [vmem:[#allocation3 + $0x3bc] sm:$0xff] %v1608_v13   ;;  %v1656_v35 = vld [vmem:[%s18372_s10 + $0x41c] sm:$0xff]  }
 0x12b   :  { %1607 = vst [vmem:[#allocation3 + $0x3b8] sm:$0xf] %v1606_v12  ;;  %v1612_v14 = vld [vmem:[%s18372_s10 + $0x3d8] sm:$0xf]  ;;  %v1614_v15 = vld [vmem:[%s18372_s10 + $0x3c4] sm:$0xf] }
 0x12c   :  { %v1616_v16 = vld [vmem:[%s18372_s10 + $0x3dc] sm:$0xf]  ;;  %1613 = vst [vmem:[#allocation3 + $0x3c4] sm:$0xf] %v1612_v14  ;;  %1615 = vst [vmem:[#allocation3 + $0x3c8] sm:$0xf] %v1614_v15 }
 0x12d   :  { %1617 = vst [vmem:[#allocation3 + $0x3cc] sm:$0xf] %v1616_v16  ;;  %v1618_v17 = vld [vmem:[%s18372_s10 + $0x3c8] sm:$0xf]  ;;  %v1620_v18 = vld [vmem:[%s18372_s10 + $0x3e0] sm:$0xf] }
 0x12e   :  { %v1622_v19 = vld [vmem:[%s18372_s10 + $0x3cc] sm:$0xf]  ;;  %1619 = vst [vmem:[#allocation3 + $0x3d0] sm:$0xf] %v1618_v17  ;;  %1621 = vst [vmem:[#allocation3 + $0x3d4] sm:$0xf] %v1620_v18 }
 0x12f   :  { %1623 = vst [vmem:[#allocation3 + $0x3d8] sm:$0xf] %v1622_v19  ;;  %v1624_v20 = vld [vmem:[%s18372_s10 + $0x3e4] sm:$0xf]  ;;  %v1626_v21 = vld [vmem:[%s18372_s10 + $0x3d0] sm:$0xf] }
 0x130   :  { %v1628_v22 = vld [vmem:[%s18372_s10 + $0x3e8] sm:$0xf]  ;;  %1625 = vst [vmem:[#allocation3 + $0x3dc] sm:$0xf] %v1624_v20  ;;  %1627 = vst [vmem:[#allocation3 + $0x3e0] sm:$0xf] %v1626_v21 }
 0x131   :  { %1629 = vst [vmem:[#allocation3 + $0x3e4] sm:$0xf] %v1628_v22  ;;  %v1630_v23 = vld [vmem:[%s18372_s10 + $0x3d4] sm:$0xf]  ;;  %v1636_v25 = vld [vmem:[%s18372_s10 + $0x408] sm:$0xf] }
 0x132   :  { %1631 = vst [vmem:[#allocation3 + $0x3e8] sm:$0xf] %v1630_v23  ;;  %1633 = vst [vmem:[#allocation3 + $0x3ec] sm:$0xff] %v1632_v24   ;;  %v1638_v26 = vld [vmem:[%s18372_s10 + $0x3f4] sm:$0xf]  ;;  %v1680_v46 = vld [vmem:[%s18372_s10 + $0x44c] sm:$0xff]  }
 0x133   :  { %1637 = vst [vmem:[#allocation3 + $0x3f4] sm:$0xf] %v1636_v25  ;;  %v1640_v27 = vld [vmem:[%s18372_s10 + $0x40c] sm:$0xf]  ;;  %v1642_v28 = vld [vmem:[%s18372_s10 + $0x3f8] sm:$0xf] }
 0x134   :  { %1639 = vst [vmem:[#allocation3 + $0x3f8] sm:$0xf] %v1638_v26  ;;  %1641 = vst [vmem:[#allocation3 + $0x3fc] sm:$0xf] %v1640_v27  ;;  %v1644_v29 = vld [vmem:[%s18372_s10 + $0x410] sm:$0xf] }
 0x135   :  { %1643 = vst [vmem:[#allocation3 + $0x400] sm:$0xf] %v1642_v28  ;;  %v1646_v30 = vld [vmem:[%s18372_s10 + $0x3fc] sm:$0xf]  ;;  %v1648_v31 = vld [vmem:[%s18372_s10 + $0x414] sm:$0xf] }
 0x136   :  { %1645 = vst [vmem:[#allocation3 + $0x404] sm:$0xf] %v1644_v29  ;;  %1647 = vst [vmem:[#allocation3 + $0x408] sm:$0xf] %v1646_v30  ;;  %v1650_v32 = vld [vmem:[%s18372_s10 + $0x400] sm:$0xf] }
 0x137   :  { %1649 = vst [vmem:[#allocation3 + $0x40c] sm:$0xf] %v1648_v31  ;;  %v1652_v33 = vld [vmem:[%s18372_s10 + $0x418] sm:$0xf]  ;;  %v1654_v34 = vld [vmem:[%s18372_s10 + $0x404] sm:$0xf] }
 0x138   :  { %1651 = vst [vmem:[#allocation3 + $0x410] sm:$0xf] %v1650_v32  ;;  %1653 = vst [vmem:[#allocation3 + $0x414] sm:$0xf] %v1652_v33  ;;  %v1660_v36 = vld [vmem:[%s18372_s10 + $0x438] sm:$0xf] }
 0x139   :  { %1655 = vst [vmem:[#allocation3 + $0x418] sm:$0xf] %v1654_v34  ;;  %v1662_v37 = vld [vmem:[%s18372_s10 + $0x424] sm:$0xf]  ;;  %1657 = vst [vmem:[#allocation3 + $0x41c] sm:$0xff] %v1656_v35   ;;  %v1704_v57 = vld [vmem:[%s18372_s10 + $0x47c] sm:$0xff]  }
 0x13a   :  { %1661 = vst [vmem:[#allocation3 + $0x424] sm:$0xf] %v1660_v36  ;;  %1663 = vst [vmem:[#allocation3 + $0x428] sm:$0xf] %v1662_v37  ;;  %v1664_v38 = vld [vmem:[%s18372_s10 + $0x43c] sm:$0xf] }
 0x13b   :  { %v1666_v39 = vld [vmem:[%s18372_s10 + $0x428] sm:$0xf]  ;;  %v1668_v40 = vld [vmem:[%s18372_s10 + $0x440] sm:$0xf]  ;;  %1665 = vst [vmem:[#allocation3 + $0x42c] sm:$0xf] %v1664_v38 }
 0x13c   :  { %1667 = vst [vmem:[#allocation3 + $0x430] sm:$0xf] %v1666_v39  ;;  %1669 = vst [vmem:[#allocation3 + $0x434] sm:$0xf] %v1668_v40  ;;  %v1670_v41 = vld [vmem:[%s18372_s10 + $0x42c] sm:$0xf] }
 0x13d   :  { %v1672_v42 = vld [vmem:[%s18372_s10 + $0x444] sm:$0xf]  ;;  %v1674_v43 = vld [vmem:[%s18372_s10 + $0x430] sm:$0xf]  ;;  %1671 = vst [vmem:[#allocation3 + $0x438] sm:$0xf] %v1670_v41 }
 0x13e   :  { %1673 = vst [vmem:[#allocation3 + $0x43c] sm:$0xf] %v1672_v42  ;;  %1675 = vst [vmem:[#allocation3 + $0x440] sm:$0xf] %v1674_v43  ;;  %v1676_v44 = vld [vmem:[%s18372_s10 + $0x448] sm:$0xf] }
 0x13f   :  { %v1678_v45 = vld [vmem:[%s18372_s10 + $0x434] sm:$0xf]  ;;  %1677 = vst [vmem:[#allocation3 + $0x444] sm:$0xf] %v1676_v44  ;;  %1681 = vst [vmem:[#allocation3 + $0x44c] sm:$0xff] %v1680_v46   ;;  %v1728_v4 = vld [vmem:[%s18372_s10 + $0x4ac] sm:$0xff]  }
 0x140   :  { %1679 = vst [vmem:[#allocation3 + $0x448] sm:$0xf] %v1678_v45  ;;  %v1684_v47 = vld [vmem:[%s18372_s10 + $0x468] sm:$0xf]  ;;  %v1686_v48 = vld [vmem:[%s18372_s10 + $0x454] sm:$0xf] }
 0x141   :  { %v1688_v49 = vld [vmem:[%s18372_s10 + $0x46c] sm:$0xf]  ;;  %1685 = vst [vmem:[#allocation3 + $0x454] sm:$0xf] %v1684_v47  ;;  %1687 = vst [vmem:[#allocation3 + $0x458] sm:$0xf] %v1686_v48 }
 0x142   :  { %1689 = vst [vmem:[#allocation3 + $0x45c] sm:$0xf] %v1688_v49  ;;  %v1690_v50 = vld [vmem:[%s18372_s10 + $0x458] sm:$0xf]  ;;  %v1692_v51 = vld [vmem:[%s18372_s10 + $0x470] sm:$0xf] }
 0x143   :  { %v1694_v52 = vld [vmem:[%s18372_s10 + $0x45c] sm:$0xf]  ;;  %1691 = vst [vmem:[#allocation3 + $0x460] sm:$0xf] %v1690_v50  ;;  %1693 = vst [vmem:[#allocation3 + $0x464] sm:$0xf] %v1692_v51 }
 0x144   :  { %1695 = vst [vmem:[#allocation3 + $0x468] sm:$0xf] %v1694_v52  ;;  %v1696_v53 = vld [vmem:[%s18372_s10 + $0x474] sm:$0xf]  ;;  %v1698_v54 = vld [vmem:[%s18372_s10 + $0x460] sm:$0xf] }
 0x145   :  { %v1700_v55 = vld [vmem:[%s18372_s10 + $0x478] sm:$0xf]  ;;  %1697 = vst [vmem:[#allocation3 + $0x46c] sm:$0xf] %v1696_v53  ;;  %1699 = vst [vmem:[#allocation3 + $0x470] sm:$0xf] %v1698_v54 }
 0x146   :  { %1701 = vst [vmem:[#allocation3 + $0x474] sm:$0xf] %v1700_v55  ;;  %v1702_v56 = vld [vmem:[%s18372_s10 + $0x464] sm:$0xf]  ;;  %v1708_v58 = vld [vmem:[%s18372_s10 + $0x498] sm:$0xf] }
 0x147   :  { %1703 = vst [vmem:[#allocation3 + $0x478] sm:$0xf] %v1702_v56  ;;  %1705 = vst [vmem:[#allocation3 + $0x47c] sm:$0xff] %v1704_v57   ;;  %v1710_v59 = vld [vmem:[%s18372_s10 + $0x484] sm:$0xf]  ;;  %v1752_v15 = vld [vmem:[%s18372_s10 + $0x4dc] sm:$0xff]  }
 0x148   :  { %1709 = vst [vmem:[#allocation3 + $0x484] sm:$0xf] %v1708_v58  ;;  %v1712_v60 = vld [vmem:[%s18372_s10 + $0x49c] sm:$0xf]  ;;  %v1714_v61 = vld [vmem:[%s18372_s10 + $0x488] sm:$0xf] }
 0x149   :  { %1711 = vst [vmem:[#allocation3 + $0x488] sm:$0xf] %v1710_v59  ;;  %1713 = vst [vmem:[#allocation3 + $0x48c] sm:$0xf] %v1712_v60  ;;  %v1716_v62 = vld [vmem:[%s18372_s10 + $0x4a0] sm:$0xf] }
 0x14a   :  { %1715 = vst [vmem:[#allocation3 + $0x490] sm:$0xf] %v1714_v61  ;;  %v1718_v63 = vld [vmem:[%s18372_s10 + $0x48c] sm:$0xf]  ;;  %v1720_v0 = vld [vmem:[%s18372_s10 + $0x4a4] sm:$0xf] }
 0x14b   :  { %1717 = vst [vmem:[#allocation3 + $0x494] sm:$0xf] %v1716_v62  ;;  %1719 = vst [vmem:[#allocation3 + $0x498] sm:$0xf] %v1718_v63  ;;  %v1722_v1 = vld [vmem:[%s18372_s10 + $0x490] sm:$0xf] }
 0x14c   :  { %1721 = vst [vmem:[#allocation3 + $0x49c] sm:$0xf] %v1720_v0  ;;  %v1724_v2 = vld [vmem:[%s18372_s10 + $0x4a8] sm:$0xf]  ;;  %v1726_v3 = vld [vmem:[%s18372_s10 + $0x494] sm:$0xf] }
 0x14d   :  { %1723 = vst [vmem:[#allocation3 + $0x4a0] sm:$0xf] %v1722_v1  ;;  %1725 = vst [vmem:[#allocation3 + $0x4a4] sm:$0xf] %v1724_v2  ;;  %v1732_v5 = vld [vmem:[%s18372_s10 + $0x4c8] sm:$0xf] }
 0x14e   :  { %1727 = vst [vmem:[#allocation3 + $0x4a8] sm:$0xf] %v1726_v3  ;;  %v1734_v6 = vld [vmem:[%s18372_s10 + $0x4b4] sm:$0xf]  ;;  %1729 = vst [vmem:[#allocation3 + $0x4ac] sm:$0xff] %v1728_v4   ;;  %v1776_v26 = vld [vmem:[%s18372_s10 + $0x50c] sm:$0xff]  }
 0x14f   :  { %1733 = vst [vmem:[#allocation3 + $0x4b4] sm:$0xf] %v1732_v5  ;;  %1735 = vst [vmem:[#allocation3 + $0x4b8] sm:$0xf] %v1734_v6  ;;  %v1736_v7 = vld [vmem:[%s18372_s10 + $0x4cc] sm:$0xf] }
 0x150   :  { %v1738_v8 = vld [vmem:[%s18372_s10 + $0x4b8] sm:$0xf]  ;;  %v1740_v9 = vld [vmem:[%s18372_s10 + $0x4d0] sm:$0xf]  ;;  %1737 = vst [vmem:[#allocation3 + $0x4bc] sm:$0xf] %v1736_v7 }
 0x151   :  { %1739 = vst [vmem:[#allocation3 + $0x4c0] sm:$0xf] %v1738_v8  ;;  %1741 = vst [vmem:[#allocation3 + $0x4c4] sm:$0xf] %v1740_v9  ;;  %v1742_v10 = vld [vmem:[%s18372_s10 + $0x4bc] sm:$0xf] }
 0x152   :  { %v1744_v11 = vld [vmem:[%s18372_s10 + $0x4d4] sm:$0xf]  ;;  %v1746_v12 = vld [vmem:[%s18372_s10 + $0x4c0] sm:$0xf]  ;;  %1743 = vst [vmem:[#allocation3 + $0x4c8] sm:$0xf] %v1742_v10 }
 0x153   :  { %1745 = vst [vmem:[#allocation3 + $0x4cc] sm:$0xf] %v1744_v11  ;;  %1747 = vst [vmem:[#allocation3 + $0x4d0] sm:$0xf] %v1746_v12  ;;  %v1748_v13 = vld [vmem:[%s18372_s10 + $0x4d8] sm:$0xf] }
 0x154   :  { %v1750_v14 = vld [vmem:[%s18372_s10 + $0x4c4] sm:$0xf]  ;;  %1749 = vst [vmem:[#allocation3 + $0x4d4] sm:$0xf] %v1748_v13  ;;  %1753 = vst [vmem:[#allocation3 + $0x4dc] sm:$0xff] %v1752_v15   ;;  %v1800_v37 = vld [vmem:[%s18372_s10 + $0x53c] sm:$0xff]  }
 0x155   :  { %1751 = vst [vmem:[#allocation3 + $0x4d8] sm:$0xf] %v1750_v14  ;;  %v1756_v16 = vld [vmem:[%s18372_s10 + $0x4f8] sm:$0xf]  ;;  %v1758_v17 = vld [vmem:[%s18372_s10 + $0x4e4] sm:$0xf] }
 0x156   :  { %v1760_v18 = vld [vmem:[%s18372_s10 + $0x4fc] sm:$0xf]  ;;  %1757 = vst [vmem:[#allocation3 + $0x4e4] sm:$0xf] %v1756_v16  ;;  %1759 = vst [vmem:[#allocation3 + $0x4e8] sm:$0xf] %v1758_v17 }
 0x157   :  { %1761 = vst [vmem:[#allocation3 + $0x4ec] sm:$0xf] %v1760_v18  ;;  %v1762_v19 = vld [vmem:[%s18372_s10 + $0x4e8] sm:$0xf]  ;;  %v1764_v20 = vld [vmem:[%s18372_s10 + $0x500] sm:$0xf] }
 0x158   :  { %v1766_v21 = vld [vmem:[%s18372_s10 + $0x4ec] sm:$0xf]  ;;  %1763 = vst [vmem:[#allocation3 + $0x4f0] sm:$0xf] %v1762_v19  ;;  %1765 = vst [vmem:[#allocation3 + $0x4f4] sm:$0xf] %v1764_v20 }
 0x159   :  { %1767 = vst [vmem:[#allocation3 + $0x4f8] sm:$0xf] %v1766_v21  ;;  %v1768_v22 = vld [vmem:[%s18372_s10 + $0x504] sm:$0xf]  ;;  %v1770_v23 = vld [vmem:[%s18372_s10 + $0x4f0] sm:$0xf] }
 0x15a   :  { %v1772_v24 = vld [vmem:[%s18372_s10 + $0x508] sm:$0xf]  ;;  %1769 = vst [vmem:[#allocation3 + $0x4fc] sm:$0xf] %v1768_v22  ;;  %1771 = vst [vmem:[#allocation3 + $0x500] sm:$0xf] %v1770_v23 }
 0x15b   :  { %1773 = vst [vmem:[#allocation3 + $0x504] sm:$0xf] %v1772_v24  ;;  %v1774_v25 = vld [vmem:[%s18372_s10 + $0x4f4] sm:$0xf]  ;;  %v1780_v27 = vld [vmem:[%s18372_s10 + $0x528] sm:$0xf] }
 0x15c   :  { %1775 = vst [vmem:[#allocation3 + $0x508] sm:$0xf] %v1774_v25  ;;  %1777 = vst [vmem:[#allocation3 + $0x50c] sm:$0xff] %v1776_v26   ;;  %v1782_v28 = vld [vmem:[%s18372_s10 + $0x514] sm:$0xf]  ;;  %v1824_v48 = vld [vmem:[%s18372_s10 + $0x56c] sm:$0xff]  }
 0x15d   :  { %1781 = vst [vmem:[#allocation3 + $0x514] sm:$0xf] %v1780_v27  ;;  %v1784_v29 = vld [vmem:[%s18372_s10 + $0x52c] sm:$0xf]  ;;  %v1786_v30 = vld [vmem:[%s18372_s10 + $0x518] sm:$0xf] }
 0x15e   :  { %1783 = vst [vmem:[#allocation3 + $0x518] sm:$0xf] %v1782_v28  ;;  %1785 = vst [vmem:[#allocation3 + $0x51c] sm:$0xf] %v1784_v29  ;;  %v1788_v31 = vld [vmem:[%s18372_s10 + $0x530] sm:$0xf] }
 0x15f   :  { %1787 = vst [vmem:[#allocation3 + $0x520] sm:$0xf] %v1786_v30  ;;  %v1790_v32 = vld [vmem:[%s18372_s10 + $0x51c] sm:$0xf]  ;;  %v1792_v33 = vld [vmem:[%s18372_s10 + $0x534] sm:$0xf] }
 0x160   :  { %1789 = vst [vmem:[#allocation3 + $0x524] sm:$0xf] %v1788_v31  ;;  %1791 = vst [vmem:[#allocation3 + $0x528] sm:$0xf] %v1790_v32  ;;  %v1794_v34 = vld [vmem:[%s18372_s10 + $0x520] sm:$0xf] }
 0x161   :  { %1793 = vst [vmem:[#allocation3 + $0x52c] sm:$0xf] %v1792_v33  ;;  %v1796_v35 = vld [vmem:[%s18372_s10 + $0x538] sm:$0xf]  ;;  %v1798_v36 = vld [vmem:[%s18372_s10 + $0x524] sm:$0xf] }
 0x162   :  { %1795 = vst [vmem:[#allocation3 + $0x530] sm:$0xf] %v1794_v34  ;;  %1797 = vst [vmem:[#allocation3 + $0x534] sm:$0xf] %v1796_v35  ;;  %v1804_v38 = vld [vmem:[%s18372_s10 + $0x558] sm:$0xf] }
 0x163   :  { %1799 = vst [vmem:[#allocation3 + $0x538] sm:$0xf] %v1798_v36  ;;  %v1806_v39 = vld [vmem:[%s18372_s10 + $0x544] sm:$0xf]  ;;  %1801 = vst [vmem:[#allocation3 + $0x53c] sm:$0xff] %v1800_v37   ;;  %v1848_v59 = vld [vmem:[%s18372_s10 + $0x59c] sm:$0xff]  }
 0x164   :  { %1805 = vst [vmem:[#allocation3 + $0x544] sm:$0xf] %v1804_v38  ;;  %1807 = vst [vmem:[#allocation3 + $0x548] sm:$0xf] %v1806_v39  ;;  %v1808_v40 = vld [vmem:[%s18372_s10 + $0x55c] sm:$0xf] }
 0x165   :  { %v1810_v41 = vld [vmem:[%s18372_s10 + $0x548] sm:$0xf]  ;;  %v1812_v42 = vld [vmem:[%s18372_s10 + $0x560] sm:$0xf]  ;;  %1809 = vst [vmem:[#allocation3 + $0x54c] sm:$0xf] %v1808_v40 }
 0x166   :  { %1811 = vst [vmem:[#allocation3 + $0x550] sm:$0xf] %v1810_v41  ;;  %1813 = vst [vmem:[#allocation3 + $0x554] sm:$0xf] %v1812_v42  ;;  %v1814_v43 = vld [vmem:[%s18372_s10 + $0x54c] sm:$0xf] }
 0x167   :  { %v1816_v44 = vld [vmem:[%s18372_s10 + $0x564] sm:$0xf]  ;;  %v1818_v45 = vld [vmem:[%s18372_s10 + $0x550] sm:$0xf]  ;;  %1815 = vst [vmem:[#allocation3 + $0x558] sm:$0xf] %v1814_v43 }
 0x168   :  { %1817 = vst [vmem:[#allocation3 + $0x55c] sm:$0xf] %v1816_v44  ;;  %1819 = vst [vmem:[#allocation3 + $0x560] sm:$0xf] %v1818_v45  ;;  %v1820_v46 = vld [vmem:[%s18372_s10 + $0x568] sm:$0xf] }
 0x169   :  { %v1822_v47 = vld [vmem:[%s18372_s10 + $0x554] sm:$0xf]  ;;  %1821 = vst [vmem:[#allocation3 + $0x564] sm:$0xf] %v1820_v46  ;;  %1825 = vst [vmem:[#allocation3 + $0x56c] sm:$0xff] %v1824_v48   ;;  %v1872_v6 = vld [vmem:[%s18372_s10 + $0x5cc] sm:$0xff]  }
 0x16a   :  { %1823 = vst [vmem:[#allocation3 + $0x568] sm:$0xf] %v1822_v47  ;;  %v1828_v49 = vld [vmem:[%s18372_s10 + $0x588] sm:$0xf]  ;;  %v1830_v50 = vld [vmem:[%s18372_s10 + $0x574] sm:$0xf] }
 0x16b   :  { %v1832_v51 = vld [vmem:[%s18372_s10 + $0x58c] sm:$0xf]  ;;  %1829 = vst [vmem:[#allocation3 + $0x574] sm:$0xf] %v1828_v49  ;;  %1831 = vst [vmem:[#allocation3 + $0x578] sm:$0xf] %v1830_v50 }
 0x16c   :  { %1833 = vst [vmem:[#allocation3 + $0x57c] sm:$0xf] %v1832_v51  ;;  %v1834_v52 = vld [vmem:[%s18372_s10 + $0x578] sm:$0xf]  ;;  %v1836_v53 = vld [vmem:[%s18372_s10 + $0x590] sm:$0xf] }
 0x16d   :  { %v1838_v54 = vld [vmem:[%s18372_s10 + $0x57c] sm:$0xf]  ;;  %1835 = vst [vmem:[#allocation3 + $0x580] sm:$0xf] %v1834_v52  ;;  %1837 = vst [vmem:[#allocation3 + $0x584] sm:$0xf] %v1836_v53 }
 0x16e   :  { %1839 = vst [vmem:[#allocation3 + $0x588] sm:$0xf] %v1838_v54  ;;  %v1840_v55 = vld [vmem:[%s18372_s10 + $0x594] sm:$0xf]  ;;  %v1842_v56 = vld [vmem:[%s18372_s10 + $0x580] sm:$0xf] }
 0x16f   :  { %v1844_v57 = vld [vmem:[%s18372_s10 + $0x598] sm:$0xf]  ;;  %1841 = vst [vmem:[#allocation3 + $0x58c] sm:$0xf] %v1840_v55  ;;  %1843 = vst [vmem:[#allocation3 + $0x590] sm:$0xf] %v1842_v56 }
 0x170   :  { %1845 = vst [vmem:[#allocation3 + $0x594] sm:$0xf] %v1844_v57  ;;  %v1846_v58 = vld [vmem:[%s18372_s10 + $0x584] sm:$0xf]  ;;  %v1852_v60 = vld [vmem:[%s18372_s10 + $0x5b8] sm:$0xf] }
 0x171   :  { %1847 = vst [vmem:[#allocation3 + $0x598] sm:$0xf] %v1846_v58  ;;  %1849 = vst [vmem:[#allocation3 + $0x59c] sm:$0xff] %v1848_v59   ;;  %v1854_v61 = vld [vmem:[%s18372_s10 + $0x5a4] sm:$0xf]  ;;  %v1896_v17 = vld [vmem:[%s18372_s10 + $0x5fc] sm:$0xff]  }
 0x172   :  { %1853 = vst [vmem:[#allocation3 + $0x5a4] sm:$0xf] %v1852_v60  ;;  %v1856_v62 = vld [vmem:[%s18372_s10 + $0x5bc] sm:$0xf]  ;;  %v1858_v63 = vld [vmem:[%s18372_s10 + $0x5a8] sm:$0xf] }
 0x173   :  { %1855 = vst [vmem:[#allocation3 + $0x5a8] sm:$0xf] %v1854_v61  ;;  %1857 = vst [vmem:[#allocation3 + $0x5ac] sm:$0xf] %v1856_v62  ;;  %v1860_v0 = vld [vmem:[%s18372_s10 + $0x5c0] sm:$0xf] }
 0x174   :  { %1859 = vst [vmem:[#allocation3 + $0x5b0] sm:$0xf] %v1858_v63  ;;  %v1862_v1 = vld [vmem:[%s18372_s10 + $0x5ac] sm:$0xf]  ;;  %v1864_v2 = vld [vmem:[%s18372_s10 + $0x5c4] sm:$0xf] }
 0x175   :  { %1861 = vst [vmem:[#allocation3 + $0x5b4] sm:$0xf] %v1860_v0  ;;  %1863 = vst [vmem:[#allocation3 + $0x5b8] sm:$0xf] %v1862_v1  ;;  %v1866_v3 = vld [vmem:[%s18372_s10 + $0x5b0] sm:$0xf] }
 0x176   :  { %1865 = vst [vmem:[#allocation3 + $0x5bc] sm:$0xf] %v1864_v2  ;;  %v1868_v4 = vld [vmem:[%s18372_s10 + $0x5c8] sm:$0xf]  ;;  %v1870_v5 = vld [vmem:[%s18372_s10 + $0x5b4] sm:$0xf] }
 0x177   :  { %1867 = vst [vmem:[#allocation3 + $0x5c0] sm:$0xf] %v1866_v3  ;;  %1869 = vst [vmem:[#allocation3 + $0x5c4] sm:$0xf] %v1868_v4  ;;  %v1876_v7 = vld [vmem:[%s18372_s10 + $0x5e8] sm:$0xf] }
 0x178   :  { %1871 = vst [vmem:[#allocation3 + $0x5c8] sm:$0xf] %v1870_v5  ;;  %v1878_v8 = vld [vmem:[%s18372_s10 + $0x5d4] sm:$0xf]  ;;  %1873 = vst [vmem:[#allocation3 + $0x5cc] sm:$0xff] %v1872_v6   ;;  %v1920_v28 = vld [vmem:[%s18372_s10 + $0x62c] sm:$0xff]  }
 0x179   :  { %1877 = vst [vmem:[#allocation3 + $0x5d4] sm:$0xf] %v1876_v7  ;;  %1879 = vst [vmem:[#allocation3 + $0x5d8] sm:$0xf] %v1878_v8  ;;  %v1880_v9 = vld [vmem:[%s18372_s10 + $0x5ec] sm:$0xf] }
 0x17a   :  { %v1882_v10 = vld [vmem:[%s18372_s10 + $0x5d8] sm:$0xf]  ;;  %v1884_v11 = vld [vmem:[%s18372_s10 + $0x5f0] sm:$0xf]  ;;  %1881 = vst [vmem:[#allocation3 + $0x5dc] sm:$0xf] %v1880_v9 }
 0x17b   :  { %1883 = vst [vmem:[#allocation3 + $0x5e0] sm:$0xf] %v1882_v10  ;;  %1885 = vst [vmem:[#allocation3 + $0x5e4] sm:$0xf] %v1884_v11  ;;  %v1886_v12 = vld [vmem:[%s18372_s10 + $0x5dc] sm:$0xf] }
 0x17c   :  { %v1888_v13 = vld [vmem:[%s18372_s10 + $0x5f4] sm:$0xf]  ;;  %v1890_v14 = vld [vmem:[%s18372_s10 + $0x5e0] sm:$0xf]  ;;  %1887 = vst [vmem:[#allocation3 + $0x5e8] sm:$0xf] %v1886_v12 }
 0x17d   :  { %1889 = vst [vmem:[#allocation3 + $0x5ec] sm:$0xf] %v1888_v13  ;;  %1891 = vst [vmem:[#allocation3 + $0x5f0] sm:$0xf] %v1890_v14  ;;  %v1892_v15 = vld [vmem:[%s18372_s10 + $0x5f8] sm:$0xf] }
 0x17e   :  { %v1894_v16 = vld [vmem:[%s18372_s10 + $0x5e4] sm:$0xf]  ;;  %1893 = vst [vmem:[#allocation3 + $0x5f4] sm:$0xf] %v1892_v15  ;;  %1897 = vst [vmem:[#allocation3 + $0x5fc] sm:$0xff] %v1896_v17   ;;  %v1944_v39 = vld [vmem:[%s18372_s10 + $0x65c] sm:$0xff]  }
 0x17f   :  { %1895 = vst [vmem:[#allocation3 + $0x5f8] sm:$0xf] %v1894_v16  ;;  %v1900_v18 = vld [vmem:[%s18372_s10 + $0x618] sm:$0xf]  ;;  %v1902_v19 = vld [vmem:[%s18372_s10 + $0x604] sm:$0xf] }
 0x180   :  { %v1904_v20 = vld [vmem:[%s18372_s10 + $0x61c] sm:$0xf]  ;;  %1901 = vst [vmem:[#allocation3 + $0x604] sm:$0xf] %v1900_v18  ;;  %1903 = vst [vmem:[#allocation3 + $0x608] sm:$0xf] %v1902_v19 }
 0x181   :  { %1905 = vst [vmem:[#allocation3 + $0x60c] sm:$0xf] %v1904_v20  ;;  %v1906_v21 = vld [vmem:[%s18372_s10 + $0x608] sm:$0xf]  ;;  %v1908_v22 = vld [vmem:[%s18372_s10 + $0x620] sm:$0xf] }
 0x182   :  { %v1910_v23 = vld [vmem:[%s18372_s10 + $0x60c] sm:$0xf]  ;;  %1907 = vst [vmem:[#allocation3 + $0x610] sm:$0xf] %v1906_v21  ;;  %1909 = vst [vmem:[#allocation3 + $0x614] sm:$0xf] %v1908_v22 }
 0x183   :  { %1911 = vst [vmem:[#allocation3 + $0x618] sm:$0xf] %v1910_v23  ;;  %v1912_v24 = vld [vmem:[%s18372_s10 + $0x624] sm:$0xf]  ;;  %v1914_v25 = vld [vmem:[%s18372_s10 + $0x610] sm:$0xf] }
 0x184   :  { %v1916_v26 = vld [vmem:[%s18372_s10 + $0x628] sm:$0xf]  ;;  %1913 = vst [vmem:[#allocation3 + $0x61c] sm:$0xf] %v1912_v24  ;;  %1915 = vst [vmem:[#allocation3 + $0x620] sm:$0xf] %v1914_v25 }
 0x185   :  { %1917 = vst [vmem:[#allocation3 + $0x624] sm:$0xf] %v1916_v26  ;;  %v1918_v27 = vld [vmem:[%s18372_s10 + $0x614] sm:$0xf]  ;;  %v1924_v29 = vld [vmem:[%s18372_s10 + $0x648] sm:$0xf] }
 0x186   :  { %1919 = vst [vmem:[#allocation3 + $0x628] sm:$0xf] %v1918_v27  ;;  %1921 = vst [vmem:[#allocation3 + $0x62c] sm:$0xff] %v1920_v28   ;;  %v1926_v30 = vld [vmem:[%s18372_s10 + $0x634] sm:$0xf]  ;;  %v1968_v50 = vld [vmem:[%s18372_s10 + $0x68c] sm:$0xff]  }
 0x187   :  { %1925 = vst [vmem:[#allocation3 + $0x634] sm:$0xf] %v1924_v29  ;;  %v1928_v31 = vld [vmem:[%s18372_s10 + $0x64c] sm:$0xf]  ;;  %v1930_v32 = vld [vmem:[%s18372_s10 + $0x638] sm:$0xf] }
 0x188   :  { %1927 = vst [vmem:[#allocation3 + $0x638] sm:$0xf] %v1926_v30  ;;  %1929 = vst [vmem:[#allocation3 + $0x63c] sm:$0xf] %v1928_v31  ;;  %v1932_v33 = vld [vmem:[%s18372_s10 + $0x650] sm:$0xf] }
 0x189   :  { %1931 = vst [vmem:[#allocation3 + $0x640] sm:$0xf] %v1930_v32  ;;  %v1934_v34 = vld [vmem:[%s18372_s10 + $0x63c] sm:$0xf]  ;;  %v1936_v35 = vld [vmem:[%s18372_s10 + $0x654] sm:$0xf] }
 0x18a   :  { %1933 = vst [vmem:[#allocation3 + $0x644] sm:$0xf] %v1932_v33  ;;  %1935 = vst [vmem:[#allocation3 + $0x648] sm:$0xf] %v1934_v34  ;;  %v1938_v36 = vld [vmem:[%s18372_s10 + $0x640] sm:$0xf] }
 0x18b   :  { %1937 = vst [vmem:[#allocation3 + $0x64c] sm:$0xf] %v1936_v35  ;;  %v1940_v37 = vld [vmem:[%s18372_s10 + $0x658] sm:$0xf]  ;;  %v1942_v38 = vld [vmem:[%s18372_s10 + $0x644] sm:$0xf] }
 0x18c   :  { %1939 = vst [vmem:[#allocation3 + $0x650] sm:$0xf] %v1938_v36  ;;  %1941 = vst [vmem:[#allocation3 + $0x654] sm:$0xf] %v1940_v37  ;;  %v1948_v40 = vld [vmem:[%s18372_s10 + $0x678] sm:$0xf] }
 0x18d   :  { %1943 = vst [vmem:[#allocation3 + $0x658] sm:$0xf] %v1942_v38  ;;  %v1950_v41 = vld [vmem:[%s18372_s10 + $0x664] sm:$0xf]  ;;  %1945 = vst [vmem:[#allocation3 + $0x65c] sm:$0xff] %v1944_v39   ;;  %v1992_v61 = vld [vmem:[%s18372_s10 + $0x6bc] sm:$0xff]  }
 0x18e   :  { %1949 = vst [vmem:[#allocation3 + $0x664] sm:$0xf] %v1948_v40  ;;  %1951 = vst [vmem:[#allocation3 + $0x668] sm:$0xf] %v1950_v41  ;;  %v1952_v42 = vld [vmem:[%s18372_s10 + $0x67c] sm:$0xf] }
 0x18f   :  { %v1954_v43 = vld [vmem:[%s18372_s10 + $0x668] sm:$0xf]  ;;  %v1956_v44 = vld [vmem:[%s18372_s10 + $0x680] sm:$0xf]  ;;  %1953 = vst [vmem:[#allocation3 + $0x66c] sm:$0xf] %v1952_v42 }
 0x190   :  { %1955 = vst [vmem:[#allocation3 + $0x670] sm:$0xf] %v1954_v43  ;;  %1957 = vst [vmem:[#allocation3 + $0x674] sm:$0xf] %v1956_v44  ;;  %v1958_v45 = vld [vmem:[%s18372_s10 + $0x66c] sm:$0xf] }
 0x191   :  { %v1960_v46 = vld [vmem:[%s18372_s10 + $0x684] sm:$0xf]  ;;  %v1962_v47 = vld [vmem:[%s18372_s10 + $0x670] sm:$0xf]  ;;  %1959 = vst [vmem:[#allocation3 + $0x678] sm:$0xf] %v1958_v45 }
 0x192   :  { %1961 = vst [vmem:[#allocation3 + $0x67c] sm:$0xf] %v1960_v46  ;;  %1963 = vst [vmem:[#allocation3 + $0x680] sm:$0xf] %v1962_v47  ;;  %v1964_v48 = vld [vmem:[%s18372_s10 + $0x688] sm:$0xf] }
 0x193   :  { %v1966_v49 = vld [vmem:[%s18372_s10 + $0x674] sm:$0xf]  ;;  %1965 = vst [vmem:[#allocation3 + $0x684] sm:$0xf] %v1964_v48  ;;  %1969 = vst [vmem:[#allocation3 + $0x68c] sm:$0xff] %v1968_v50   ;;  %v2016_v8 = vld [vmem:[%s18372_s10 + $0x6ec] sm:$0xff]  }
 0x194   :  { %1967 = vst [vmem:[#allocation3 + $0x688] sm:$0xf] %v1966_v49  ;;  %v1972_v51 = vld [vmem:[%s18372_s10 + $0x6a8] sm:$0xf]  ;;  %v1974_v52 = vld [vmem:[%s18372_s10 + $0x694] sm:$0xf] }
 0x195   :  { %v1976_v53 = vld [vmem:[%s18372_s10 + $0x6ac] sm:$0xf]  ;;  %1973 = vst [vmem:[#allocation3 + $0x694] sm:$0xf] %v1972_v51  ;;  %1975 = vst [vmem:[#allocation3 + $0x698] sm:$0xf] %v1974_v52 }
 0x196   :  { %1977 = vst [vmem:[#allocation3 + $0x69c] sm:$0xf] %v1976_v53  ;;  %v1978_v54 = vld [vmem:[%s18372_s10 + $0x698] sm:$0xf]  ;;  %v1980_v55 = vld [vmem:[%s18372_s10 + $0x6b0] sm:$0xf] }
 0x197   :  { %v1982_v56 = vld [vmem:[%s18372_s10 + $0x69c] sm:$0xf]  ;;  %1979 = vst [vmem:[#allocation3 + $0x6a0] sm:$0xf] %v1978_v54  ;;  %1981 = vst [vmem:[#allocation3 + $0x6a4] sm:$0xf] %v1980_v55 }
 0x198   :  { %1983 = vst [vmem:[#allocation3 + $0x6a8] sm:$0xf] %v1982_v56  ;;  %v1984_v57 = vld [vmem:[%s18372_s10 + $0x6b4] sm:$0xf]  ;;  %v1986_v58 = vld [vmem:[%s18372_s10 + $0x6a0] sm:$0xf] }
 0x199   :  { %v1988_v59 = vld [vmem:[%s18372_s10 + $0x6b8] sm:$0xf]  ;;  %1985 = vst [vmem:[#allocation3 + $0x6ac] sm:$0xf] %v1984_v57  ;;  %1987 = vst [vmem:[#allocation3 + $0x6b0] sm:$0xf] %v1986_v58 }
 0x19a   :  { %1989 = vst [vmem:[#allocation3 + $0x6b4] sm:$0xf] %v1988_v59  ;;  %v1990_v60 = vld [vmem:[%s18372_s10 + $0x6a4] sm:$0xf]  ;;  %v1996_v62 = vld [vmem:[%s18372_s10 + $0x6d8] sm:$0xf] }
 0x19b   :  { %1991 = vst [vmem:[#allocation3 + $0x6b8] sm:$0xf] %v1990_v60  ;;  %1993 = vst [vmem:[#allocation3 + $0x6bc] sm:$0xff] %v1992_v61   ;;  %v1998_v63 = vld [vmem:[%s18372_s10 + $0x6c4] sm:$0xf]  ;;  %v2040_v19 = vld [vmem:[%s18372_s10 + $0x71c] sm:$0xff]  }
 0x19c   :  { %1997 = vst [vmem:[#allocation3 + $0x6c4] sm:$0xf] %v1996_v62  ;;  %v2000_v0 = vld [vmem:[%s18372_s10 + $0x6dc] sm:$0xf]  ;;  %v2002_v1 = vld [vmem:[%s18372_s10 + $0x6c8] sm:$0xf] }
 0x19d   :  { %1999 = vst [vmem:[#allocation3 + $0x6c8] sm:$0xf] %v1998_v63  ;;  %2001 = vst [vmem:[#allocation3 + $0x6cc] sm:$0xf] %v2000_v0  ;;  %v2004_v2 = vld [vmem:[%s18372_s10 + $0x6e0] sm:$0xf] }
 0x19e   :  { %2003 = vst [vmem:[#allocation3 + $0x6d0] sm:$0xf] %v2002_v1  ;;  %v2006_v3 = vld [vmem:[%s18372_s10 + $0x6cc] sm:$0xf]  ;;  %v2008_v4 = vld [vmem:[%s18372_s10 + $0x6e4] sm:$0xf] }
 0x19f   :  { %2005 = vst [vmem:[#allocation3 + $0x6d4] sm:$0xf] %v2004_v2  ;;  %2007 = vst [vmem:[#allocation3 + $0x6d8] sm:$0xf] %v2006_v3  ;;  %v2010_v5 = vld [vmem:[%s18372_s10 + $0x6d0] sm:$0xf] }
 0x1a0   :  { %2009 = vst [vmem:[#allocation3 + $0x6dc] sm:$0xf] %v2008_v4  ;;  %v2012_v6 = vld [vmem:[%s18372_s10 + $0x6e8] sm:$0xf]  ;;  %v2014_v7 = vld [vmem:[%s18372_s10 + $0x6d4] sm:$0xf] }
 0x1a1   :  { %2011 = vst [vmem:[#allocation3 + $0x6e0] sm:$0xf] %v2010_v5  ;;  %2013 = vst [vmem:[#allocation3 + $0x6e4] sm:$0xf] %v2012_v6  ;;  %v2020_v9 = vld [vmem:[%s18372_s10 + $0x708] sm:$0xf] }
 0x1a2   :  { %2015 = vst [vmem:[#allocation3 + $0x6e8] sm:$0xf] %v2014_v7  ;;  %v2022_v10 = vld [vmem:[%s18372_s10 + $0x6f4] sm:$0xf]  ;;  %2017 = vst [vmem:[#allocation3 + $0x6ec] sm:$0xff] %v2016_v8   ;;  %v2064_v30 = vld [vmem:[%s18372_s10 + $0x74c] sm:$0xff]  }
 0x1a3   :  { %2021 = vst [vmem:[#allocation3 + $0x6f4] sm:$0xf] %v2020_v9  ;;  %2023 = vst [vmem:[#allocation3 + $0x6f8] sm:$0xf] %v2022_v10  ;;  %v2024_v11 = vld [vmem:[%s18372_s10 + $0x70c] sm:$0xf] }
 0x1a4   :  { %v2026_v12 = vld [vmem:[%s18372_s10 + $0x6f8] sm:$0xf]  ;;  %v2028_v13 = vld [vmem:[%s18372_s10 + $0x710] sm:$0xf]  ;;  %2025 = vst [vmem:[#allocation3 + $0x6fc] sm:$0xf] %v2024_v11 }
 0x1a5   :  { %2027 = vst [vmem:[#allocation3 + $0x700] sm:$0xf] %v2026_v12  ;;  %2029 = vst [vmem:[#allocation3 + $0x704] sm:$0xf] %v2028_v13  ;;  %v2030_v14 = vld [vmem:[%s18372_s10 + $0x6fc] sm:$0xf] }
 0x1a6   :  { %v2032_v15 = vld [vmem:[%s18372_s10 + $0x714] sm:$0xf]  ;;  %v2034_v16 = vld [vmem:[%s18372_s10 + $0x700] sm:$0xf]  ;;  %2031 = vst [vmem:[#allocation3 + $0x708] sm:$0xf] %v2030_v14 }
 0x1a7   :  { %2033 = vst [vmem:[#allocation3 + $0x70c] sm:$0xf] %v2032_v15  ;;  %2035 = vst [vmem:[#allocation3 + $0x710] sm:$0xf] %v2034_v16  ;;  %v2036_v17 = vld [vmem:[%s18372_s10 + $0x718] sm:$0xf] }
 0x1a8   :  { %v2038_v18 = vld [vmem:[%s18372_s10 + $0x704] sm:$0xf]  ;;  %2037 = vst [vmem:[#allocation3 + $0x714] sm:$0xf] %v2036_v17  ;;  %2041 = vst [vmem:[#allocation3 + $0x71c] sm:$0xff] %v2040_v19   ;;  %v2088_v41 = vld [vmem:[%s18372_s10 + $0x77c] sm:$0xff]  }
 0x1a9   :  { %2039 = vst [vmem:[#allocation3 + $0x718] sm:$0xf] %v2038_v18  ;;  %v2044_v20 = vld [vmem:[%s18372_s10 + $0x738] sm:$0xf]  ;;  %v2046_v21 = vld [vmem:[%s18372_s10 + $0x724] sm:$0xf] }
 0x1aa   :  { %v2048_v22 = vld [vmem:[%s18372_s10 + $0x73c] sm:$0xf]  ;;  %2045 = vst [vmem:[#allocation3 + $0x724] sm:$0xf] %v2044_v20  ;;  %2047 = vst [vmem:[#allocation3 + $0x728] sm:$0xf] %v2046_v21 }
 0x1ab   :  { %2049 = vst [vmem:[#allocation3 + $0x72c] sm:$0xf] %v2048_v22  ;;  %v2050_v23 = vld [vmem:[%s18372_s10 + $0x728] sm:$0xf]  ;;  %v2052_v24 = vld [vmem:[%s18372_s10 + $0x740] sm:$0xf] }
 0x1ac   :  { %v2054_v25 = vld [vmem:[%s18372_s10 + $0x72c] sm:$0xf]  ;;  %2051 = vst [vmem:[#allocation3 + $0x730] sm:$0xf] %v2050_v23  ;;  %2053 = vst [vmem:[#allocation3 + $0x734] sm:$0xf] %v2052_v24 }
 0x1ad   :  { %2055 = vst [vmem:[#allocation3 + $0x738] sm:$0xf] %v2054_v25  ;;  %v2056_v26 = vld [vmem:[%s18372_s10 + $0x744] sm:$0xf]  ;;  %v2058_v27 = vld [vmem:[%s18372_s10 + $0x730] sm:$0xf] }
 0x1ae   :  { %v2060_v28 = vld [vmem:[%s18372_s10 + $0x748] sm:$0xf]  ;;  %2057 = vst [vmem:[#allocation3 + $0x73c] sm:$0xf] %v2056_v26  ;;  %2059 = vst [vmem:[#allocation3 + $0x740] sm:$0xf] %v2058_v27 }
 0x1af   :  { %2061 = vst [vmem:[#allocation3 + $0x744] sm:$0xf] %v2060_v28  ;;  %v2062_v29 = vld [vmem:[%s18372_s10 + $0x734] sm:$0xf]  ;;  %v2068_v31 = vld [vmem:[%s18372_s10 + $0x768] sm:$0xf] }
 0x1b0   :  { %2063 = vst [vmem:[#allocation3 + $0x748] sm:$0xf] %v2062_v29  ;;  %2065 = vst [vmem:[#allocation3 + $0x74c] sm:$0xff] %v2064_v30   ;;  %v2070_v32 = vld [vmem:[%s18372_s10 + $0x754] sm:$0xf]  ;;  %v2112_v52 = vld [vmem:[%s18372_s10 + $0x7ac] sm:$0xff]  }
 0x1b1   :  { %2069 = vst [vmem:[#allocation3 + $0x754] sm:$0xf] %v2068_v31  ;;  %v2072_v33 = vld [vmem:[%s18372_s10 + $0x76c] sm:$0xf]  ;;  %v2074_v34 = vld [vmem:[%s18372_s10 + $0x758] sm:$0xf] }
 0x1b2   :  { %2071 = vst [vmem:[#allocation3 + $0x758] sm:$0xf] %v2070_v32  ;;  %2073 = vst [vmem:[#allocation3 + $0x75c] sm:$0xf] %v2072_v33  ;;  %v2076_v35 = vld [vmem:[%s18372_s10 + $0x770] sm:$0xf] }
 0x1b3   :  { %2075 = vst [vmem:[#allocation3 + $0x760] sm:$0xf] %v2074_v34  ;;  %v2078_v36 = vld [vmem:[%s18372_s10 + $0x75c] sm:$0xf]  ;;  %v2080_v37 = vld [vmem:[%s18372_s10 + $0x774] sm:$0xf] }
 0x1b4   :  { %2077 = vst [vmem:[#allocation3 + $0x764] sm:$0xf] %v2076_v35  ;;  %2079 = vst [vmem:[#allocation3 + $0x768] sm:$0xf] %v2078_v36  ;;  %v2082_v38 = vld [vmem:[%s18372_s10 + $0x760] sm:$0xf] }
 0x1b5   :  { %2081 = vst [vmem:[#allocation3 + $0x76c] sm:$0xf] %v2080_v37  ;;  %v2084_v39 = vld [vmem:[%s18372_s10 + $0x778] sm:$0xf]  ;;  %v2086_v40 = vld [vmem:[%s18372_s10 + $0x764] sm:$0xf] }
 0x1b6   :  { %2083 = vst [vmem:[#allocation3 + $0x770] sm:$0xf] %v2082_v38  ;;  %2085 = vst [vmem:[#allocation3 + $0x774] sm:$0xf] %v2084_v39  ;;  %v2092_v42 = vld [vmem:[%s18372_s10 + $0x798] sm:$0xf] }
 0x1b7   :  { %2087 = vst [vmem:[#allocation3 + $0x778] sm:$0xf] %v2086_v40  ;;  %v2094_v43 = vld [vmem:[%s18372_s10 + $0x784] sm:$0xf]  ;;  %2089 = vst [vmem:[#allocation3 + $0x77c] sm:$0xff] %v2088_v41   ;;  %v2136_v63 = vld [vmem:[%s18372_s10 + $0x7dc] sm:$0xff]  }
 0x1b8   :  { %2093 = vst [vmem:[#allocation3 + $0x784] sm:$0xf] %v2092_v42  ;;  %2095 = vst [vmem:[#allocation3 + $0x788] sm:$0xf] %v2094_v43  ;;  %v2096_v44 = vld [vmem:[%s18372_s10 + $0x79c] sm:$0xf] }
 0x1b9   :  { %v2098_v45 = vld [vmem:[%s18372_s10 + $0x788] sm:$0xf]  ;;  %v2100_v46 = vld [vmem:[%s18372_s10 + $0x7a0] sm:$0xf]  ;;  %2097 = vst [vmem:[#allocation3 + $0x78c] sm:$0xf] %v2096_v44 }
 0x1ba   :  { %2099 = vst [vmem:[#allocation3 + $0x790] sm:$0xf] %v2098_v45  ;;  %2101 = vst [vmem:[#allocation3 + $0x794] sm:$0xf] %v2100_v46  ;;  %v2102_v47 = vld [vmem:[%s18372_s10 + $0x78c] sm:$0xf] }
 0x1bb   :  { %v2104_v48 = vld [vmem:[%s18372_s10 + $0x7a4] sm:$0xf]  ;;  %v2106_v49 = vld [vmem:[%s18372_s10 + $0x790] sm:$0xf]  ;;  %2103 = vst [vmem:[#allocation3 + $0x798] sm:$0xf] %v2102_v47 }
 0x1bc   :  { %2105 = vst [vmem:[#allocation3 + $0x79c] sm:$0xf] %v2104_v48  ;;  %2107 = vst [vmem:[#allocation3 + $0x7a0] sm:$0xf] %v2106_v49  ;;  %v2108_v50 = vld [vmem:[%s18372_s10 + $0x7a8] sm:$0xf] }
 0x1bd   :  { %v2110_v51 = vld [vmem:[%s18372_s10 + $0x794] sm:$0xf]  ;;  %2109 = vst [vmem:[#allocation3 + $0x7a4] sm:$0xf] %v2108_v50  ;;  %2113 = vst [vmem:[#allocation3 + $0x7ac] sm:$0xff] %v2112_v52   ;;  %v2160_v10 = vld [vmem:[%s18372_s10 + $0x80c] sm:$0xff]  }
 0x1be   :  { %2111 = vst [vmem:[#allocation3 + $0x7a8] sm:$0xf] %v2110_v51  ;;  %v2116_v53 = vld [vmem:[%s18372_s10 + $0x7c8] sm:$0xf]  ;;  %v2118_v54 = vld [vmem:[%s18372_s10 + $0x7b4] sm:$0xf] }
 0x1bf   :  { %v2120_v55 = vld [vmem:[%s18372_s10 + $0x7cc] sm:$0xf]  ;;  %2117 = vst [vmem:[#allocation3 + $0x7b4] sm:$0xf] %v2116_v53  ;;  %2119 = vst [vmem:[#allocation3 + $0x7b8] sm:$0xf] %v2118_v54 }
 0x1c0   :  { %2121 = vst [vmem:[#allocation3 + $0x7bc] sm:$0xf] %v2120_v55  ;;  %v2122_v56 = vld [vmem:[%s18372_s10 + $0x7b8] sm:$0xf]  ;;  %v2124_v57 = vld [vmem:[%s18372_s10 + $0x7d0] sm:$0xf] }
 0x1c1   :  { %v2126_v58 = vld [vmem:[%s18372_s10 + $0x7bc] sm:$0xf]  ;;  %2123 = vst [vmem:[#allocation3 + $0x7c0] sm:$0xf] %v2122_v56  ;;  %2125 = vst [vmem:[#allocation3 + $0x7c4] sm:$0xf] %v2124_v57 }
 0x1c2   :  { %2127 = vst [vmem:[#allocation3 + $0x7c8] sm:$0xf] %v2126_v58  ;;  %v2128_v59 = vld [vmem:[%s18372_s10 + $0x7d4] sm:$0xf]  ;;  %v2130_v60 = vld [vmem:[%s18372_s10 + $0x7c0] sm:$0xf] }
 0x1c3   :  { %v2132_v61 = vld [vmem:[%s18372_s10 + $0x7d8] sm:$0xf]  ;;  %2129 = vst [vmem:[#allocation3 + $0x7cc] sm:$0xf] %v2128_v59  ;;  %2131 = vst [vmem:[#allocation3 + $0x7d0] sm:$0xf] %v2130_v60 }
 0x1c4   :  { %2133 = vst [vmem:[#allocation3 + $0x7d4] sm:$0xf] %v2132_v61  ;;  %v2134_v62 = vld [vmem:[%s18372_s10 + $0x7c4] sm:$0xf]  ;;  %v2140_v0 = vld [vmem:[%s18372_s10 + $0x7f8] sm:$0xf] }
 0x1c5   :  { %2135 = vst [vmem:[#allocation3 + $0x7d8] sm:$0xf] %v2134_v62  ;;  %2137 = vst [vmem:[#allocation3 + $0x7dc] sm:$0xff] %v2136_v63   ;;  %v2142_v1 = vld [vmem:[%s18372_s10 + $0x7e4] sm:$0xf]  ;;  %v2184_v21 = vld [vmem:[%s18372_s10 + $0x83c] sm:$0xff]  }
 0x1c6   :  { %2141 = vst [vmem:[#allocation3 + $0x7e4] sm:$0xf] %v2140_v0  ;;  %v2144_v2 = vld [vmem:[%s18372_s10 + $0x7fc] sm:$0xf]  ;;  %v2146_v3 = vld [vmem:[%s18372_s10 + $0x7e8] sm:$0xf] }
 0x1c7   :  { %2143 = vst [vmem:[#allocation3 + $0x7e8] sm:$0xf] %v2142_v1  ;;  %2145 = vst [vmem:[#allocation3 + $0x7ec] sm:$0xf] %v2144_v2  ;;  %v2148_v4 = vld [vmem:[%s18372_s10 + $0x800] sm:$0xf] }
 0x1c8   :  { %2147 = vst [vmem:[#allocation3 + $0x7f0] sm:$0xf] %v2146_v3  ;;  %v2150_v5 = vld [vmem:[%s18372_s10 + $0x7ec] sm:$0xf]  ;;  %v2152_v6 = vld [vmem:[%s18372_s10 + $0x804] sm:$0xf] }
 0x1c9   :  { %2149 = vst [vmem:[#allocation3 + $0x7f4] sm:$0xf] %v2148_v4  ;;  %2151 = vst [vmem:[#allocation3 + $0x7f8] sm:$0xf] %v2150_v5  ;;  %v2154_v7 = vld [vmem:[%s18372_s10 + $0x7f0] sm:$0xf] }
 0x1ca   :  { %2153 = vst [vmem:[#allocation3 + $0x7fc] sm:$0xf] %v2152_v6  ;;  %v2156_v8 = vld [vmem:[%s18372_s10 + $0x808] sm:$0xf]  ;;  %v2158_v9 = vld [vmem:[%s18372_s10 + $0x7f4] sm:$0xf] }
 0x1cb   :  { %2155 = vst [vmem:[#allocation3 + $0x800] sm:$0xf] %v2154_v7  ;;  %2157 = vst [vmem:[#allocation3 + $0x804] sm:$0xf] %v2156_v8  ;;  %v2164_v11 = vld [vmem:[%s18372_s10 + $0x828] sm:$0xf] }
 0x1cc   :  { %2159 = vst [vmem:[#allocation3 + $0x808] sm:$0xf] %v2158_v9  ;;  %v2166_v12 = vld [vmem:[%s18372_s10 + $0x814] sm:$0xf]  ;;  %2161 = vst [vmem:[#allocation3 + $0x80c] sm:$0xff] %v2160_v10   ;;  %v2208_v32 = vld [vmem:[%s18372_s10 + $0x86c] sm:$0xff]  }
 0x1cd   :  { %2165 = vst [vmem:[#allocation3 + $0x814] sm:$0xf] %v2164_v11  ;;  %2167 = vst [vmem:[#allocation3 + $0x818] sm:$0xf] %v2166_v12  ;;  %v2168_v13 = vld [vmem:[%s18372_s10 + $0x82c] sm:$0xf] }
 0x1ce   :  { %v2170_v14 = vld [vmem:[%s18372_s10 + $0x818] sm:$0xf]  ;;  %v2172_v15 = vld [vmem:[%s18372_s10 + $0x830] sm:$0xf]  ;;  %2169 = vst [vmem:[#allocation3 + $0x81c] sm:$0xf] %v2168_v13 }
 0x1cf   :  { %2171 = vst [vmem:[#allocation3 + $0x820] sm:$0xf] %v2170_v14  ;;  %2173 = vst [vmem:[#allocation3 + $0x824] sm:$0xf] %v2172_v15  ;;  %v2174_v16 = vld [vmem:[%s18372_s10 + $0x81c] sm:$0xf] }
 0x1d0   :  { %v2176_v17 = vld [vmem:[%s18372_s10 + $0x834] sm:$0xf]  ;;  %v2178_v18 = vld [vmem:[%s18372_s10 + $0x820] sm:$0xf]  ;;  %2175 = vst [vmem:[#allocation3 + $0x828] sm:$0xf] %v2174_v16 }
 0x1d1   :  { %2177 = vst [vmem:[#allocation3 + $0x82c] sm:$0xf] %v2176_v17  ;;  %2179 = vst [vmem:[#allocation3 + $0x830] sm:$0xf] %v2178_v18  ;;  %v2180_v19 = vld [vmem:[%s18372_s10 + $0x838] sm:$0xf] }
 0x1d2   :  { %v2182_v20 = vld [vmem:[%s18372_s10 + $0x824] sm:$0xf]  ;;  %2181 = vst [vmem:[#allocation3 + $0x834] sm:$0xf] %v2180_v19  ;;  %2185 = vst [vmem:[#allocation3 + $0x83c] sm:$0xff] %v2184_v21   ;;  %v2232_v43 = vld [vmem:[%s18372_s10 + $0x89c] sm:$0xff]  }
 0x1d3   :  { %2183 = vst [vmem:[#allocation3 + $0x838] sm:$0xf] %v2182_v20  ;;  %v2188_v22 = vld [vmem:[%s18372_s10 + $0x858] sm:$0xf]  ;;  %v2190_v23 = vld [vmem:[%s18372_s10 + $0x844] sm:$0xf] }
 0x1d4   :  { %v2192_v24 = vld [vmem:[%s18372_s10 + $0x85c] sm:$0xf]  ;;  %2189 = vst [vmem:[#allocation3 + $0x844] sm:$0xf] %v2188_v22  ;;  %2191 = vst [vmem:[#allocation3 + $0x848] sm:$0xf] %v2190_v23 }
 0x1d5   :  { %2193 = vst [vmem:[#allocation3 + $0x84c] sm:$0xf] %v2192_v24  ;;  %v2194_v25 = vld [vmem:[%s18372_s10 + $0x848] sm:$0xf]  ;;  %v2196_v26 = vld [vmem:[%s18372_s10 + $0x860] sm:$0xf] }
 0x1d6   :  { %v2198_v27 = vld [vmem:[%s18372_s10 + $0x84c] sm:$0xf]  ;;  %2195 = vst [vmem:[#allocation3 + $0x850] sm:$0xf] %v2194_v25  ;;  %2197 = vst [vmem:[#allocation3 + $0x854] sm:$0xf] %v2196_v26 }
 0x1d7   :  { %2199 = vst [vmem:[#allocation3 + $0x858] sm:$0xf] %v2198_v27  ;;  %v2200_v28 = vld [vmem:[%s18372_s10 + $0x864] sm:$0xf]  ;;  %v2202_v29 = vld [vmem:[%s18372_s10 + $0x850] sm:$0xf] }
 0x1d8   :  { %v2204_v30 = vld [vmem:[%s18372_s10 + $0x868] sm:$0xf]  ;;  %2201 = vst [vmem:[#allocation3 + $0x85c] sm:$0xf] %v2200_v28  ;;  %2203 = vst [vmem:[#allocation3 + $0x860] sm:$0xf] %v2202_v29 }
 0x1d9   :  { %2205 = vst [vmem:[#allocation3 + $0x864] sm:$0xf] %v2204_v30  ;;  %v2206_v31 = vld [vmem:[%s18372_s10 + $0x854] sm:$0xf]  ;;  %v2212_v33 = vld [vmem:[%s18372_s10 + $0x888] sm:$0xf] }
 0x1da   :  { %2207 = vst [vmem:[#allocation3 + $0x868] sm:$0xf] %v2206_v31  ;;  %2209 = vst [vmem:[#allocation3 + $0x86c] sm:$0xff] %v2208_v32   ;;  %v2214_v34 = vld [vmem:[%s18372_s10 + $0x874] sm:$0xf]  ;;  %v2256_v54 = vld [vmem:[%s18372_s10 + $0x8cc] sm:$0xff]  }
 0x1db   :  { %2213 = vst [vmem:[#allocation3 + $0x874] sm:$0xf] %v2212_v33  ;;  %v2216_v35 = vld [vmem:[%s18372_s10 + $0x88c] sm:$0xf]  ;;  %v2218_v36 = vld [vmem:[%s18372_s10 + $0x878] sm:$0xf] }
 0x1dc   :  { %2215 = vst [vmem:[#allocation3 + $0x878] sm:$0xf] %v2214_v34  ;;  %2217 = vst [vmem:[#allocation3 + $0x87c] sm:$0xf] %v2216_v35  ;;  %v2220_v37 = vld [vmem:[%s18372_s10 + $0x890] sm:$0xf] }
 0x1dd   :  { %2219 = vst [vmem:[#allocation3 + $0x880] sm:$0xf] %v2218_v36  ;;  %v2222_v38 = vld [vmem:[%s18372_s10 + $0x87c] sm:$0xf]  ;;  %v2224_v39 = vld [vmem:[%s18372_s10 + $0x894] sm:$0xf] }
 0x1de   :  { %2221 = vst [vmem:[#allocation3 + $0x884] sm:$0xf] %v2220_v37  ;;  %2223 = vst [vmem:[#allocation3 + $0x888] sm:$0xf] %v2222_v38  ;;  %v2226_v40 = vld [vmem:[%s18372_s10 + $0x880] sm:$0xf] }
 0x1df   :  { %2225 = vst [vmem:[#allocation3 + $0x88c] sm:$0xf] %v2224_v39  ;;  %v2228_v41 = vld [vmem:[%s18372_s10 + $0x898] sm:$0xf]  ;;  %v2230_v42 = vld [vmem:[%s18372_s10 + $0x884] sm:$0xf] }
 0x1e0   :  { %2227 = vst [vmem:[#allocation3 + $0x890] sm:$0xf] %v2226_v40  ;;  %2229 = vst [vmem:[#allocation3 + $0x894] sm:$0xf] %v2228_v41  ;;  %v2236_v44 = vld [vmem:[%s18372_s10 + $0x8b8] sm:$0xf] }
 0x1e1   :  { %2231 = vst [vmem:[#allocation3 + $0x898] sm:$0xf] %v2230_v42  ;;  %v2238_v45 = vld [vmem:[%s18372_s10 + $0x8a4] sm:$0xf]  ;;  %2233 = vst [vmem:[#allocation3 + $0x89c] sm:$0xff] %v2232_v43   ;;  %v2280_v1 = vld [vmem:[%s18372_s10 + $0x8fc] sm:$0xff]  }
 0x1e2   :  { %2237 = vst [vmem:[#allocation3 + $0x8a4] sm:$0xf] %v2236_v44  ;;  %2239 = vst [vmem:[#allocation3 + $0x8a8] sm:$0xf] %v2238_v45  ;;  %v2240_v46 = vld [vmem:[%s18372_s10 + $0x8bc] sm:$0xf] }
 0x1e3   :  { %v2242_v47 = vld [vmem:[%s18372_s10 + $0x8a8] sm:$0xf]  ;;  %v2244_v48 = vld [vmem:[%s18372_s10 + $0x8c0] sm:$0xf]  ;;  %2241 = vst [vmem:[#allocation3 + $0x8ac] sm:$0xf] %v2240_v46 }
 0x1e4   :  { %2243 = vst [vmem:[#allocation3 + $0x8b0] sm:$0xf] %v2242_v47  ;;  %2245 = vst [vmem:[#allocation3 + $0x8b4] sm:$0xf] %v2244_v48  ;;  %v2246_v49 = vld [vmem:[%s18372_s10 + $0x8ac] sm:$0xf] }
 0x1e5   :  { %v2248_v50 = vld [vmem:[%s18372_s10 + $0x8c4] sm:$0xf]  ;;  %v2250_v51 = vld [vmem:[%s18372_s10 + $0x8b0] sm:$0xf]  ;;  %2247 = vst [vmem:[#allocation3 + $0x8b8] sm:$0xf] %v2246_v49 }
 0x1e6   :  { %2249 = vst [vmem:[#allocation3 + $0x8bc] sm:$0xf] %v2248_v50  ;;  %2251 = vst [vmem:[#allocation3 + $0x8c0] sm:$0xf] %v2250_v51  ;;  %v2252_v52 = vld [vmem:[%s18372_s10 + $0x8c8] sm:$0xf] }
 0x1e7   :  { %v2254_v53 = vld [vmem:[%s18372_s10 + $0x8b4] sm:$0xf]  ;;  %2253 = vst [vmem:[#allocation3 + $0x8c4] sm:$0xf] %v2252_v52  ;;  %2257 = vst [vmem:[#allocation3 + $0x8cc] sm:$0xff] %v2256_v54   ;;  %v2304_v12 = vld [vmem:[%s18372_s10 + $0x92c] sm:$0xff]  }
 0x1e8   :  { %2255 = vst [vmem:[#allocation3 + $0x8c8] sm:$0xf] %v2254_v53  ;;  %v2260_v55 = vld [vmem:[%s18372_s10 + $0x8e8] sm:$0xf]  ;;  %v2262_v56 = vld [vmem:[%s18372_s10 + $0x8d4] sm:$0xf] }
 0x1e9   :  { %v2264_v57 = vld [vmem:[%s18372_s10 + $0x8ec] sm:$0xf]  ;;  %2261 = vst [vmem:[#allocation3 + $0x8d4] sm:$0xf] %v2260_v55  ;;  %2263 = vst [vmem:[#allocation3 + $0x8d8] sm:$0xf] %v2262_v56 }
 0x1ea   :  { %2265 = vst [vmem:[#allocation3 + $0x8dc] sm:$0xf] %v2264_v57  ;;  %v2266_v58 = vld [vmem:[%s18372_s10 + $0x8d8] sm:$0xf]  ;;  %v2268_v59 = vld [vmem:[%s18372_s10 + $0x8f0] sm:$0xf] }
 0x1eb   :  { %v2270_v60 = vld [vmem:[%s18372_s10 + $0x8dc] sm:$0xf]  ;;  %2267 = vst [vmem:[#allocation3 + $0x8e0] sm:$0xf] %v2266_v58  ;;  %2269 = vst [vmem:[#allocation3 + $0x8e4] sm:$0xf] %v2268_v59 }
 0x1ec   :  { %2271 = vst [vmem:[#allocation3 + $0x8e8] sm:$0xf] %v2270_v60  ;;  %v2272_v61 = vld [vmem:[%s18372_s10 + $0x8f4] sm:$0xf]  ;;  %v2274_v62 = vld [vmem:[%s18372_s10 + $0x8e0] sm:$0xf] }
 0x1ed   :  { %v2276_v63 = vld [vmem:[%s18372_s10 + $0x8f8] sm:$0xf]  ;;  %2273 = vst [vmem:[#allocation3 + $0x8ec] sm:$0xf] %v2272_v61  ;;  %2275 = vst [vmem:[#allocation3 + $0x8f0] sm:$0xf] %v2274_v62 }
 0x1ee   :  { %2277 = vst [vmem:[#allocation3 + $0x8f4] sm:$0xf] %v2276_v63  ;;  %v2278_v0 = vld [vmem:[%s18372_s10 + $0x8e4] sm:$0xf]  ;;  %v2284_v2 = vld [vmem:[%s18372_s10 + $0x918] sm:$0xf] }
 0x1ef   :  { %2279 = vst [vmem:[#allocation3 + $0x8f8] sm:$0xf] %v2278_v0  ;;  %2281 = vst [vmem:[#allocation3 + $0x8fc] sm:$0xff] %v2280_v1   ;;  %v2286_v3 = vld [vmem:[%s18372_s10 + $0x904] sm:$0xf]  ;;  %v2328_v23 = vld [vmem:[%s18372_s10 + $0x95c] sm:$0xff]  }
 0x1f0   :  { %2285 = vst [vmem:[#allocation3 + $0x904] sm:$0xf] %v2284_v2  ;;  %v2288_v4 = vld [vmem:[%s18372_s10 + $0x91c] sm:$0xf]  ;;  %v2290_v5 = vld [vmem:[%s18372_s10 + $0x908] sm:$0xf] }
 0x1f1   :  { %2287 = vst [vmem:[#allocation3 + $0x908] sm:$0xf] %v2286_v3  ;;  %2289 = vst [vmem:[#allocation3 + $0x90c] sm:$0xf] %v2288_v4  ;;  %v2292_v6 = vld [vmem:[%s18372_s10 + $0x920] sm:$0xf] }
 0x1f2   :  { %2291 = vst [vmem:[#allocation3 + $0x910] sm:$0xf] %v2290_v5  ;;  %v2294_v7 = vld [vmem:[%s18372_s10 + $0x90c] sm:$0xf]  ;;  %v2296_v8 = vld [vmem:[%s18372_s10 + $0x924] sm:$0xf] }
 0x1f3   :  { %2293 = vst [vmem:[#allocation3 + $0x914] sm:$0xf] %v2292_v6  ;;  %2295 = vst [vmem:[#allocation3 + $0x918] sm:$0xf] %v2294_v7  ;;  %v2298_v9 = vld [vmem:[%s18372_s10 + $0x910] sm:$0xf] }
 0x1f4   :  { %2297 = vst [vmem:[#allocation3 + $0x91c] sm:$0xf] %v2296_v8  ;;  %v2300_v10 = vld [vmem:[%s18372_s10 + $0x928] sm:$0xf]  ;;  %v2302_v11 = vld [vmem:[%s18372_s10 + $0x914] sm:$0xf] }
 0x1f5   :  { %2299 = vst [vmem:[#allocation3 + $0x920] sm:$0xf] %v2298_v9  ;;  %2301 = vst [vmem:[#allocation3 + $0x924] sm:$0xf] %v2300_v10  ;;  %v2308_v13 = vld [vmem:[%s18372_s10 + $0x948] sm:$0xf] }
 0x1f6   :  { %2303 = vst [vmem:[#allocation3 + $0x928] sm:$0xf] %v2302_v11  ;;  %v2310_v14 = vld [vmem:[%s18372_s10 + $0x934] sm:$0xf]  ;;  %2305 = vst [vmem:[#allocation3 + $0x92c] sm:$0xff] %v2304_v12   ;;  %v2352_v34 = vld [vmem:[%s18372_s10 + $0x98c] sm:$0xff]  }
 0x1f7   :  { %2309 = vst [vmem:[#allocation3 + $0x934] sm:$0xf] %v2308_v13  ;;  %2311 = vst [vmem:[#allocation3 + $0x938] sm:$0xf] %v2310_v14  ;;  %v2312_v15 = vld [vmem:[%s18372_s10 + $0x94c] sm:$0xf] }
 0x1f8   :  { %v2314_v16 = vld [vmem:[%s18372_s10 + $0x938] sm:$0xf]  ;;  %v2316_v17 = vld [vmem:[%s18372_s10 + $0x950] sm:$0xf]  ;;  %2313 = vst [vmem:[#allocation3 + $0x93c] sm:$0xf] %v2312_v15 }
 0x1f9   :  { %2315 = vst [vmem:[#allocation3 + $0x940] sm:$0xf] %v2314_v16  ;;  %2317 = vst [vmem:[#allocation3 + $0x944] sm:$0xf] %v2316_v17  ;;  %v2318_v18 = vld [vmem:[%s18372_s10 + $0x93c] sm:$0xf] }
 0x1fa   :  { %v2320_v19 = vld [vmem:[%s18372_s10 + $0x954] sm:$0xf]  ;;  %v2322_v20 = vld [vmem:[%s18372_s10 + $0x940] sm:$0xf]  ;;  %2319 = vst [vmem:[#allocation3 + $0x948] sm:$0xf] %v2318_v18 }
 0x1fb   :  { %2321 = vst [vmem:[#allocation3 + $0x94c] sm:$0xf] %v2320_v19  ;;  %2323 = vst [vmem:[#allocation3 + $0x950] sm:$0xf] %v2322_v20  ;;  %v2324_v21 = vld [vmem:[%s18372_s10 + $0x958] sm:$0xf] }
 0x1fc   :  { %v2326_v22 = vld [vmem:[%s18372_s10 + $0x944] sm:$0xf]  ;;  %2325 = vst [vmem:[#allocation3 + $0x954] sm:$0xf] %v2324_v21  ;;  %2329 = vst [vmem:[#allocation3 + $0x95c] sm:$0xff] %v2328_v23   ;;  %v2376_v45 = vld [vmem:[%s18372_s10 + $0x9bc] sm:$0xff]  }
 0x1fd   :  { %2327 = vst [vmem:[#allocation3 + $0x958] sm:$0xf] %v2326_v22  ;;  %v2332_v24 = vld [vmem:[%s18372_s10 + $0x978] sm:$0xf]  ;;  %v2334_v25 = vld [vmem:[%s18372_s10 + $0x964] sm:$0xf] }
 0x1fe   :  { %v2336_v26 = vld [vmem:[%s18372_s10 + $0x97c] sm:$0xf]  ;;  %2333 = vst [vmem:[#allocation3 + $0x964] sm:$0xf] %v2332_v24  ;;  %2335 = vst [vmem:[#allocation3 + $0x968] sm:$0xf] %v2334_v25 }
 0x1ff   :  { %2337 = vst [vmem:[#allocation3 + $0x96c] sm:$0xf] %v2336_v26  ;;  %v2338_v27 = vld [vmem:[%s18372_s10 + $0x968] sm:$0xf]  ;;  %v2340_v28 = vld [vmem:[%s18372_s10 + $0x980] sm:$0xf] }
 0x200   :  { %v2342_v29 = vld [vmem:[%s18372_s10 + $0x96c] sm:$0xf]  ;;  %2339 = vst [vmem:[#allocation3 + $0x970] sm:$0xf] %v2338_v27  ;;  %2341 = vst [vmem:[#allocation3 + $0x974] sm:$0xf] %v2340_v28 }
 0x201   :  { %2343 = vst [vmem:[#allocation3 + $0x978] sm:$0xf] %v2342_v29  ;;  %v2344_v30 = vld [vmem:[%s18372_s10 + $0x984] sm:$0xf]  ;;  %v2346_v31 = vld [vmem:[%s18372_s10 + $0x970] sm:$0xf] }
 0x202   :  { %v2348_v32 = vld [vmem:[%s18372_s10 + $0x988] sm:$0xf]  ;;  %2345 = vst [vmem:[#allocation3 + $0x97c] sm:$0xf] %v2344_v30  ;;  %2347 = vst [vmem:[#allocation3 + $0x980] sm:$0xf] %v2346_v31 }
 0x203   :  { %2349 = vst [vmem:[#allocation3 + $0x984] sm:$0xf] %v2348_v32  ;;  %v2350_v33 = vld [vmem:[%s18372_s10 + $0x974] sm:$0xf]  ;;  %v2356_v35 = vld [vmem:[%s18372_s10 + $0x9a8] sm:$0xf] }
 0x204   :  { %2351 = vst [vmem:[#allocation3 + $0x988] sm:$0xf] %v2350_v33  ;;  %2353 = vst [vmem:[#allocation3 + $0x98c] sm:$0xff] %v2352_v34   ;;  %v2358_v36 = vld [vmem:[%s18372_s10 + $0x994] sm:$0xf]  ;;  %v2400_v56 = vld [vmem:[%s18372_s10 + $0x9ec] sm:$0xff]  }
 0x205   :  { %2357 = vst [vmem:[#allocation3 + $0x994] sm:$0xf] %v2356_v35  ;;  %v2360_v37 = vld [vmem:[%s18372_s10 + $0x9ac] sm:$0xf]  ;;  %v2362_v38 = vld [vmem:[%s18372_s10 + $0x998] sm:$0xf] }
 0x206   :  { %2359 = vst [vmem:[#allocation3 + $0x998] sm:$0xf] %v2358_v36  ;;  %2361 = vst [vmem:[#allocation3 + $0x99c] sm:$0xf] %v2360_v37  ;;  %v2364_v39 = vld [vmem:[%s18372_s10 + $0x9b0] sm:$0xf] }
 0x207   :  { %2363 = vst [vmem:[#allocation3 + $0x9a0] sm:$0xf] %v2362_v38  ;;  %v2366_v40 = vld [vmem:[%s18372_s10 + $0x99c] sm:$0xf]  ;;  %v2368_v41 = vld [vmem:[%s18372_s10 + $0x9b4] sm:$0xf] }
 0x208   :  { %2365 = vst [vmem:[#allocation3 + $0x9a4] sm:$0xf] %v2364_v39  ;;  %2367 = vst [vmem:[#allocation3 + $0x9a8] sm:$0xf] %v2366_v40  ;;  %v2370_v42 = vld [vmem:[%s18372_s10 + $0x9a0] sm:$0xf] }
 0x209   :  { %2369 = vst [vmem:[#allocation3 + $0x9ac] sm:$0xf] %v2368_v41  ;;  %v2372_v43 = vld [vmem:[%s18372_s10 + $0x9b8] sm:$0xf]  ;;  %v2374_v44 = vld [vmem:[%s18372_s10 + $0x9a4] sm:$0xf] }
 0x20a   :  { %2371 = vst [vmem:[#allocation3 + $0x9b0] sm:$0xf] %v2370_v42  ;;  %2373 = vst [vmem:[#allocation3 + $0x9b4] sm:$0xf] %v2372_v43  ;;  %v2380_v46 = vld [vmem:[%s18372_s10 + $0x9d8] sm:$0xf] }
 0x20b   :  { %2375 = vst [vmem:[#allocation3 + $0x9b8] sm:$0xf] %v2374_v44  ;;  %v2382_v47 = vld [vmem:[%s18372_s10 + $0x9c4] sm:$0xf]  ;;  %2377 = vst [vmem:[#allocation3 + $0x9bc] sm:$0xff] %v2376_v45   ;;  %v2424_v3 = vld [vmem:[%s18372_s10 + $0xa1c] sm:$0xff]  }
 0x20c   :  { %2381 = vst [vmem:[#allocation3 + $0x9c4] sm:$0xf] %v2380_v46  ;;  %2383 = vst [vmem:[#allocation3 + $0x9c8] sm:$0xf] %v2382_v47  ;;  %v2384_v48 = vld [vmem:[%s18372_s10 + $0x9dc] sm:$0xf] }
 0x20d   :  { %v2386_v49 = vld [vmem:[%s18372_s10 + $0x9c8] sm:$0xf]  ;;  %v2388_v50 = vld [vmem:[%s18372_s10 + $0x9e0] sm:$0xf]  ;;  %2385 = vst [vmem:[#allocation3 + $0x9cc] sm:$0xf] %v2384_v48 }
 0x20e   :  { %2387 = vst [vmem:[#allocation3 + $0x9d0] sm:$0xf] %v2386_v49  ;;  %2389 = vst [vmem:[#allocation3 + $0x9d4] sm:$0xf] %v2388_v50  ;;  %v2390_v51 = vld [vmem:[%s18372_s10 + $0x9cc] sm:$0xf] }
 0x20f   :  { %v2392_v52 = vld [vmem:[%s18372_s10 + $0x9e4] sm:$0xf]  ;;  %v2394_v53 = vld [vmem:[%s18372_s10 + $0x9d0] sm:$0xf]  ;;  %2391 = vst [vmem:[#allocation3 + $0x9d8] sm:$0xf] %v2390_v51 }
 0x210   :  { %2393 = vst [vmem:[#allocation3 + $0x9dc] sm:$0xf] %v2392_v52  ;;  %2395 = vst [vmem:[#allocation3 + $0x9e0] sm:$0xf] %v2394_v53  ;;  %v2396_v54 = vld [vmem:[%s18372_s10 + $0x9e8] sm:$0xf] }
 0x211   :  { %v2398_v55 = vld [vmem:[%s18372_s10 + $0x9d4] sm:$0xf]  ;;  %2397 = vst [vmem:[#allocation3 + $0x9e4] sm:$0xf] %v2396_v54  ;;  %2401 = vst [vmem:[#allocation3 + $0x9ec] sm:$0xff] %v2400_v56   ;;  %v2448_v14 = vld [vmem:[%s18372_s10 + $0xa4c] sm:$0xff]  }
 0x212   :  { %2399 = vst [vmem:[#allocation3 + $0x9e8] sm:$0xf] %v2398_v55  ;;  %v2404_v57 = vld [vmem:[%s18372_s10 + $0xa08] sm:$0xf]  ;;  %v2406_v58 = vld [vmem:[%s18372_s10 + $0x9f4] sm:$0xf] }
 0x213   :  { %v2408_v59 = vld [vmem:[%s18372_s10 + $0xa0c] sm:$0xf]  ;;  %2405 = vst [vmem:[#allocation3 + $0x9f4] sm:$0xf] %v2404_v57  ;;  %2407 = vst [vmem:[#allocation3 + $0x9f8] sm:$0xf] %v2406_v58 }
 0x214   :  { %2409 = vst [vmem:[#allocation3 + $0x9fc] sm:$0xf] %v2408_v59  ;;  %v2410_v60 = vld [vmem:[%s18372_s10 + $0x9f8] sm:$0xf]  ;;  %v2412_v61 = vld [vmem:[%s18372_s10 + $0xa10] sm:$0xf] }
 0x215   :  { %v2414_v62 = vld [vmem:[%s18372_s10 + $0x9fc] sm:$0xf]  ;;  %2411 = vst [vmem:[#allocation3 + $0xa00] sm:$0xf] %v2410_v60  ;;  %2413 = vst [vmem:[#allocation3 + $0xa04] sm:$0xf] %v2412_v61 }
 0x216   :  { %2415 = vst [vmem:[#allocation3 + $0xa08] sm:$0xf] %v2414_v62  ;;  %v2416_v63 = vld [vmem:[%s18372_s10 + $0xa14] sm:$0xf]  ;;  %v2418_v0 = vld [vmem:[%s18372_s10 + $0xa00] sm:$0xf] }
 0x217   :  { %v2420_v1 = vld [vmem:[%s18372_s10 + $0xa18] sm:$0xf]  ;;  %2417 = vst [vmem:[#allocation3 + $0xa0c] sm:$0xf] %v2416_v63  ;;  %2419 = vst [vmem:[#allocation3 + $0xa10] sm:$0xf] %v2418_v0 }
 0x218   :  { %2421 = vst [vmem:[#allocation3 + $0xa14] sm:$0xf] %v2420_v1  ;;  %v2422_v2 = vld [vmem:[%s18372_s10 + $0xa04] sm:$0xf]  ;;  %v2428_v4 = vld [vmem:[%s18372_s10 + $0xa38] sm:$0xf] }
 0x219   :  { %2423 = vst [vmem:[#allocation3 + $0xa18] sm:$0xf] %v2422_v2  ;;  %2425 = vst [vmem:[#allocation3 + $0xa1c] sm:$0xff] %v2424_v3   ;;  %v2430_v5 = vld [vmem:[%s18372_s10 + $0xa24] sm:$0xf]  ;;  %v2472_v25 = vld [vmem:[%s18372_s10 + $0xa7c] sm:$0xff]  }
 0x21a   :  { %2429 = vst [vmem:[#allocation3 + $0xa24] sm:$0xf] %v2428_v4  ;;  %v2432_v6 = vld [vmem:[%s18372_s10 + $0xa3c] sm:$0xf]  ;;  %v2434_v7 = vld [vmem:[%s18372_s10 + $0xa28] sm:$0xf] }
 0x21b   :  { %2431 = vst [vmem:[#allocation3 + $0xa28] sm:$0xf] %v2430_v5  ;;  %2433 = vst [vmem:[#allocation3 + $0xa2c] sm:$0xf] %v2432_v6  ;;  %v2436_v8 = vld [vmem:[%s18372_s10 + $0xa40] sm:$0xf] }
 0x21c   :  { %2435 = vst [vmem:[#allocation3 + $0xa30] sm:$0xf] %v2434_v7  ;;  %v2438_v9 = vld [vmem:[%s18372_s10 + $0xa2c] sm:$0xf]  ;;  %v2440_v10 = vld [vmem:[%s18372_s10 + $0xa44] sm:$0xf] }
 0x21d   :  { %2437 = vst [vmem:[#allocation3 + $0xa34] sm:$0xf] %v2436_v8  ;;  %2439 = vst [vmem:[#allocation3 + $0xa38] sm:$0xf] %v2438_v9  ;;  %v2442_v11 = vld [vmem:[%s18372_s10 + $0xa30] sm:$0xf] }
 0x21e   :  { %2441 = vst [vmem:[#allocation3 + $0xa3c] sm:$0xf] %v2440_v10  ;;  %v2444_v12 = vld [vmem:[%s18372_s10 + $0xa48] sm:$0xf]  ;;  %v2446_v13 = vld [vmem:[%s18372_s10 + $0xa34] sm:$0xf] }
 0x21f   :  { %2443 = vst [vmem:[#allocation3 + $0xa40] sm:$0xf] %v2442_v11  ;;  %2445 = vst [vmem:[#allocation3 + $0xa44] sm:$0xf] %v2444_v12  ;;  %v2452_v15 = vld [vmem:[%s18372_s10 + $0xa68] sm:$0xf] }
 0x220   :  { %2447 = vst [vmem:[#allocation3 + $0xa48] sm:$0xf] %v2446_v13  ;;  %v2454_v16 = vld [vmem:[%s18372_s10 + $0xa54] sm:$0xf]  ;;  %2449 = vst [vmem:[#allocation3 + $0xa4c] sm:$0xff] %v2448_v14   ;;  %v2496_v36 = vld [vmem:[%s18372_s10 + $0xaac] sm:$0xff]  }
 0x221   :  { %2453 = vst [vmem:[#allocation3 + $0xa54] sm:$0xf] %v2452_v15  ;;  %2455 = vst [vmem:[#allocation3 + $0xa58] sm:$0xf] %v2454_v16  ;;  %v2456_v17 = vld [vmem:[%s18372_s10 + $0xa6c] sm:$0xf] }
 0x222   :  { %v2458_v18 = vld [vmem:[%s18372_s10 + $0xa58] sm:$0xf]  ;;  %v2460_v19 = vld [vmem:[%s18372_s10 + $0xa70] sm:$0xf]  ;;  %2457 = vst [vmem:[#allocation3 + $0xa5c] sm:$0xf] %v2456_v17 }
 0x223   :  { %2459 = vst [vmem:[#allocation3 + $0xa60] sm:$0xf] %v2458_v18  ;;  %2461 = vst [vmem:[#allocation3 + $0xa64] sm:$0xf] %v2460_v19  ;;  %v2462_v20 = vld [vmem:[%s18372_s10 + $0xa5c] sm:$0xf] }
 0x224   :  { %v2464_v21 = vld [vmem:[%s18372_s10 + $0xa74] sm:$0xf]  ;;  %v2466_v22 = vld [vmem:[%s18372_s10 + $0xa60] sm:$0xf]  ;;  %2463 = vst [vmem:[#allocation3 + $0xa68] sm:$0xf] %v2462_v20 }
 0x225   :  { %2465 = vst [vmem:[#allocation3 + $0xa6c] sm:$0xf] %v2464_v21  ;;  %2467 = vst [vmem:[#allocation3 + $0xa70] sm:$0xf] %v2466_v22  ;;  %v2468_v23 = vld [vmem:[%s18372_s10 + $0xa78] sm:$0xf] }
 0x226   :  { %v2470_v24 = vld [vmem:[%s18372_s10 + $0xa64] sm:$0xf]  ;;  %2469 = vst [vmem:[#allocation3 + $0xa74] sm:$0xf] %v2468_v23  ;;  %2473 = vst [vmem:[#allocation3 + $0xa7c] sm:$0xff] %v2472_v25   ;;  %v2520_v47 = vld [vmem:[%s18372_s10 + $0xadc] sm:$0xff]  }
 0x227   :  { %2471 = vst [vmem:[#allocation3 + $0xa78] sm:$0xf] %v2470_v24  ;;  %v2476_v26 = vld [vmem:[%s18372_s10 + $0xa98] sm:$0xf]  ;;  %v2478_v27 = vld [vmem:[%s18372_s10 + $0xa84] sm:$0xf] }
 0x228   :  { %v2480_v28 = vld [vmem:[%s18372_s10 + $0xa9c] sm:$0xf]  ;;  %2477 = vst [vmem:[#allocation3 + $0xa84] sm:$0xf] %v2476_v26  ;;  %2479 = vst [vmem:[#allocation3 + $0xa88] sm:$0xf] %v2478_v27 }
 0x229   :  { %2481 = vst [vmem:[#allocation3 + $0xa8c] sm:$0xf] %v2480_v28  ;;  %v2482_v29 = vld [vmem:[%s18372_s10 + $0xa88] sm:$0xf]  ;;  %v2484_v30 = vld [vmem:[%s18372_s10 + $0xaa0] sm:$0xf] }
 0x22a   :  { %v2486_v31 = vld [vmem:[%s18372_s10 + $0xa8c] sm:$0xf]  ;;  %2483 = vst [vmem:[#allocation3 + $0xa90] sm:$0xf] %v2482_v29  ;;  %2485 = vst [vmem:[#allocation3 + $0xa94] sm:$0xf] %v2484_v30 }
 0x22b   :  { %2487 = vst [vmem:[#allocation3 + $0xa98] sm:$0xf] %v2486_v31  ;;  %v2488_v32 = vld [vmem:[%s18372_s10 + $0xaa4] sm:$0xf]  ;;  %v2490_v33 = vld [vmem:[%s18372_s10 + $0xa90] sm:$0xf] }
 0x22c   :  { %v2492_v34 = vld [vmem:[%s18372_s10 + $0xaa8] sm:$0xf]  ;;  %2489 = vst [vmem:[#allocation3 + $0xa9c] sm:$0xf] %v2488_v32  ;;  %2491 = vst [vmem:[#allocation3 + $0xaa0] sm:$0xf] %v2490_v33 }
 0x22d   :  { %2493 = vst [vmem:[#allocation3 + $0xaa4] sm:$0xf] %v2492_v34  ;;  %v2494_v35 = vld [vmem:[%s18372_s10 + $0xa94] sm:$0xf]  ;;  %v2500_v37 = vld [vmem:[%s18372_s10 + $0xac8] sm:$0xf] }
 0x22e   :  { %2495 = vst [vmem:[#allocation3 + $0xaa8] sm:$0xf] %v2494_v35  ;;  %2497 = vst [vmem:[#allocation3 + $0xaac] sm:$0xff] %v2496_v36   ;;  %v2502_v38 = vld [vmem:[%s18372_s10 + $0xab4] sm:$0xf]  ;;  %v2544_v58 = vld [vmem:[%s18372_s10 + $0xb0c] sm:$0xff]  }
 0x22f   :  { %2501 = vst [vmem:[#allocation3 + $0xab4] sm:$0xf] %v2500_v37  ;;  %v2504_v39 = vld [vmem:[%s18372_s10 + $0xacc] sm:$0xf]  ;;  %v2506_v40 = vld [vmem:[%s18372_s10 + $0xab8] sm:$0xf] }
 0x230   :  { %2503 = vst [vmem:[#allocation3 + $0xab8] sm:$0xf] %v2502_v38  ;;  %2505 = vst [vmem:[#allocation3 + $0xabc] sm:$0xf] %v2504_v39  ;;  %v2508_v41 = vld [vmem:[%s18372_s10 + $0xad0] sm:$0xf] }
 0x231   :  { %2507 = vst [vmem:[#allocation3 + $0xac0] sm:$0xf] %v2506_v40  ;;  %v2510_v42 = vld [vmem:[%s18372_s10 + $0xabc] sm:$0xf]  ;;  %v2512_v43 = vld [vmem:[%s18372_s10 + $0xad4] sm:$0xf] }
 0x232   :  { %2509 = vst [vmem:[#allocation3 + $0xac4] sm:$0xf] %v2508_v41  ;;  %2511 = vst [vmem:[#allocation3 + $0xac8] sm:$0xf] %v2510_v42  ;;  %v2514_v44 = vld [vmem:[%s18372_s10 + $0xac0] sm:$0xf] }
 0x233   :  { %2513 = vst [vmem:[#allocation3 + $0xacc] sm:$0xf] %v2512_v43  ;;  %v2516_v45 = vld [vmem:[%s18372_s10 + $0xad8] sm:$0xf]  ;;  %v2518_v46 = vld [vmem:[%s18372_s10 + $0xac4] sm:$0xf] }
 0x234   :  { %2515 = vst [vmem:[#allocation3 + $0xad0] sm:$0xf] %v2514_v44  ;;  %2517 = vst [vmem:[#allocation3 + $0xad4] sm:$0xf] %v2516_v45  ;;  %v2524_v48 = vld [vmem:[%s18372_s10 + $0xaf8] sm:$0xf] }
 0x235   :  { %2519 = vst [vmem:[#allocation3 + $0xad8] sm:$0xf] %v2518_v46  ;;  %v2526_v49 = vld [vmem:[%s18372_s10 + $0xae4] sm:$0xf]  ;;  %2521 = vst [vmem:[#allocation3 + $0xadc] sm:$0xff] %v2520_v47   ;;  %v2568_v5 = vld [vmem:[%s18372_s10 + $0xb3c] sm:$0xff]  }
 0x236   :  { %2525 = vst [vmem:[#allocation3 + $0xae4] sm:$0xf] %v2524_v48  ;;  %2527 = vst [vmem:[#allocation3 + $0xae8] sm:$0xf] %v2526_v49  ;;  %v2528_v50 = vld [vmem:[%s18372_s10 + $0xafc] sm:$0xf] }
 0x237   :  { %v2530_v51 = vld [vmem:[%s18372_s10 + $0xae8] sm:$0xf]  ;;  %v2532_v52 = vld [vmem:[%s18372_s10 + $0xb00] sm:$0xf]  ;;  %2529 = vst [vmem:[#allocation3 + $0xaec] sm:$0xf] %v2528_v50 }
 0x238   :  { %2531 = vst [vmem:[#allocation3 + $0xaf0] sm:$0xf] %v2530_v51  ;;  %2533 = vst [vmem:[#allocation3 + $0xaf4] sm:$0xf] %v2532_v52  ;;  %v2534_v53 = vld [vmem:[%s18372_s10 + $0xaec] sm:$0xf] }
 0x239   :  { %v2536_v54 = vld [vmem:[%s18372_s10 + $0xb04] sm:$0xf]  ;;  %v2538_v55 = vld [vmem:[%s18372_s10 + $0xaf0] sm:$0xf]  ;;  %2535 = vst [vmem:[#allocation3 + $0xaf8] sm:$0xf] %v2534_v53 }
 0x23a   :  { %2537 = vst [vmem:[#allocation3 + $0xafc] sm:$0xf] %v2536_v54  ;;  %2539 = vst [vmem:[#allocation3 + $0xb00] sm:$0xf] %v2538_v55  ;;  %v2540_v56 = vld [vmem:[%s18372_s10 + $0xb08] sm:$0xf] }
 0x23b   :  { %v2542_v57 = vld [vmem:[%s18372_s10 + $0xaf4] sm:$0xf]  ;;  %2541 = vst [vmem:[#allocation3 + $0xb04] sm:$0xf] %v2540_v56  ;;  %2545 = vst [vmem:[#allocation3 + $0xb0c] sm:$0xff] %v2544_v58   ;;  %v2592_v16 = vld [vmem:[%s18372_s10 + $0xb6c] sm:$0xff]  }
 0x23c   :  { %2543 = vst [vmem:[#allocation3 + $0xb08] sm:$0xf] %v2542_v57  ;;  %v2548_v59 = vld [vmem:[%s18372_s10 + $0xb28] sm:$0xf]  ;;  %v2550_v60 = vld [vmem:[%s18372_s10 + $0xb14] sm:$0xf] }
 0x23d   :  { %v2552_v61 = vld [vmem:[%s18372_s10 + $0xb2c] sm:$0xf]  ;;  %2549 = vst [vmem:[#allocation3 + $0xb14] sm:$0xf] %v2548_v59  ;;  %2551 = vst [vmem:[#allocation3 + $0xb18] sm:$0xf] %v2550_v60 }
 0x23e   :  { %2553 = vst [vmem:[#allocation3 + $0xb1c] sm:$0xf] %v2552_v61  ;;  %v2554_v62 = vld [vmem:[%s18372_s10 + $0xb18] sm:$0xf]  ;;  %v2556_v63 = vld [vmem:[%s18372_s10 + $0xb30] sm:$0xf] }
 0x23f   :  { %v2558_v0 = vld [vmem:[%s18372_s10 + $0xb1c] sm:$0xf]  ;;  %2555 = vst [vmem:[#allocation3 + $0xb20] sm:$0xf] %v2554_v62  ;;  %2557 = vst [vmem:[#allocation3 + $0xb24] sm:$0xf] %v2556_v63 }
 0x240   :  { %2559 = vst [vmem:[#allocation3 + $0xb28] sm:$0xf] %v2558_v0  ;;  %v2560_v1 = vld [vmem:[%s18372_s10 + $0xb34] sm:$0xf]  ;;  %v2562_v2 = vld [vmem:[%s18372_s10 + $0xb20] sm:$0xf] }
 0x241   :  { %v2564_v3 = vld [vmem:[%s18372_s10 + $0xb38] sm:$0xf]  ;;  %2561 = vst [vmem:[#allocation3 + $0xb2c] sm:$0xf] %v2560_v1  ;;  %2563 = vst [vmem:[#allocation3 + $0xb30] sm:$0xf] %v2562_v2 }
 0x242   :  { %2565 = vst [vmem:[#allocation3 + $0xb34] sm:$0xf] %v2564_v3  ;;  %v2566_v4 = vld [vmem:[%s18372_s10 + $0xb24] sm:$0xf]  ;;  %v2572_v6 = vld [vmem:[%s18372_s10 + $0xb58] sm:$0xf] }
 0x243   :  { %2567 = vst [vmem:[#allocation3 + $0xb38] sm:$0xf] %v2566_v4  ;;  %2569 = vst [vmem:[#allocation3 + $0xb3c] sm:$0xff] %v2568_v5   ;;  %v2574_v7 = vld [vmem:[%s18372_s10 + $0xb44] sm:$0xf]  ;;  %v2616_v27 = vld [vmem:[%s18372_s10 + $0xb9c] sm:$0xff]  }
 0x244   :  { %2573 = vst [vmem:[#allocation3 + $0xb44] sm:$0xf] %v2572_v6  ;;  %v2576_v8 = vld [vmem:[%s18372_s10 + $0xb5c] sm:$0xf]  ;;  %v2578_v9 = vld [vmem:[%s18372_s10 + $0xb48] sm:$0xf] }
 0x245   :  { %2575 = vst [vmem:[#allocation3 + $0xb48] sm:$0xf] %v2574_v7  ;;  %2577 = vst [vmem:[#allocation3 + $0xb4c] sm:$0xf] %v2576_v8  ;;  %v2580_v10 = vld [vmem:[%s18372_s10 + $0xb60] sm:$0xf] }
 0x246   :  { %2579 = vst [vmem:[#allocation3 + $0xb50] sm:$0xf] %v2578_v9  ;;  %v2582_v11 = vld [vmem:[%s18372_s10 + $0xb4c] sm:$0xf]  ;;  %v2584_v12 = vld [vmem:[%s18372_s10 + $0xb64] sm:$0xf] }
 0x247   :  { %2581 = vst [vmem:[#allocation3 + $0xb54] sm:$0xf] %v2580_v10  ;;  %2583 = vst [vmem:[#allocation3 + $0xb58] sm:$0xf] %v2582_v11  ;;  %v2586_v13 = vld [vmem:[%s18372_s10 + $0xb50] sm:$0xf] }
 0x248   :  { %2585 = vst [vmem:[#allocation3 + $0xb5c] sm:$0xf] %v2584_v12  ;;  %v2588_v14 = vld [vmem:[%s18372_s10 + $0xb68] sm:$0xf]  ;;  %v2590_v15 = vld [vmem:[%s18372_s10 + $0xb54] sm:$0xf] }
 0x249   :  { %2587 = vst [vmem:[#allocation3 + $0xb60] sm:$0xf] %v2586_v13  ;;  %2589 = vst [vmem:[#allocation3 + $0xb64] sm:$0xf] %v2588_v14  ;;  %v2596_v17 = vld [vmem:[%s18372_s10 + $0xb88] sm:$0xf] }
 0x24a   :  { %2591 = vst [vmem:[#allocation3 + $0xb68] sm:$0xf] %v2590_v15  ;;  %v2598_v18 = vld [vmem:[%s18372_s10 + $0xb74] sm:$0xf]  ;;  %2593 = vst [vmem:[#allocation3 + $0xb6c] sm:$0xff] %v2592_v16   ;;  %v2640_v38 = vld [vmem:[%s18372_s10 + $0xbcc] sm:$0xff]  }
 0x24b   :  { %2597 = vst [vmem:[#allocation3 + $0xb74] sm:$0xf] %v2596_v17  ;;  %2599 = vst [vmem:[#allocation3 + $0xb78] sm:$0xf] %v2598_v18  ;;  %v2600_v19 = vld [vmem:[%s18372_s10 + $0xb8c] sm:$0xf] }
 0x24c   :  { %v2602_v20 = vld [vmem:[%s18372_s10 + $0xb78] sm:$0xf]  ;;  %v2604_v21 = vld [vmem:[%s18372_s10 + $0xb90] sm:$0xf]  ;;  %2601 = vst [vmem:[#allocation3 + $0xb7c] sm:$0xf] %v2600_v19 }
 0x24d   :  { %2603 = vst [vmem:[#allocation3 + $0xb80] sm:$0xf] %v2602_v20  ;;  %2605 = vst [vmem:[#allocation3 + $0xb84] sm:$0xf] %v2604_v21  ;;  %v2606_v22 = vld [vmem:[%s18372_s10 + $0xb7c] sm:$0xf] }
 0x24e   :  { %v2608_v23 = vld [vmem:[%s18372_s10 + $0xb94] sm:$0xf]  ;;  %v2610_v24 = vld [vmem:[%s18372_s10 + $0xb80] sm:$0xf]  ;;  %2607 = vst [vmem:[#allocation3 + $0xb88] sm:$0xf] %v2606_v22 }
 0x24f   :  { %2609 = vst [vmem:[#allocation3 + $0xb8c] sm:$0xf] %v2608_v23  ;;  %2611 = vst [vmem:[#allocation3 + $0xb90] sm:$0xf] %v2610_v24  ;;  %v2612_v25 = vld [vmem:[%s18372_s10 + $0xb98] sm:$0xf] }
 0x250   :  { %v2614_v26 = vld [vmem:[%s18372_s10 + $0xb84] sm:$0xf]  ;;  %2613 = vst [vmem:[#allocation3 + $0xb94] sm:$0xf] %v2612_v25  ;;  %2617 = vst [vmem:[#allocation3 + $0xb9c] sm:$0xff] %v2616_v27  }
 0x251   :  { %2615 = vst [vmem:[#allocation3 + $0xb98] sm:$0xf] %v2614_v26  ;;  %v2620_v28 = vld [vmem:[%s18372_s10 + $0xbb8] sm:$0xf]  ;;  %v2622_v29 = vld [vmem:[%s18372_s10 + $0xba4] sm:$0xf] }
 0x252   :  { %v2624_v30 = vld [vmem:[%s18372_s10 + $0xbbc] sm:$0xf]  ;;  %2621 = vst [vmem:[#allocation3 + $0xba4] sm:$0xf] %v2620_v28  ;;  %2623 = vst [vmem:[#allocation3 + $0xba8] sm:$0xf] %v2622_v29 }
 0x253   :  { %2625 = vst [vmem:[#allocation3 + $0xbac] sm:$0xf] %v2624_v30  ;;  %v2626_v31 = vld [vmem:[%s18372_s10 + $0xba8] sm:$0xf]  ;;  %v2628_v32 = vld [vmem:[%s18372_s10 + $0xbc0] sm:$0xf] }
 0x254   :  { %v2630_v33 = vld [vmem:[%s18372_s10 + $0xbac] sm:$0xf]  ;;  %2627 = vst [vmem:[#allocation3 + $0xbb0] sm:$0xf] %v2626_v31  ;;  %2629 = vst [vmem:[#allocation3 + $0xbb4] sm:$0xf] %v2628_v32 }
 0x255   :  { %2631 = vst [vmem:[#allocation3 + $0xbb8] sm:$0xf] %v2630_v33  ;;  %v2632_v34 = vld [vmem:[%s18372_s10 + $0xbc4] sm:$0xf]  ;;  %v2634_v35 = vld [vmem:[%s18372_s10 + $0xbb0] sm:$0xf] }
 0x256   :  { %v2636_v36 = vld [vmem:[%s18372_s10 + $0xbc8] sm:$0xf]  ;;  %2633 = vst [vmem:[#allocation3 + $0xbbc] sm:$0xf] %v2632_v34  ;;  %2635 = vst [vmem:[#allocation3 + $0xbc0] sm:$0xf] %v2634_v35 }
 0x257   :  { %2637 = vst [vmem:[#allocation3 + $0xbc4] sm:$0xf] %v2636_v36  ;;  %v2638_v37 = vld [vmem:[%s18372_s10 + $0xbb4] sm:$0xf]  ;;  %v2644_v39 = vld [vmem:[%s18372_s10 + $0xbe8] sm:$0xf] }
 0x258   :  { %2639 = vst [vmem:[#allocation3 + $0xbc8] sm:$0xf] %v2638_v37  ;;  %2641 = vst [vmem:[#allocation3 + $0xbcc] sm:$0xff] %v2640_v38   ;;  %v2646_v40 = vld [vmem:[%s18372_s10 + $0xbd4] sm:$0xf] }
 0x259   :  { %2645 = vst [vmem:[#allocation3 + $0xbd4] sm:$0xf] %v2644_v39  ;;  %v2648_v41 = vld [vmem:[%s18372_s10 + $0xbec] sm:$0xf]  ;;  %v2650_v42 = vld [vmem:[%s18372_s10 + $0xbd8] sm:$0xf] }
 0x25a   :  { %2647 = vst [vmem:[#allocation3 + $0xbd8] sm:$0xf] %v2646_v40  ;;  %2649 = vst [vmem:[#allocation3 + $0xbdc] sm:$0xf] %v2648_v41  ;;  %v2652_v43 = vld [vmem:[%s18372_s10 + $0xbf0] sm:$0xf] }
 0x25b   :  { %2651 = vst [vmem:[#allocation3 + $0xbe0] sm:$0xf] %v2650_v42  ;;  %v2654_v44 = vld [vmem:[%s18372_s10 + $0xbdc] sm:$0xf]  ;;  %v2656_v45 = vld [vmem:[%s18372_s10 + $0xbf4] sm:$0xf] }
 0x25c   :  { %2653 = vst [vmem:[#allocation3 + $0xbe4] sm:$0xf] %v2652_v43  ;;  %2655 = vst [vmem:[#allocation3 + $0xbe8] sm:$0xf] %v2654_v44  ;;  %v2658_v46 = vld [vmem:[%s18372_s10 + $0xbe0] sm:$0xf] }
 0x25d   :  { %2657 = vst [vmem:[#allocation3 + $0xbec] sm:$0xf] %v2656_v45  ;;  %v2660_v47 = vld [vmem:[%s18372_s10 + $0xbf8] sm:$0xf]  ;;  %v2662_v48 = vld [vmem:[%s18372_s10 + $0xbe4] sm:$0xf] }
 0x25e   :  { %2659 = vst [vmem:[#allocation3 + $0xbf0] sm:$0xf] %v2658_v46  ;;  %2661 = vst [vmem:[#allocation3 + $0xbf4] sm:$0xf] %v2660_v47  ;;  %v2664_v49 = vld [vmem:[%s18372_s10 + $0xbfc] sm:$0xf] }
 0x25f   :  { %2663 = vst [vmem:[#allocation3 + $0xbf8] sm:$0xf] %v2662_v48  ;;  %2665 = vst [vmem:[#allocation3 + $0xbfc] sm:$0xf] %v2664_v49 }
 0x260   :  { %7337 = vsyncadd [#allocation5 + $0x1], 49152  ;;  %v16438_v50 = vld [vmem:[%s18373_s11] sm:$0xff]  ;;  %v16443_v51 = vld [vmem:[%s18373_s11 + $0x8] sm:$0xff] }
 0x261   :  { %v16448_v52 = vld [vmem:[%s18373_s11 + $0x10] sm:$0xff]  ;;  %v16453_v53 = vld [vmem:[%s18373_s11 + $0x18] sm:$0xff]  ;;  %v16458_v54 = vld [vmem:[%s18373_s11 + $0x20] sm:$0xff] }
 0x262   :  { %18379 = vst [vmem:[#allocation18_spill] sm:$0xff] %v16458_v54  ;;  %v16463_v55 = vld [vmem:[%s18373_s11 + $0x28] sm:$0xff]  ;;  %v16468_v56 = vld [vmem:[%s18373_s11 + $0x30] sm:$0xff]  ;;  %v16473_v57 = vld [vmem:[%s18373_s11 + $0x38] sm:$0xff] }
 0x263   :  { %18380 = vst [vmem:[#allocation19_spill] sm:$0xff] %v16463_v55  ;;  %18381 = vst [vmem:[#allocation20_spill] sm:$0xff] %v16468_v56  ;;  %v16478_v58 = vld [vmem:[%s18373_s11 + $0x40] sm:$0xff]  ;;  %v16483_v59 = vld [vmem:[%s18373_s11 + $0x48] sm:$0xff] }
 0x264   :  { %18382 = vst [vmem:[#allocation21_spill] sm:$0xff] %v16473_v57  ;;  %v16488_v60 = vld [vmem:[%s18373_s11 + $0x50] sm:$0xff]  ;;  %v16493_v61 = vld [vmem:[%s18373_s11 + $0x58] sm:$0xff]  ;;  %v16498_v62 = vld [vmem:[%s18373_s11 + $0x60] sm:$0xff] }
 0x265   :  { %v16503_v63 = vld [vmem:[%s18373_s11 + $0x68] sm:$0xff]  ;;  %v16508_v0 = vld [vmem:[%s18373_s11 + $0x70] sm:$0xff]  ;;  %v16513_v1 = vld [vmem:[%s18373_s11 + $0x78] sm:$0xff] }
 0x266   :  { %18383 = vst [vmem:[#allocation22_spill] sm:$0xff] %v16503_v63  ;;  %18384 = vst [vmem:[#allocation23_spill] sm:$0xff] %v16508_v0  ;;  %v16518_v2 = vld [vmem:[%s18373_s11 + $0x80] sm:$0xff]  ;;  %v16523_v3 = vld [vmem:[%s18373_s11 + $0x88] sm:$0xff] }
 0x267   :  { %18385 = vst [vmem:[#allocation24_spill] sm:$0xff] %v16513_v1  ;;  %18386 = vst [vmem:[#allocation25_spill] sm:$0xff] %v16518_v2  ;;  %v16528_v4 = vld [vmem:[%s18373_s11 + $0x90] sm:$0xff]  ;;  %v16533_v5 = vld [vmem:[%s18373_s11 + $0x98] sm:$0xff] }
 0x268   :  { %18387 = vst [vmem:[#allocation26_spill] sm:$0xff] %v16523_v3  ;;  %18388 = vst [vmem:[#allocation27_spill] sm:$0xff] %v16528_v4  ;;  %v16538_v6 = vld [vmem:[%s18373_s11 + $0xa0] sm:$0xff]  ;;  %v16543_v7 = vld [vmem:[%s18373_s11 + $0xa8] sm:$0xff] }
 0x269   :  { %18389 = vst [vmem:[#allocation28_spill] sm:$0xff] %v16533_v5  ;;  %18390 = vst [vmem:[#allocation29_spill] sm:$0xff] %v16538_v6  ;;  %v16548_v8 = vld [vmem:[%s18373_s11 + $0xb0] sm:$0xff]  ;;  %v16553_v9 = vld [vmem:[%s18373_s11 + $0xb8] sm:$0xff] }
 0x26a   :  { %18391 = vst [vmem:[#allocation30_spill] sm:$0xff] %v16543_v7  ;;  %18392 = vst [vmem:[#allocation31_spill] sm:$0xff] %v16548_v8  ;;  %v16558_v10 = vld [vmem:[%s18373_s11 + $0xc0] sm:$0xff]  ;;  %v16563_v11 = vld [vmem:[%s18373_s11 + $0xc8] sm:$0xff] }
 0x26b   :  { %18393 = vst [vmem:[#allocation32_spill] sm:$0xff] %v16553_v9  ;;  %18394 = vst [vmem:[#allocation33_spill] sm:$0xff] %v16558_v10  ;;  %v16568_v12 = vld [vmem:[%s18373_s11 + $0xd0] sm:$0xff]  ;;  %v16573_v13 = vld [vmem:[%s18373_s11 + $0xd8] sm:$0xff] }
 0x26c   :  { %18395 = vst [vmem:[#allocation34_spill] sm:$0xff] %v16563_v11  ;;  %18396 = vst [vmem:[#allocation35_spill] sm:$0xff] %v16568_v12  ;;  %v16578_v14 = vld [vmem:[%s18373_s11 + $0xe0] sm:$0xff]  ;;  %v16583_v15 = vld [vmem:[%s18373_s11 + $0xe8] sm:$0xff] }
 0x26d   :  { %18397 = vst [vmem:[#allocation36_spill] sm:$0xff] %v16573_v13  ;;  %18398 = vst [vmem:[#allocation37_spill] sm:$0xff] %v16578_v14  ;;  %v16588_v16 = vld [vmem:[%s18373_s11 + $0xf0] sm:$0xff]  ;;  %v16593_v17 = vld [vmem:[%s18373_s11 + $0xf8] sm:$0xff] }
 0x26e   :  { %18399 = vst [vmem:[#allocation38_spill] sm:$0xff] %v16583_v15  ;;  %18400 = vst [vmem:[#allocation39_spill] sm:$0xff] %v16588_v16  ;;  %v16598_v18 = vld [vmem:[%s18373_s11 + $0x100] sm:$0xff]  ;;  %v16603_v19 = vld [vmem:[%s18373_s11 + $0x108] sm:$0xff] }
 0x26f   :  { %18401 = vst [vmem:[#allocation40_spill] sm:$0xff] %v16593_v17  ;;  %18402 = vst [vmem:[#allocation41_spill] sm:$0xff] %v16598_v18  ;;  %v16608_v20 = vld [vmem:[%s18373_s11 + $0x110] sm:$0xff]  ;;  %v16613_v21 = vld [vmem:[%s18373_s11 + $0x118] sm:$0xff] }
 0x270   :  { %18403 = vst [vmem:[#allocation42_spill] sm:$0xff] %v16603_v19  ;;  %18404 = vst [vmem:[#allocation43_spill] sm:$0xff] %v16608_v20  ;;  %v16618_v22 = vld [vmem:[%s18373_s11 + $0x120] sm:$0xff]  ;;  %v16623_v23 = vld [vmem:[%s18373_s11 + $0x128] sm:$0xff] }
 0x271   :  { %18405 = vst [vmem:[#allocation44_spill] sm:$0xff] %v16613_v21  ;;  %18406 = vst [vmem:[#allocation45_spill] sm:$0xff] %v16618_v22  ;;  %v16628_v24 = vld [vmem:[%s18373_s11 + $0x130] sm:$0xff]  ;;  %v16633_v25 = vld [vmem:[%s18373_s11 + $0x138] sm:$0xff] }
 0x272   :  { %18407 = vst [vmem:[#allocation46_spill] sm:$0xff] %v16623_v23  ;;  %18408 = vst [vmem:[#allocation47_spill] sm:$0xff] %v16628_v24  ;;  %v16638_v26 = vld [vmem:[%s18373_s11 + $0x140] sm:$0xff]  ;;  %v16643_v27 = vld [vmem:[%s18373_s11 + $0x148] sm:$0xff] }
 0x273   :  { %18409 = vst [vmem:[#allocation48_spill] sm:$0xff] %v16633_v25  ;;  %18410 = vst [vmem:[#allocation49_spill] sm:$0xff] %v16638_v26  ;;  %v16648_v28 = vld [vmem:[%s18373_s11 + $0x150] sm:$0xff]  ;;  %v16653_v29 = vld [vmem:[%s18373_s11 + $0x158] sm:$0xff] }
 0x274   :  { %18411 = vst [vmem:[#allocation50_spill] sm:$0xff] %v16643_v27  ;;  %18412 = vst [vmem:[#allocation51_spill] sm:$0xff] %v16648_v28  ;;  %v16658_v30 = vld [vmem:[%s18373_s11 + $0x160] sm:$0xff]  ;;  %v16663_v31 = vld [vmem:[%s18373_s11 + $0x168] sm:$0xff] }
 0x275   :  { %18413 = vst [vmem:[#allocation52_spill] sm:$0xff] %v16653_v29  ;;  %18414 = vst [vmem:[#allocation53_spill] sm:$0xff] %v16658_v30  ;;  %v16668_v32 = vld [vmem:[%s18373_s11 + $0x170] sm:$0xff]  ;;  %v16673_v33 = vld [vmem:[%s18373_s11 + $0x178] sm:$0xff] }
 0x276   :  { %18415 = vst [vmem:[#allocation54_spill] sm:$0xff] %v16663_v31  ;;  %18416 = vst [vmem:[#allocation55_spill] sm:$0xff] %v16668_v32  ;;  %v16678_v34 = vld [vmem:[%s18373_s11 + $0x180] sm:$0xff]  ;;  %v16683_v35 = vld [vmem:[%s18373_s11 + $0x188] sm:$0xff] }
 0x277   :  { %18417 = vst [vmem:[#allocation56_spill] sm:$0xff] %v16673_v33  ;;  %18418 = vst [vmem:[#allocation57_spill] sm:$0xff] %v16678_v34  ;;  %v16688_v36 = vld [vmem:[%s18373_s11 + $0x190] sm:$0xff]  ;;  %v16693_v37 = vld [vmem:[%s18373_s11 + $0x198] sm:$0xff] }
 0x278   :  { %18419 = vst [vmem:[#allocation58_spill] sm:$0xff] %v16683_v35  ;;  %18420 = vst [vmem:[#allocation59_spill] sm:$0xff] %v16688_v36  ;;  %v16698_v38 = vld [vmem:[%s18373_s11 + $0x1a0] sm:$0xff]  ;;  %v16703_v39 = vld [vmem:[%s18373_s11 + $0x1a8] sm:$0xff] }
 0x279   :  { %18421 = vst [vmem:[#allocation60_spill] sm:$0xff] %v16693_v37  ;;  %18422 = vst [vmem:[#allocation61_spill] sm:$0xff] %v16698_v38  ;;  %v16708_v40 = vld [vmem:[%s18373_s11 + $0x1b0] sm:$0xff]  ;;  %v16713_v41 = vld [vmem:[%s18373_s11 + $0x1b8] sm:$0xff] }
 0x27a   :  { %18423 = vst [vmem:[#allocation62_spill] sm:$0xff] %v16703_v39  ;;  %18424 = vst [vmem:[#allocation63_spill] sm:$0xff] %v16708_v40  ;;  %v16718_v42 = vld [vmem:[%s18373_s11 + $0x1c0] sm:$0xff]  ;;  %v16723_v43 = vld [vmem:[%s18373_s11 + $0x1c8] sm:$0xff] }
 0x27b   :  { %18425 = vst [vmem:[#allocation64_spill] sm:$0xff] %v16713_v41  ;;  %18426 = vst [vmem:[#allocation65_spill] sm:$0xff] %v16718_v42  ;;  %v16728_v44 = vld [vmem:[%s18373_s11 + $0x1d0] sm:$0xff]  ;;  %v16733_v45 = vld [vmem:[%s18373_s11 + $0x1d8] sm:$0xff] }
 0x27c   :  { %18427 = vst [vmem:[#allocation66_spill] sm:$0xff] %v16723_v43  ;;  %18428 = vst [vmem:[#allocation67_spill] sm:$0xff] %v16728_v44  ;;  %v16738_v46 = vld [vmem:[%s18373_s11 + $0x1e0] sm:$0xff]  ;;  %v16743_v47 = vld [vmem:[%s18373_s11 + $0x1e8] sm:$0xff] }
 0x27d   :  { %18429 = vst [vmem:[#allocation68_spill] sm:$0xff] %v16733_v45  ;;  %18430 = vst [vmem:[#allocation69_spill] sm:$0xff] %v16738_v46  ;;  %v16748_v48 = vld [vmem:[%s18373_s11 + $0x1f0] sm:$0xff]  ;;  %v16753_v49 = vld [vmem:[%s18373_s11 + $0x1f8] sm:$0xff] }
 0x27e   :  { %18431 = vst [vmem:[#allocation70_spill] sm:$0xff] %v16743_v47  ;;  %18432 = vst [vmem:[#allocation71_spill] sm:$0xff] %v16748_v48 }
 0x27f   :  { %18433 = vst [vmem:[#allocation72_spill] sm:$0xff] %v16753_v49 }
 0x280   :  { %7506 = vsyncadd [#allocation5 + $0x2], 8192  ;;  %v12978_v41 = vld [vmem:[%s18365_s3 + $0x4] ss:$8 sps:$4 sm:$0xff]   ;;  %v12980_v40 = vld [vmem:[%s18365_s3] ss:$8 sps:$4 sm:$0xff]   ;;  %v7525_v36 = vlaneseq }
 0x281   :  { %v13521_v39 = vmov 0   ;;  %v12981_v48 = vld [vmem:[%s18365_s3 + $0x14] ss:$8 sps:$4 sm:$0xff]   ;;  %7572 = vmatprep.subr.bf16.mxu0 %v12978_v41  ;;  %v12983_v49 = vld [vmem:[%s18365_s3 + $0x10] ss:$8 sps:$4 sm:$0xff]   ;;  %v7511_v46 = vld [vmem:[%s18362_s0] sm:$0xff] }
 0x282   :  { %7604 = vmatprep.mubr.bf16.mxu0 %v13521_v39  ;;  %7573 = vmatpush1.bf16.msra.mxu0 %v12980_v40  ;;  %v12984_v47 = vld [vmem:[%s18365_s3 + $0x24] ss:$8 sps:$4 sm:$0xff]   ;;  %v12986_v38 = vld [vmem:[%s18365_s3 + $0x20] ss:$8 sps:$4 sm:$0xff]   ;;  %vm7565_vm0 = vcmask 392192   ;;  %v7514_v37 = vld [vmem:[%s18362_s0 + $0x18] sm:$0xff] }
 0x283   :  { %7574 = vmatprep.subr.bf16.mxu0 %v12981_v48  ;;  %v7512_v40 = vld [vmem:[%s18362_s0 + $0x8] sm:$0xff]  ;;  %v7513_v48 = vld [vmem:[%s18362_s0 + $0x10] sm:$0xff]  ;;  %v16785_v44 = vshrl.u32 %v7525_v36, 7  ;;  %v7510_v42 = vld [vmem:[%s18363_s1 + $0x18] sm:$0xff]  ;;  %vm13523_vm1 = vmmov 0   ;;  %vm8599_vm2 = vcmask 130048  }
 0x284   :  { %v7521_v41 = vpack.c.bf16 %v7512_v40, %v7511_v46  ;;  %v7522_v45 = vpack.c.bf16 %v7514_v37, %v7513_v48  ;;  %v7507_v37 = vld [vmem:[%s18363_s1] sm:$0xff]  ;;  %v7509_v34 = vld [vmem:[%s18363_s1 + $0x10] sm:$0xff] }
 0x285   :  { %v16794_v46 = vsub.s32 1, %v16785_v44 }
 0x286   :  { %7575 = vmatpush1.bf16.msra.mxu0 %v12983_v49 }
 0x287   :  { %7576 = vmatprep.subr.bf16.mxu0 %v12984_v47  ;;  %v16788_v47 = vsub.s32 0, %v16785_v44 }
 0x28a   :  { %7577 = vmatpush1.bf16.msra.mxu0 %v12986_v38  ;;  %v7523_v38 = vld [vmem:[%s18364_s2] sm:$0x3] }
 0x28b   :  { %v7528_v49 = vrot.slane %v7523_v38, %v16788_v47  ;;  %v7532_v40 = vrot.slane %v7523_v38, %v16794_v46 }
 0x28d   :  { %12465 = vmatmul.mubr.msk.bf16.vlgmr.msra.gmra.mrb[0].mxu0 %vm7565_vm0, %v7521_v41 }
 0x28e   :  { %7614 = vmatprep.mubr.bf16.mxu0 %v13521_v39 }
 0x295   :  { %12466 = vmatmul.mubr.msk.bf16.gmra.mrb[4].mxu0 %vm7565_vm0, %v7522_v45  ;;  %v7508_v45 = vld [vmem:[%s18363_s1 + $0x8] sm:$0xff] }
 0x360   :  { %v7606_v36 = vpop.f32.mrb[0].mxu0 }
 0x361   :  { %v7607_v39 = vadd.f32 %v7606_v36, %v7528_v49  ;;  %v7608_v41 = vpop.f32.mrb[1].mxu0 }
 0x362   :  { %v7609_v48 = vadd.f32 %v7608_v41, %v7532_v40  ;;  %v7610_v35 = vpop.f32.mrb[2].mxu0 }
 0x363   :  { %v16804_v43 = vadd.f32 %v7607_v39, %v7507_v37  ;;  %v7611_v38 = vadd.f32 %v7610_v35, %v7528_v49  ;;  %v7612_v25 = vpop.f32.mrb[3].mxu0 }
 0x364   :  { %v16812_v36 = vadd.f32 %v7609_v48, %v7508_v45  ;;  %v7613_v33 = vadd.f32 %v7612_v25, %v7532_v40 }
 0x365   :  { %v16814_v24 = vadd.f32 %v7611_v38, %v7509_v34 }
 0x366   :  { %v16816_v32 = vadd.f32 %v7613_v33, %v7510_v42  ;;  %v7635_v39 = vadd.f32 %v16812_v36, %v16804_v43 }
 0x368   :  { %v7616_v41 = vpop.f32.mrb[4].mxu0  ;;  %7636 = vadd.xlane.f32.xlu0 %v7635_v39  ;;  %v7638_v30 = vadd.f32 %v16816_v32, %v16814_v24 }
 0x369   :  { %v7617_v23 = vadd.f32 %v7616_v41, %v7528_v49  ;;  %v7618_v31 = vpop.f32.mrb[5].mxu0  ;;  %v13004_v41 = vld [vmem:[%s18366_s4 + $0x6c] ss:$24 sps:$4 sm:$0xff]  }
 0x36a   :  { %v7619_v35 = vadd.f32 %v7618_v31, %v7532_v40  ;;  %v7620_v22 = vpop.f32.mrb[6].mxu0 }
 0x36b   :  { %v16822_v21 = vadd.f32 %v7617_v23, %v7507_v37  ;;  %v7621_v48 = vadd.f32 %v7620_v22, %v7528_v49  ;;  %v7622_v25 = vpop.f32.mrb[7].mxu0  ;;  %v12987_v22 = vld [vmem:[%s18366_s4 + $0x4] ss:$24 sps:$4 sm:$0xff]   ;;  %v12989_v23 = vld [vmem:[%s18366_s4] ss:$24 sps:$4 sm:$0xff]  }
 0x36c   :  { %v16824_v38 = vadd.f32 %v7619_v35, %v7508_v45  ;;  %7639 = vadd.xlane.f32.xlu0 %v7638_v30  ;;  %v7623_v33 = vadd.f32 %v7622_v25, %v7532_v40  ;;  %v12990_v30 = vld [vmem:[%s18366_s4 + $0x8] ss:$24 sps:$4 sm:$0xff]   ;;  %8350 = vmatprep.subr.bf16.mxu1 %v12987_v22  ;;  %v12998_v49 = vld [vmem:[%s18366_s4 + $0x3c] ss:$24 sps:$4 sm:$0xff]   ;;  %v12996_v37 = vld [vmem:[%s18366_s4 + $0x38] ss:$24 sps:$4 sm:$0xff]  }
 0x36d   :  { %v16826_v29 = vadd.f32 %v7621_v48, %v7509_v34  ;;  %v12992_v34 = vld [vmem:[%s18366_s4 + $0xc] ss:$24 sps:$4 sm:$0xff]   ;;  %8351 = vmatpush1.bf16.msra.mxu1 %v12989_v23  ;;  %v12995_v40 = vld [vmem:[%s18366_s4 + $0x30] ss:$24 sps:$4 sm:$0xff]   ;;  %v13001_v35 = vld [vmem:[%s18366_s4 + $0x60] ss:$24 sps:$4 sm:$0xff]  }
 0x36e   :  { %v16828_v20 = vadd.f32 %v7623_v33, %v7510_v42  ;;  %v7641_v39 = vadd.f32 %v16824_v38, %v16822_v21  ;;  %v12993_v42 = vld [vmem:[%s18366_s4 + $0x34] ss:$24 sps:$4 sm:$0xff]   ;;  %8403 = vmatprep.subr.bf16.mxu0 %v12992_v34  ;;  %v12999_v45 = vld [vmem:[%s18366_s4 + $0x64] ss:$24 sps:$4 sm:$0xff]   ;;  %v13002_v48 = vld [vmem:[%s18366_s4 + $0x68] ss:$24 sps:$4 sm:$0xff]  }
 0x36f   :  { %8404 = vmatpush1.bf16.msra.mxu0 %v12990_v30  ;;  %8352 = vmatprep.subr.bf16.mxu1 %v12993_v42  ;;  %v13005_v25 = vld [vmem:[%s18366_s4 + $0x94] ss:$24 sps:$4 sm:$0xff]   ;;  %v13011_v22 = vld [vmem:[%s18366_s4 + $0xc4] ss:$24 sps:$4 sm:$0xff]   ;;  %v13013_v30 = vld [vmem:[%s18366_s4 + $0xc0] ss:$24 sps:$4 sm:$0xff]  }
 0x370   :  { %7642 = vadd.xlane.f32.xlu1 %v7641_v39  ;;  %v7644_v31 = vadd.f32 %v16828_v20, %v16826_v29  ;;  %8405 = vmatprep.subr.bf16.mxu0 %v12998_v49  ;;  %v13010_v33 = vld [vmem:[%s18366_s4 + $0x9c] ss:$24 sps:$4 sm:$0xff]   ;;  %v13007_v39 = vld [vmem:[%s18366_s4 + $0x90] ss:$24 sps:$4 sm:$0xff]   ;;  %v13016_v23 = vld [vmem:[%s18366_s4 + $0xcc] ss:$24 sps:$4 sm:$0xff]  }
 0x371   :  { %8353 = vmatpush1.bf16.msra.mxu1 %v12995_v40  ;;  %v13014_v34 = vld [vmem:[%s18366_s4 + $0xc8] ss:$24 sps:$4 sm:$0xff]   ;;  %v13017_v42 = vld [vmem:[%s18366_s4 + $0xf4] ss:$24 sps:$4 sm:$0xff]  }
 0x372   :  { %8354 = vmatprep.subr.bf16.mxu1 %v12999_v45  ;;  %v13022_v49 = vld [vmem:[%s18366_s4 + $0xfc] ss:$24 sps:$4 sm:$0xff]   ;;  %v13019_v40 = vld [vmem:[%s18366_s4 + $0xf0] ss:$24 sps:$4 sm:$0xff]  }
 0x373   :  { %8406 = vmatpush1.bf16.msra.mxu0 %v12996_v37  ;;  %v13020_v37 = vld [vmem:[%s18366_s4 + $0xf8] ss:$24 sps:$4 sm:$0xff]   ;;  %v13023_v45 = vld [vmem:[%s18366_s4 + $0x124] ss:$24 sps:$4 sm:$0xff]  }
 0x374   :  { %7645 = vadd.xlane.f32.xlu1 %v7644_v31  ;;  %8407 = vmatprep.subr.bf16.mxu0 %v13004_v41  ;;  %v13008_v31 = vld [vmem:[%s18366_s4 + $0x98] ss:$24 sps:$4 sm:$0xff]   ;;  %v13028_v41 = vld [vmem:[%s18366_s4 + $0x12c] ss:$24 sps:$4 sm:$0xff]  }
 0x375   :  { %8355 = vmatpush1.bf16.msra.mxu1 %v13001_v35  ;;  %v13025_v35 = vld [vmem:[%s18366_s4 + $0x120] ss:$24 sps:$4 sm:$0xff]  }
 0x376   :  { %8356 = vmatprep.subr.bf16.mxu1 %v13005_v25  ;;  %v13029_v25 = vld [vmem:[%s18366_s4 + $0x154] ss:$24 sps:$4 sm:$0xff]  }
 0x377   :  { %8408 = vmatpush1.bf16.msra.mxu0 %v13002_v48  ;;  %v13026_v48 = vld [vmem:[%s18366_s4 + $0x128] ss:$24 sps:$4 sm:$0xff]  }
 0x378   :  { %8409 = vmatprep.subr.bf16.mxu0 %v13010_v33  ;;  %v13034_v33 = vld [vmem:[%s18366_s4 + $0x15c] ss:$24 sps:$4 sm:$0xff]  }
 0x379   :  { %8357 = vmatpush1.bf16.msra.mxu1 %v13007_v39  ;;  %v13031_v39 = vld [vmem:[%s18366_s4 + $0x150] ss:$24 sps:$4 sm:$0xff]  }
 0x37a   :  { %8358 = vmatprep.subr.bf16.mxu1 %v13011_v22  ;;  %v13035_v22 = vld [vmem:[%s18366_s4 + $0x184] ss:$24 sps:$4 sm:$0xff]  }
 0x37b   :  { %8410 = vmatpush1.bf16.msra.mxu0 %v13008_v31  ;;  %v13032_v31 = vld [vmem:[%s18366_s4 + $0x158] ss:$24 sps:$4 sm:$0xff]  }
 0x37c   :  { %8411 = vmatprep.subr.bf16.mxu0 %v13016_v23  ;;  %v13040_v23 = vld [vmem:[%s18366_s4 + $0x18c] ss:$24 sps:$4 sm:$0xff]  }
 0x37d   :  { %8359 = vmatpush1.bf16.msra.mxu1 %v13013_v30  ;;  %v13037_v30 = vld [vmem:[%s18366_s4 + $0x180] ss:$24 sps:$4 sm:$0xff]  }
 0x37e   :  { %8360 = vmatprep.subr.bf16.mxu1 %v13017_v42  ;;  %v13041_v42 = vld [vmem:[%s18366_s4 + $0x1b4] ss:$24 sps:$4 sm:$0xff]  }
 0x37f   :  { %8412 = vmatpush1.bf16.msra.mxu0 %v13014_v34  ;;  %v13038_v34 = vld [vmem:[%s18366_s4 + $0x188] ss:$24 sps:$4 sm:$0xff]  }
 0x380   :  { %8413 = vmatprep.subr.bf16.mxu0 %v13022_v49 }
 0x381   :  { %8361 = vmatpush1.bf16.msra.mxu1 %v13019_v40 }
 0x382   :  { %8362 = vmatprep.subr.bf16.mxu1 %v13023_v45 }
 0x383   :  { %8414 = vmatpush1.bf16.msra.mxu0 %v13020_v37 }
 0x384   :  { %8415 = vmatprep.subr.bf16.mxu0 %v13028_v41 }
 0x385   :  { %8363 = vmatpush1.bf16.msra.mxu1 %v13025_v35 }
 0x386   :  { %8364 = vmatprep.subr.bf16.mxu1 %v13029_v25 }
 0x387   :  { %8416 = vmatpush1.bf16.msra.mxu0 %v13026_v48 }
 0x388   :  { %8417 = vmatprep.subr.bf16.mxu0 %v13034_v33 }
 0x389   :  { %8365 = vmatpush1.bf16.msra.mxu1 %v13031_v39 }
 0x38a   :  { %8366 = vmatprep.subr.bf16.mxu1 %v13035_v22 }
 0x38b   :  { %8418 = vmatpush1.bf16.msra.mxu0 %v13032_v31 }
 0x38c   :  { %8419 = vmatprep.subr.bf16.mxu0 %v13040_v23 }
 0x38d   :  { %8367 = vmatpush1.bf16.msra.mxu1 %v13037_v30 }
 0x38e   :  { %8368 = vmatprep.subr.bf16.mxu1 %v13041_v42 }
 0x38f   :  { %8420 = vmatpush1.bf16.msra.mxu0 %v13038_v34 }
 0x3f5   :  { %v7637_v49 = vpop.xlane.xlu0 %7636 }
 0x3f6   :  { %v7648_v40 = vmul.f32 0.00390625, %v7637_v49 }
 0x3f8   :  { %v16946_v37 = vsub.f32 %v16804_v43, %v7648_v40  ;;  %v16949_v45 = vsub.f32 %v16812_v36, %v7648_v40 }
 0x3f9   :  { %v7640_v41 = vpop.xlane.xlu0 %7639 }
 0x3fa   :  { %v7649_v35 = vmul.f32 0.00390625, %v7640_v41  ;;  %v7660_v48 = vmul.f32 %v16946_v37, %v16946_v37  ;;  %v7661_v25 = vmul.f32 %v16949_v45, %v16949_v45 }
 0x3fc   :  { %v16956_v33 = vsub.f32 %v16814_v24, %v7649_v35  ;;  %v16959_v39 = vsub.f32 %v16816_v32, %v7649_v35  ;;  %v7668_v31 = vadd.f32 %v7661_v25, %v7660_v48 }
 0x3fd   :  { %v7643_v22 = vpop.xlane.xlu1 %7642 }
 0x3fe   :  { %v7650_v23 = vmul.f32 0.00390625, %v7643_v22  ;;  %7669 = vadd.xlane.f32.xlu0 %v7668_v31  ;;  %v7662_v30 = vmul.f32 %v16956_v33, %v16956_v33  ;;  %v7663_v34 = vmul.f32 %v16959_v39, %v16959_v39 }
 0x400   :  { %v16966_v42 = vsub.f32 %v16822_v21, %v7650_v23  ;;  %v16969_v49 = vsub.f32 %v16824_v38, %v7650_v23  ;;  %v7671_v40 = vadd.f32 %v7663_v34, %v7662_v30 }
 0x401   :  { %v7646_v41 = vpop.xlane.xlu1 %7645 }
 0x402   :  { %v7651_v35 = vmul.f32 0.00390625, %v7646_v41  ;;  %7672 = vadd.xlane.f32.xlu1 %v7671_v40  ;;  %v7664_v48 = vmul.f32 %v16966_v42, %v16966_v42  ;;  %v7665_v25 = vmul.f32 %v16969_v49, %v16969_v49  ;;  %v13043_v40 = vld [vmem:[%s18366_s4 + $0x1b0] ss:$24 sps:$4 sm:$0xff]   ;;  %v13046_v41 = vld [vmem:[%s18366_s4 + $0x1bc] ss:$24 sps:$4 sm:$0xff]  }
 0x403   :  { %8369 = vmatpush1.bf16.msra.mxu1 %v13043_v40  ;;  %8421 = vmatprep.subr.bf16.mxu0 %v13046_v41  ;;  %v13058_v40 = vld [vmem:[%s18366_s4 + $0x21c] ss:$24 sps:$4 sm:$0xff]   ;;  %v13056_v41 = vld [vmem:[%s18366_s4 + $0x218] ss:$24 sps:$4 sm:$0xff]  }
 0x404   :  { %v16976_v31 = vsub.f32 %v16826_v29, %v7651_v35  ;;  %v16979_v22 = vsub.f32 %v16828_v20, %v7651_v35  ;;  %v7674_v28 = vadd.f32 %v7665_v25, %v7664_v48  ;;  %v13047_v35 = vld [vmem:[%s18366_s4 + $0x1e4] ss:$24 sps:$4 sm:$0xff]   ;;  %v13049_v48 = vld [vmem:[%s18366_s4 + $0x1e0] ss:$24 sps:$4 sm:$0xff]  }
 0x405   :  { %v13052_v25 = vld [vmem:[%s18366_s4 + $0x1ec] ss:$24 sps:$4 sm:$0xff]   ;;  %8370 = vmatprep.subr.bf16.mxu1 %v13047_v35  ;;  %v13061_v35 = vld [vmem:[%s18366_s4 + $0x240] ss:$24 sps:$4 sm:$0xff]  }
 0x406   :  { %7675 = vadd.xlane.f32.xlu0 %v7674_v28  ;;  %v7666_v23 = vmul.f32 %v16976_v31, %v16976_v31  ;;  %v7667_v30 = vmul.f32 %v16979_v22, %v16979_v22  ;;  %v13044_v28 = vld [vmem:[%s18366_s4 + $0x1b8] ss:$24 sps:$4 sm:$0xff]  }
 0x407   :  { %8422 = vmatpush1.bf16.msra.mxu0 %v13044_v28  ;;  %8371 = vmatpush1.bf16.msra.mxu1 %v13049_v48  ;;  %v13059_v28 = vld [vmem:[%s18366_s4 + $0x244] ss:$24 sps:$4 sm:$0xff]  }
 0x408   :  { %v7677_v34 = vadd.f32 %v7667_v30, %v7666_v23  ;;  %v13050_v23 = vld [vmem:[%s18366_s4 + $0x1e8] ss:$24 sps:$4 sm:$0xff]   ;;  %8423 = vmatprep.subr.bf16.mxu0 %v13052_v25  ;;  %v13053_v30 = vld [vmem:[%s18366_s4 + $0x214] ss:$24 sps:$4 sm:$0xff]  }
 0x409   :  { %8372 = vmatprep.subr.bf16.mxu1 %v13053_v30  ;;  %v13064_v48 = vld [vmem:[%s18366_s4 + $0x24c] ss:$24 sps:$4 sm:$0xff]   ;;  %v13062_v25 = vld [vmem:[%s18366_s4 + $0x248] ss:$24 sps:$4 sm:$0xff]  }
 0x40a   :  { %7678 = vadd.xlane.f32.xlu1 %v7677_v34  ;;  %v13055_v34 = vld [vmem:[%s18366_s4 + $0x210] ss:$24 sps:$4 sm:$0xff]  }
 0x40b   :  { %8424 = vmatpush1.bf16.msra.mxu0 %v13050_v23  ;;  %8373 = vmatpush1.bf16.msra.mxu1 %v13055_v34  ;;  %v13065_v23 = vld [vmem:[%s18366_s4 + $0x274] ss:$24 sps:$4 sm:$0xff]   ;;  %v13067_v30 = vld [vmem:[%s18366_s4 + $0x270] ss:$24 sps:$4 sm:$0xff]  }
 0x40c   :  { %8425 = vmatprep.subr.bf16.mxu0 %v13058_v40  ;;  %8374 = vmatprep.subr.bf16.mxu1 %v13059_v28  ;;  %v13070_v34 = vld [vmem:[%s18366_s4 + $0x27c] ss:$24 sps:$4 sm:$0xff]   ;;  %v13068_v40 = vld [vmem:[%s18366_s4 + $0x278] ss:$24 sps:$4 sm:$0xff]  }
 0x40d   :  { %v13073_v28 = vld [vmem:[%s18366_s4 + $0x2a0] ss:$24 sps:$4 sm:$0xff]  }
 0x40f   :  { %8426 = vmatpush1.bf16.msra.mxu0 %v13056_v41  ;;  %8375 = vmatpush1.bf16.msra.mxu1 %v13061_v35  ;;  %v13071_v41 = vld [vmem:[%s18366_s4 + $0x2a4] ss:$24 sps:$4 sm:$0xff]   ;;  %v13074_v35 = vld [vmem:[%s18366_s4 + $0x2a8] ss:$24 sps:$4 sm:$0xff]  }
 0x410   :  { %8427 = vmatprep.subr.bf16.mxu0 %v13064_v48  ;;  %8376 = vmatprep.subr.bf16.mxu1 %v13065_v23  ;;  %v13076_v48 = vld [vmem:[%s18366_s4 + $0x2ac] ss:$24 sps:$4 sm:$0xff]   ;;  %v13082_v23 = vld [vmem:[%s18366_s4 + $0x2dc] ss:$24 sps:$4 sm:$0xff]  }
 0x413   :  { %8428 = vmatpush1.bf16.msra.mxu0 %v13062_v25  ;;  %8377 = vmatpush1.bf16.msra.mxu1 %v13067_v30  ;;  %v13077_v25 = vld [vmem:[%s18366_s4 + $0x2d4] ss:$24 sps:$4 sm:$0xff]   ;;  %v13079_v30 = vld [vmem:[%s18366_s4 + $0x2d0] ss:$24 sps:$4 sm:$0xff]  }
 0x414   :  { %8429 = vmatprep.subr.bf16.mxu0 %v13070_v34  ;;  %8378 = vmatprep.subr.bf16.mxu1 %v13071_v41  ;;  %v13080_v34 = vld [vmem:[%s18366_s4 + $0x2d8] ss:$24 sps:$4 sm:$0xff]  }
 0x417   :  { %8430 = vmatpush1.bf16.msra.mxu0 %v13068_v40  ;;  %8379 = vmatpush1.bf16.msra.mxu1 %v13073_v28  ;;  %v13085_v40 = vld [vmem:[%s18366_s4 + $0x14] ss:$24 sps:$4 sm:$0xff]  }
 0x418   :  { %8431 = vmatprep.subr.bf16.mxu0 %v13076_v48  ;;  %8380 = vmatprep.subr.bf16.mxu1 %v13077_v25 }
 0x41b   :  { %8432 = vmatpush1.bf16.msra.mxu0 %v13074_v35  ;;  %8381 = vmatpush1.bf16.msra.mxu1 %v13079_v30 }
 0x41c   :  { %8433 = vmatprep.subr.bf16.mxu0 %v13082_v23  ;;  %8456 = vmatprep.subr.bf16.mxu1 %v13085_v40  ;;  %v7633_v23 = vld [vmem:[%s18364_s2 + $0x2] sm:$0x3] }
 0x41f   :  { %8434 = vmatpush1.bf16.msra.mxu0 %v13080_v34 }
 0x48b   :  { %v7670_v41 = vpop.xlane.xlu0 %7669 }
 0x48c   :  { %v7680_v28 = vmul.f32 0.00390625, %v7670_v41  ;;  %v7708_v41 = vrot.slane %v7633_v23, %v16794_v46 }
 0x48e   :  { %v7684_v48 = vadd.f32 1e-05, %v7680_v28  ;;  %v7704_v28 = vrot.slane %v7633_v23, %v16788_v47 }
 0x48f   :  { %v7673_v19 = vpop.xlane.xlu1 %7672 }
 0x490   :  { %13371 = vrsqrt.f32 %v7684_v48  ;;  %v7681_v27 = vmul.f32 0.00390625, %v7673_v19  ;;  %v7634_v19 = vld [vmem:[%s18364_s2 + $0x4] sm:$0x3] }
 0x492   :  { %v7685_v35 = vadd.f32 1e-05, %v7681_v27 }
 0x493   :  { %v7676_v25 = vpop.xlane.xlu0 %7675 }
 0x494   :  { %13373 = vrsqrt.f32 %v7685_v35  ;;  %v7682_v18 = vmul.f32 0.00390625, %v7676_v25  ;;  %v7723_v25 = vrot.slane %v7634_v19, %v16788_v47 }
 0x496   :  { %v7686_v26 = vadd.f32 1e-05, %v7682_v18 }
 0x497   :  { %v7679_v9 = vpop.xlane.xlu1 %7678 }
 0x498   :  { %13375 = vrsqrt.f32 %v7686_v26  ;;  %v7683_v30 = vmul.f32 0.00390625, %v7679_v9  ;;  %v7727_v26 = vrot.slane %v7634_v19, %v16794_v46  ;;  %v13083_v19 = vld [vmem:[%s18366_s4 + $0x10] ss:$24 sps:$4 sm:$0xff]  }
 0x49a   :  { %v13372_v34 = vpop.eup %13371  ;;  %v7687_v40 = vadd.f32 1e-05, %v7683_v30 }
 0x49b   :  { %v7693_v27 = vmul.f32 %v13372_v34, %v16949_v45  ;;  %v7692_v18 = vmul.f32 %v13372_v34, %v16946_v37 }
 0x49c   :  { %13377 = vrsqrt.f32 %v7687_v40 }
 0x49d   :  { %v7712_v35 = vmul.f32 %v7708_v41, %v7693_v27  ;;  %v7711_v9 = vmul.f32 %v7704_v28, %v7692_v18 }
 0x49e   :  { %v13374_v48 = vpop.eup %13373 }
 0x49f   :  { %v7695_v30 = vmul.f32 %v13374_v48, %v16959_v39  ;;  %v7694_v23 = vmul.f32 %v13374_v48, %v16956_v33  ;;  %v7731_v7 = vadd.f32 %v7727_v26, %v7712_v35  ;;  %v7730_v15 = vadd.f32 %v7723_v25, %v7711_v9  ;;  %v13088_v33 = vld [vmem:[%s18366_s4 + $0x44] ss:$24 sps:$4 sm:$0xff]   ;;  %v13089_v9 = vld [vmem:[%s18366_s4 + $0x70] ss:$24 sps:$4 sm:$0xff]  }
 0x4a1   :  { %v7714_v17 = vmul.f32 %v7708_v41, %v7695_v30  ;;  %v7713_v8 = vmul.f32 %v7704_v28, %v7694_v23  ;;  %v13100_v23 = vld [vmem:[%s18366_s4 + $0x104] ss:$24 sps:$4 sm:$0xff]  }
 0x4a2   :  { %v13376_v16 = vpop.eup %13375 }
 0x4a3   :  { %v7733_v45 = vadd.f32 %v7727_v26, %v7714_v17  ;;  %v7732_v6 = vadd.f32 %v7723_v25, %v7713_v8  ;;  %v7697_v37 = vmul.f32 %v13376_v16, %v16969_v49  ;;  %v7696_v34 = vmul.f32 %v13376_v16, %v16966_v42  ;;  %v13091_v42 = vld [vmem:[%s18366_s4 + $0x74] ss:$24 sps:$4 sm:$0xff]  }
 0x4a5   :  { %v7835_v40 = vpack.c.bf16 %v7733_v45, %v7731_v7  ;;  %v17088_v27 = vpack.c.bf16 %v7732_v6, %v7730_v15  ;;  %v7716_v18 = vmul.f32 %v7708_v41, %v7697_v37  ;;  %v7715_v16 = vmul.f32 %v7704_v28, %v7696_v34  ;;  %v13086_v6 = vld [vmem:[%s18366_s4 + $0x40] ss:$24 sps:$4 sm:$0xff]   ;;  %v13103_v37 = vld [vmem:[%s18366_s4 + $0x134] ss:$24 sps:$4 sm:$0xff]   ;;  %v13101_v34 = vld [vmem:[%s18366_s4 + $0x130] ss:$24 sps:$4 sm:$0xff]  }
 0x4a6   :  { %v13378_v39 = vpop.eup %13377  ;;  %v13098_v45 = vld [vmem:[%s18366_s4 + $0x100] ss:$24 sps:$4 sm:$0xff]  }
 0x4a7   :  { %8382 = vmatprep.mubr.bf16.mxu1 %v7835_v40  ;;  %8435 = vmatprep.mubr.bf16.mxu0 %v7835_v40  ;;  %v7699_v8 = vmul.f32 %v13378_v39, %v16979_v22  ;;  %v7698_v17 = vmul.f32 %v13378_v39, %v16976_v31  ;;  %v7735_v49 = vadd.f32 %v7727_v26, %v7716_v18  ;;  %v13109_v39 = vld [vmem:[%s18366_s4 + $0x194] ss:$24 sps:$4 sm:$0xff]   ;;  %v13112_v18 = vld [vmem:[%s18366_s4 + $0x1c4] ss:$24 sps:$4 sm:$0xff]  }
 0x4a8   :  { %8383 = vmatmul.mubr.bf16.vlgmr.msra.gmra.mrb[0].mxu1 %v17088_v27  ;;  %8436 = vmatmul.mubr.bf16.vlgmr.msra.gmra.mrb[8].mxu0 %v17088_v27  ;;  %v7734_v31 = vadd.f32 %v7723_v25, %v7715_v16  ;;  %v13113_v16 = vld [vmem:[%s18366_s4 + $0x1f0] ss:$24 sps:$4 sm:$0xff]  }
 0x4a9   :  { %8457 = vmatpush1.bf16.msra.mxu1 %v13083_v19  ;;  %v7718_v7 = vmul.f32 %v7708_v41, %v7699_v8  ;;  %v7717_v15 = vmul.f32 %v7704_v28, %v7698_v17  ;;  %v13094_v41 = vld [vmem:[%s18366_s4 + $0xa4] ss:$24 sps:$4 sm:$0xff]   ;;  %v13092_v28 = vld [vmem:[%s18366_s4 + $0xa0] ss:$24 sps:$4 sm:$0xff]   ;;  %v13115_v17 = vld [vmem:[%s18366_s4 + $0x1f4] ss:$24 sps:$4 sm:$0xff]  }
 0x4aa   :  { %8458 = vmatprep.subr.bf16.mxu1 %v13088_v33  ;;  %v13104_v19 = vld [vmem:[%s18366_s4 + $0x160] ss:$24 sps:$4 sm:$0xff]   ;;  %v13107_v33 = vld [vmem:[%s18366_s4 + $0x190] ss:$24 sps:$4 sm:$0xff]  }
 0x4ab   :  { %v7737_v22 = vadd.f32 %v7727_v26, %v7718_v7  ;;  %v7736_v48 = vadd.f32 %v7723_v25, %v7717_v15  ;;  %v13097_v26 = vld [vmem:[%s18366_s4 + $0xd4] ss:$24 sps:$4 sm:$0xff]   ;;  %v13095_v25 = vld [vmem:[%s18366_s4 + $0xd0] ss:$24 sps:$4 sm:$0xff]   ;;  %v13110_v8 = vld [vmem:[%s18366_s4 + $0x1c0] ss:$24 sps:$4 sm:$0xff]  }
 0x4ac   :  { %v13116_v7 = vld [vmem:[%s18366_s4 + $0x220] ss:$24 sps:$4 sm:$0xff]   ;;  %v13121_v15 = vld [vmem:[%s18366_s4 + $0x254] ss:$24 sps:$4 sm:$0xff]  }
 0x4ad   :  { %8459 = vmatpush1.bf16.msra.mxu1 %v13086_v6  ;;  %v7837_v35 = vpack.c.bf16 %v7737_v22, %v7735_v49  ;;  %v7836_v30 = vpack.c.bf16 %v7736_v48, %v7734_v31  ;;  %v13118_v6 = vld [vmem:[%s18366_s4 + $0x224] ss:$24 sps:$4 sm:$0xff]   ;;  %v13122_v22 = vld [vmem:[%s18366_s4 + $0x280] ss:$24 sps:$4 sm:$0xff]   ;;  %v13127_v31 = vld [vmem:[%s18366_s4 + $0x2b4] ss:$24 sps:$4 sm:$0xff]  }
 0x4ae   :  { %8460 = vmatprep.subr.bf16.mxu1 %v13091_v42  ;;  %v13119_v42 = vld [vmem:[%s18366_s4 + $0x250] ss:$24 sps:$4 sm:$0xff]   ;;  %v13124_v49 = vld [vmem:[%s18366_s4 + $0x284] ss:$24 sps:$4 sm:$0xff]  }
 0x4af   :  { %8392 = vmatprep.mubr.bf16.mxu1 %v7837_v35  ;;  %8445 = vmatprep.mubr.bf16.mxu0 %v7837_v35  ;;  %v13125_v48 = vld [vmem:[%s18366_s4 + $0x2b0] ss:$24 sps:$4 sm:$0xff]  }
 0x4b0   :  { %8393 = vmatmul.mubr.bf16.gmra.mrb[4].mxu1 %v7836_v30  ;;  %8446 = vmatmul.mubr.bf16.gmra.mrb[12].mxu0 %v7836_v30 }
 0x4b1   :  { %8461 = vmatpush1.bf16.msra.mxu1 %v13089_v9  ;;  %8488 = vmatprep.mubr.bf16.mxu1 %v7835_v40  ;;  %v13106_v40 = vld [vmem:[%s18366_s4 + $0x164] ss:$24 sps:$4 sm:$0xff]  }
 0x4b2   :  { %8462 = vmatprep.subr.bf16.mxu1 %v13094_v41  ;;  %v13130_v9 = vld [vmem:[%s18366_s4 + $0x2e4] ss:$24 sps:$4 sm:$0xff]   ;;  %v13128_v41 = vld [vmem:[%s18366_s4 + $0x2e0] ss:$24 sps:$4 sm:$0xff]  }
 0x4b5   :  { %8463 = vmatpush1.bf16.msra.mxu1 %v13092_v28  ;;  %v18376_v28 = vmov 0.0  }
 0x4b6   :  { %8464 = vmatprep.subr.bf16.mxu1 %v13097_v26  ;;  %12854 = vmatprep.subr.bf16.mxu0 %v18376_v28  ;;  %v17189_v26 = vsub.s32 2, %v16785_v44 }
 0x4b7   :  { %12856 = vmatprep.mubr.msk.bf16.mxu0 %vm13523_vm1, %v18376_v28 }
 0x4b9   :  { %8465 = vmatpush1.bf16.msra.mxu1 %v13095_v25  ;;  %v7838_v25 = vld [vmem:[%s18364_s2 + $0x6] sm:$0x3f] }
 0x4ba   :  { %8466 = vmatprep.subr.bf16.mxu1 %v13100_v23  ;;  %v17195_v23 = vsub.s32 3, %v16785_v44 }
 0x4bd   :  { %8467 = vmatpush1.bf16.msra.mxu1 %v13098_v45 }
 0x4be   :  { %8468 = vmatprep.subr.bf16.mxu1 %v13103_v37  ;;  %v7847_v37 = vrot.slane %v7838_v25, %v16794_v46 }
 0x4c1   :  { %8469 = vmatpush1.bf16.msra.mxu1 %v13101_v34  ;;  %v7855_v34 = vrot.slane %v7838_v25, %v17195_v23 }
 0x4c2   :  { %8470 = vmatprep.subr.bf16.mxu1 %v13106_v40 }
 0x4c5   :  { %8471 = vmatpush1.bf16.msra.mxu1 %v13104_v19 }
 0x4c6   :  { %8472 = vmatprep.subr.bf16.mxu1 %v13109_v39 }
 0x4c9   :  { %8473 = vmatpush1.bf16.msra.mxu1 %v13107_v33 }
 0x4ca   :  { %8474 = vmatprep.subr.bf16.mxu1 %v13112_v18 }
 0x4cd   :  { %8475 = vmatpush1.bf16.msra.mxu1 %v13110_v8 }
 0x4ce   :  { %8476 = vmatprep.subr.bf16.mxu1 %v13115_v17 }
 0x4d1   :  { %8477 = vmatpush1.bf16.msra.mxu1 %v13113_v16 }
 0x4d2   :  { %8478 = vmatprep.subr.bf16.mxu1 %v13118_v6 }
 0x4d5   :  { %8479 = vmatpush1.bf16.msra.mxu1 %v13116_v7 }
 0x4d6   :  { %8480 = vmatprep.subr.bf16.mxu1 %v13121_v15 }
 0x4d9   :  { %8481 = vmatpush1.bf16.msra.mxu1 %v13119_v42 }
 0x4da   :  { %8482 = vmatprep.subr.bf16.mxu1 %v13124_v49 }
 0x4dd   :  { %8483 = vmatpush1.bf16.msra.mxu1 %v13122_v22 }
 0x4de   :  { %8484 = vmatprep.subr.bf16.mxu1 %v13127_v31 }
 0x4e1   :  { %8485 = vmatpush1.bf16.msra.mxu1 %v13125_v48 }
 0x4e2   :  { %8486 = vmatprep.subr.bf16.mxu1 %v13130_v9 }
 0x4e5   :  { %8487 = vmatpush1.bf16.msra.mxu1 %v13128_v41 }
 0x4e8   :  { %8489 = vmatmul.mubr.bf16.vlgmr.msra.gmra.mrb[8].mxu1 %v17088_v27  ;;  %v7843_v27 = vrot.slane %v7838_v25, %v16788_v47 }
 0x4e9   :  { %8498 = vmatprep.mubr.bf16.mxu1 %v7837_v35  ;;  %v7851_v35 = vrot.slane %v7838_v25, %v17189_v26 }
 0x4f0   :  { %8499 = vmatmul.mubr.bf16.gmra.mrb[12].mxu1 %v7836_v30 }
 0x57b   :  { %v8384_v30 = vpop.f32.mrb[0].mxu1  ;;  %v8437_v45 = vpop.f32.mrb[8].mxu0 }
 0x57c   :  { %v8386_v40 = vpop.f32.mrb[1].mxu1  ;;  %v8439_v19 = vpop.f32.mrb[9].mxu0  ;;  %v8385_v18 = vadd.f32 %v8384_v30, %v7843_v27  ;;  %v8438_v8 = vadd.f32 %v8437_v45, %v7851_v35 }
 0x57d   :  { %v8388_v39 = vpop.f32.mrb[2].mxu1  ;;  %v8441_v33 = vpop.f32.mrb[10].mxu0  ;;  %v17201_v15 = vadd.f32 %v8386_v40, %v7847_v37  ;;  %v17203_v42 = vadd.f32 %v8439_v19, %v7855_v34 }
 0x57e   :  { %v8389_v17 = vadd.f32 %v8388_v39, %v7843_v27  ;;  %v8442_v16 = vadd.f32 %v8441_v33, %v7851_v35  ;;  %v8390_v6 = vpop.f32.mrb[3].mxu1  ;;  %v8443_v7 = vpop.f32.mrb[11].mxu0 }
 0x57f   :  { %v17205_v49 = vadd.f32 %v8390_v6, %v7847_v37  ;;  %v17207_v22 = vadd.f32 %v8443_v7, %v7855_v34 }
 0x580   :  { %v8509_v31 = vpack.c.bf16 %v8389_v17, %v8385_v18  ;;  %v8511_v48 = vpack.c.bf16 %v8442_v16, %v8438_v8 }
 0x582   :  { %12855 = vmatpush3.bf16.xpose.msra.mxu0 %v8511_v48 }
 0x583   :  { %v8394_v30 = vpop.f32.mrb[4].mxu1  ;;  %v8447_v45 = vpop.f32.mrb[12].mxu0  ;;  %12860 = vmatprep.subr.bf16.mxu0 %v18376_v28 }
 0x584   :  { %v8396_v40 = vpop.f32.mrb[5].mxu1  ;;  %v8449_v19 = vpop.f32.mrb[13].mxu0  ;;  %v8395_v6 = vadd.f32 %v8394_v30, %v7843_v27  ;;  %v8448_v7 = vadd.f32 %v8447_v45, %v7851_v35 }
 0x585   :  { %v8398_v39 = vpop.f32.mrb[6].mxu1  ;;  %v8451_v33 = vpop.f32.mrb[14].mxu0  ;;  %v17214_v16 = vadd.f32 %v8396_v40, %v7847_v37  ;;  %v17216_v9 = vadd.f32 %v8449_v19, %v7855_v34 }
 0x586   :  { %v8399_v14 = vadd.f32 %v8398_v39, %v7843_v27  ;;  %v8452_v18 = vadd.f32 %v8451_v33, %v7851_v35  ;;  %v8400_v8 = vpop.f32.mrb[7].mxu1  ;;  %v8453_v17 = vpop.f32.mrb[15].mxu0  ;;  %v18434_v27 = vmov 0.0   ;;  %v17235_v35 = vsub.s32 5, %v16785_v44 }
 0x587   :  { %v17218_v41 = vadd.f32 %v8400_v8, %v7847_v37  ;;  %v17220_v48 = vadd.f32 %v8453_v17, %v7855_v34 }
 0x588   :  { %v8510_v5 = vpack.c.bf16 %v8399_v14, %v8395_v6  ;;  %v8512_v28 = vpack.c.bf16 %v8452_v18, %v8448_v7  ;;  %v17232_v14 = vsub.s32 4, %v16785_v44 }
 0x589   :  { %12857 = vmatmul.mubr.bf16.vlgmr.msra.gmra.mrb[16].mxu0 %v8509_v31 }
 0x58a   :  { %12861 = vmatpush3.bf16.xpose.msra.mxu0 %v8512_v28  ;;  %12862 = vmatprep.mubr.msk.bf16.mxu0 %vm13523_vm1, %v18434_v27  ;;  %v7859_v37 = vrot.slane %v7838_v25, %v17232_v14  ;;  %v7863_v28 = vrot.slane %v7838_v25, %v17235_v35 }
 0x58b   :  { %12866 = vmatprep.subr.bf16.mxu0 %v18434_v27 }
 0x591   :  { %12863 = vmatmul.mubr.bf16.vlgmr.msra.gmra.mrb[20].mxu0 %v8510_v5 }
 0x592   :  { %12868 = vmatprep.mubr.msk.bf16.mxu0 %vm13523_vm1, %v18434_v27 }
 0x5bb   :  { %v8490_v34 = vpop.f32.mrb[8].mxu1 }
 0x5bc   :  { %v8492_v31 = vpop.f32.mrb[9].mxu1  ;;  %v8491_v40 = vadd.f32 %v8490_v34, %v7859_v37 }
 0x5bd   :  { %v8494_v45 = vpop.f32.mrb[10].mxu1  ;;  %v17239_v5 = vadd.f32 %v8492_v31, %v7863_v28 }
 0x5be   :  { %v8495_v19 = vadd.f32 %v8494_v45, %v7859_v37  ;;  %v8496_v39 = vpop.f32.mrb[11].mxu1 }
 0x5bf   :  { %v17241_v33 = vadd.f32 %v8496_v39, %v7863_v28 }
 0x5c0   :  { %v8646_v6 = vpack.c.bf16 %v8495_v19, %v8491_v40 }
 0x5c2   :  { %12867 = vmatpush3.bf16.msra.mxu0 %v8646_v6 }
 0x5c3   :  { %v8500_v18 = vpop.f32.mrb[12].mxu1  ;;  %12872 = vmatprep.subr.bf16.mxu0 %v18434_v27 }
 0x5c4   :  { %v17246_v8 = vadd.f32 %v8500_v18, %v7859_v37  ;;  %v8502_v25 = vpop.f32.mrb[13].mxu1 }
 0x5c5   :  { %v17248_v17 = vadd.f32 %v8502_v25, %v7863_v28  ;;  %v8504_v34 = vpop.f32.mrb[14].mxu1 }
 0x5c6   :  { %v17250_v45 = vadd.f32 %v8504_v34, %v7859_v37  ;;  %v8506_v31 = vpop.f32.mrb[15].mxu1 }
 0x5c7   :  { %v17252_v13 = vadd.f32 %v8506_v31, %v7863_v28 }
 0x65c   :  { %v8547_v39 = vpop.f32.mrb[16].mxu0 }
 0x65d   :  { %v8595_v6 = vmul.f32 0.088388346, %v8547_v39  ;;  %v12858_v18 = vpop.f32.mrb[17].mxu0 }
 0x65e   :  { %v8550_v7 = vpop.f32.mrb[18].mxu0 }
 0x65f   :  { %v8596_v30 = vmul.f32 0.088388346, %v8550_v7  ;;  %v12859_v25 = vpop.f32.mrb[19].mxu0  ;;  %v8600_v4 = vsel %vm8599_vm2, %v8595_v6, -inf }
 0x660   :  { %8601 = vmax.xlane.f32.xlu0 %v8600_v4 }
 0x661   :  { %v8603_v37 = vsel %vm8599_vm2, %v8596_v30, -inf }
 0x662   :  { %8604 = vmax.xlane.f32.xlu1 %v8603_v37 }
 0x664   :  { %v8588_v28 = vpop.f32.mrb[20].mxu0 }
 0x665   :  { %v8597_v34 = vmul.f32 0.088388346, %v8588_v28  ;;  %v12864_v31 = vpop.f32.mrb[21].mxu0 }
 0x666   :  { %v8591_v40 = vpop.f32.mrb[22].mxu0 }
 0x667   :  { %v8598_v12 = vmul.f32 0.088388346, %v8591_v40  ;;  %v12865_v3 = vpop.f32.mrb[23].mxu0  ;;  %v8606_v19 = vsel %vm8599_vm2, %v8597_v34, -inf }
 0x668   :  { %8607 = vmax.xlane.f32.xlu0 %v8606_v19 }
 0x669   :  { %v8609_v39 = vsel %vm8599_vm2, %v8598_v12, -inf }
 0x66a   :  { %8610 = vmax.xlane.f32.xlu1 %v8609_v39 }
 0x6ed   :  { %v8602_v7 = vpop.xlane.xlu0 %8601 }
 0x6ee   :  { %v8612_v18 = vsub.f32 %v8595_v6, %v8602_v7 }
 0x6ef   :  { %v8605_v25 = vpop.xlane.xlu1 %8604 }
 0x6f0   :  { %v8616_v11 = vmul.f32 1.442695, %v8612_v18  ;;  %v8613_v4 = vsub.f32 %v8596_v30, %v8605_v25 }
 0x6f2   :  { %13379 = vpow2.f32 %v8616_v11  ;;  %v8618_v2 = vmul.f32 1.442695, %v8613_v4 }
 0x6f4   :  { %13381 = vpow2.f32 %v8618_v2 }
 0x6f5   :  { %v8608_v37 = vpop.xlane.xlu0 %8607 }
 0x6f6   :  { %v8614_v28 = vsub.f32 %v8597_v34, %v8608_v37 }
 0x6f7   :  { %v8611_v31 = vpop.xlane.xlu1 %8610 }
 0x6f8   :  { %v8620_v10 = vmul.f32 1.442695, %v8614_v28  ;;  %v8615_v40 = vsub.f32 %v8598_v12, %v8611_v31 }
 0x6fa   :  { %13383 = vpow2.f32 %v8620_v10  ;;  %v8622_v3 = vmul.f32 1.442695, %v8615_v40 }
 0x6fc   :  { %v13380_v57 = vpop.eup %13379  ;;  %13385 = vpow2.f32 %v8622_v3  ;;  %v18435_v3 = vpack.c.bf16 %v17250_v45, %v17246_v8  ;;  %v18437_v8 = vpack.c.bf16 %v17205_v49, %v17201_v15  ;;  %v18438_v45 = vpack.c.bf16 %v17220_v48, %v17216_v9 }
 0x6fd   :  { %v8624_v19 = vsel %vm8599_vm2, %v13380_v57, 0.0 }
 0x6fe   :  { %v13382_v39 = vpop.eup %13381  ;;  %8625 = vadd.xlane.f32.xlu0 %v8624_v19 }
 0x6ff   :  { %v8627_v6 = vsel %vm8599_vm2, %v13382_v39, 0.0 }
 0x700   :  { %8628 = vadd.xlane.f32.xlu1 %v8627_v6 }
 0x704   :  { %v13384_v30 = vpop.eup %13383 }
 0x705   :  { %v8630_v11 = vsel %vm8599_vm2, %v13384_v30, 0.0 }
 0x706   :  { %v13386_v2 = vpop.eup %13385  ;;  %8631 = vadd.xlane.f32.xlu0 %v8630_v11 }
 0x707   :  { %v8633_v34 = vsel %vm8599_vm2, %v13386_v2, 0.0 }
 0x708   :  { %8634 = vadd.xlane.f32.xlu1 %v8633_v34 }
 0x78b   :  { %v8626_v12 = vpop.xlane.xlu0 %8625 }
 0x78c   :  { %13387 = vrcp.f32 %v8626_v12 }
 0x78d   :  { %v8629_v10 = vpop.xlane.xlu1 %8628 }
 0x78e   :  { %13389 = vrcp.f32 %v8629_v10 }
 0x793   :  { %v8632_v7 = vpop.xlane.xlu0 %8631 }
 0x794   :  { %13391 = vrcp.f32 %v8632_v7 }
 0x795   :  { %v8635_v18 = vpop.xlane.xlu1 %8634 }
 0x796   :  { %v13388_v25 = vpop.eup %13387  ;;  %13393 = vrcp.f32 %v8635_v18 }
 0x797   :  { %v8637_v37 = vmul.f32 %v13388_v25, %v13380_v57  ;;  %v18436_v57 = vpack.c.bf16 %v17207_v22, %v17203_v42  ;;  %v18440_v42 = vpack.c.bf16 %v17241_v33, %v17239_v5 }
 0x798   :  { %v13390_v4 = vpop.eup %13389 }
 0x799   :  { %v8639_v28 = vmul.f32 %v13390_v4, %v13382_v39  ;;  %v18439_v39 = vpack.c.bf16 %v17218_v41, %v17214_v16 }
 0x79b   :  { %v8644_v31 = vpack.c.bf16 %v8639_v28, %v8637_v37 }
 0x79d   :  { %12869 = vmatmul.mubr.msk.bf16.vlgmr.msra.gmra.mrb[24].mxu0 %vm8599_vm2, %v8644_v31 }
 0x79e   :  { %v13392_v40 = vpop.eup %13391  ;;  %12873 = vmatpush3.bf16.msra.mxu0 %v18435_v3  ;;  %12874 = vmatprep.mubr.msk.bf16.mxu0 %vm13523_vm1, %v18434_v27 }
 0x79f   :  { %12878 = vmatprep.subr.bf16.mxu0 %v18434_v27  ;;  %v8641_v6 = vmul.f32 %v13392_v40, %v13384_v30 }
 0x7a0   :  { %v13394_v19 = vpop.eup %13393 }
 0x7a1   :  { %v8643_v11 = vmul.f32 %v13394_v19, %v13386_v2 }
 0x7a3   :  { %v8645_v34 = vpack.c.bf16 %v8643_v11, %v8641_v6 }
 0x7a5   :  { %12875 = vmatmul.mubr.msk.bf16.vlgmr.msra.gmra.mrb[28].mxu0 %vm8599_vm2, %v8645_v34 }
 0x7a6   :  { %12880 = vmatprep.mubr.msk.bf16.mxu0 %vm13523_vm1, %v18434_v27 }
 0x7a7   :  { %12879 = vmatpush3.bf16.xpose.msra.mxu0 %v18436_v57 }
 0x7a8   :  { %12884 = vmatprep.subr.bf16.mxu0 %v18434_v27 }
 0x7ae   :  { %12881 = vmatmul.mubr.bf16.vlgmr.msra.gmra.mrb[32].mxu0 %v18437_v8 }
 0x7af   :  { %12885 = vmatpush3.bf16.xpose.msra.mxu0 %v18438_v45  ;;  %12886 = vmatprep.mubr.msk.bf16.mxu0 %vm13523_vm1, %v18434_v27 }
 0x7b0   :  { %12890 = vmatprep.subr.bf16.mxu0 %v18434_v27 }
 0x7b6   :  { %12887 = vmatmul.mubr.bf16.vlgmr.msra.gmra.mrb[36].mxu0 %v18439_v39 }
 0x7b7   :  { %12891 = vmatpush3.bf16.msra.mxu0 %v18440_v42  ;;  %12892 = vmatprep.mubr.msk.bf16.mxu0 %vm13523_vm1, %v18434_v27 }
 0x7b8   :  { %12896 = vmatprep.subr.bf16.mxu0 %v18434_v27 }
 0x870   :  { %v17298_v15 = vpop.f32.mrb[24].mxu0 }
 0x871   :  { %v12870_v49 = vpop.f32.mrb[25].mxu0 }
 0x872   :  { %v17300_v22 = vpop.f32.mrb[26].mxu0 }
 0x873   :  { %v8994_v9 = vpack.c.bf16 %v17300_v22, %v17298_v15  ;;  %v12871_v48 = vpop.f32.mrb[27].mxu0 }
 0x878   :  { %v17304_v41 = vpop.f32.mrb[28].mxu0 }
 0x879   :  { %v12876_v16 = vpop.f32.mrb[29].mxu0 }
 0x87a   :  { %v17306_v30 = vpop.f32.mrb[30].mxu0 }
 0x87b   :  { %v8996_v5 = vpack.c.bf16 %v17306_v30, %v17304_v41  ;;  %v12877_v33 = vpop.f32.mrb[31].mxu0 }
 0x881   :  { %v8774_v2 = vpop.f32.mrb[32].mxu0 }
 0x882   :  { %v8822_v12 = vmul.f32 0.088388346, %v8774_v2  ;;  %v12882_v10 = vpop.f32.mrb[33].mxu0 }
 0x883   :  { %v8777_v7 = vpop.f32.mrb[34].mxu0 }
 0x884   :  { %v8823_v18 = vmul.f32 0.088388346, %v8777_v7  ;;  %v12883_v25 = vpop.f32.mrb[35].mxu0  ;;  %v8826_v4 = vsel %vm8599_vm2, %v8822_v12, -inf }
 0x885   :  { %8827 = vmax.xlane.f32.xlu0 %v8826_v4 }
 0x886   :  { %v8829_v37 = vsel %vm8599_vm2, %v8823_v18, -inf }
 0x887   :  { %8830 = vmax.xlane.f32.xlu1 %v8829_v37 }
 0x889   :  { %v8815_v28 = vpop.f32.mrb[36].mxu0 }
 0x88a   :  { %v8824_v31 = vmul.f32 0.088388346, %v8815_v28  ;;  %v12888_v40 = vpop.f32.mrb[37].mxu0 }
 0x88b   :  { %v8818_v3 = vpop.f32.mrb[38].mxu0 }
 0x88c   :  { %v8825_v19 = vmul.f32 0.088388346, %v8818_v3  ;;  %v12889_v6 = vpop.f32.mrb[39].mxu0  ;;  %v8832_v11 = vsel %vm8599_vm2, %v8824_v31, -inf }
 0x88d   :  { %8833 = vmax.xlane.f32.xlu0 %v8832_v11 }
 0x88e   :  { %v8835_v34 = vsel %vm8599_vm2, %v8825_v19, -inf }
 0x88f   :  { %8836 = vmax.xlane.f32.xlu1 %v8835_v34 }
 0x912   :  { %v8828_v57 = vpop.xlane.xlu0 %8827 }
 0x913   :  { %v8838_v8 = vsub.f32 %v8822_v12, %v8828_v57 }
 0x914   :  { %v8831_v45 = vpop.xlane.xlu1 %8830 }
 0x915   :  { %v8842_v39 = vmul.f32 1.442695, %v8838_v8  ;;  %v8839_v42 = vsub.f32 %v8823_v18, %v8831_v45 }
 0x917   :  { %13395 = vpow2.f32 %v8842_v39  ;;  %v8844_v49 = vmul.f32 1.442695, %v8839_v42  ;;  %v13133_v42 = vld [vmem:[%s18367_s5 + $0x4] ss:$8 sps:$4 sm:$0xff]  }
 0x919   :  { %13397 = vpow2.f32 %v8844_v49 }
 0x91a   :  { %v8834_v48 = vpop.xlane.xlu0 %8833 }
 0x91b   :  { %v8840_v16 = vsub.f32 %v8824_v31, %v8834_v48  ;;  %v18441_v48 = vpack.c.bf16 %v17252_v13, %v17248_v17  ;;  %v13134_v13 = vld [vmem:[%s18367_s5 + $0x10] ss:$8 sps:$4 sm:$0xff]   ;;  %v13139_v17 = vld [vmem:[%s18367_s5 + $0x24] ss:$8 sps:$4 sm:$0xff]  }
 0x91c   :  { %v8837_v33 = vpop.xlane.xlu1 %8836 }
 0x91d   :  { %v8846_v2 = vmul.f32 1.442695, %v8840_v16  ;;  %v8841_v10 = vsub.f32 %v8825_v19, %v8837_v33 }
 0x91f   :  { %13399 = vpow2.f32 %v8846_v2  ;;  %v8848_v7 = vmul.f32 1.442695, %v8841_v10  ;;  %v13131_v10 = vld [vmem:[%s18367_s5] ss:$8 sps:$4 sm:$0xff]  }
 0x921   :  { %v13396_v25 = vpop.eup %13395  ;;  %13401 = vpow2.f32 %v8848_v7 }
 0x922   :  { %v8850_v4 = vsel %vm8599_vm2, %v13396_v25, 0.0 }
 0x923   :  { %v13398_v37 = vpop.eup %13397  ;;  %8851 = vadd.xlane.f32.xlu0 %v8850_v4  ;;  %v13137_v4 = vld [vmem:[%s18367_s5 + $0x20] ss:$8 sps:$4 sm:$0xff]  }
 0x924   :  { %v8853_v12 = vsel %vm8599_vm2, %v13398_v37, 0.0 }
 0x925   :  { %8854 = vadd.xlane.f32.xlu1 %v8853_v12  ;;  %v13140_v12 = vld [vmem:[%s18367_s5 + $0x30] ss:$8 sps:$4 sm:$0xff]  }
 0x929   :  { %v13400_v18 = vpop.eup %13399 }
 0x92a   :  { %v8856_v28 = vsel %vm8599_vm2, %v13400_v18, 0.0 }
 0x92b   :  { %v13402_v40 = vpop.eup %13401  ;;  %8857 = vadd.xlane.f32.xlu0 %v8856_v28  ;;  %v13143_v28 = vld [vmem:[%s18367_s5 + $0x40] ss:$8 sps:$4 sm:$0xff]  }
 0x92c   :  { %v8859_v31 = vsel %vm8599_vm2, %v13402_v40, 0.0 }
 0x92d   :  { %8860 = vadd.xlane.f32.xlu1 %v8859_v31  ;;  %v13146_v31 = vld [vmem:[%s18367_s5 + $0x50] ss:$8 sps:$4 sm:$0xff]  }
 0x9b0   :  { %v8852_v3 = vpop.xlane.xlu0 %8851 }
 0x9b1   :  { %13403 = vrcp.f32 %v8852_v3  ;;  %v13151_v3 = vld [vmem:[%s18367_s5 + $0x64] ss:$8 sps:$4 sm:$0xff]  }
 0x9b2   :  { %v8855_v19 = vpop.xlane.xlu1 %8854 }
 0x9b3   :  { %13405 = vrcp.f32 %v8855_v19  ;;  %v13149_v19 = vld [vmem:[%s18367_s5 + $0x60] ss:$8 sps:$4 sm:$0xff]  }
 0x9b8   :  { %v8858_v6 = vpop.xlane.xlu0 %8857 }
 0x9b9   :  { %13407 = vrcp.f32 %v8858_v6  ;;  %v13154_v6 = vld [vmem:[%s18367_s5 + $0x74] ss:$8 sps:$4 sm:$0xff]  }
 0x9ba   :  { %v8861_v11 = vpop.xlane.xlu1 %8860 }
 0x9bb   :  { %v13404_v34 = vpop.eup %13403  ;;  %13409 = vrcp.f32 %v8861_v11  ;;  %v13152_v11 = vld [vmem:[%s18367_s5 + $0x70] ss:$8 sps:$4 sm:$0xff]  }
 0x9bc   :  { %v8863_v8 = vmul.f32 %v13404_v34, %v13396_v25  ;;  %v13136_v25 = vld [vmem:[%s18367_s5 + $0x14] ss:$8 sps:$4 sm:$0xff]   ;;  %v13157_v34 = vld [vmem:[%s18367_s5 + $0x84] ss:$8 sps:$4 sm:$0xff]  }
 0x9bd   :  { %v13406_v57 = vpop.eup %13405 }
 0x9be   :  { %v8865_v45 = vmul.f32 %v13406_v57, %v13398_v37  ;;  %v13142_v37 = vld [vmem:[%s18367_s5 + $0x34] ss:$8 sps:$4 sm:$0xff]   ;;  %v13155_v57 = vld [vmem:[%s18367_s5 + $0x80] ss:$8 sps:$4 sm:$0xff]  }
 0x9c0   :  { %v8870_v39 = vpack.c.bf16 %v8865_v45, %v8863_v8  ;;  %v13160_v8 = vld [vmem:[%s18367_s5 + $0x94] ss:$8 sps:$4 sm:$0xff]   ;;  %v13158_v45 = vld [vmem:[%s18367_s5 + $0x90] ss:$8 sps:$4 sm:$0xff]  }
 0x9c2   :  { %12893 = vmatmul.mubr.msk.bf16.vlgmr.msra.gmra.mrb[40].mxu0 %vm8599_vm2, %v8870_v39  ;;  %v13163_v39 = vld [vmem:[%s18367_s5 + $0xa4] ss:$8 sps:$4 sm:$0xff]  }
 0x9c3   :  { %v13408_v49 = vpop.eup %13407  ;;  %12897 = vmatpush3.bf16.msra.mxu0 %v18441_v48  ;;  %12898 = vmatprep.mubr.msk.bf16.mxu0 %vm13523_vm1, %v18434_v27  ;;  %v13164_v48 = vld [vmem:[%s18367_s5 + $0xb0] ss:$8 sps:$4 sm:$0xff]  }
 0x9c4   :  { %9158 = vmatprep.subr.bf16.mxu0 %v13133_v42  ;;  %v8867_v33 = vmul.f32 %v13408_v49, %v13400_v18  ;;  %v13145_v18 = vld [vmem:[%s18367_s5 + $0x44] ss:$8 sps:$4 sm:$0xff]   ;;  %v13161_v42 = vld [vmem:[%s18367_s5 + $0xa0] ss:$8 sps:$4 sm:$0xff]   ;;  %v13166_v49 = vld [vmem:[%s18367_s5 + $0xb4] ss:$8 sps:$4 sm:$0xff]  }
 0x9c5   :  { %v13410_v16 = vpop.eup %13409 }
 0x9c6   :  { %v8869_v2 = vmul.f32 %v13410_v16, %v13402_v40  ;;  %v13148_v40 = vld [vmem:[%s18367_s5 + $0x54] ss:$8 sps:$4 sm:$0xff]   ;;  %v13169_v16 = vld [vmem:[%s18367_s5 + $0xc4] ss:$8 sps:$4 sm:$0xff]  }
 0x9c8   :  { %v8871_v7 = vpack.c.bf16 %v8869_v2, %v8867_v33  ;;  %v13167_v33 = vld [vmem:[%s18367_s5 + $0xc0] ss:$8 sps:$4 sm:$0xff]   ;;  %v13172_v2 = vld [vmem:[%s18367_s5 + $0xd4] ss:$8 sps:$4 sm:$0xff]  }
 0x9ca   :  { %12899 = vmatmul.mubr.msk.bf16.vlgmr.msra.gmra.mrb[44].mxu0 %vm8599_vm2, %v8871_v7  ;;  %v13175_v7 = vld [vmem:[%s18367_s5 + $0xe4] ss:$8 sps:$4 sm:$0xff]  }
 0x9cb   :  { %9159 = vmatpush1.bf16.msra.mxu0 %v13131_v10  ;;  %v13170_v10 = vld [vmem:[%s18367_s5 + $0xd0] ss:$8 sps:$4 sm:$0xff]  }
 0x9cc   :  { %9160 = vmatprep.subr.bf16.mxu0 %v13136_v25  ;;  %v13173_v25 = vld [vmem:[%s18367_s5 + $0xe0] ss:$8 sps:$4 sm:$0xff]  }
 0x9cf   :  { %9161 = vmatpush1.bf16.msra.mxu0 %v13134_v13  ;;  %v13178_v13 = vld [vmem:[%s18367_s5 + $0xf4] ss:$8 sps:$4 sm:$0xff]  }
 0x9d0   :  { %9162 = vmatprep.subr.bf16.mxu0 %v13139_v17  ;;  %v13176_v17 = vld [vmem:[%s18367_s5 + $0xf0] ss:$8 sps:$4 sm:$0xff]  }
 0x9d3   :  { %9163 = vmatpush1.bf16.msra.mxu0 %v13137_v4 }
 0x9d4   :  { %9164 = vmatprep.subr.bf16.mxu0 %v13142_v37 }
 0x9d7   :  { %9165 = vmatpush1.bf16.msra.mxu0 %v13140_v12 }
 0x9d8   :  { %9166 = vmatprep.subr.bf16.mxu0 %v13145_v18 }
 0x9db   :  { %9167 = vmatpush1.bf16.msra.mxu0 %v13143_v28 }
 0x9dc   :  { %9168 = vmatprep.subr.bf16.mxu0 %v13148_v40 }
 0x9df   :  { %9169 = vmatpush1.bf16.msra.mxu0 %v13146_v31 }
 0x9e0   :  { %9170 = vmatprep.subr.bf16.mxu0 %v13151_v3 }
 0x9e3   :  { %9171 = vmatpush1.bf16.msra.mxu0 %v13149_v19 }
 0x9e4   :  { %9172 = vmatprep.subr.bf16.mxu0 %v13154_v6 }
 0x9e7   :  { %9173 = vmatpush1.bf16.msra.mxu0 %v13152_v11  ;;  %v9219_v11 = vld [vmem:[%s18364_s2 + $0xc] sm:$0x3] }
 0x9e8   :  { %9174 = vmatprep.subr.bf16.mxu0 %v13157_v34  ;;  %v9224_v34 = vrot.slane %v9219_v11, %v16788_v47  ;;  %v9228_v15 = vrot.slane %v9219_v11, %v16794_v46  ;;  %v13191_v11 = vld [vmem:[%s18368_s6 + $0x40] ss:$16 sps:$4 sm:$0xff]  }
 0x9eb   :  { %9175 = vmatpush1.bf16.msra.mxu0 %v13155_v57 }
 0x9ec   :  { %9176 = vmatprep.subr.bf16.mxu0 %v13160_v8 }
 0x9ef   :  { %9177 = vmatpush1.bf16.msra.mxu0 %v13158_v45 }
 0x9f0   :  { %9178 = vmatprep.subr.bf16.mxu0 %v13163_v39 }
 0x9f3   :  { %9179 = vmatpush1.bf16.msra.mxu0 %v13161_v42 }
 0x9f4   :  { %9180 = vmatprep.subr.bf16.mxu0 %v13166_v49 }
 0x9f7   :  { %9181 = vmatpush1.bf16.msra.mxu0 %v13164_v48 }
 0x9f8   :  { %9182 = vmatprep.subr.bf16.mxu0 %v13169_v16 }
 0x9fb   :  { %9183 = vmatpush1.bf16.msra.mxu0 %v13167_v33 }
 0x9fc   :  { %9184 = vmatprep.subr.bf16.mxu0 %v13172_v2 }
 0x9ff   :  { %9185 = vmatpush1.bf16.msra.mxu0 %v13170_v10 }
 0xa00   :  { %9186 = vmatprep.subr.bf16.mxu0 %v13175_v7 }
 0xa03   :  { %9187 = vmatpush1.bf16.msra.mxu0 %v13173_v25 }
 0xa04   :  { %9188 = vmatprep.subr.bf16.mxu0 %v13178_v13 }
 0xa07   :  { %9189 = vmatpush1.bf16.msra.mxu0 %v13176_v17 }
 0xa95   :  { %v8911_v4 = vpop.f32.mrb[40].mxu0 }
 0xa96   :  { %v12894_v37 = vpop.f32.mrb[41].mxu0 }
 0xa97   :  { %v8914_v12 = vpop.f32.mrb[42].mxu0 }
 0xa98   :  { %v8995_v18 = vpack.c.bf16 %v8914_v12, %v8911_v4  ;;  %v12895_v28 = vpop.f32.mrb[43].mxu0  ;;  %v13182_v12 = vld [vmem:[%s18368_s6 + $0x8] ss:$16 sps:$4 sm:$0xff]  }
 0xa99   :  { %v13187_v28 = vld [vmem:[%s18368_s6 + $0x24] ss:$16 sps:$4 sm:$0xff]  }
 0xa9a   :  { %9190 = vmatprep.mubr.bf16.mxu0 %v8995_v18  ;;  %v13184_v18 = vld [vmem:[%s18368_s6 + $0xc] ss:$16 sps:$4 sm:$0xff]  }
 0xa9b   :  { %9191 = vmatmul.mubr.bf16.vlgmr.msra.gmra.mrb[48].mxu0 %v8994_v9  ;;  %9806 = vmatprep.subr.bf16.mxu0 %v13184_v18  ;;  %v13235_v18 = vld [vmem:[%s18368_s6 + $0x124] ss:$16 sps:$4 sm:$0xff]  }
 0xa9c   :  { %9807 = vmatpush1.bf16.msra.mxu0 %v13182_v12  ;;  %v13230_v12 = vld [vmem:[%s18368_s6 + $0x108] ss:$16 sps:$4 sm:$0xff]  }
 0xa9d   :  { %v8955_v40 = vpop.f32.mrb[44].mxu0 }
 0xa9e   :  { %v12900_v31 = vpop.f32.mrb[45].mxu0 }
 0xa9f   :  { %v8958_v3 = vpop.f32.mrb[46].mxu0  ;;  %v13185_v31 = vld [vmem:[%s18368_s6 + $0x20] ss:$16 sps:$4 sm:$0xff]  }
 0xaa0   :  { %v8997_v19 = vpack.c.bf16 %v8958_v3, %v8955_v40  ;;  %v12901_v6 = vpop.f32.mrb[47].mxu0  ;;  %v13190_v40 = vld [vmem:[%s18368_s6 + $0x2c] ss:$16 sps:$4 sm:$0xff]   ;;  %v13188_v3 = vld [vmem:[%s18368_s6 + $0x28] ss:$16 sps:$4 sm:$0xff]  }
 0xaa1   :  { %9808 = vmatprep.subr.bf16.mxu0 %v13190_v40  ;;  %v13196_v6 = vld [vmem:[%s18368_s6 + $0x4c] ss:$16 sps:$4 sm:$0xff]   ;;  %v13233_v40 = vld [vmem:[%s18368_s6 + $0x120] ss:$16 sps:$4 sm:$0xff]  }
 0xaa2   :  { %9200 = vmatprep.mubr.bf16.mxu0 %v8997_v19  ;;  %v13193_v19 = vld [vmem:[%s18368_s6 + $0x44] ss:$16 sps:$4 sm:$0xff]   ;;  %9809 = vmatpush1.bf16.msra.mxu0 %v13188_v3 }
 0xaa3   :  { %9201 = vmatmul.mubr.bf16.gmra.mrb[52].mxu0 %v8996_v5  ;;  %9810 = vmatprep.subr.bf16.mxu0 %v13196_v6 }
 0xb6e   :  { %v9192_v57 = vpop.f32.mrb[48].mxu0 }
 0xb6f   :  { %v9211_v22 = vadd.f32 %v9192_v57, %v16804_v43  ;;  %v9194_v9 = vpop.f32.mrb[49].mxu0  ;;  %v13199_v57 = vld [vmem:[%s18368_s6 + $0x64] ss:$16 sps:$4 sm:$0xff]  }
 0xb70   :  { %v9212_v8 = vadd.f32 %v9194_v9, %v16812_v36  ;;  %v9196_v45 = vpop.f32.mrb[50].mxu0  ;;  %v13200_v9 = vld [vmem:[%s18368_s6 + $0x68] ss:$16 sps:$4 sm:$0xff]  }
 0xb71   :  { %v17434_v39 = vadd.f32 %v9224_v34, %v9211_v22  ;;  %v9213_v41 = vadd.f32 %v9196_v45, %v16814_v24  ;;  %v9198_v30 = vpop.f32.mrb[51].mxu0  ;;  %v13197_v22 = vld [vmem:[%s18368_s6 + $0x60] ss:$16 sps:$4 sm:$0xff]   ;;  %v13208_v45 = vld [vmem:[%s18368_s6 + $0x8c] ss:$16 sps:$4 sm:$0xff]  }
 0xb72   :  { %v17437_v5 = vadd.f32 %v9228_v15, %v9212_v8  ;;  %v9214_v42 = vadd.f32 %v9198_v30, %v16816_v32  ;;  %v13205_v8 = vld [vmem:[%s18368_s6 + $0x84] ss:$16 sps:$4 sm:$0xff]   ;;  %v13206_v30 = vld [vmem:[%s18368_s6 + $0x88] ss:$16 sps:$4 sm:$0xff]  }
 0xb73   :  { %v17440_v49 = vadd.f32 %v9224_v34, %v9213_v41  ;;  %v13203_v41 = vld [vmem:[%s18368_s6 + $0x80] ss:$16 sps:$4 sm:$0xff]  }
 0xb74   :  { %v17442_v48 = vadd.f32 %v9228_v15, %v9214_v42  ;;  %v9241_v43 = vadd.f32 %v17437_v5, %v17434_v39  ;;  %v13211_v42 = vld [vmem:[%s18368_s6 + $0xa4] ss:$16 sps:$4 sm:$0xff]  }
 0xb76   :  { %9242 = vadd.xlane.f32.xlu0 %v9241_v43  ;;  %v9202_v16 = vpop.f32.mrb[52].mxu0  ;;  %v9244_v36 = vadd.f32 %v17442_v48, %v17440_v49  ;;  %v13214_v43 = vld [vmem:[%s18368_s6 + $0xac] ss:$16 sps:$4 sm:$0xff]  }
 0xb77   :  { %v9215_v33 = vadd.f32 %v9202_v16, %v16822_v21  ;;  %v9204_v24 = vpop.f32.mrb[53].mxu0  ;;  %v13209_v16 = vld [vmem:[%s18368_s6 + $0xa0] ss:$16 sps:$4 sm:$0xff]  }
 0xb78   :  { %v9216_v2 = vadd.f32 %v9204_v24, %v16824_v38  ;;  %9245 = vadd.xlane.f32.xlu1 %v9244_v36  ;;  %v9206_v10 = vpop.f32.mrb[54].mxu0  ;;  %v13212_v36 = vld [vmem:[%s18368_s6 + $0xa8] ss:$16 sps:$4 sm:$0xff]   ;;  %v13220_v24 = vld [vmem:[%s18368_s6 + $0xcc] ss:$16 sps:$4 sm:$0xff]  }
 0xb79   :  { %v17450_v32 = vadd.f32 %v9224_v34, %v9215_v33  ;;  %v9217_v7 = vadd.f32 %v9206_v10, %v16826_v29  ;;  %v9208_v25 = vpop.f32.mrb[55].mxu0  ;;  %v13179_v29 = vld [vmem:[%s18368_s6] ss:$16 sps:$4 sm:$0xff]   ;;  %v13217_v33 = vld [vmem:[%s18368_s6 + $0xc4] ss:$16 sps:$4 sm:$0xff]  }
 0xb7a   :  { %v17453_v13 = vadd.f32 %v9228_v15, %v9216_v2  ;;  %v9218_v17 = vadd.f32 %v9208_v25, %v16828_v20  ;;  %v13181_v20 = vld [vmem:[%s18368_s6 + $0x4] ss:$16 sps:$4 sm:$0xff]   ;;  %v13215_v2 = vld [vmem:[%s18368_s6 + $0xc0] ss:$16 sps:$4 sm:$0xff]   ;;  %v13218_v10 = vld [vmem:[%s18368_s6 + $0xc8] ss:$16 sps:$4 sm:$0xff]  }
 0xb7b   :  { %v17456_v4 = vadd.f32 %v9224_v34, %v9217_v7  ;;  %9753 = vmatprep.subr.bf16.mxu1 %v13181_v20  ;;  %v13194_v34 = vld [vmem:[%s18368_s6 + $0x48] ss:$16 sps:$4 sm:$0xff]   ;;  %v13223_v7 = vld [vmem:[%s18368_s6 + $0xe4] ss:$16 sps:$4 sm:$0xff]   ;;  %v13226_v25 = vld [vmem:[%s18368_s6 + $0xec] ss:$16 sps:$4 sm:$0xff]  }
 0xb7c   :  { %v17458_v37 = vadd.f32 %v9228_v15, %v9218_v17  ;;  %v9247_v21 = vadd.f32 %v17453_v13, %v17450_v32  ;;  %9754 = vmatpush1.bf16.msra.mxu1 %v13179_v29  ;;  %v13202_v15 = vld [vmem:[%s18368_s6 + $0x6c] ss:$16 sps:$4 sm:$0xff]   ;;  %9811 = vmatpush1.bf16.msra.mxu0 %v13194_v34  ;;  %v13221_v17 = vld [vmem:[%s18368_s6 + $0xe0] ss:$16 sps:$4 sm:$0xff]  }
 0xb7d   :  { %9755 = vmatprep.subr.bf16.mxu1 %v13187_v28  ;;  %9812 = vmatprep.subr.bf16.mxu0 %v13202_v15  ;;  %v13232_v29 = vld [vmem:[%s18368_s6 + $0x10c] ss:$16 sps:$4 sm:$0xff]   ;;  %v13227_v20 = vld [vmem:[%s18368_s6 + $0x100] ss:$16 sps:$4 sm:$0xff]  }
 0xb7e   :  { %9248 = vadd.xlane.f32.xlu0 %v9247_v21  ;;  %v9250_v38 = vadd.f32 %v17458_v37, %v17456_v4  ;;  %v13224_v21 = vld [vmem:[%s18368_s6 + $0xe8] ss:$16 sps:$4 sm:$0xff]   ;;  %v13238_v28 = vld [vmem:[%s18368_s6 + $0x12c] ss:$16 sps:$4 sm:$0xff]  }
 0xb80   :  { %9251 = vadd.xlane.f32.xlu1 %v9250_v38  ;;  %9756 = vmatpush1.bf16.msra.mxu1 %v13185_v31  ;;  %v13229_v38 = vld [vmem:[%s18368_s6 + $0x104] ss:$16 sps:$4 sm:$0xff]   ;;  %v13236_v31 = vld [vmem:[%s18368_s6 + $0x128] ss:$16 sps:$4 sm:$0xff]  }
 0xb81   :  { %9757 = vmatprep.subr.bf16.mxu1 %v13193_v19  ;;  %9813 = vmatpush1.bf16.msra.mxu0 %v13200_v9 }
 0xb82   :  { %9814 = vmatprep.subr.bf16.mxu0 %v13208_v45 }
 0xb84   :  { %9758 = vmatpush1.bf16.msra.mxu1 %v13191_v11 }
 0xb85   :  { %9759 = vmatprep.subr.bf16.mxu1 %v13199_v57  ;;  %9815 = vmatpush1.bf16.msra.mxu0 %v13206_v30 }
 0xb86   :  { %9816 = vmatprep.subr.bf16.mxu0 %v13214_v43 }
 0xb88   :  { %9760 = vmatpush1.bf16.msra.mxu1 %v13197_v22 }
 0xb89   :  { %9761 = vmatprep.subr.bf16.mxu1 %v13205_v8  ;;  %9817 = vmatpush1.bf16.msra.mxu0 %v13212_v36 }
 0xb8a   :  { %9818 = vmatprep.subr.bf16.mxu0 %v13220_v24 }
 0xb8c   :  { %9762 = vmatpush1.bf16.msra.mxu1 %v13203_v41 }
 0xb8d   :  { %9763 = vmatprep.subr.bf16.mxu1 %v13211_v42  ;;  %9819 = vmatpush1.bf16.msra.mxu0 %v13218_v10 }
 0xb8e   :  { %9820 = vmatprep.subr.bf16.mxu0 %v13226_v25 }
 0xb90   :  { %9764 = vmatpush1.bf16.msra.mxu1 %v13209_v16 }
 0xb91   :  { %9765 = vmatprep.subr.bf16.mxu1 %v13217_v33  ;;  %9821 = vmatpush1.bf16.msra.mxu0 %v13224_v21 }
 0xb92   :  { %9822 = vmatprep.subr.bf16.mxu0 %v13232_v29 }
 0xb94   :  { %9766 = vmatpush1.bf16.msra.mxu1 %v13215_v2 }
 0xb95   :  { %9767 = vmatprep.subr.bf16.mxu1 %v13223_v7  ;;  %9823 = vmatpush1.bf16.msra.mxu0 %v13230_v12  ;;  %v13241_v12 = vld [vmem:[%s18368_s6 + $0x144] ss:$16 sps:$4 sm:$0xff]  }
 0xb96   :  { %9824 = vmatprep.subr.bf16.mxu0 %v13238_v28  ;;  %v13239_v28 = vld [vmem:[%s18368_s6 + $0x140] ss:$16 sps:$4 sm:$0xff]  }
 0xb98   :  { %9768 = vmatpush1.bf16.msra.mxu1 %v13221_v17 }
 0xb99   :  { %9769 = vmatprep.subr.bf16.mxu1 %v13229_v38  ;;  %9825 = vmatpush1.bf16.msra.mxu0 %v13236_v31  ;;  %v13247_v31 = vld [vmem:[%s18368_s6 + $0x164] ss:$16 sps:$4 sm:$0xff]  }
 0xb9c   :  { %9770 = vmatpush1.bf16.msra.mxu1 %v13227_v20 }
 0xb9d   :  { %9771 = vmatprep.subr.bf16.mxu1 %v13235_v18  ;;  %v13244_v18 = vld [vmem:[%s18368_s6 + $0x14c] ss:$16 sps:$4 sm:$0xff]  }
 0xb9e   :  { %9826 = vmatprep.subr.bf16.mxu0 %v13244_v18 }
 0xba0   :  { %9772 = vmatpush1.bf16.msra.mxu1 %v13233_v40  ;;  %v13242_v40 = vld [vmem:[%s18368_s6 + $0x148] ss:$16 sps:$4 sm:$0xff]  }
 0xba1   :  { %9773 = vmatprep.subr.bf16.mxu1 %v13241_v12  ;;  %9827 = vmatpush1.bf16.msra.mxu0 %v13242_v40 }
 0xba4   :  { %9774 = vmatpush1.bf16.msra.mxu1 %v13239_v28 }
 0xba5   :  { %9775 = vmatprep.subr.bf16.mxu1 %v13247_v31 }
 0xc03   :  { %v9243_v3 = vpop.xlane.xlu0 %9242 }
 0xc04   :  { %v9253_v19 = vmul.f32 0.00390625, %v9243_v3  ;;  %v13250_v3 = vld [vmem:[%s18368_s6 + $0x16c] ss:$16 sps:$4 sm:$0xff]  }
 0xc05   :  { %v9246_v6 = vpop.xlane.xlu1 %9245  ;;  %9828 = vmatprep.subr.bf16.mxu0 %v13250_v3 }
 0xc06   :  { %v17585_v11 = vsub.f32 %v17434_v39, %v9253_v19  ;;  %v17588_v34 = vsub.f32 %v17437_v5, %v9253_v19  ;;  %v9254_v57 = vmul.f32 0.00390625, %v9246_v6  ;;  %v13245_v19 = vld [vmem:[%s18368_s6 + $0x160] ss:$16 sps:$4 sm:$0xff]   ;;  %v13248_v6 = vld [vmem:[%s18368_s6 + $0x168] ss:$16 sps:$4 sm:$0xff]  }
 0xc07   :  { %9776 = vmatpush1.bf16.msra.mxu1 %v13245_v19  ;;  %9829 = vmatpush1.bf16.msra.mxu0 %v13248_v6 }
 0xc08   :  { %v17591_v15 = vsub.f32 %v17440_v49, %v9254_v57  ;;  %v17594_v22 = vsub.f32 %v17442_v48, %v9254_v57  ;;  %v9265_v9 = vmul.f32 %v17585_v11, %v17585_v11  ;;  %v9266_v8 = vmul.f32 %v17588_v34, %v17588_v34  ;;  %v13253_v57 = vld [vmem:[%s18368_s6 + $0x184] ss:$16 sps:$4 sm:$0xff]  }
 0xc09   :  { %9777 = vmatprep.subr.bf16.mxu1 %v13253_v57 }
 0xc0a   :  { %v9273_v45 = vadd.f32 %v9266_v8, %v9265_v9  ;;  %v9267_v41 = vmul.f32 %v17591_v15, %v17591_v15  ;;  %v9268_v30 = vmul.f32 %v17594_v22, %v17594_v22  ;;  %v13256_v9 = vld [vmem:[%s18368_s6 + $0x18c] ss:$16 sps:$4 sm:$0xff]   ;;  %v13251_v8 = vld [vmem:[%s18368_s6 + $0x180] ss:$16 sps:$4 sm:$0xff]  }
 0xc0b   :  { %v9249_v42 = vpop.xlane.xlu0 %9248  ;;  %9830 = vmatprep.subr.bf16.mxu0 %v13256_v9  ;;  %9778 = vmatpush1.bf16.msra.mxu1 %v13251_v8  ;;  %v9239_v9 = vld [vmem:[%s18364_s2 + $0xe] sm:$0x3] }
 0xc0c   :  { %v9255_v43 = vmul.f32 0.00390625, %v9249_v42  ;;  %9274 = vadd.xlane.f32.xlu0 %v9273_v45  ;;  %v9276_v16 = vadd.f32 %v9268_v30, %v9267_v41  ;;  %v13254_v45 = vld [vmem:[%s18368_s6 + $0x188] ss:$16 sps:$4 sm:$0xff]   ;;  %v13259_v41 = vld [vmem:[%s18368_s6 + $0x1a4] ss:$16 sps:$4 sm:$0xff]  }
 0xc0d   :  { %v9252_v36 = vpop.xlane.xlu1 %9251  ;;  %9831 = vmatpush1.bf16.msra.mxu0 %v13254_v45  ;;  %v13262_v30 = vld [vmem:[%s18368_s6 + $0x1ac] ss:$16 sps:$4 sm:$0xff]   ;;  %v13257_v42 = vld [vmem:[%s18368_s6 + $0x1a0] ss:$16 sps:$4 sm:$0xff]   ;;  %9779 = vmatprep.subr.bf16.mxu1 %v13259_v41 }
 0xc0e   :  { %v17605_v33 = vsub.f32 %v17450_v32, %v9255_v43  ;;  %v17608_v24 = vsub.f32 %v17453_v13, %v9255_v43  ;;  %v9256_v2 = vmul.f32 0.00390625, %v9252_v36  ;;  %9277 = vadd.xlane.f32.xlu1 %v9276_v16  ;;  %v13260_v43 = vld [vmem:[%s18368_s6 + $0x1a8] ss:$16 sps:$4 sm:$0xff]   ;;  %9832 = vmatprep.subr.bf16.mxu0 %v13262_v30  ;;  %v13265_v16 = vld [vmem:[%s18368_s6 + $0x1c4] ss:$16 sps:$4 sm:$0xff]   ;;  %v9309_v30 = vrot.slane %v9239_v9, %v16788_v47 }
 0xc0f   :  { %9780 = vmatpush1.bf16.msra.mxu1 %v13257_v42  ;;  %v13268_v36 = vld [vmem:[%s18368_s6 + $0x1cc] ss:$16 sps:$4 sm:$0xff]   ;;  %v9240_v42 = vld [vmem:[%s18364_s2 + $0x10] sm:$0x3] }
 0xc10   :  { %v17611_v10 = vsub.f32 %v17456_v4, %v9256_v2  ;;  %v17614_v7 = vsub.f32 %v17458_v37, %v9256_v2  ;;  %v9269_v25 = vmul.f32 %v17605_v33, %v17605_v33  ;;  %v9270_v17 = vmul.f32 %v17608_v24, %v17608_v24  ;;  %v13263_v2 = vld [vmem:[%s18368_s6 + $0x1c0] ss:$16 sps:$4 sm:$0xff]   ;;  %9781 = vmatprep.subr.bf16.mxu1 %v13265_v16 }
 0xc11   :  { %9833 = vmatpush1.bf16.msra.mxu0 %v13260_v43  ;;  %v9313_v43 = vrot.slane %v9239_v9, %v16794_v46 }
 0xc12   :  { %v9279_v21 = vadd.f32 %v9270_v17, %v9269_v25  ;;  %v9271_v38 = vmul.f32 %v17611_v10, %v17611_v10  ;;  %v9272_v29 = vmul.f32 %v17614_v7, %v17614_v7  ;;  %v13266_v25 = vld [vmem:[%s18368_s6 + $0x1c8] ss:$16 sps:$4 sm:$0xff]   ;;  %9834 = vmatprep.subr.bf16.mxu0 %v13268_v36  ;;  %v13271_v17 = vld [vmem:[%s18368_s6 + $0x1e4] ss:$16 sps:$4 sm:$0xff]  }
 0xc13   :  { %9782 = vmatpush1.bf16.msra.mxu1 %v13263_v2 }
 0xc14   :  { %9280 = vadd.xlane.f32.xlu0 %v9279_v21  ;;  %v9282_v20 = vadd.f32 %v9272_v29, %v9271_v38  ;;  %v13269_v21 = vld [vmem:[%s18368_s6 + $0x1e0] ss:$16 sps:$4 sm:$0xff]   ;;  %v13272_v38 = vld [vmem:[%s18368_s6 + $0x1e8] ss:$16 sps:$4 sm:$0xff]   ;;  %v13274_v29 = vld [vmem:[%s18368_s6 + $0x1ec] ss:$16 sps:$4 sm:$0xff]   ;;  %9783 = vmatprep.subr.bf16.mxu1 %v13271_v17  ;;  %v9328_v17 = vrot.slane %v9240_v42, %v16788_v47 }
 0xc15   :  { %9835 = vmatpush1.bf16.msra.mxu0 %v13266_v25 }
 0xc16   :  { %9283 = vadd.xlane.f32.xlu1 %v9282_v20  ;;  %9836 = vmatprep.subr.bf16.mxu0 %v13274_v29  ;;  %v13277_v20 = vld [vmem:[%s18369_s7 + $0x4] ss:$8 sps:$4 sm:$0xff]  }
 0xc17   :  { %9784 = vmatpush1.bf16.msra.mxu1 %v13269_v21  ;;  %v9332_v21 = vrot.slane %v9240_v42, %v16794_v46 }
 0xc18   :  { %10395 = vmatprep.subr.bf16.mxu1 %v13277_v20 }
 0xc19   :  { %9837 = vmatpush1.bf16.msra.mxu0 %v13272_v38 }
 0xc99   :  { %v9275_v12 = vpop.xlane.xlu0 %9274 }
 0xc9a   :  { %v9285_v18 = vmul.f32 0.00390625, %v9275_v12 }
 0xc9b   :  { %v9278_v28 = vpop.xlane.xlu1 %9277 }
 0xc9c   :  { %v9289_v40 = vadd.f32 1e-05, %v9285_v18  ;;  %v9286_v31 = vmul.f32 0.00390625, %v9278_v28 }
 0xc9e   :  { %13411 = vrsqrt.f32 %v9289_v40  ;;  %v9290_v3 = vadd.f32 1e-05, %v9286_v31 }
 0xca0   :  { %13413 = vrsqrt.f32 %v9290_v3 }
 0xca1   :  { %v9281_v19 = vpop.xlane.xlu0 %9280 }
 0xca2   :  { %v9287_v6 = vmul.f32 0.00390625, %v9281_v19 }
 0xca3   :  { %v9284_v57 = vpop.xlane.xlu1 %9283 }
 0xca4   :  { %v9291_v8 = vadd.f32 1e-05, %v9287_v6  ;;  %v9288_v45 = vmul.f32 0.00390625, %v9284_v57 }
 0xca6   :  { %13415 = vrsqrt.f32 %v9291_v8  ;;  %v9292_v41 = vadd.f32 1e-05, %v9288_v45 }
 0xca8   :  { %v13412_v16 = vpop.eup %13411  ;;  %13417 = vrsqrt.f32 %v9292_v41 }
 0xca9   :  { %v9297_v36 = vmul.f32 %v13412_v16, %v17585_v11  ;;  %v9298_v2 = vmul.f32 %v13412_v16, %v17588_v34 }
 0xcaa   :  { %v13414_v25 = vpop.eup %13413 }
 0xcab   :  { %v9316_v38 = vmul.f32 %v9309_v30, %v9297_v36  ;;  %v9299_v29 = vmul.f32 %v13414_v25, %v17591_v15  ;;  %v9300_v20 = vmul.f32 %v13414_v25, %v17594_v22  ;;  %v9317_v12 = vmul.f32 %v9313_v43, %v9298_v2  ;;  %v13275_v15 = vld [vmem:[%s18369_s7] ss:$8 sps:$4 sm:$0xff]   ;;  %v13280_v22 = vld [vmem:[%s18369_s7 + $0x14] ss:$8 sps:$4 sm:$0xff]   ;;  %v13278_v36 = vld [vmem:[%s18369_s7 + $0x10] ss:$8 sps:$4 sm:$0xff]  }
 0xcac   :  { %v13283_v2 = vld [vmem:[%s18369_s7 + $0x24] ss:$8 sps:$4 sm:$0xff]  }
 0xcad   :  { %v9318_v18 = vmul.f32 %v9309_v30, %v9299_v29  ;;  %v9319_v28 = vmul.f32 %v9313_v43, %v9300_v20  ;;  %v9336_v40 = vadd.f32 %v9332_v21, %v9317_v12  ;;  %v9335_v3 = vadd.f32 %v9328_v17, %v9316_v38  ;;  %v13287_v12 = vld [vmem:[%s18369_s7 + $0x40] ss:$8 sps:$4 sm:$0xff]  }
 0xcaf   :  { %v9338_v31 = vadd.f32 %v9332_v21, %v9319_v28  ;;  %v9337_v19 = vadd.f32 %v9328_v17, %v9318_v18  ;;  %v13292_v18 = vld [vmem:[%s18369_s7 + $0x54] ss:$8 sps:$4 sm:$0xff]   ;;  %v13290_v28 = vld [vmem:[%s18369_s7 + $0x50] ss:$8 sps:$4 sm:$0xff]  }
 0xcb0   :  { %v13416_v11 = vpop.eup %13415 }
 0xcb1   :  { %v9408_v6 = vpack.c.bf16 %v9338_v31, %v9336_v40  ;;  %v9407_v34 = vpack.c.bf16 %v9337_v19, %v9335_v3  ;;  %v9302_v57 = vmul.f32 %v13416_v11, %v17608_v24  ;;  %v9301_v9 = vmul.f32 %v13416_v11, %v17605_v33  ;;  %v13295_v40 = vld [vmem:[%s18369_s7 + $0x64] ss:$8 sps:$4 sm:$0xff]   ;;  %v13293_v31 = vld [vmem:[%s18369_s7 + $0x60] ss:$8 sps:$4 sm:$0xff]   ;;  %v13298_v3 = vld [vmem:[%s18369_s7 + $0x74] ss:$8 sps:$4 sm:$0xff]  }
 0xcb2   :  { %v13418_v8 = vpop.eup %13417  ;;  %v13296_v19 = vld [vmem:[%s18369_s7 + $0x70] ss:$8 sps:$4 sm:$0xff]   ;;  %v13301_v11 = vld [vmem:[%s18369_s7 + $0x84] ss:$8 sps:$4 sm:$0xff]  }
 0xcb3   :  { %9785 = vmatprep.mubr.bf16.mxu1 %v9408_v6  ;;  %9838 = vmatprep.mubr.bf16.mxu0 %v9408_v6  ;;  %v9304_v45 = vmul.f32 %v13418_v8, %v17614_v7  ;;  %v9321_v41 = vmul.f32 %v9313_v43, %v9302_v57  ;;  %v9303_v42 = vmul.f32 %v13418_v8, %v17611_v10  ;;  %v13299_v6 = vld [vmem:[%s18369_s7 + $0x80] ss:$8 sps:$4 sm:$0xff]   ;;  %v13302_v57 = vld [vmem:[%s18369_s7 + $0x90] ss:$8 sps:$4 sm:$0xff]   ;;  %v13310_v8 = vld [vmem:[%s18369_s7 + $0xb4] ss:$8 sps:$4 sm:$0xff]  }
 0xcb4   :  { %9786 = vmatmul.mubr.bf16.vlgmr.msra.gmra.mrb[16].mxu1 %v9407_v34  ;;  %9839 = vmatmul.mubr.bf16.vlgmr.msra.gmra.mrb[56].mxu0 %v9407_v34  ;;  %v9320_v24 = vmul.f32 %v9309_v30, %v9301_v9  ;;  %v13304_v34 = vld [vmem:[%s18369_s7 + $0x94] ss:$8 sps:$4 sm:$0xff]   ;;  %v13307_v9 = vld [vmem:[%s18369_s7 + $0xa4] ss:$8 sps:$4 sm:$0xff]  }
 0xcb5   :  { %v9323_v33 = vmul.f32 %v9313_v43, %v9304_v45  ;;  %v9322_v16 = vmul.f32 %v9309_v30, %v9303_v42  ;;  %10396 = vmatpush1.bf16.msra.mxu1 %v13275_v15  ;;  %v9340_v25 = vadd.f32 %v9332_v21, %v9321_v41  ;;  %v13281_v30 = vld [vmem:[%s18369_s7 + $0x20] ss:$8 sps:$4 sm:$0xff]   ;;  %v13286_v43 = vld [vmem:[%s18369_s7 + $0x34] ss:$8 sps:$4 sm:$0xff]   ;;  %v13313_v45 = vld [vmem:[%s18369_s7 + $0xc4] ss:$8 sps:$4 sm:$0xff]  }
 0xcb6   :  { %10397 = vmatprep.subr.bf16.mxu1 %v13280_v22  ;;  %v9339_v38 = vadd.f32 %v9328_v17, %v9320_v24  ;;  %v13305_v15 = vld [vmem:[%s18369_s7 + $0xa0] ss:$8 sps:$4 sm:$0xff]   ;;  %v13308_v22 = vld [vmem:[%s18369_s7 + $0xb0] ss:$8 sps:$4 sm:$0xff]   ;;  %v13316_v42 = vld [vmem:[%s18369_s7 + $0xd4] ss:$8 sps:$4 sm:$0xff]  }
 0xcb7   :  { %v9342_v7 = vadd.f32 %v9332_v21, %v9323_v33  ;;  %v9341_v29 = vadd.f32 %v9328_v17, %v9322_v16  ;;  %v13284_v17 = vld [vmem:[%s18369_s7 + $0x30] ss:$8 sps:$4 sm:$0xff]   ;;  %v13289_v21 = vld [vmem:[%s18369_s7 + $0x44] ss:$8 sps:$4 sm:$0xff]   ;;  %v13311_v41 = vld [vmem:[%s18369_s7 + $0xc0] ss:$8 sps:$4 sm:$0xff]  }
 0xcb8   :  { %v13314_v24 = vld [vmem:[%s18369_s7 + $0xd0] ss:$8 sps:$4 sm:$0xff]   ;;  %v13317_v33 = vld [vmem:[%s18369_s7 + $0xe0] ss:$8 sps:$4 sm:$0xff]   ;;  %v13319_v16 = vld [vmem:[%s18369_s7 + $0xe4] ss:$8 sps:$4 sm:$0xff]  }
 0xcb9   :  { %v9410_v10 = vpack.c.bf16 %v9342_v7, %v9340_v25  ;;  %v9409_v20 = vpack.c.bf16 %v9341_v29, %v9339_v38  ;;  %10398 = vmatpush1.bf16.msra.mxu1 %v13278_v36  ;;  %v13322_v36 = vld [vmem:[%s18369_s7 + $0xf4] ss:$8 sps:$4 sm:$0xff]   ;;  %v13325_v25 = vld [vmem:[%s18369_s7 + $0x104] ss:$8 sps:$4 sm:$0xff]  }
 0xcba   :  { %10399 = vmatprep.subr.bf16.mxu1 %v13283_v2  ;;  %v13320_v2 = vld [vmem:[%s18369_s7 + $0xf0] ss:$8 sps:$4 sm:$0xff]  }
 0xcbb   :  { %9795 = vmatprep.mubr.bf16.mxu1 %v9410_v10  ;;  %9848 = vmatprep.mubr.bf16.mxu0 %v9410_v10  ;;  %v9411_v7 = vld [vmem:[%s18364_s2 + $0x12] sm:$0xf] }
 0xcbc   :  { %9796 = vmatmul.mubr.bf16.gmra.mrb[20].mxu1 %v9409_v20  ;;  %9849 = vmatmul.mubr.bf16.gmra.mrb[60].mxu0 %v9409_v20  ;;  %v17817_v38 = vrot.slane %v9411_v7, %v16788_v47  ;;  %v17820_v29 = vrot.slane %v9411_v7, %v17189_v26  ;;  %v17823_v10 = vrot.slane %v9411_v7, %v16794_v46 }
 0xcbd   :  { %10400 = vmatpush1.bf16.msra.mxu1 %v13281_v30  ;;  %v17826_v20 = vrot.slane %v9411_v7, %v17195_v23 }
 0xcbe   :  { %10401 = vmatprep.subr.bf16.mxu1 %v13286_v43 }
 0xcc1   :  { %10402 = vmatpush1.bf16.msra.mxu1 %v13284_v17 }
 0xcc2   :  { %10403 = vmatprep.subr.bf16.mxu1 %v13289_v21 }
 0xcc5   :  { %10404 = vmatpush1.bf16.msra.mxu1 %v13287_v12 }
 0xcc6   :  { %10405 = vmatprep.subr.bf16.mxu1 %v13292_v18 }
 0xcc9   :  { %10406 = vmatpush1.bf16.msra.mxu1 %v13290_v28 }
 0xcca   :  { %10407 = vmatprep.subr.bf16.mxu1 %v13295_v40 }
 0xccd   :  { %10408 = vmatpush1.bf16.msra.mxu1 %v13293_v31 }
 0xcce   :  { %10409 = vmatprep.subr.bf16.mxu1 %v13298_v3 }
 0xcd1   :  { %10410 = vmatpush1.bf16.msra.mxu1 %v13296_v19 }
 0xcd2   :  { %10411 = vmatprep.subr.bf16.mxu1 %v13301_v11 }
 0xcd5   :  { %10412 = vmatpush1.bf16.msra.mxu1 %v13299_v6 }
 0xcd6   :  { %10413 = vmatprep.subr.bf16.mxu1 %v13304_v34 }
 0xcd9   :  { %10414 = vmatpush1.bf16.msra.mxu1 %v13302_v57 }
 0xcda   :  { %10415 = vmatprep.subr.bf16.mxu1 %v13307_v9 }
 0xcdd   :  { %10416 = vmatpush1.bf16.msra.mxu1 %v13305_v15 }
 0xcde   :  { %10417 = vmatprep.subr.bf16.mxu1 %v13310_v8 }
 0xce1   :  { %10418 = vmatpush1.bf16.msra.mxu1 %v13308_v22 }
 0xce2   :  { %10419 = vmatprep.subr.bf16.mxu1 %v13313_v45 }
 0xce5   :  { %10420 = vmatpush1.bf16.msra.mxu1 %v13311_v41 }
 0xce6   :  { %10421 = vmatprep.subr.bf16.mxu1 %v13316_v42 }
 0xce9   :  { %10422 = vmatpush1.bf16.msra.mxu1 %v13314_v24 }
 0xcea   :  { %10423 = vmatprep.subr.bf16.mxu1 %v13319_v16 }
 0xced   :  { %10424 = vmatpush1.bf16.msra.mxu1 %v13317_v33 }
 0xcee   :  { %10425 = vmatprep.subr.bf16.mxu1 %v13322_v36 }
 0xcf1   :  { %10426 = vmatpush1.bf16.msra.mxu1 %v13320_v2 }
 0xcf2   :  { %10448 = vmatprep.subr.bf16.mxu1 %v13325_v25 }
 0xd87   :  { %v9787_v30 = vpop.f32.mrb[16].mxu1  ;;  %v9840_v43 = vpop.f32.mrb[56].mxu0 }
 0xd88   :  { %v17829_v17 = vadd.f32 %v9787_v30, %v17817_v38  ;;  %v17832_v21 = vadd.f32 %v9840_v43, %v17820_v29  ;;  %v9789_v12 = vpop.f32.mrb[17].mxu1  ;;  %v9842_v18 = vpop.f32.mrb[57].mxu0 }
 0xd89   :  { %v17835_v28 = vadd.f32 %v9789_v12, %v17823_v10  ;;  %v17838_v40 = vadd.f32 %v9842_v18, %v17826_v20  ;;  %v9791_v31 = vpop.f32.mrb[18].mxu1  ;;  %v9844_v3 = vpop.f32.mrb[58].mxu0 }
 0xd8a   :  { %v9859_v19 = vmul.f32 %v17829_v17, %v17829_v17  ;;  %v9861_v11 = vmul.f32 %v17832_v21, %v17832_v21  ;;  %v17845_v6 = vadd.f32 %v9791_v31, %v17817_v38  ;;  %v17848_v34 = vadd.f32 %v9844_v3, %v17820_v29  ;;  %v9793_v57 = vpop.f32.mrb[19].mxu1  ;;  %v9846_v9 = vpop.f32.mrb[59].mxu0 }
 0xd8b   :  { %v9860_v15 = vmul.f32 %v17835_v28, %v17835_v28  ;;  %v9862_v8 = vmul.f32 %v17838_v40, %v17838_v40  ;;  %v17855_v22 = vadd.f32 %v9793_v57, %v17823_v10  ;;  %v17858_v45 = vadd.f32 %v9846_v9, %v17826_v20 }
 0xd8c   :  { %v9875_v41 = vmul.f32 %v9859_v19, %v17829_v17  ;;  %v9877_v42 = vmul.f32 %v9861_v11, %v17832_v21  ;;  %v9863_v24 = vmul.f32 %v17845_v6, %v17845_v6  ;;  %v9865_v33 = vmul.f32 %v17848_v34, %v17848_v34 }
 0xd8d   :  { %v9876_v16 = vmul.f32 %v9860_v15, %v17835_v28  ;;  %v9878_v36 = vmul.f32 %v9862_v8, %v17838_v40  ;;  %v9864_v2 = vmul.f32 %v17855_v22, %v17855_v22  ;;  %v9866_v25 = vmul.f32 %v17858_v45, %v17858_v45 }
 0xd8e   :  { %v9891_v7 = vmul.f32 0.044715, %v9875_v41  ;;  %v9893_v30 = vmul.f32 0.044715, %v9877_v42  ;;  %v9879_v43 = vmul.f32 %v9863_v24, %v17845_v6  ;;  %v9881_v12 = vmul.f32 %v9865_v33, %v17848_v34 }
 0xd8f   :  { %v9892_v18 = vmul.f32 0.044715, %v9876_v16  ;;  %v9894_v31 = vmul.f32 0.044715, %v9878_v36  ;;  %v9880_v3 = vmul.f32 %v9864_v2, %v17855_v22  ;;  %v9882_v19 = vmul.f32 %v9866_v25, %v17858_v45  ;;  %v9797_v11 = vpop.f32.mrb[20].mxu1  ;;  %v9850_v57 = vpop.f32.mrb[60].mxu0 }
 0xd90   :  { %v9907_v9 = vadd.f32 %v9891_v7, %v17829_v17  ;;  %v9909_v15 = vadd.f32 %v9893_v30, %v17832_v21  ;;  %v9895_v8 = vmul.f32 0.044715, %v9879_v43  ;;  %v9897_v27 = vmul.f32 0.044715, %v9881_v12  ;;  %v9799_v41 = vpop.f32.mrb[21].mxu1  ;;  %v9852_v42 = vpop.f32.mrb[61].mxu0 }
 0xd91   :  { %v9908_v24 = vadd.f32 %v9892_v18, %v17835_v28  ;;  %v9910_v33 = vadd.f32 %v9894_v31, %v17838_v40  ;;  %v9896_v16 = vmul.f32 0.044715, %v9880_v3  ;;  %v9898_v36 = vmul.f32 0.044715, %v9882_v19  ;;  %v9801_v1 = vpop.f32.mrb[22].mxu1  ;;  %v9854_v2 = vpop.f32.mrb[62].mxu0 }
 0xd92   :  { %v9923_v56 = vmul.f32 0.7978846, %v9907_v9  ;;  %v9925_v25 = vmul.f32 0.7978846, %v9909_v15  ;;  %v9911_v0 = vadd.f32 %v9895_v8, %v17845_v6  ;;  %v9913_v7 = vadd.f32 %v9897_v27, %v17848_v34  ;;  %v9803_v55 = vpop.f32.mrb[23].mxu1  ;;  %v9856_v30 = vpop.f32.mrb[63].mxu0 }
 0xd93   :  { %v9924_v43 = vmul.f32 0.7978846, %v9908_v24  ;;  %v9926_v12 = vmul.f32 0.7978846, %v9910_v33  ;;  %v9912_v63 = vadd.f32 %v9896_v16, %v17855_v22  ;;  %v9914_v18 = vadd.f32 %v9898_v36, %v17858_v45 }
 0xd94   :  { %13419 = vtanh.f32 %v9923_v56  ;;  %v9927_v31 = vmul.f32 0.7978846, %v9911_v0  ;;  %v9929_v3 = vmul.f32 0.7978846, %v9913_v7  ;;  %v17885_v19 = vadd.f32 %v9797_v11, %v17817_v38 }
 0xd95   :  { %13421 = vtanh.f32 %v9925_v25  ;;  %v9928_v9 = vmul.f32 0.7978846, %v9912_v63  ;;  %v9930_v15 = vmul.f32 0.7978846, %v9914_v18  ;;  %v17888_v8 = vadd.f32 %v9850_v57, %v17820_v29 }
 0xd96   :  { %13423 = vtanh.f32 %v9924_v43  ;;  %v9867_v27 = vmul.f32 %v17885_v19, %v17885_v19  ;;  %v17893_v24 = vadd.f32 %v9799_v41, %v17823_v10  ;;  %v17896_v56 = vadd.f32 %v9852_v42, %v17826_v20 }
 0xd97   :  { %13425 = vtanh.f32 %v9926_v12  ;;  %v9869_v0 = vmul.f32 %v17888_v8, %v17888_v8  ;;  %v17901_v63 = vadd.f32 %v9801_v1, %v17817_v38  ;;  %v17904_v11 = vadd.f32 %v9854_v2, %v17820_v29 }
 0xd98   :  { %13427 = vtanh.f32 %v9927_v31  ;;  %v9883_v57 = vmul.f32 %v9867_v27, %v17885_v19  ;;  %v9868_v41 = vmul.f32 %v17893_v24, %v17893_v24  ;;  %v9870_v42 = vmul.f32 %v17896_v56, %v17896_v56 }
 0xd99   :  { %13429 = vtanh.f32 %v9929_v3  ;;  %v9885_v33 = vmul.f32 %v9869_v0, %v17888_v8  ;;  %v9871_v16 = vmul.f32 %v17901_v63, %v17901_v63  ;;  %v9873_v1 = vmul.f32 %v17904_v11, %v17904_v11 }
 0xd9a   :  { %13431 = vtanh.f32 %v9928_v9  ;;  %v9899_v38 = vmul.f32 0.044715, %v9883_v57  ;;  %v9884_v29 = vmul.f32 %v9868_v41, %v17893_v24  ;;  %v9886_v36 = vmul.f32 %v9870_v42, %v17896_v56 }
 0xd9b   :  { %13433 = vtanh.f32 %v9930_v15  ;;  %v9901_v2 = vmul.f32 0.044715, %v9885_v33  ;;  %v9887_v25 = vmul.f32 %v9871_v16, %v17901_v63  ;;  %v9889_v7 = vmul.f32 %v9873_v1, %v17904_v11 }
 0xd9c   :  { %v9915_v43 = vadd.f32 %v9899_v38, %v17885_v19  ;;  %v9900_v12 = vmul.f32 0.044715, %v9884_v29  ;;  %v9902_v18 = vmul.f32 0.044715, %v9886_v36  ;;  %v17922_v31 = vadd.f32 %v9803_v55, %v17823_v10 }
 0xd9d   :  { %v9917_v3 = vadd.f32 %v9901_v2, %v17888_v8  ;;  %v9903_v9 = vmul.f32 0.044715, %v9887_v25  ;;  %v9905_v27 = vmul.f32 0.044715, %v9889_v7  ;;  %v17926_v0 = vadd.f32 %v9856_v30, %v17826_v20 }
 0xd9e   :  { %v13420_v15 = vpop.eup %13419  ;;  %v9931_v57 = vmul.f32 0.7978846, %v9915_v43  ;;  %v9916_v41 = vadd.f32 %v9900_v12, %v17893_v24  ;;  %v9918_v42 = vadd.f32 %v9902_v18, %v17896_v56  ;;  %v9872_v33 = vmul.f32 %v17922_v31, %v17922_v31 }
 0xd9f   :  { %v13422_v16 = vpop.eup %13421  ;;  %v9955_v1 = vadd.f32 1.0, %v13420_v15  ;;  %v9933_v55 = vmul.f32 0.7978846, %v9917_v3  ;;  %v9919_v10 = vadd.f32 %v9903_v9, %v17901_v63  ;;  %v9921_v38 = vadd.f32 %v9905_v27, %v17904_v11 }
 0xda0   :  { %v13424_v29 = vpop.eup %13423  ;;  %v9957_v36 = vadd.f32 1.0, %v13422_v16  ;;  %13435 = vtanh.f32 %v9931_v57  ;;  %v9932_v20 = vmul.f32 0.7978846, %v9916_v41  ;;  %v9934_v30 = vmul.f32 0.7978846, %v9918_v42 }
 0xda1   :  { %v13426_v2 = vpop.eup %13425  ;;  %v9971_v25 = vmul.f32 0.5, %v9955_v1  ;;  %13437 = vtanh.f32 %v9933_v55  ;;  %v9935_v7 = vmul.f32 0.7978846, %v9919_v10  ;;  %v9937_v43 = vmul.f32 0.7978846, %v9921_v38 }
 0xda2   :  { %v13428_v12 = vpop.eup %13427  ;;  %v9973_v18 = vmul.f32 0.5, %v9957_v36  ;;  %13439 = vtanh.f32 %v9932_v20  ;;  %v9888_v15 = vmul.f32 %v9872_v33, %v17922_v31  ;;  %v9874_v3 = vmul.f32 %v17926_v0, %v17926_v0 }
 0xda3   :  { %v13430_v9 = vpop.eup %13429  ;;  %v9987_v27 = vmul.f32 %v9971_v25, %v17829_v17  ;;  %v9959_v16 = vadd.f32 1.0, %v13428_v12  ;;  %13441 = vtanh.f32 %v9934_v30  ;;  %v9956_v57 = vadd.f32 1.0, %v13424_v29 }
 0xda4   :  { %v13432_v41 = vpop.eup %13431  ;;  %v17939_v42 = vmul.f32 %v9973_v18, %v17832_v21  ;;  %v9961_v1 = vadd.f32 1.0, %v13430_v9  ;;  %13443 = vtanh.f32 %v9935_v7  ;;  %v9904_v55 = vmul.f32 0.044715, %v9888_v15 }
 0xda5   :  { %v13434_v10 = vpop.eup %13433  ;;  %v9975_v38 = vmul.f32 0.5, %v9959_v16  ;;  %13445 = vtanh.f32 %v9937_v43  ;;  %v9890_v33 = vmul.f32 %v9874_v3, %v17926_v0  ;;  %v9960_v36 = vadd.f32 1.0, %v13432_v41 }
 0xda6   :  { %v9977_v20 = vmul.f32 0.5, %v9961_v1  ;;  %v9920_v54 = vadd.f32 %v9904_v55, %v17922_v31  ;;  %v9972_v17 = vmul.f32 0.5, %v9956_v57  ;;  %v9958_v25 = vadd.f32 1.0, %v13426_v2 }
 0xda7   :  { %v9991_v29 = vmul.f32 %v9975_v38, %v17845_v6  ;;  %v9906_v30 = vmul.f32 0.044715, %v9890_v33  ;;  %v9976_v12 = vmul.f32 0.5, %v9960_v36  ;;  %v9962_v21 = vadd.f32 1.0, %v13434_v10  ;;  %v13328_v10 = vld [vmem:[%s18369_s7 + $0x114] ss:$8 sps:$4 sm:$0xff]  }
 0xda8   :  { %v17945_v18 = vmul.f32 %v9977_v20, %v17848_v34  ;;  %v9936_v7 = vmul.f32 0.7978846, %v9920_v54  ;;  %v9988_v15 = vmul.f32 %v9972_v17, %v17835_v28  ;;  %v9974_v43 = vmul.f32 0.5, %v9958_v25  ;;  %v13323_v28 = vld [vmem:[%s18369_s7 + $0x100] ss:$8 sps:$4 sm:$0xff]  }
 0xda9   :  { %v10067_v9 = vpack.c.bf16 %v9991_v29, %v9987_v27  ;;  %v9922_v3 = vadd.f32 %v9906_v30, %v17926_v0  ;;  %v9992_v16 = vmul.f32 %v9976_v12, %v17855_v22  ;;  %v9978_v41 = vmul.f32 0.5, %v9962_v21  ;;  %v13326_v17 = vld [vmem:[%s18369_s7 + $0x110] ss:$8 sps:$4 sm:$0xff]   ;;  %v13331_v29 = vld [vmem:[%s18369_s7 + $0x124] ss:$8 sps:$4 sm:$0xff]  }
 0xdaa   :  { %v13436_v57 = vpop.eup %13435  ;;  %v10069_v6 = vpack.c.bf16 %v17945_v18, %v17939_v42  ;;  %13447 = vtanh.f32 %v9936_v7  ;;  %v17953_v2 = vmul.f32 %v9974_v43, %v17838_v40  ;;  %v13329_v43 = vld [vmem:[%s18369_s7 + $0x120] ss:$8 sps:$4 sm:$0xff]  }
 0xdab   :  { %v13438_v34 = vpop.eup %13437  ;;  %v9938_v1 = vmul.f32 0.7978846, %v9922_v3  ;;  %v10068_v54 = vpack.c.bf16 %v9992_v16, %v9988_v15  ;;  %v9963_v27 = vadd.f32 1.0, %v13436_v57  ;;  %v9994_v55 = vmul.f32 %v9978_v41, %v17858_v45  ;;  %v13334_v41 = vld [vmem:[%s18369_s7 + $0x134] ss:$8 sps:$4 sm:$0xff]  }
 0xdac   :  { %v13440_v22 = vpop.eup %13439  ;;  %v9965_v38 = vadd.f32 1.0, %v13438_v34 }
 0xdad   :  { %v13442_v33 = vpop.eup %13441  ;;  %13449 = vtanh.f32 %v9938_v1  ;;  %10427 = vmatprep.mubr.bf16.mxu1 %v10068_v54  ;;  %v10070_v40 = vpack.c.bf16 %v9994_v55, %v17953_v2  ;;  %v9979_v25 = vmul.f32 0.5, %v9963_v27  ;;  %v9964_v21 = vadd.f32 1.0, %v13440_v22  ;;  %v13332_v55 = vld [vmem:[%s18369_s7 + $0x130] ss:$8 sps:$4 sm:$0xff]  }
 0xdae   :  { %v13444_v36 = vpop.eup %13443  ;;  %10428 = vmatmul.mubr.bf16.vlgmr.msra.gmra.mrb[24].mxu1 %v10067_v9  ;;  %v9981_v12 = vmul.f32 0.5, %v9965_v38  ;;  %v9966_v57 = vadd.f32 1.0, %v13442_v33 }
 0xdaf   :  { %v13446_v20 = vpop.eup %13445  ;;  %10449 = vmatpush1.bf16.msra.mxu1 %v13323_v28  ;;  %v9967_v45 = vadd.f32 1.0, %v13444_v36  ;;  %v9995_v9 = vmul.f32 %v9979_v25, %v17885_v19  ;;  %v9980_v54 = vmul.f32 0.5, %v9964_v21  ;;  %v13352_v21 = vld [vmem:[%s18369_s7 + $0x194] ss:$8 sps:$4 sm:$0xff]  }
 0xdb0   :  { %10450 = vmatprep.subr.bf16.mxu1 %v13328_v10  ;;  %v9969_v30 = vadd.f32 1.0, %v13446_v20  ;;  %v17978_v2 = vmul.f32 %v9981_v12, %v17888_v8  ;;  %v13337_v8 = vld [vmem:[%s18369_s7 + $0x144] ss:$8 sps:$4 sm:$0xff]   ;;  %v9982_v22 = vmul.f32 0.5, %v9966_v57  ;;  %v13335_v20 = vld [vmem:[%s18369_s7 + $0x140] ss:$8 sps:$4 sm:$0xff]  }
 0xdb1   :  { %v9983_v7 = vmul.f32 0.5, %v9967_v45  ;;  %v9996_v10 = vmul.f32 %v9980_v54, %v17893_v24  ;;  %v13347_v12 = vld [vmem:[%s18369_s7 + $0x180] ss:$8 sps:$4 sm:$0xff]   ;;  %v13364_v57 = vld [vmem:[%s18369_s7 + $0x1d4] ss:$8 sps:$4 sm:$0xff]  }
 0xdb2   :  { %v9985_v15 = vmul.f32 0.5, %v9969_v30  ;;  %v9998_v45 = vmul.f32 %v9982_v22, %v17896_v56  ;;  %v13341_v56 = vld [vmem:[%s18369_s7 + $0x160] ss:$8 sps:$4 sm:$0xff]   ;;  %v13349_v30 = vld [vmem:[%s18369_s7 + $0x184] ss:$8 sps:$4 sm:$0xff]  }
 0xdb3   :  { %10451 = vmatpush1.bf16.msra.mxu1 %v13326_v17  ;;  %v9999_v3 = vmul.f32 %v9983_v7, %v17901_v63  ;;  %v13340_v17 = vld [vmem:[%s18369_s7 + $0x154] ss:$8 sps:$4 sm:$0xff]   ;;  %v13350_v7 = vld [vmem:[%s18369_s7 + $0x190] ss:$8 sps:$4 sm:$0xff]   ;;  %v13367_v54 = vld [vmem:[%s18369_s7 + $0x1e4] ss:$8 sps:$4 sm:$0xff]  }
 0xdb4   :  { %v13448_v16 = vpop.eup %13447  ;;  %10452 = vmatprep.subr.bf16.mxu1 %v13331_v29  ;;  %v17981_v34 = vmul.f32 %v9985_v15, %v17904_v11  ;;  %v13343_v29 = vld [vmem:[%s18369_s7 + $0x164] ss:$8 sps:$4 sm:$0xff]  }
 0xdb5   :  { %v9968_v1 = vadd.f32 1.0, %v13448_v16  ;;  %v10071_v28 = vpack.c.bf16 %v9999_v3, %v9995_v9  ;;  %v13355_v15 = vld [vmem:[%s18369_s7 + $0x1a4] ss:$8 sps:$4 sm:$0xff]   ;;  %v13358_v9 = vld [vmem:[%s18369_s7 + $0x1b4] ss:$8 sps:$4 sm:$0xff]  }
 0xdb6   :  { %v10073_v19 = vpack.c.bf16 %v17981_v34, %v17978_v2  ;;  %v13356_v3 = vld [vmem:[%s18369_s7 + $0x1b0] ss:$8 sps:$4 sm:$0xff]   ;;  %v13361_v16 = vld [vmem:[%s18369_s7 + $0x1c4] ss:$8 sps:$4 sm:$0xff]  }
 0xdb7   :  { %v13450_v63 = vpop.eup %13449  ;;  %v9984_v27 = vmul.f32 0.5, %v9968_v1  ;;  %10453 = vmatpush1.bf16.msra.mxu1 %v13329_v43  ;;  %v13353_v43 = vld [vmem:[%s18369_s7 + $0x1a0] ss:$8 sps:$4 sm:$0xff]   ;;  %v13362_v1 = vld [vmem:[%s18369_s7 + $0x1d0] ss:$8 sps:$4 sm:$0xff]  }
 0xdb8   :  { %10454 = vmatprep.subr.bf16.mxu1 %v13334_v41  ;;  %v9970_v11 = vadd.f32 1.0, %v13450_v63  ;;  %v13359_v41 = vld [vmem:[%s18369_s7 + $0x1c0] ss:$8 sps:$4 sm:$0xff]   ;;  %v13370_v63 = vld [vmem:[%s18369_s7 + $0x1f4] ss:$8 sps:$4 sm:$0xff]  }
 0xdb9   :  { %v10000_v38 = vmul.f32 %v9984_v27, %v17922_v31  ;;  %v13338_v31 = vld [vmem:[%s18369_s7 + $0x150] ss:$8 sps:$4 sm:$0xff]  }
 0xdba   :  { %v9986_v33 = vmul.f32 0.5, %v9970_v11  ;;  %v13368_v27 = vld [vmem:[%s18369_s7 + $0x1f0] ss:$8 sps:$4 sm:$0xff]  }
 0xdbb   :  { %v10072_v36 = vpack.c.bf16 %v10000_v38, %v9996_v10  ;;  %10455 = vmatpush1.bf16.msra.mxu1 %v13332_v55  ;;  %v10509_v55 = vld [vmem:[%s18364_s2 + $0x16] sm:$0x3] }
 0xdbc   :  { %10456 = vmatprep.subr.bf16.mxu1 %v13337_v8  ;;  %v10002_v25 = vmul.f32 %v9986_v33, %v17926_v0  ;;  %v13346_v0 = vld [vmem:[%s18369_s7 + $0x174] ss:$8 sps:$4 sm:$0xff]   ;;  %v10514_v8 = vrot.slane %v10509_v55, %v16788_v47  ;;  %v10518_v22 = vrot.slane %v10509_v55, %v16794_v46 }
 0xdbd   :  { %10437 = vmatprep.mubr.bf16.mxu1 %v10072_v36 }
 0xdbe   :  { %10438 = vmatmul.mubr.bf16.gmra.mrb[28].mxu1 %v10071_v28  ;;  %v10074_v24 = vpack.c.bf16 %v10002_v25, %v9998_v45  ;;  %v13365_v28 = vld [vmem:[%s18369_s7 + $0x1e0] ss:$8 sps:$4 sm:$0xff]  }
 0xdbf   :  { %10480 = vmatprep.mubr.bf16.mxu1 %v10070_v40  ;;  %10457 = vmatpush1.bf16.msra.mxu1 %v13335_v20  ;;  %v13344_v40 = vld [vmem:[%s18369_s7 + $0x170] ss:$8 sps:$4 sm:$0xff]  }
 0xdc0   :  { %10458 = vmatprep.subr.bf16.mxu1 %v13340_v17 }
 0xdc3   :  { %10459 = vmatpush1.bf16.msra.mxu1 %v13338_v31 }
 0xdc4   :  { %10460 = vmatprep.subr.bf16.mxu1 %v13343_v29 }
 0xdc7   :  { %10461 = vmatpush1.bf16.msra.mxu1 %v13341_v56 }
 0xdc8   :  { %10462 = vmatprep.subr.bf16.mxu1 %v13346_v0 }
 0xdcb   :  { %10463 = vmatpush1.bf16.msra.mxu1 %v13344_v40 }
 0xdcc   :  { %10464 = vmatprep.subr.bf16.mxu1 %v13349_v30 }
 0xdcf   :  { %10465 = vmatpush1.bf16.msra.mxu1 %v13347_v12 }
 0xdd0   :  { %10466 = vmatprep.subr.bf16.mxu1 %v13352_v21 }
 0xdd3   :  { %10467 = vmatpush1.bf16.msra.mxu1 %v13350_v7 }
 0xdd4   :  { %10468 = vmatprep.subr.bf16.mxu1 %v13355_v15 }
 0xdd7   :  { %10469 = vmatpush1.bf16.msra.mxu1 %v13353_v43 }
 0xdd8   :  { %10470 = vmatprep.subr.bf16.mxu1 %v13358_v9 }
 0xddb   :  { %10471 = vmatpush1.bf16.msra.mxu1 %v13356_v3 }
 0xddc   :  { %10472 = vmatprep.subr.bf16.mxu1 %v13361_v16 }
 0xddf   :  { %10473 = vmatpush1.bf16.msra.mxu1 %v13359_v41 }
 0xde0   :  { %10474 = vmatprep.subr.bf16.mxu1 %v13364_v57 }
 0xde3   :  { %10475 = vmatpush1.bf16.msra.mxu1 %v13362_v1 }
 0xde4   :  { %10476 = vmatprep.subr.bf16.mxu1 %v13367_v54 }
 0xde7   :  { %10477 = vmatpush1.bf16.msra.mxu1 %v13365_v28 }
 0xde8   :  { %10478 = vmatprep.subr.bf16.mxu1 %v13370_v63 }
 0xdeb   :  { %10479 = vmatpush1.bf16.msra.mxu1 %v13368_v27 }
 0xdee   :  { %10481 = vmatmul.mubr.bf16.vlgmr.msra.gmra.mrb[24].mxu1 %v10069_v6 }
 0xdef   :  { %10490 = vmatprep.mubr.bf16.mxu1 %v10074_v24 }
 0xdf6   :  { %10491 = vmatmul.mubr.bf16.gmra.mrb[28].mxu1 %v10073_v19 }
 0xec1   :  { %v10482_v11 = vpop.f32.mrb[24].mxu1 }
 0xec2   :  { %v10501_v10 = vadd.f32 %v10482_v11, %v17434_v39  ;;  %v10484_v38 = vpop.f32.mrb[25].mxu1 }
 0xec3   :  { %v10502_v42 = vadd.f32 %v10484_v38, %v17437_v5  ;;  %v10486_v18 = vpop.f32.mrb[26].mxu1 }
 0xec4   :  { %v10521_v6 = vadd.f32 %v10514_v8, %v10501_v10  ;;  %v10503_v33 = vadd.f32 %v10486_v18, %v17440_v49  ;;  %v10488_v2 = vpop.f32.mrb[27].mxu1 }
 0xec5   :  { %v10522_v34 = vadd.f32 %v10518_v22, %v10502_v42  ;;  %v10504_v19 = vadd.f32 %v10488_v2, %v17442_v48 }
 0xec6   :  { %v10523_v36 = vadd.f32 %v10514_v8, %v10503_v33 }
 0xec7   :  { %v10524_v20 = vadd.f32 %v10518_v22, %v10504_v19  ;;  %v10531_v17 = vadd.f32 %v10522_v34, %v10521_v6 }
 0xec9   :  { %10532 = vadd.xlane.f32.xlu0 %v10531_v17  ;;  %v10492_v45 = vpop.f32.mrb[28].mxu1  ;;  %v10534_v25 = vadd.f32 %v10524_v20, %v10523_v36 }
 0xeca   :  { %v10505_v24 = vadd.f32 %v10492_v45, %v17450_v32  ;;  %v10494_v39 = vpop.f32.mrb[29].mxu1 }
 0xecb   :  { %v10506_v31 = vadd.f32 %v10494_v39, %v17453_v13  ;;  %10535 = vadd.xlane.f32.xlu1 %v10534_v25  ;;  %v10496_v5 = vpop.f32.mrb[30].mxu1 }
 0xecc   :  { %v10525_v29 = vadd.f32 %v10514_v8, %v10505_v24  ;;  %v10507_v49 = vadd.f32 %v10496_v5, %v17456_v4  ;;  %v10498_v56 = vpop.f32.mrb[31].mxu1 }
 0xecd   :  { %v10526_v0 = vadd.f32 %v10518_v22, %v10506_v31  ;;  %v10508_v48 = vadd.f32 %v10498_v56, %v17458_v37  ;;  %v10529_v31 = vld [vmem:[%s18364_s2 + $0x18] sm:$0x3]  ;;  %v10530_v56 = vld [vmem:[%s18364_s2 + $0x1a] sm:$0x3] }
 0xece   :  { %v10527_v40 = vadd.f32 %v10514_v8, %v10507_v49 }
 0xecf   :  { %v10528_v30 = vadd.f32 %v10518_v22, %v10508_v48  ;;  %v10537_v12 = vadd.f32 %v10526_v0, %v10525_v29  ;;  %v10603_v48 = vrot.slane %v10529_v31, %v16794_v46 }
 0xed1   :  { %10538 = vadd.xlane.f32.xlu0 %v10537_v12  ;;  %v10540_v21 = vadd.f32 %v10528_v30, %v10527_v40 }
 0xed3   :  { %10541 = vadd.xlane.f32.xlu1 %v10540_v21 }
 0xf56   :  { %v10533_v7 = vpop.xlane.xlu0 %10532 }
 0xf57   :  { %v10543_v32 = vmul.f32 0.00390625, %v10533_v7  ;;  %v10618_v7 = vrot.slane %v10530_v56, %v16788_v47 }
 0xf58   :  { %v10536_v15 = vpop.xlane.xlu1 %10535 }
 0xf59   :  { %v10547_v43 = vsub.f32 %v10521_v6, %v10543_v32  ;;  %v10548_v13 = vsub.f32 %v10522_v34, %v10543_v32  ;;  %v10544_v9 = vmul.f32 0.00390625, %v10536_v15  ;;  %v10622_v32 = vrot.slane %v10530_v56, %v16794_v46 }
 0xf5b   :  { %v10549_v3 = vsub.f32 %v10523_v36, %v10544_v9  ;;  %v10550_v16 = vsub.f32 %v10524_v20, %v10544_v9  ;;  %v10555_v41 = vmul.f32 %v10547_v43, %v10547_v43  ;;  %v10556_v4 = vmul.f32 %v10548_v13, %v10548_v13 }
 0xf5d   :  { %v10563_v57 = vadd.f32 %v10556_v4, %v10555_v41  ;;  %v10557_v1 = vmul.f32 %v10549_v3, %v10549_v3  ;;  %v10558_v54 = vmul.f32 %v10550_v16, %v10550_v16 }
 0xf5e   :  { %v10539_v37 = vpop.xlane.xlu0 %10538 }
 0xf5f   :  { %v10545_v28 = vmul.f32 0.00390625, %v10539_v37  ;;  %10564 = vadd.xlane.f32.xlu0 %v10563_v57  ;;  %v10566_v63 = vadd.f32 %v10558_v54, %v10557_v1 }
 0xf60   :  { %v10542_v27 = vpop.xlane.xlu1 %10541 }
 0xf61   :  { %v10551_v55 = vsub.f32 %v10525_v29, %v10545_v28  ;;  %v10552_v8 = vsub.f32 %v10526_v0, %v10545_v28  ;;  %v10546_v11 = vmul.f32 0.00390625, %v10542_v27  ;;  %10567 = vadd.xlane.f32.xlu1 %v10566_v63  ;;  %v10599_v0 = vrot.slane %v10529_v31, %v16788_v47 }
 0xf63   :  { %v10553_v22 = vsub.f32 %v10527_v40, %v10546_v11  ;;  %v10554_v10 = vsub.f32 %v10528_v30, %v10546_v11  ;;  %v10559_v38 = vmul.f32 %v10551_v55, %v10551_v55  ;;  %v10560_v42 = vmul.f32 %v10552_v8, %v10552_v8 }
 0xf65   :  { %v10569_v18 = vadd.f32 %v10560_v42, %v10559_v38  ;;  %v10561_v6 = vmul.f32 %v10553_v22, %v10553_v22  ;;  %v10562_v33 = vmul.f32 %v10554_v10, %v10554_v10 }
 0xf67   :  { %10570 = vadd.xlane.f32.xlu0 %v10569_v18  ;;  %v10572_v2 = vadd.f32 %v10562_v33, %v10561_v6 }
 0xf69   :  { %10573 = vadd.xlane.f32.xlu1 %v10572_v2 }
 0xfec   :  { %v10565_v34 = vpop.xlane.xlu0 %10564 }
 0xfed   :  { %v10575_v19 = vmul.f32 0.00390625, %v10565_v34 }
 0xfee   :  { %v10568_v36 = vpop.xlane.xlu1 %10567 }
 0xfef   :  { %v10579_v20 = vadd.f32 1e-05, %v10575_v19  ;;  %v10576_v17 = vmul.f32 0.00390625, %v10568_v36 }
 0xff1   :  { %13451 = vrsqrt.f32 %v10579_v20  ;;  %v10580_v45 = vadd.f32 1e-05, %v10576_v17 }
 0xff3   :  { %13453 = vrsqrt.f32 %v10580_v45 }
 0xff4   :  { %v10571_v25 = vpop.xlane.xlu0 %10570 }
 0xff5   :  { %v10577_v24 = vmul.f32 0.00390625, %v10571_v25 }
 0xff6   :  { %v10574_v39 = vpop.xlane.xlu1 %10573 }
 0xff7   :  { %v10581_v5 = vadd.f32 1e-05, %v10577_v24  ;;  %v10578_v29 = vmul.f32 0.00390625, %v10574_v39 }
 0xff9   :  { %13455 = vrsqrt.f32 %v10581_v5  ;;  %v10582_v49 = vadd.f32 1e-05, %v10578_v29 }
 0xffb   :  { %v13452_v40 = vpop.eup %13451  ;;  %13457 = vrsqrt.f32 %v10582_v49 }
 0xffc   :  { %v10587_v30 = vmul.f32 %v13452_v40, %v10547_v43  ;;  %v10588_v12 = vmul.f32 %v13452_v40, %v10548_v13 }
 0xffd   :  { %v13454_v21 = vpop.eup %13453 }
 0xffe   :  { %v10606_v15 = vmul.f32 %v10599_v0, %v10587_v30  ;;  %v10607_v9 = vmul.f32 %v10603_v48, %v10588_v12  ;;  %v10589_v41 = vmul.f32 %v13454_v21, %v10549_v3  ;;  %v10590_v4 = vmul.f32 %v13454_v21, %v10550_v16 }
0x1000   :  { %v10608_v57 = vmul.f32 %v10599_v0, %v10589_v41  ;;  %v10609_v1 = vmul.f32 %v10603_v48, %v10590_v4  ;;  %v10625_v54 = vadd.f32 %v10618_v7, %v10606_v15  ;;  %v10626_v37 = vadd.f32 %v10622_v32, %v10607_v9 }
0x1002   :  { %v10627_v28 = vadd.f32 %v10618_v7, %v10608_v57  ;;  %v10628_v63 = vadd.f32 %v10622_v32, %v10609_v1 }
0x1003   :  { %v13456_v27 = vpop.eup %13455 }
0x1004   :  { %v10633_v11 = vadd.f32 %v10627_v28, %v10625_v54  ;;  %v10640_v38 = vadd.f32 %v10628_v63, %v10626_v37  ;;  %v10591_v43 = vmul.f32 %v13456_v27, %v10551_v55  ;;  %v10592_v13 = vmul.f32 %v13456_v27, %v10552_v8 }
0x1005   :  { %v13458_v42 = vpop.eup %13457 }
0x1006   :  { %v10634_v18 = vrot.slane %v10633_v11, 4  ;;  %v10641_v6 = vrot.slane %v10640_v38, 4  ;;  %v10610_v33 = vmul.f32 %v10599_v0, %v10591_v43  ;;  %v10611_v2 = vmul.f32 %v10603_v48, %v10592_v13 }
0x1007   :  { %v10593_v34 = vmul.f32 %v13458_v42, %v10553_v22  ;;  %v10594_v19 = vmul.f32 %v13458_v42, %v10554_v10 }
0x1008   :  { %v10635_v3 = vadd.f32 %v10634_v18, %v10633_v11  ;;  %v10642_v16 = vadd.f32 %v10641_v6, %v10640_v38  ;;  %v10629_v25 = vadd.f32 %v10618_v7, %v10610_v33  ;;  %v10630_v24 = vadd.f32 %v10622_v32, %v10611_v2 }
0x1009   :  { %v10612_v36 = vmul.f32 %v10599_v0, %v10593_v34  ;;  %v10613_v20 = vmul.f32 %v10603_v48, %v10594_v19 }
0x100a   :  { %v10636_v17 = vrot.slane %v10635_v3, 2  ;;  %v10643_v45 = vrot.slane %v10642_v16, 2 }
0x100b   :  { %v10631_v39 = vadd.f32 %v10618_v7, %v10612_v36  ;;  %v10632_v31 = vadd.f32 %v10622_v32, %v10613_v20 }
0x100c   :  { %v10637_v5 = vadd.f32 %v10636_v17, %v10635_v3  ;;  %v10644_v55 = vadd.f32 %v10643_v45, %v10642_v16 }
0x100d   :  { %v10647_v8 = vadd.f32 %v10631_v39, %v10629_v25  ;;  %v10654_v29 = vadd.f32 %v10632_v31, %v10630_v24 }
0x100e   :  { %v10638_v49 = vrot.slane %v10637_v5, 1  ;;  %v10645_v56 = vrot.slane %v10644_v55, 1 }
0x100f   :  { %v10648_v40 = vrot.slane %v10647_v8, 4  ;;  %v10655_v30 = vrot.slane %v10654_v29, 4 }
0x1010   :  { %v10639_v22 = vadd.f32 %v10638_v49, %v10637_v5  ;;  %v10646_v10 = vadd.f32 %v10645_v56, %v10644_v55 }
0x1011   :  { %v10649_v12 = vadd.f32 %v10648_v40, %v10647_v8  ;;  %v10656_v21 = vadd.f32 %v10655_v30, %v10654_v29 }
0x1012   :  { %v18093_v0 = vmul.f32 0.0625, %v10639_v22  ;;  %v10662_v48 = vmul.f32 0.0625, %v10646_v10 }
0x1013   :  { %v10650_v15 = vrot.slane %v10649_v12, 2  ;;  %v10657_v9 = vrot.slane %v10656_v21, 2 }
0x1015   :  { %v10651_v41 = vadd.f32 %v10650_v15, %v10649_v12  ;;  %v10658_v7 = vadd.f32 %v10657_v9, %v10656_v21 }
0x1017   :  { %v10652_v32 = vrot.slane %v10651_v41, 1  ;;  %v10659_v4 = vrot.slane %v10658_v7, 1 }
0x1019   :  { %v10653_v57 = vadd.f32 %v10652_v32, %v10651_v41  ;;  %v10660_v1 = vadd.f32 %v10659_v4, %v10658_v7 }
0x101b   :  { %v18095_v54 = vmul.f32 0.0625, %v10653_v57  ;;  %v10664_v37 = vmul.f32 0.0625, %v10660_v1 }
0x101c   :  { %13511 = dma.done.wait [#allocation5], 16384 }
0x101d   :  { %13512 = vsyncadd [#allocation5], 4294950912  ;;  %v10798_v28 = vpack.c.bf16 %v10662_v48, %v10662_v48  ;;  %v10800_v63 = vpack.c.bf16 %v10664_v37, %v10664_v37  ;;  %vm10851_vm3 = vcmask 1041409   ;;  %v10670_v13 = vld [vmem:[#allocation2 + $0x8] sm:$0xff]  ;;  %v10669_v42 = vld [vmem:[#allocation2] sm:$0xff] }
0x101e   :  { %v10678_v18 = vld [vmem:[#allocation2 + $0x48] sm:$0xff]  ;;  %10858 = vmatprep.subr.bf16.mxu0 %v10670_v13  ;;  %v10677_v6 = vld [vmem:[#allocation2 + $0x40] sm:$0xff]  ;;  %v10799_v13 = vpack.c.bf16 %v18095_v54, %v18095_v54 }
0x101f   :  { %v10848_v27 = vunpack.c.l.b16 %v10798_v28  ;;  %v10850_v11 = vunpack.c.l.b16 %v10800_v63  ;;  %10859 = vmatpush1.bf16.msra.mxu0 %v10669_v42  ;;  %v10686_v33 = vld [vmem:[#allocation2 + $0x88] sm:$0xff]  ;;  %v10685_v2 = vld [vmem:[#allocation2 + $0x80] sm:$0xff] }
0x1020   :  { %10860 = vmatprep.subr.bf16.mxu0 %v10678_v18  ;;  %v10694_v34 = vld [vmem:[#allocation2 + $0xc8] sm:$0xff]  ;;  %v10693_v19 = vld [vmem:[#allocation2 + $0xc0] sm:$0xff] }
0x1021   :  { %v10853_v38 = vsel %vm10851_vm3, %v10850_v11, %v10848_v27  ;;  %v10702_v3 = vld [vmem:[#allocation2 + $0x108] sm:$0xff]  ;;  %v10701_v16 = vld [vmem:[#allocation2 + $0x100] sm:$0xff] }
0x1022   :  { %v18098_v43 = vpack.c.b16 %v10853_v38, %v10853_v38  ;;  %v10710_v36 = vld [vmem:[#allocation2 + $0x148] sm:$0xff]  ;;  %v10709_v20 = vld [vmem:[#allocation2 + $0x140] sm:$0xff]  ;;  %v10797_v38 = vpack.c.bf16 %v18093_v0, %v18093_v0 }
0x1023   :  { %10861 = vmatpush1.bf16.msra.mxu0 %v10677_v6  ;;  %v10718_v17 = vld [vmem:[#allocation2 + $0x188] sm:$0xff]  ;;  %v10673_v25 = vld [vmem:[#allocation2 + $0x20] sm:$0xff] }
0x1024   :  { %10890 = vmatprep.mubr.bf16.mxu0 %v18098_v43  ;;  %10972 = vmatprep.mubr.bf16.mxu1 %v18098_v43  ;;  %v10674_v45 = vld [vmem:[#allocation2 + $0x28] sm:$0xff]  ;;  %v10717_v39 = vld [vmem:[#allocation2 + $0x180] sm:$0xff] }
0x1025   :  { %10862 = vmatprep.subr.bf16.mxu0 %v10686_v33  ;;  %10940 = vmatprep.subr.bf16.mxu1 %v10674_v45  ;;  %v10682_v24 = vld [vmem:[#allocation2 + $0x68] sm:$0xff]  ;;  %v10681_v5 = vld [vmem:[#allocation2 + $0x60] sm:$0xff] }
0x1026   :  { %10941 = vmatpush1.bf16.msra.mxu1 %v10673_v25  ;;  %v10726_v31 = vld [vmem:[#allocation2 + $0x1c8] sm:$0xff]  ;;  %v10725_v8 = vld [vmem:[#allocation2 + $0x1c0] sm:$0xff] }
0x1027   :  { %10863 = vmatpush1.bf16.msra.mxu0 %v10685_v2  ;;  %10942 = vmatprep.subr.bf16.mxu1 %v10682_v24  ;;  %v10690_v55 = vld [vmem:[#allocation2 + $0xa8] sm:$0xff]  ;;  %v10689_v49 = vld [vmem:[#allocation2 + $0xa0] sm:$0xff]  ;;  %v10847_v2 = vunpack.c.l.b16 %v10797_v38  ;;  %v10671_v24 = vld [vmem:[#allocation2 + $0x10] sm:$0xff] }
0x1028   :  { %10864 = vmatprep.subr.bf16.mxu0 %v10694_v34  ;;  %v10734_v29 = vld [vmem:[#allocation2 + $0x208] sm:$0xff]  ;;  %v10733_v40 = vld [vmem:[#allocation2 + $0x200] sm:$0xff]  ;;  %v10849_v34 = vunpack.c.l.b16 %v10799_v13  ;;  %v10751_v38 = vld [vmem:[#allocation2 + $0x290] sm:$0xff] }
0x1029   :  { %v10698_v56 = vld [vmem:[#allocation2 + $0xe8] sm:$0xff]  ;;  %v10697_v22 = vld [vmem:[#allocation2 + $0xe0] sm:$0xff]  ;;  %v10760_v13 = vld [vmem:[#allocation2 + $0x2d8] sm:$0xff] }
0x102a   :  { %10943 = vmatpush1.bf16.msra.mxu1 %v10681_v5  ;;  %v10742_v30 = vld [vmem:[#allocation2 + $0x248] sm:$0xff]  ;;  %v10741_v12 = vld [vmem:[#allocation2 + $0x240] sm:$0xff]  ;;  %v10852_v54 = vsel %vm10851_vm3, %v10849_v34, %v10847_v2  ;;  %v10775_v2 = vld [vmem:[#allocation2 + $0x350] sm:$0xff] }
0x102b   :  { %10865 = vmatpush1.bf16.msra.mxu0 %v10693_v19  ;;  %10944 = vmatprep.subr.bf16.mxu1 %v10690_v55  ;;  %v10706_v10 = vld [vmem:[#allocation2 + $0x128] sm:$0xff]  ;;  %v10705_v48 = vld [vmem:[#allocation2 + $0x120] sm:$0xff]  ;;  %v18107_v45 = vpack.c.b16 %v10852_v54, %v10852_v54  ;;  %v10679_v55 = vld [vmem:[#allocation2 + $0x50] sm:$0xff] }
0x102c   :  { %10866 = vmatprep.subr.bf16.mxu0 %v10702_v3  ;;  %v10750_v21 = vld [vmem:[#allocation2 + $0x288] sm:$0xff]  ;;  %v10749_v9 = vld [vmem:[#allocation2 + $0x280] sm:$0xff]  ;;  %v10784_v34 = vld [vmem:[#allocation2 + $0x398] sm:$0xff] }
0x102d   :  { %v10714_v15 = vld [vmem:[#allocation2 + $0x168] sm:$0xff]  ;;  %v10713_v7 = vld [vmem:[#allocation2 + $0x160] sm:$0xff]  ;;  %v10675_v54 = vld [vmem:[#allocation2 + $0x30] sm:$0xff] }
0x102e   :  { %10945 = vmatpush1.bf16.msra.mxu1 %v10689_v49  ;;  %v10758_v41 = vld [vmem:[#allocation2 + $0x2c8] sm:$0xff]  ;;  %v10757_v4 = vld [vmem:[#allocation2 + $0x2c0] sm:$0xff] }
0x102f   :  { %10867 = vmatpush1.bf16.msra.mxu0 %v10701_v16  ;;  %10946 = vmatprep.subr.bf16.mxu1 %v10698_v56  ;;  %v10722_v32 = vld [vmem:[#allocation2 + $0x1a8] sm:$0xff]  ;;  %v10721_v1 = vld [vmem:[#allocation2 + $0x1a0] sm:$0xff]  ;;  %v10687_v56 = vld [vmem:[#allocation2 + $0x90] sm:$0xff] }
0x1030   :  { %10868 = vmatprep.subr.bf16.mxu0 %v10710_v36  ;;  %v10766_v57 = vld [vmem:[#allocation2 + $0x308] sm:$0xff]  ;;  %v10765_v28 = vld [vmem:[#allocation2 + $0x300] sm:$0xff] }
0x1031   :  { %v10730_v37 = vld [vmem:[#allocation2 + $0x1e8] sm:$0xff]  ;;  %v10729_v27 = vld [vmem:[#allocation2 + $0x1e0] sm:$0xff] }
0x1032   :  { %10947 = vmatpush1.bf16.msra.mxu1 %v10697_v22  ;;  %v10774_v63 = vld [vmem:[#allocation2 + $0x348] sm:$0xff]  ;;  %v10773_v42 = vld [vmem:[#allocation2 + $0x340] sm:$0xff] }
0x1033   :  { %10869 = vmatpush1.bf16.msra.mxu0 %v10709_v20  ;;  %10948 = vmatprep.subr.bf16.mxu1 %v10706_v10  ;;  %v10738_v11 = vld [vmem:[#allocation2 + $0x228] sm:$0xff]  ;;  %v10737_v6 = vld [vmem:[#allocation2 + $0x220] sm:$0xff]  ;;  %v10672_v20 = vld [vmem:[#allocation2 + $0x18] sm:$0xff] }
0x1034   :  { %10870 = vmatprep.subr.bf16.mxu0 %v10718_v17  ;;  %v10782_v18 = vld [vmem:[#allocation2 + $0x388] sm:$0xff]  ;;  %v10781_v19 = vld [vmem:[#allocation2 + $0x380] sm:$0xff]  ;;  %v10695_v10 = vld [vmem:[#allocation2 + $0xd0] sm:$0xff] }
0x1035   :  { %v10746_v33 = vld [vmem:[#allocation2 + $0x268] sm:$0xff]  ;;  %v10745_v16 = vld [vmem:[#allocation2 + $0x260] sm:$0xff] }
0x1036   :  { %10949 = vmatpush1.bf16.msra.mxu1 %v10705_v48  ;;  %v10790_v3 = vld [vmem:[#allocation2 + $0x3c8] sm:$0xff]  ;;  %v10789_v36 = vld [vmem:[#allocation2 + $0x3c0] sm:$0xff] }
0x1037   :  { %10871 = vmatpush1.bf16.msra.mxu0 %v10717_v39  ;;  %10950 = vmatprep.subr.bf16.mxu1 %v10714_v15  ;;  %v10754_v0 = vld [vmem:[#allocation2 + $0x2a8] sm:$0xff]  ;;  %v10753_v17 = vld [vmem:[#allocation2 + $0x2a0] sm:$0xff]  ;;  %v10680_v39 = vld [vmem:[#allocation2 + $0x58] sm:$0xff] }
0x1038   :  { %10872 = vmatprep.subr.bf16.mxu0 %v10726_v31  ;;  %v10762_v25 = vld [vmem:[#allocation2 + $0x2e8] sm:$0xff]  ;;  %v10761_v31 = vld [vmem:[#allocation2 + $0x2e0] sm:$0xff]  ;;  %v10703_v15 = vld [vmem:[#allocation2 + $0x110] sm:$0xff] }
0x1039   :  { %v10770_v5 = vld [vmem:[#allocation2 + $0x328] sm:$0xff] }
0x103a   :  { %10951 = vmatpush1.bf16.msra.mxu1 %v10713_v7  ;;  %v10778_v49 = vld [vmem:[#allocation2 + $0x368] sm:$0xff]  ;;  %v10711_v7 = vld [vmem:[#allocation2 + $0x150] sm:$0xff] }
0x103b   :  { %10873 = vmatpush1.bf16.msra.mxu0 %v10725_v8  ;;  %10952 = vmatprep.subr.bf16.mxu1 %v10722_v32  ;;  %v10688_v8 = vld [vmem:[#allocation2 + $0x98] sm:$0xff]  ;;  %v10786_v22 = vld [vmem:[#allocation2 + $0x3a8] sm:$0xff] }
0x103c   :  { %10874 = vmatprep.subr.bf16.mxu0 %v10734_v29  ;;  %v10769_v29 = vld [vmem:[#allocation2 + $0x320] sm:$0xff]  ;;  %v10794_v48 = vld [vmem:[#allocation2 + $0x3e8] sm:$0xff]  ;;  %v10720_v32 = vld [vmem:[#allocation2 + $0x198] sm:$0xff] }
0x103e   :  { %10953 = vmatpush1.bf16.msra.mxu1 %v10721_v1  ;;  %v10727_v1 = vld [vmem:[#allocation2 + $0x1d0] sm:$0xff] }
0x103f   :  { %10875 = vmatpush1.bf16.msra.mxu0 %v10733_v40  ;;  %10954 = vmatprep.subr.bf16.mxu1 %v10730_v37  ;;  %v10696_v40 = vld [vmem:[#allocation2 + $0xd8] sm:$0xff] }
0x1040   :  { %10876 = vmatprep.subr.bf16.mxu0 %v10742_v30  ;;  %v10777_v30 = vld [vmem:[#allocation2 + $0x360] sm:$0xff]  ;;  %v10736_v37 = vld [vmem:[#allocation2 + $0x218] sm:$0xff] }
0x1042   :  { %10955 = vmatpush1.bf16.msra.mxu1 %v10729_v27  ;;  %v10743_v27 = vld [vmem:[#allocation2 + $0x250] sm:$0xff] }
0x1043   :  { %10877 = vmatpush1.bf16.msra.mxu0 %v10741_v12  ;;  %10956 = vmatprep.subr.bf16.mxu1 %v10738_v11  ;;  %v10704_v12 = vld [vmem:[#allocation2 + $0x118] sm:$0xff] }
0x1044   :  { %10878 = vmatprep.subr.bf16.mxu0 %v10750_v21  ;;  %v10785_v21 = vld [vmem:[#allocation2 + $0x3a0] sm:$0xff]  ;;  %v10752_v11 = vld [vmem:[#allocation2 + $0x298] sm:$0xff] }
0x1046   :  { %10957 = vmatpush1.bf16.msra.mxu1 %v10737_v6  ;;  %v10767_v6 = vld [vmem:[#allocation2 + $0x310] sm:$0xff] }
0x1047   :  { %10879 = vmatpush1.bf16.msra.mxu0 %v10749_v9  ;;  %10958 = vmatprep.subr.bf16.mxu1 %v10746_v33  ;;  %v10712_v9 = vld [vmem:[#allocation2 + $0x158] sm:$0xff] }
0x1048   :  { %10880 = vmatprep.subr.bf16.mxu0 %v10758_v41  ;;  %v10793_v41 = vld [vmem:[#allocation2 + $0x3e0] sm:$0xff]  ;;  %v10776_v33 = vld [vmem:[#allocation2 + $0x358] sm:$0xff] }
0x104a   :  { %10959 = vmatpush1.bf16.msra.mxu1 %v10745_v16  ;;  %v10791_v16 = vld [vmem:[#allocation2 + $0x3d0] sm:$0xff] }
0x104b   :  { %10881 = vmatpush1.bf16.msra.mxu0 %v10757_v4  ;;  %10960 = vmatprep.subr.bf16.mxu1 %v10754_v0  ;;  %v10719_v4 = vld [vmem:[#allocation2 + $0x190] sm:$0xff]  ;;  %v10676_v0 = vld [vmem:[#allocation2 + $0x38] sm:$0xff] }
0x104c   :  { %10882 = vmatprep.subr.bf16.mxu0 %v10766_v57  ;;  %v10728_v57 = vld [vmem:[#allocation2 + $0x1d8] sm:$0xff] }
0x104e   :  { %10961 = vmatpush1.bf16.msra.mxu1 %v10753_v17  ;;  %v10692_v17 = vld [vmem:[#allocation2 + $0xb8] sm:$0xff] }
0x104f   :  { %10883 = vmatpush1.bf16.msra.mxu0 %v10765_v28  ;;  %10962 = vmatprep.subr.bf16.mxu1 %v10762_v25  ;;  %v10735_v28 = vld [vmem:[#allocation2 + $0x210] sm:$0xff] }
0x1050   :  { %10884 = vmatprep.subr.bf16.mxu0 %v10774_v63  ;;  %v10744_v63 = vld [vmem:[#allocation2 + $0x258] sm:$0xff]  ;;  %v10691_v25 = vld [vmem:[#allocation2 + $0xb0] sm:$0xff] }
0x1052   :  { %10963 = vmatpush1.bf16.msra.mxu1 %v10761_v31  ;;  %v10708_v31 = vld [vmem:[#allocation2 + $0x138] sm:$0xff] }
0x1053   :  { %10885 = vmatpush1.bf16.msra.mxu0 %v10773_v42  ;;  %10964 = vmatprep.subr.bf16.mxu1 %v10770_v5  ;;  %v10759_v42 = vld [vmem:[#allocation2 + $0x2d0] sm:$0xff] }
0x1054   :  { %10886 = vmatprep.subr.bf16.mxu0 %v10782_v18  ;;  %v10768_v18 = vld [vmem:[#allocation2 + $0x318] sm:$0xff]  ;;  %v10707_v5 = vld [vmem:[#allocation2 + $0x130] sm:$0xff] }
0x1056   :  { %10965 = vmatpush1.bf16.msra.mxu1 %v10769_v29  ;;  %v10724_v29 = vld [vmem:[#allocation2 + $0x1b8] sm:$0xff] }
0x1057   :  { %10887 = vmatpush1.bf16.msra.mxu0 %v10781_v19  ;;  %10966 = vmatprep.subr.bf16.mxu1 %v10778_v49  ;;  %v10783_v19 = vld [vmem:[#allocation2 + $0x390] sm:$0xff]  ;;  %v10732_v49 = vld [vmem:[#allocation2 + $0x1f8] sm:$0xff] }
0x1058   :  { %10888 = vmatprep.subr.bf16.mxu0 %v10790_v3  ;;  %v10792_v3 = vld [vmem:[#allocation2 + $0x3d8] sm:$0xff] }
0x105a   :  { %10967 = vmatpush1.bf16.msra.mxu1 %v10777_v30  ;;  %v10739_v30 = vld [vmem:[#allocation2 + $0x230] sm:$0xff] }
0x105b   :  { %10889 = vmatpush1.bf16.msra.mxu0 %v10789_v36  ;;  %10968 = vmatprep.subr.bf16.mxu1 %v10786_v22  ;;  %v10684_v36 = vld [vmem:[#allocation2 + $0x78] sm:$0xff] }
0x105c   :  { %10899 = vmatprep.subr.bf16.mxu0 %v10672_v20  ;;  %v10683_v20 = vld [vmem:[#allocation2 + $0x70] sm:$0xff]  ;;  %v10748_v22 = vld [vmem:[#allocation2 + $0x278] sm:$0xff] }
0x105e   :  { %10891 = vmatmul.mubr.bf16.vlgmr.msra.gmra.mrb[64].mxu0 %v18107_v45  ;;  %10969 = vmatpush1.bf16.msra.mxu1 %v10785_v21  ;;  %v10755_v21 = vld [vmem:[#allocation2 + $0x2b0] sm:$0xff] }
0x105f   :  { %10900 = vmatpush1.bf16.msra.mxu0 %v10671_v24  ;;  %10931 = vmatprep.mubr.bf16.mxu0 %v18098_v43  ;;  %v10700_v24 = vld [vmem:[#allocation2 + $0xf8] sm:$0xff] }
0x1060   :  { %10901 = vmatprep.subr.bf16.mxu0 %v10680_v39  ;;  %10970 = vmatprep.subr.bf16.mxu1 %v10794_v48  ;;  %v10699_v39 = vld [vmem:[#allocation2 + $0xf0] sm:$0xff]  ;;  %v10764_v48 = vld [vmem:[#allocation2 + $0x2f8] sm:$0xff] }
0x1062   :  { %10971 = vmatpush1.bf16.msra.mxu1 %v10793_v41  ;;  %v10771_v41 = vld [vmem:[#allocation2 + $0x330] sm:$0xff] }
0x1063   :  { %10902 = vmatpush1.bf16.msra.mxu0 %v10679_v55  ;;  %v10716_v55 = vld [vmem:[#allocation2 + $0x178] sm:$0xff] }
0x1064   :  { %10903 = vmatprep.subr.bf16.mxu0 %v10688_v8  ;;  %v10715_v8 = vld [vmem:[#allocation2 + $0x170] sm:$0xff] }
0x1065   :  { %10973 = vmatmul.mubr.bf16.vlgmr.msra.gmra.mrb[32].mxu1 %v18107_v45 }
0x1067   :  { %10904 = vmatpush1.bf16.msra.mxu0 %v10687_v56  ;;  %v10731_v56 = vld [vmem:[#allocation2 + $0x1f0] sm:$0xff] }
0x1068   :  { %10905 = vmatprep.subr.bf16.mxu0 %v10696_v40  ;;  %v10740_v40 = vld [vmem:[#allocation2 + $0x238] sm:$0xff] }
0x106b   :  { %10906 = vmatpush1.bf16.msra.mxu0 %v10695_v10  ;;  %v10747_v10 = vld [vmem:[#allocation2 + $0x270] sm:$0xff] }
0x106c   :  { %10907 = vmatprep.subr.bf16.mxu0 %v10704_v12  ;;  %v10756_v12 = vld [vmem:[#allocation2 + $0x2b8] sm:$0xff] }
0x106f   :  { %10908 = vmatpush1.bf16.msra.mxu0 %v10703_v15  ;;  %v10763_v15 = vld [vmem:[#allocation2 + $0x2f0] sm:$0xff] }
0x1070   :  { %10909 = vmatprep.subr.bf16.mxu0 %v10712_v9  ;;  %v10772_v9 = vld [vmem:[#allocation2 + $0x338] sm:$0xff] }
0x1073   :  { %10910 = vmatpush1.bf16.msra.mxu0 %v10711_v7  ;;  %v10780_v7 = vld [vmem:[#allocation2 + $0x378] sm:$0xff] }
0x1074   :  { %10911 = vmatprep.subr.bf16.mxu0 %v10720_v32  ;;  %v10779_v32 = vld [vmem:[#allocation2 + $0x370] sm:$0xff] }
0x1077   :  { %10912 = vmatpush1.bf16.msra.mxu0 %v10719_v4  ;;  %v10788_v4 = vld [vmem:[#allocation2 + $0x3b8] sm:$0xff] }
0x1078   :  { %10913 = vmatprep.subr.bf16.mxu0 %v10728_v57  ;;  %v10787_v57 = vld [vmem:[#allocation2 + $0x3b0] sm:$0xff] }
0x107b   :  { %10914 = vmatpush1.bf16.msra.mxu0 %v10727_v1  ;;  %v10796_v1 = vld [vmem:[#allocation2 + $0x3f8] sm:$0xff] }
0x107c   :  { %10915 = vmatprep.subr.bf16.mxu0 %v10736_v37  ;;  %v10795_v37 = vld [vmem:[#allocation2 + $0x3f0] sm:$0xff] }
0x107f   :  { %10916 = vmatpush1.bf16.msra.mxu0 %v10735_v28  ;;  %v10801_v28 = vld [vmem:[%s18364_s2 + $0x1c] sm:$0xff] }
0x1080   :  { %10917 = vmatprep.subr.bf16.mxu0 %v10744_v63  ;;  %v10806_v63 = vrot.slane %v10801_v28, %v16788_v47 }
0x1083   :  { %10918 = vmatpush1.bf16.msra.mxu0 %v10743_v27  ;;  %v10810_v27 = vrot.slane %v10801_v28, %v16794_v46 }
0x1084   :  { %10919 = vmatprep.subr.bf16.mxu0 %v10752_v11 }
0x1087   :  { %10920 = vmatpush1.bf16.msra.mxu0 %v10751_v38 }
0x1088   :  { %10921 = vmatprep.subr.bf16.mxu0 %v10760_v13 }
0x108b   :  { %10922 = vmatpush1.bf16.msra.mxu0 %v10759_v42 }
0x108c   :  { %10923 = vmatprep.subr.bf16.mxu0 %v10768_v18 }
0x108f   :  { %10924 = vmatpush1.bf16.msra.mxu0 %v10767_v6 }
0x1090   :  { %10925 = vmatprep.subr.bf16.mxu0 %v10776_v33 }
0x1093   :  { %10926 = vmatpush1.bf16.msra.mxu0 %v10775_v2 }
0x1094   :  { %10927 = vmatprep.subr.bf16.mxu0 %v10784_v34  ;;  %v10826_v34 = vrot.slane %v10801_v28, %v17235_v35 }
0x1097   :  { %10928 = vmatpush1.bf16.msra.mxu0 %v10783_v19 }
0x1098   :  { %10929 = vmatprep.subr.bf16.mxu0 %v10792_v3 }
0x109b   :  { %10930 = vmatpush1.bf16.msra.mxu0 %v10791_v16 }
0x109c   :  { %10981 = vmatprep.subr.bf16.mxu0 %v10676_v0 }
0x109e   :  { %10932 = vmatmul.mubr.bf16.vlgmr.msra.gmra.mrb[68].mxu0 %v18107_v45 }
0x109f   :  { %10982 = vmatpush1.bf16.msra.mxu0 %v10675_v54  ;;  %11013 = vmatprep.mubr.bf16.mxu0 %v18098_v43  ;;  %v10723_v43 = vld [vmem:[#allocation2 + $0x1b0] sm:$0xff] }
0x10a0   :  { %10983 = vmatprep.subr.bf16.mxu0 %v10684_v36 }
0x10a3   :  { %10984 = vmatpush1.bf16.msra.mxu0 %v10683_v20 }
0x10a4   :  { %10985 = vmatprep.subr.bf16.mxu0 %v10692_v17 }
0x10a7   :  { %10986 = vmatpush1.bf16.msra.mxu0 %v10691_v25  ;;  %v10814_v25 = vrot.slane %v10801_v28, %v17189_v26 }
0x10a8   :  { %10987 = vmatprep.subr.bf16.mxu0 %v10700_v24  ;;  %v10818_v24 = vrot.slane %v10801_v28, %v17195_v23 }
0x10ab   :  { %10988 = vmatpush1.bf16.msra.mxu0 %v10699_v39 }
0x10ac   :  { %10989 = vmatprep.subr.bf16.mxu0 %v10708_v31 }
0x10af   :  { %10990 = vmatpush1.bf16.msra.mxu0 %v10707_v5 }
0x10b0   :  { %10991 = vmatprep.subr.bf16.mxu0 %v10716_v55 }
0x10b3   :  { %10992 = vmatpush1.bf16.msra.mxu0 %v10715_v8 }
0x10b4   :  { %10993 = vmatprep.subr.bf16.mxu0 %v10724_v29 }
0x10b7   :  { %10994 = vmatpush1.bf16.msra.mxu0 %v10723_v43 }
0x10b8   :  { %10995 = vmatprep.subr.bf16.mxu0 %v10732_v49 }
0x10bb   :  { %10996 = vmatpush1.bf16.msra.mxu0 %v10731_v56  ;;  %v10829_v56 = vsub.s32 6, %v16785_v44 }
0x10bc   :  { %10997 = vmatprep.subr.bf16.mxu0 %v10740_v40  ;;  %v10833_v40 = vsub.s32 7, %v16785_v44 }
0x10bf   :  { %10998 = vmatpush1.bf16.msra.mxu0 %v10739_v30  ;;  %v10830_v30 = vrot.slane %v10801_v28, %v10829_v56 }
0x10c0   :  { %10999 = vmatprep.subr.bf16.mxu0 %v10748_v22  ;;  %v10834_v22 = vrot.slane %v10801_v28, %v10833_v40 }
0x10c3   :  { %11000 = vmatpush1.bf16.msra.mxu0 %v10747_v10 }
0x10c4   :  { %11001 = vmatprep.subr.bf16.mxu0 %v10756_v12 }
0x10c7   :  { %11002 = vmatpush1.bf16.msra.mxu0 %v10755_v21 }
0x10c8   :  { %11003 = vmatprep.subr.bf16.mxu0 %v10764_v48 }
0x10cb   :  { %11004 = vmatpush1.bf16.msra.mxu0 %v10763_v15 }
0x10cc   :  { %11005 = vmatprep.subr.bf16.mxu0 %v10772_v9 }
0x10cf   :  { %11006 = vmatpush1.bf16.msra.mxu0 %v10771_v41 }
0x10d0   :  { %11007 = vmatprep.subr.bf16.mxu0 %v10780_v7 }
0x10d3   :  { %11008 = vmatpush1.bf16.msra.mxu0 %v10779_v32 }
0x10d4   :  { %11009 = vmatprep.subr.bf16.mxu0 %v10788_v4 }
0x10d7   :  { %11010 = vmatpush1.bf16.msra.mxu0 %v10787_v57 }
0x10d8   :  { %11011 = vmatprep.subr.bf16.mxu0 %v10796_v1 }
0x10db   :  { %11012 = vmatpush1.bf16.msra.mxu0 %v10795_v37 }
0x10de   :  { %11014 = vmatmul.mubr.bf16.vlgmr.msra.gmra.mrb[72].mxu0 %v18107_v45  ;;  %v10822_v45 = vrot.slane %v10801_v28, %v17232_v14 }
0x1131   :  { %v10892_v11 = vpop.f32.mrb[64].mxu0 }
0x1132   :  { %v18120_v38 = vadd.f32 %v10892_v11, %v10806_v63  ;;  %v10894_v13 = vpop.f32.mrb[65].mxu0 }
0x1133   :  { %v10895_v42 = vadd.f32 %v10894_v13, %v10810_v27  ;;  %v10896_v18 = vpop.f32.mrb[66].mxu0 }
0x1134   :  { %v11022_v6 = vmax.f32 %v18120_v38, 0.0  ;;  %v10897_v33 = vpop.f32.mrb[67].mxu0 }
0x1135   :  { %v11023_v2 = vmax.f32 %v10895_v42, 0.0 }
0x1138   :  { %v10974_v19 = vpop.f32.mrb[32].mxu1 }
0x1139   :  { %v18125_v3 = vadd.f32 %v10974_v19, %v10822_v45  ;;  %v10976_v16 = vpop.f32.mrb[33].mxu1 }
0x113a   :  { %v18127_v0 = vadd.f32 %v10976_v16, %v10826_v34  ;;  %v10978_v54 = vpop.f32.mrb[34].mxu1 }
0x113b   :  { %v11026_v36 = vmax.f32 %v18125_v3, 0.0  ;;  %v10979_v20 = vpop.f32.mrb[35].mxu1 }
0x113c   :  { %v11027_v17 = vmax.f32 %v18127_v0, 0.0 }
0x1171   :  { %v10933_v39 = vpop.f32.mrb[68].mxu0 }
0x1172   :  { %v18133_v31 = vadd.f32 %v10933_v39, %v10814_v25  ;;  %v10935_v5 = vpop.f32.mrb[69].mxu0 }
0x1173   :  { %v18135_v55 = vadd.f32 %v10935_v5, %v10818_v24  ;;  %v10937_v8 = vpop.f32.mrb[70].mxu0 }
0x1174   :  { %v11024_v29 = vmax.f32 %v18133_v31, 0.0  ;;  %v10938_v43 = vpop.f32.mrb[71].mxu0 }
0x1175   :  { %v11025_v49 = vmax.f32 %v18135_v55, 0.0 }
0x11b1   :  { %v11015_v10 = vpop.f32.mrb[72].mxu0 }
0x11b2   :  { %v18141_v12 = vadd.f32 %v11015_v10, %v10830_v30  ;;  %v11017_v21 = vpop.f32.mrb[73].mxu0 }
0x11b3   :  { %v18143_v48 = vadd.f32 %v11017_v21, %v10834_v22  ;;  %v11019_v15 = vpop.f32.mrb[74].mxu0 }
0x11b4   :  { %v11028_v9 = vmax.f32 %v18141_v12, 0.0  ;;  %v11020_v41 = vpop.f32.mrb[75].mxu0 }
0x11b5   :  { %v11029_v7 = vmax.f32 %v18143_v48, 0.0 }
0x11b6   :  { %13513 = dma.done.wait [#allocation5 + $0x1], 49152 }
0x11b7   :  { %13514 = vsyncadd [#allocation5 + $0x1], 4294918144  ;;  %v18147_v32 = vpack.c.bf16 %v11023_v2, %v11023_v2  ;;  %v11035_v4 = vld [vmem:[#allocation3 + $0x8] sm:$0xff]  ;;  %v11037_v57 = vld [vmem:[#allocation3 + $0x18] sm:$0xff] }
0x11b8   :  { %v11034_v1 = vld [vmem:[#allocation3] sm:$0xff]  ;;  %11458 = vmatprep.subr.bf16.mxu1 %v11035_v4  ;;  %11622 = vmatprep.subr.bf16.mxu0 %v11037_v57  ;;  %v11036_v37 = vld [vmem:[#allocation3 + $0x10] sm:$0xff]  ;;  %v11041_v28 = vld [vmem:[#allocation3 + $0x38] sm:$0xff] }
0x11b9   :  { %11490 = vmatprep.mubr.bf16.mxu1 %v18147_v32  ;;  %11654 = vmatprep.mubr.bf16.mxu0 %v18147_v32  ;;  %v11043_v63 = vld [vmem:[#allocation3 + $0x48] sm:$0xff]  ;;  %v11040_v27 = vld [vmem:[#allocation3 + $0x30] sm:$0xff]  ;;  %v11042_v11 = vld [vmem:[#allocation3 + $0x40] sm:$0xff] }
0x11ba   :  { %11459 = vmatpush1.bf16.msra.mxu1 %v11034_v1  ;;  %11623 = vmatpush1.bf16.msra.mxu0 %v11036_v37  ;;  %v11047_v13 = vld [vmem:[#allocation3 + $0x68] sm:$0xff]  ;;  %v11049_v42 = vld [vmem:[#allocation3 + $0x78] sm:$0xff]  ;;  %v11046_v18 = vld [vmem:[#allocation3 + $0x60] sm:$0xff] }
0x11bb   :  { %11460 = vmatprep.subr.bf16.mxu1 %v11041_v28  ;;  %11624 = vmatprep.subr.bf16.mxu0 %v11043_v63  ;;  %v11048_v33 = vld [vmem:[#allocation3 + $0x70] sm:$0xff]  ;;  %v11053_v2 = vld [vmem:[#allocation3 + $0x98] sm:$0xff]  ;;  %v11055_v45 = vld [vmem:[#allocation3 + $0xa8] sm:$0xff] }
0x11bc   :  { %v11052_v34 = vld [vmem:[#allocation3 + $0x90] sm:$0xff]  ;;  %v11054_v19 = vld [vmem:[#allocation3 + $0xa0] sm:$0xff]  ;;  %v11059_v16 = vld [vmem:[#allocation3 + $0xc8] sm:$0xff] }
0x11bd   :  { %v11061_v54 = vld [vmem:[#allocation3 + $0xd8] sm:$0xff]  ;;  %v11058_v20 = vld [vmem:[#allocation3 + $0xc0] sm:$0xff]  ;;  %v11060_v25 = vld [vmem:[#allocation3 + $0xd0] sm:$0xff] }
0x11be   :  { %11461 = vmatpush1.bf16.msra.mxu1 %v11040_v27  ;;  %11625 = vmatpush1.bf16.msra.mxu0 %v11042_v11  ;;  %v11065_v24 = vld [vmem:[#allocation3 + $0xf8] sm:$0xff]  ;;  %v11067_v39 = vld [vmem:[#allocation3 + $0x108] sm:$0xff]  ;;  %v11064_v5 = vld [vmem:[#allocation3 + $0xf0] sm:$0xff] }
0x11bf   :  { %11462 = vmatprep.subr.bf16.mxu1 %v11047_v13  ;;  %11626 = vmatprep.subr.bf16.mxu0 %v11049_v42  ;;  %v11066_v8 = vld [vmem:[#allocation3 + $0x100] sm:$0xff]  ;;  %v11071_v43 = vld [vmem:[#allocation3 + $0x128] sm:$0xff]  ;;  %v11073_v56 = vld [vmem:[#allocation3 + $0x138] sm:$0xff] }
0x11c0   :  { %v11070_v40 = vld [vmem:[#allocation3 + $0x120] sm:$0xff]  ;;  %v11072_v30 = vld [vmem:[#allocation3 + $0x130] sm:$0xff]  ;;  %v11077_v22 = vld [vmem:[#allocation3 + $0x158] sm:$0xff] }
0x11c1   :  { %v11079_v10 = vld [vmem:[#allocation3 + $0x168] sm:$0xff]  ;;  %v11076_v21 = vld [vmem:[#allocation3 + $0x150] sm:$0xff]  ;;  %v11078_v15 = vld [vmem:[#allocation3 + $0x160] sm:$0xff] }
0x11c2   :  { %11463 = vmatpush1.bf16.msra.mxu1 %v11046_v18  ;;  %11627 = vmatpush1.bf16.msra.mxu0 %v11048_v33  ;;  %v11083_v41 = vld [vmem:[#allocation3 + $0x188] sm:$0xff]  ;;  %v11085_v4 = vld [vmem:[#allocation3 + $0x198] sm:$0xff]  ;;  %v11082_v57 = vld [vmem:[#allocation3 + $0x180] sm:$0xff] }
0x11c3   :  { %11464 = vmatprep.subr.bf16.mxu1 %v11053_v2  ;;  %11628 = vmatprep.subr.bf16.mxu0 %v11055_v45  ;;  %v11084_v1 = vld [vmem:[#allocation3 + $0x190] sm:$0xff]  ;;  %v11089_v37 = vld [vmem:[#allocation3 + $0x1b8] sm:$0xff]  ;;  %v11091_v28 = vld [vmem:[#allocation3 + $0x1c8] sm:$0xff] }
0x11c4   :  { %v11088_v63 = vld [vmem:[#allocation3 + $0x1b0] sm:$0xff]  ;;  %v11090_v27 = vld [vmem:[#allocation3 + $0x1c0] sm:$0xff]  ;;  %v11095_v11 = vld [vmem:[#allocation3 + $0x1e8] sm:$0xff] }
0x11c5   :  { %v11097_v13 = vld [vmem:[#allocation3 + $0x1f8] sm:$0xff]  ;;  %v11094_v42 = vld [vmem:[#allocation3 + $0x1e0] sm:$0xff]  ;;  %v11096_v18 = vld [vmem:[#allocation3 + $0x1f0] sm:$0xff] }
0x11c6   :  { %11465 = vmatpush1.bf16.msra.mxu1 %v11052_v34  ;;  %11629 = vmatpush1.bf16.msra.mxu0 %v11054_v19  ;;  %v11101_v33 = vld [vmem:[#allocation3 + $0x218] sm:$0xff]  ;;  %v11103_v2 = vld [vmem:[#allocation3 + $0x228] sm:$0xff]  ;;  %v11100_v45 = vld [vmem:[#allocation3 + $0x210] sm:$0xff] }
0x11c7   :  { %11466 = vmatprep.subr.bf16.mxu1 %v11059_v16  ;;  %11630 = vmatprep.subr.bf16.mxu0 %v11061_v54  ;;  %v11102_v34 = vld [vmem:[#allocation3 + $0x220] sm:$0xff]  ;;  %v11107_v19 = vld [vmem:[#allocation3 + $0x248] sm:$0xff]  ;;  %v11109_v16 = vld [vmem:[#allocation3 + $0x258] sm:$0xff] }
0x11c8   :  { %v11106_v54 = vld [vmem:[#allocation3 + $0x240] sm:$0xff]  ;;  %v11136_v38 = vld [vmem:[#allocation3 + $0x330] sm:$0xff] }
0x11c9   :  { %v11142_v55 = vld [vmem:[#allocation3 + $0x360] sm:$0xff]  ;;  %v11232_v31 = vld [vmem:[#allocation3 + $0x630] sm:$0xff] }
0x11ca   :  { %11467 = vmatpush1.bf16.msra.mxu1 %v11058_v20  ;;  %11631 = vmatpush1.bf16.msra.mxu0 %v11060_v25  ;;  %v11108_v20 = vld [vmem:[#allocation3 + $0x250] sm:$0xff]  ;;  %v11113_v25 = vld [vmem:[#allocation3 + $0x278] sm:$0xff]  ;;  %v11238_v0 = vld [vmem:[#allocation3 + $0x660] sm:$0xff] }
0x11cb   :  { %11468 = vmatprep.subr.bf16.mxu1 %v11065_v24  ;;  %11632 = vmatprep.subr.bf16.mxu0 %v11067_v39  ;;  %v11115_v24 = vld [vmem:[#allocation3 + $0x288] sm:$0xff]  ;;  %v11112_v39 = vld [vmem:[#allocation3 + $0x270] sm:$0xff]  ;;  %v11334_v48 = vld [vmem:[#allocation3 + $0x960] sm:$0xff] }
0x11cc   :  { %v11328_v3 = vld [vmem:[#allocation3 + $0x930] sm:$0xff]  ;;  %v11050_v12 = vld [vmem:[#allocation3 + $0x80] sm:$0xff] }
0x11ce   :  { %11469 = vmatpush1.bf16.msra.mxu1 %v11064_v5  ;;  %11633 = vmatpush1.bf16.msra.mxu0 %v11066_v8  ;;  %v11114_v5 = vld [vmem:[#allocation3 + $0x280] sm:$0xff]  ;;  %v11119_v8 = vld [vmem:[#allocation3 + $0x2a8] sm:$0xff] }
0x11cf   :  { %11470 = vmatprep.subr.bf16.mxu1 %v11071_v43  ;;  %11634 = vmatprep.subr.bf16.mxu0 %v11073_v56  ;;  %v11121_v43 = vld [vmem:[#allocation3 + $0x2b8] sm:$0xff]  ;;  %v11118_v56 = vld [vmem:[#allocation3 + $0x2a0] sm:$0xff] }
0x11d2   :  { %11471 = vmatpush1.bf16.msra.mxu1 %v11070_v40  ;;  %11635 = vmatpush1.bf16.msra.mxu0 %v11072_v30  ;;  %v11120_v40 = vld [vmem:[#allocation3 + $0x2b0] sm:$0xff]  ;;  %v11125_v30 = vld [vmem:[#allocation3 + $0x2d8] sm:$0xff] }
0x11d3   :  { %11472 = vmatprep.subr.bf16.mxu1 %v11077_v22  ;;  %11636 = vmatprep.subr.bf16.mxu0 %v11079_v10  ;;  %v11127_v22 = vld [vmem:[#allocation3 + $0x2e8] sm:$0xff]  ;;  %v11124_v10 = vld [vmem:[#allocation3 + $0x2d0] sm:$0xff] }
0x11d6   :  { %11473 = vmatpush1.bf16.msra.mxu1 %v11076_v21  ;;  %11637 = vmatpush1.bf16.msra.mxu0 %v11078_v15  ;;  %v11126_v21 = vld [vmem:[#allocation3 + $0x2e0] sm:$0xff]  ;;  %v11131_v15 = vld [vmem:[#allocation3 + $0x308] sm:$0xff] }
0x11d7   :  { %11474 = vmatprep.subr.bf16.mxu1 %v11083_v41  ;;  %11638 = vmatprep.subr.bf16.mxu0 %v11085_v4  ;;  %v11133_v41 = vld [vmem:[#allocation3 + $0x318] sm:$0xff]  ;;  %v18154_v4 = vpack.c.bf16 %v11022_v6, %v11022_v6  ;;  %v11138_v6 = vld [vmem:[#allocation3 + $0x340] sm:$0xff] }
0x11da   :  { %11475 = vmatpush1.bf16.msra.mxu1 %v11082_v57  ;;  %11639 = vmatpush1.bf16.msra.mxu0 %v11084_v1  ;;  %v11130_v57 = vld [vmem:[#allocation3 + $0x300] sm:$0xff]  ;;  %v11132_v1 = vld [vmem:[#allocation3 + $0x310] sm:$0xff] }
0x11db   :  { %11476 = vmatprep.subr.bf16.mxu1 %v11089_v37  ;;  %11640 = vmatprep.subr.bf16.mxu0 %v11091_v28  ;;  %v11137_v37 = vld [vmem:[#allocation3 + $0x338] sm:$0xff]  ;;  %v11139_v28 = vld [vmem:[#allocation3 + $0x348] sm:$0xff] }
0x11de   :  { %11477 = vmatpush1.bf16.msra.mxu1 %v11088_v63  ;;  %11641 = vmatpush1.bf16.msra.mxu0 %v11090_v27  ;;  %v18159_v63 = vpack.c.bf16 %v11025_v49, %v11025_v49  ;;  %v11143_v27 = vld [vmem:[#allocation3 + $0x368] sm:$0xff]  ;;  %v11144_v49 = vld [vmem:[#allocation3 + $0x370] sm:$0xff] }
0x11df   :  { %11478 = vmatprep.subr.bf16.mxu1 %v11095_v11  ;;  %11642 = vmatprep.subr.bf16.mxu0 %v11097_v13  ;;  %v11145_v11 = vld [vmem:[#allocation3 + $0x378] sm:$0xff] }
0x11e0   :  { %v11149_v13 = vld [vmem:[#allocation3 + $0x398] sm:$0xff] }
0x11e2   :  { %11479 = vmatpush1.bf16.msra.mxu1 %v11094_v42  ;;  %11643 = vmatpush1.bf16.msra.mxu0 %v11096_v18  ;;  %v11151_v42 = vld [vmem:[#allocation3 + $0x3a8] sm:$0xff]  ;;  %v11148_v18 = vld [vmem:[#allocation3 + $0x390] sm:$0xff] }
0x11e3   :  { %11480 = vmatprep.subr.bf16.mxu1 %v11101_v33  ;;  %11644 = vmatprep.subr.bf16.mxu0 %v11103_v2  ;;  %v11150_v33 = vld [vmem:[#allocation3 + $0x3a0] sm:$0xff]  ;;  %v11155_v2 = vld [vmem:[#allocation3 + $0x3c8] sm:$0xff] }
0x11e6   :  { %11481 = vmatpush1.bf16.msra.mxu1 %v11100_v45  ;;  %11645 = vmatpush1.bf16.msra.mxu0 %v11102_v34  ;;  %v11157_v45 = vld [vmem:[#allocation3 + $0x3d8] sm:$0xff]  ;;  %v11154_v34 = vld [vmem:[#allocation3 + $0x3c0] sm:$0xff] }
0x11e7   :  { %11482 = vmatprep.subr.bf16.mxu1 %v11107_v19  ;;  %11646 = vmatprep.subr.bf16.mxu0 %v11109_v16  ;;  %v11156_v19 = vld [vmem:[#allocation3 + $0x3d0] sm:$0xff]  ;;  %v11161_v16 = vld [vmem:[#allocation3 + $0x3f8] sm:$0xff] }
0x11ea   :  { %11483 = vmatpush1.bf16.msra.mxu1 %v11106_v54  ;;  %11647 = vmatpush1.bf16.msra.mxu0 %v11108_v20  ;;  %v11163_v54 = vld [vmem:[#allocation3 + $0x408] sm:$0xff]  ;;  %v11160_v20 = vld [vmem:[#allocation3 + $0x3f0] sm:$0xff] }
0x11eb   :  { %11484 = vmatprep.subr.bf16.mxu1 %v11113_v25  ;;  %11648 = vmatprep.subr.bf16.mxu0 %v11115_v24  ;;  %v11162_v25 = vld [vmem:[#allocation3 + $0x400] sm:$0xff]  ;;  %v11167_v24 = vld [vmem:[#allocation3 + $0x428] sm:$0xff] }
0x11ee   :  { %11485 = vmatpush1.bf16.msra.mxu1 %v11112_v39  ;;  %11649 = vmatpush1.bf16.msra.mxu0 %v11114_v5  ;;  %v11169_v39 = vld [vmem:[#allocation3 + $0x438] sm:$0xff]  ;;  %v11166_v5 = vld [vmem:[#allocation3 + $0x420] sm:$0xff] }
0x11ef   :  { %11486 = vmatprep.subr.bf16.mxu1 %v11119_v8  ;;  %11650 = vmatprep.subr.bf16.mxu0 %v11121_v43  ;;  %v11168_v8 = vld [vmem:[#allocation3 + $0x430] sm:$0xff]  ;;  %v11173_v43 = vld [vmem:[#allocation3 + $0x458] sm:$0xff] }
0x11f2   :  { %11487 = vmatpush1.bf16.msra.mxu1 %v11118_v56  ;;  %11651 = vmatpush1.bf16.msra.mxu0 %v11120_v40  ;;  %v11175_v56 = vld [vmem:[#allocation3 + $0x468] sm:$0xff]  ;;  %v11172_v40 = vld [vmem:[#allocation3 + $0x450] sm:$0xff] }
0x11f3   :  { %11488 = vmatprep.subr.bf16.mxu1 %v11125_v30  ;;  %11652 = vmatprep.subr.bf16.mxu0 %v11127_v22  ;;  %v11174_v30 = vld [vmem:[#allocation3 + $0x460] sm:$0xff]  ;;  %v11179_v22 = vld [vmem:[#allocation3 + $0x488] sm:$0xff] }
0x11f6   :  { %11489 = vmatpush1.bf16.msra.mxu1 %v11124_v10  ;;  %11653 = vmatpush1.bf16.msra.mxu0 %v11126_v21  ;;  %v11181_v10 = vld [vmem:[#allocation3 + $0x498] sm:$0xff]  ;;  %v11178_v21 = vld [vmem:[#allocation3 + $0x480] sm:$0xff] }
0x11f7   :  { %11499 = vmatprep.subr.bf16.mxu1 %v11131_v15  ;;  %11663 = vmatprep.subr.bf16.mxu0 %v11133_v41  ;;  %v11180_v15 = vld [vmem:[#allocation3 + $0x490] sm:$0xff]  ;;  %v11185_v41 = vld [vmem:[#allocation3 + $0x4b8] sm:$0xff] }
0x11f9   :  { %11491 = vmatmul.mubr.bf16.vlgmr.msra.gmra.mrb[36].mxu1 %v18154_v4  ;;  %11655 = vmatmul.mubr.bf16.vlgmr.msra.gmra.mrb[76].mxu0 %v18154_v4 }
0x11fa   :  { %11500 = vmatpush1.bf16.msra.mxu1 %v11130_v57  ;;  %11664 = vmatpush1.bf16.msra.mxu0 %v11132_v1  ;;  %v11187_v57 = vld [vmem:[#allocation3 + $0x4c8] sm:$0xff]  ;;  %v11184_v1 = vld [vmem:[#allocation3 + $0x4b0] sm:$0xff] }
0x11fb   :  { %11501 = vmatprep.subr.bf16.mxu1 %v11137_v37  ;;  %11665 = vmatprep.subr.bf16.mxu0 %v11139_v28  ;;  %v11186_v37 = vld [vmem:[#allocation3 + $0x4c0] sm:$0xff]  ;;  %v11191_v28 = vld [vmem:[#allocation3 + $0x4e8] sm:$0xff] }
0x11fc   :  { %11531 = vmatprep.mubr.bf16.mxu1 %v18159_v63  ;;  %11695 = vmatprep.mubr.bf16.mxu0 %v18159_v63 }
0x11fe   :  { %11502 = vmatpush1.bf16.msra.mxu1 %v11136_v38  ;;  %11666 = vmatpush1.bf16.msra.mxu0 %v11138_v6  ;;  %v11193_v38 = vld [vmem:[#allocation3 + $0x4f8] sm:$0xff]  ;;  %v11190_v6 = vld [vmem:[#allocation3 + $0x4e0] sm:$0xff] }
0x11ff   :  { %11503 = vmatprep.subr.bf16.mxu1 %v11143_v27  ;;  %11667 = vmatprep.subr.bf16.mxu0 %v11145_v11  ;;  %v11192_v27 = vld [vmem:[#allocation3 + $0x4f0] sm:$0xff]  ;;  %v11197_v11 = vld [vmem:[#allocation3 + $0x518] sm:$0xff] }
0x1202   :  { %11504 = vmatpush1.bf16.msra.mxu1 %v11142_v55  ;;  %11668 = vmatpush1.bf16.msra.mxu0 %v11144_v49  ;;  %v11199_v55 = vld [vmem:[#allocation3 + $0x528] sm:$0xff]  ;;  %v11196_v49 = vld [vmem:[#allocation3 + $0x510] sm:$0xff] }
0x1203   :  { %11505 = vmatprep.subr.bf16.mxu1 %v11149_v13  ;;  %11669 = vmatprep.subr.bf16.mxu0 %v11151_v42  ;;  %v11198_v13 = vld [vmem:[#allocation3 + $0x520] sm:$0xff]  ;;  %v11203_v42 = vld [vmem:[#allocation3 + $0x548] sm:$0xff] }
0x1206   :  { %11506 = vmatpush1.bf16.msra.mxu1 %v11148_v18  ;;  %11670 = vmatpush1.bf16.msra.mxu0 %v11150_v33  ;;  %v11205_v18 = vld [vmem:[#allocation3 + $0x558] sm:$0xff]  ;;  %v11202_v33 = vld [vmem:[#allocation3 + $0x540] sm:$0xff] }
0x1207   :  { %11507 = vmatprep.subr.bf16.mxu1 %v11155_v2  ;;  %11671 = vmatprep.subr.bf16.mxu0 %v11157_v45  ;;  %v11204_v2 = vld [vmem:[#allocation3 + $0x550] sm:$0xff]  ;;  %v11209_v45 = vld [vmem:[#allocation3 + $0x578] sm:$0xff] }
0x120a   :  { %11508 = vmatpush1.bf16.msra.mxu1 %v11154_v34  ;;  %11672 = vmatpush1.bf16.msra.mxu0 %v11156_v19  ;;  %v11211_v34 = vld [vmem:[#allocation3 + $0x588] sm:$0xff]  ;;  %v11208_v19 = vld [vmem:[#allocation3 + $0x570] sm:$0xff] }
0x120b   :  { %11509 = vmatprep.subr.bf16.mxu1 %v11161_v16  ;;  %11673 = vmatprep.subr.bf16.mxu0 %v11163_v54  ;;  %v11210_v16 = vld [vmem:[#allocation3 + $0x580] sm:$0xff]  ;;  %v11215_v54 = vld [vmem:[#allocation3 + $0x5a8] sm:$0xff] }
0x120e   :  { %11510 = vmatpush1.bf16.msra.mxu1 %v11160_v20  ;;  %11674 = vmatpush1.bf16.msra.mxu0 %v11162_v25  ;;  %v11217_v20 = vld [vmem:[#allocation3 + $0x5b8] sm:$0xff]  ;;  %v11214_v25 = vld [vmem:[#allocation3 + $0x5a0] sm:$0xff] }
0x120f   :  { %11511 = vmatprep.subr.bf16.mxu1 %v11167_v24  ;;  %11675 = vmatprep.subr.bf16.mxu0 %v11169_v39  ;;  %v11216_v24 = vld [vmem:[#allocation3 + $0x5b0] sm:$0xff]  ;;  %v11221_v39 = vld [vmem:[#allocation3 + $0x5d8] sm:$0xff] }
0x1212   :  { %11512 = vmatpush1.bf16.msra.mxu1 %v11166_v5  ;;  %11676 = vmatpush1.bf16.msra.mxu0 %v11168_v8  ;;  %v11223_v5 = vld [vmem:[#allocation3 + $0x5e8] sm:$0xff]  ;;  %v11220_v8 = vld [vmem:[#allocation3 + $0x5d0] sm:$0xff] }
0x1213   :  { %11513 = vmatprep.subr.bf16.mxu1 %v11173_v43  ;;  %11677 = vmatprep.subr.bf16.mxu0 %v11175_v56  ;;  %v11222_v43 = vld [vmem:[#allocation3 + $0x5e0] sm:$0xff]  ;;  %v11227_v56 = vld [vmem:[#allocation3 + $0x608] sm:$0xff] }
0x1216   :  { %11514 = vmatpush1.bf16.msra.mxu1 %v11172_v40  ;;  %11678 = vmatpush1.bf16.msra.mxu0 %v11174_v30  ;;  %v11229_v40 = vld [vmem:[#allocation3 + $0x618] sm:$0xff]  ;;  %v18168_v30 = vpack.c.bf16 %v11024_v29, %v11024_v29  ;;  %v11234_v29 = vld [vmem:[#allocation3 + $0x640] sm:$0xff] }
0x1217   :  { %11515 = vmatprep.subr.bf16.mxu1 %v11179_v22  ;;  %11679 = vmatprep.subr.bf16.mxu0 %v11181_v10  ;;  %v11226_v22 = vld [vmem:[#allocation3 + $0x600] sm:$0xff]  ;;  %v11228_v10 = vld [vmem:[#allocation3 + $0x610] sm:$0xff] }
0x121a   :  { %11516 = vmatpush1.bf16.msra.mxu1 %v11178_v21  ;;  %11680 = vmatpush1.bf16.msra.mxu0 %v11180_v15  ;;  %v11233_v21 = vld [vmem:[#allocation3 + $0x638] sm:$0xff]  ;;  %v11235_v15 = vld [vmem:[#allocation3 + $0x648] sm:$0xff] }
0x121b   :  { %11517 = vmatprep.subr.bf16.mxu1 %v11185_v41  ;;  %11681 = vmatprep.subr.bf16.mxu0 %v11187_v57  ;;  %v18173_v41 = vpack.c.bf16 %v11027_v17, %v11027_v17  ;;  %v11239_v57 = vld [vmem:[#allocation3 + $0x668] sm:$0xff]  ;;  %v11240_v17 = vld [vmem:[#allocation3 + $0x670] sm:$0xff] }
0x121e   :  { %11518 = vmatpush1.bf16.msra.mxu1 %v11184_v1  ;;  %11682 = vmatpush1.bf16.msra.mxu0 %v11186_v37  ;;  %v11241_v1 = vld [vmem:[#allocation3 + $0x678] sm:$0xff] }
0x121f   :  { %11519 = vmatprep.subr.bf16.mxu1 %v11191_v28  ;;  %11683 = vmatprep.subr.bf16.mxu0 %v11193_v38  ;;  %v11245_v37 = vld [vmem:[#allocation3 + $0x698] sm:$0xff]  ;;  %v11247_v28 = vld [vmem:[#allocation3 + $0x6a8] sm:$0xff]  ;;  %v11244_v38 = vld [vmem:[#allocation3 + $0x690] sm:$0xff] }
0x1222   :  { %11520 = vmatpush1.bf16.msra.mxu1 %v11190_v6  ;;  %11684 = vmatpush1.bf16.msra.mxu0 %v11192_v27  ;;  %v11246_v6 = vld [vmem:[#allocation3 + $0x6a0] sm:$0xff]  ;;  %v11251_v27 = vld [vmem:[#allocation3 + $0x6c8] sm:$0xff] }
0x1223   :  { %11521 = vmatprep.subr.bf16.mxu1 %v11197_v11  ;;  %11685 = vmatprep.subr.bf16.mxu0 %v11199_v55  ;;  %v11253_v11 = vld [vmem:[#allocation3 + $0x6d8] sm:$0xff]  ;;  %v11250_v55 = vld [vmem:[#allocation3 + $0x6c0] sm:$0xff] }
0x1226   :  { %11522 = vmatpush1.bf16.msra.mxu1 %v11196_v49  ;;  %11686 = vmatpush1.bf16.msra.mxu0 %v11198_v13  ;;  %v11252_v49 = vld [vmem:[#allocation3 + $0x6d0] sm:$0xff]  ;;  %v11257_v13 = vld [vmem:[#allocation3 + $0x6f8] sm:$0xff] }
0x1227   :  { %11523 = vmatprep.subr.bf16.mxu1 %v11203_v42  ;;  %11687 = vmatprep.subr.bf16.mxu0 %v11205_v18  ;;  %v11259_v42 = vld [vmem:[#allocation3 + $0x708] sm:$0xff]  ;;  %v11256_v18 = vld [vmem:[#allocation3 + $0x6f0] sm:$0xff] }
0x122a   :  { %11524 = vmatpush1.bf16.msra.mxu1 %v11202_v33  ;;  %11688 = vmatpush1.bf16.msra.mxu0 %v11204_v2  ;;  %v11258_v33 = vld [vmem:[#allocation3 + $0x700] sm:$0xff]  ;;  %v11263_v2 = vld [vmem:[#allocation3 + $0x728] sm:$0xff] }
0x122b   :  { %11525 = vmatprep.subr.bf16.mxu1 %v11209_v45  ;;  %11689 = vmatprep.subr.bf16.mxu0 %v11211_v34  ;;  %v11265_v45 = vld [vmem:[#allocation3 + $0x738] sm:$0xff]  ;;  %v11262_v34 = vld [vmem:[#allocation3 + $0x720] sm:$0xff] }
0x122e   :  { %11526 = vmatpush1.bf16.msra.mxu1 %v11208_v19  ;;  %11690 = vmatpush1.bf16.msra.mxu0 %v11210_v16  ;;  %v11264_v19 = vld [vmem:[#allocation3 + $0x730] sm:$0xff]  ;;  %v11269_v16 = vld [vmem:[#allocation3 + $0x758] sm:$0xff] }
0x122f   :  { %11527 = vmatprep.subr.bf16.mxu1 %v11215_v54  ;;  %11691 = vmatprep.subr.bf16.mxu0 %v11217_v20  ;;  %v11271_v54 = vld [vmem:[#allocation3 + $0x768] sm:$0xff]  ;;  %v11268_v20 = vld [vmem:[#allocation3 + $0x750] sm:$0xff] }
0x1232   :  { %11528 = vmatpush1.bf16.msra.mxu1 %v11214_v25  ;;  %11692 = vmatpush1.bf16.msra.mxu0 %v11216_v24  ;;  %v11270_v25 = vld [vmem:[#allocation3 + $0x760] sm:$0xff]  ;;  %v11275_v24 = vld [vmem:[#allocation3 + $0x788] sm:$0xff] }
0x1233   :  { %11529 = vmatprep.subr.bf16.mxu1 %v11221_v39  ;;  %11693 = vmatprep.subr.bf16.mxu0 %v11223_v5  ;;  %v11277_v39 = vld [vmem:[#allocation3 + $0x798] sm:$0xff]  ;;  %v11274_v5 = vld [vmem:[#allocation3 + $0x780] sm:$0xff] }
0x1236   :  { %11530 = vmatpush1.bf16.msra.mxu1 %v11220_v8  ;;  %11694 = vmatpush1.bf16.msra.mxu0 %v11222_v43  ;;  %v11276_v8 = vld [vmem:[#allocation3 + $0x790] sm:$0xff]  ;;  %v11281_v43 = vld [vmem:[#allocation3 + $0x7b8] sm:$0xff] }
0x1237   :  { %11540 = vmatprep.subr.bf16.mxu1 %v11227_v56  ;;  %11704 = vmatprep.subr.bf16.mxu0 %v11229_v40  ;;  %v11283_v56 = vld [vmem:[#allocation3 + $0x7c8] sm:$0xff]  ;;  %v11280_v40 = vld [vmem:[#allocation3 + $0x7b0] sm:$0xff] }
0x1239   :  { %11532 = vmatmul.mubr.bf16.vlgmr.msra.gmra.mrb[36].mxu1 %v18168_v30  ;;  %11696 = vmatmul.mubr.bf16.vlgmr.msra.gmra.mrb[76].mxu0 %v18168_v30 }
0x123a   :  { %11541 = vmatpush1.bf16.msra.mxu1 %v11226_v22  ;;  %11705 = vmatpush1.bf16.msra.mxu0 %v11228_v10  ;;  %v11282_v22 = vld [vmem:[#allocation3 + $0x7c0] sm:$0xff]  ;;  %v11287_v10 = vld [vmem:[#allocation3 + $0x7e8] sm:$0xff] }
0x123b   :  { %11542 = vmatprep.subr.bf16.mxu1 %v11233_v21  ;;  %11706 = vmatprep.subr.bf16.mxu0 %v11235_v15  ;;  %v11289_v21 = vld [vmem:[#allocation3 + $0x7f8] sm:$0xff]  ;;  %v11286_v15 = vld [vmem:[#allocation3 + $0x7e0] sm:$0xff] }
0x123c   :  { %11572 = vmatprep.mubr.bf16.mxu1 %v18173_v41  ;;  %11736 = vmatprep.mubr.bf16.mxu0 %v18173_v41 }
0x123e   :  { %11543 = vmatpush1.bf16.msra.mxu1 %v11232_v31  ;;  %11707 = vmatpush1.bf16.msra.mxu0 %v11234_v29  ;;  %v11288_v31 = vld [vmem:[#allocation3 + $0x7f0] sm:$0xff]  ;;  %v11293_v29 = vld [vmem:[#allocation3 + $0x818] sm:$0xff] }
0x123f   :  { %11544 = vmatprep.subr.bf16.mxu1 %v11239_v57  ;;  %11708 = vmatprep.subr.bf16.mxu0 %v11241_v1  ;;  %v11295_v57 = vld [vmem:[#allocation3 + $0x828] sm:$0xff]  ;;  %v11292_v1 = vld [vmem:[#allocation3 + $0x810] sm:$0xff] }
0x1242   :  { %11545 = vmatpush1.bf16.msra.mxu1 %v11238_v0  ;;  %11709 = vmatpush1.bf16.msra.mxu0 %v11240_v17  ;;  %v11294_v0 = vld [vmem:[#allocation3 + $0x820] sm:$0xff]  ;;  %v11299_v17 = vld [vmem:[#allocation3 + $0x848] sm:$0xff] }
0x1243   :  { %11546 = vmatprep.subr.bf16.mxu1 %v11245_v37  ;;  %11710 = vmatprep.subr.bf16.mxu0 %v11247_v28  ;;  %v11301_v37 = vld [vmem:[#allocation3 + $0x858] sm:$0xff]  ;;  %v11298_v28 = vld [vmem:[#allocation3 + $0x840] sm:$0xff] }
0x1246   :  { %11547 = vmatpush1.bf16.msra.mxu1 %v11244_v38  ;;  %11711 = vmatpush1.bf16.msra.mxu0 %v11246_v6  ;;  %v11300_v38 = vld [vmem:[#allocation3 + $0x850] sm:$0xff]  ;;  %v11305_v6 = vld [vmem:[#allocation3 + $0x878] sm:$0xff] }
0x1247   :  { %11548 = vmatprep.subr.bf16.mxu1 %v11251_v27  ;;  %11712 = vmatprep.subr.bf16.mxu0 %v11253_v11  ;;  %v11307_v27 = vld [vmem:[#allocation3 + $0x888] sm:$0xff]  ;;  %v11304_v11 = vld [vmem:[#allocation3 + $0x870] sm:$0xff] }
0x124a   :  { %11549 = vmatpush1.bf16.msra.mxu1 %v11250_v55  ;;  %11713 = vmatpush1.bf16.msra.mxu0 %v11252_v49  ;;  %v11306_v55 = vld [vmem:[#allocation3 + $0x880] sm:$0xff]  ;;  %v11311_v49 = vld [vmem:[#allocation3 + $0x8a8] sm:$0xff] }
0x124b   :  { %11550 = vmatprep.subr.bf16.mxu1 %v11257_v13  ;;  %11714 = vmatprep.subr.bf16.mxu0 %v11259_v42  ;;  %v11313_v13 = vld [vmem:[#allocation3 + $0x8b8] sm:$0xff]  ;;  %v11310_v42 = vld [vmem:[#allocation3 + $0x8a0] sm:$0xff] }
0x124e   :  { %11551 = vmatpush1.bf16.msra.mxu1 %v11256_v18  ;;  %11715 = vmatpush1.bf16.msra.mxu0 %v11258_v33  ;;  %v11312_v18 = vld [vmem:[#allocation3 + $0x8b0] sm:$0xff]  ;;  %v11317_v33 = vld [vmem:[#allocation3 + $0x8d8] sm:$0xff] }
0x124f   :  { %11552 = vmatprep.subr.bf16.mxu1 %v11263_v2  ;;  %11716 = vmatprep.subr.bf16.mxu0 %v11265_v45  ;;  %v11319_v2 = vld [vmem:[#allocation3 + $0x8e8] sm:$0xff]  ;;  %v11316_v45 = vld [vmem:[#allocation3 + $0x8d0] sm:$0xff] }
0x1252   :  { %11553 = vmatpush1.bf16.msra.mxu1 %v11262_v34  ;;  %11717 = vmatpush1.bf16.msra.mxu0 %v11264_v19  ;;  %v11318_v34 = vld [vmem:[#allocation3 + $0x8e0] sm:$0xff]  ;;  %v11323_v19 = vld [vmem:[#allocation3 + $0x908] sm:$0xff] }
0x1253   :  { %11554 = vmatprep.subr.bf16.mxu1 %v11269_v16  ;;  %11718 = vmatprep.subr.bf16.mxu0 %v11271_v54  ;;  %v11325_v16 = vld [vmem:[#allocation3 + $0x918] sm:$0xff]  ;;  %v18182_v54 = vpack.c.bf16 %v11026_v36, %v11026_v36  ;;  %v11330_v36 = vld [vmem:[#allocation3 + $0x940] sm:$0xff] }
0x1256   :  { %11555 = vmatpush1.bf16.msra.mxu1 %v11268_v20  ;;  %11719 = vmatpush1.bf16.msra.mxu0 %v11270_v25  ;;  %v11322_v20 = vld [vmem:[#allocation3 + $0x900] sm:$0xff]  ;;  %v11324_v25 = vld [vmem:[#allocation3 + $0x910] sm:$0xff] }
0x1257   :  { %11556 = vmatprep.subr.bf16.mxu1 %v11275_v24  ;;  %11720 = vmatprep.subr.bf16.mxu0 %v11277_v39  ;;  %v11329_v24 = vld [vmem:[#allocation3 + $0x938] sm:$0xff]  ;;  %v11331_v39 = vld [vmem:[#allocation3 + $0x948] sm:$0xff] }
0x125a   :  { %11557 = vmatpush1.bf16.msra.mxu1 %v11274_v5  ;;  %11721 = vmatpush1.bf16.msra.mxu0 %v11276_v8  ;;  %v18187_v5 = vpack.c.bf16 %v11029_v7, %v11029_v7  ;;  %v11335_v8 = vld [vmem:[#allocation3 + $0x968] sm:$0xff]  ;;  %v11336_v7 = vld [vmem:[#allocation3 + $0x970] sm:$0xff] }
0x125b   :  { %11558 = vmatprep.subr.bf16.mxu1 %v11281_v43  ;;  %11722 = vmatprep.subr.bf16.mxu0 %v11283_v56  ;;  %v11337_v43 = vld [vmem:[#allocation3 + $0x978] sm:$0xff] }
0x125c   :  { %v11341_v56 = vld [vmem:[#allocation3 + $0x998] sm:$0xff] }
0x125e   :  { %11559 = vmatpush1.bf16.msra.mxu1 %v11280_v40  ;;  %11723 = vmatpush1.bf16.msra.mxu0 %v11282_v22  ;;  %v11343_v40 = vld [vmem:[#allocation3 + $0x9a8] sm:$0xff]  ;;  %v11340_v22 = vld [vmem:[#allocation3 + $0x990] sm:$0xff] }
0x125f   :  { %11560 = vmatprep.subr.bf16.mxu1 %v11287_v10  ;;  %11724 = vmatprep.subr.bf16.mxu0 %v11289_v21  ;;  %v11342_v10 = vld [vmem:[#allocation3 + $0x9a0] sm:$0xff]  ;;  %v11347_v21 = vld [vmem:[#allocation3 + $0x9c8] sm:$0xff] }
0x1262   :  { %11561 = vmatpush1.bf16.msra.mxu1 %v11286_v15  ;;  %11725 = vmatpush1.bf16.msra.mxu0 %v11288_v31  ;;  %v11349_v15 = vld [vmem:[#allocation3 + $0x9d8] sm:$0xff]  ;;  %v11346_v31 = vld [vmem:[#allocation3 + $0x9c0] sm:$0xff] }
0x1263   :  { %11562 = vmatprep.subr.bf16.mxu1 %v11293_v29  ;;  %11726 = vmatprep.subr.bf16.mxu0 %v11295_v57  ;;  %v11348_v29 = vld [vmem:[#allocation3 + $0x9d0] sm:$0xff]  ;;  %v11353_v57 = vld [vmem:[#allocation3 + $0x9f8] sm:$0xff] }
0x1266   :  { %11563 = vmatpush1.bf16.msra.mxu1 %v11292_v1  ;;  %11727 = vmatpush1.bf16.msra.mxu0 %v11294_v0  ;;  %v11355_v1 = vld [vmem:[#allocation3 + $0xa08] sm:$0xff]  ;;  %v11352_v0 = vld [vmem:[#allocation3 + $0x9f0] sm:$0xff] }
0x1267   :  { %11564 = vmatprep.subr.bf16.mxu1 %v11299_v17  ;;  %11728 = vmatprep.subr.bf16.mxu0 %v11301_v37  ;;  %v11354_v17 = vld [vmem:[#allocation3 + $0xa00] sm:$0xff]  ;;  %v11359_v37 = vld [vmem:[#allocation3 + $0xa28] sm:$0xff] }
0x126a   :  { %11565 = vmatpush1.bf16.msra.mxu1 %v11298_v28  ;;  %11729 = vmatpush1.bf16.msra.mxu0 %v11300_v38  ;;  %v11361_v28 = vld [vmem:[#allocation3 + $0xa38] sm:$0xff]  ;;  %v11358_v38 = vld [vmem:[#allocation3 + $0xa20] sm:$0xff] }
0x126b   :  { %11566 = vmatprep.subr.bf16.mxu1 %v11305_v6  ;;  %11730 = vmatprep.subr.bf16.mxu0 %v11307_v27  ;;  %v11360_v6 = vld [vmem:[#allocation3 + $0xa30] sm:$0xff]  ;;  %v11365_v27 = vld [vmem:[#allocation3 + $0xa58] sm:$0xff] }
0x126e   :  { %11567 = vmatpush1.bf16.msra.mxu1 %v11304_v11  ;;  %11731 = vmatpush1.bf16.msra.mxu0 %v11306_v55  ;;  %v11367_v11 = vld [vmem:[#allocation3 + $0xa68] sm:$0xff]  ;;  %v11364_v55 = vld [vmem:[#allocation3 + $0xa50] sm:$0xff] }
0x126f   :  { %11568 = vmatprep.subr.bf16.mxu1 %v11311_v49  ;;  %11732 = vmatprep.subr.bf16.mxu0 %v11313_v13  ;;  %v11366_v49 = vld [vmem:[#allocation3 + $0xa60] sm:$0xff]  ;;  %v11371_v13 = vld [vmem:[#allocation3 + $0xa88] sm:$0xff] }
0x1272   :  { %11569 = vmatpush1.bf16.msra.mxu1 %v11310_v42  ;;  %11733 = vmatpush1.bf16.msra.mxu0 %v11312_v18  ;;  %v11373_v42 = vld [vmem:[#allocation3 + $0xa98] sm:$0xff]  ;;  %v11370_v18 = vld [vmem:[#allocation3 + $0xa80] sm:$0xff] }
0x1273   :  { %11570 = vmatprep.subr.bf16.mxu1 %v11317_v33  ;;  %11734 = vmatprep.subr.bf16.mxu0 %v11319_v2  ;;  %v11372_v33 = vld [vmem:[#allocation3 + $0xa90] sm:$0xff]  ;;  %v11377_v2 = vld [vmem:[#allocation3 + $0xab8] sm:$0xff] }
0x1276   :  { %11571 = vmatpush1.bf16.msra.mxu1 %v11316_v45  ;;  %11735 = vmatpush1.bf16.msra.mxu0 %v11318_v34  ;;  %v11379_v45 = vld [vmem:[#allocation3 + $0xac8] sm:$0xff]  ;;  %v11376_v34 = vld [vmem:[#allocation3 + $0xab0] sm:$0xff] }
0x1277   :  { %11581 = vmatprep.subr.bf16.mxu1 %v11323_v19  ;;  %11745 = vmatprep.subr.bf16.mxu0 %v11325_v16  ;;  %v11378_v19 = vld [vmem:[#allocation3 + $0xac0] sm:$0xff]  ;;  %v11383_v16 = vld [vmem:[#allocation3 + $0xae8] sm:$0xff] }
0x1279   :  { %11573 = vmatmul.mubr.bf16.vlgmr.msra.gmra.mrb[36].mxu1 %v18182_v54  ;;  %11737 = vmatmul.mubr.bf16.vlgmr.msra.gmra.mrb[76].mxu0 %v18182_v54 }
0x127a   :  { %11582 = vmatpush1.bf16.msra.mxu1 %v11322_v20  ;;  %11746 = vmatpush1.bf16.msra.mxu0 %v11324_v25  ;;  %v11385_v20 = vld [vmem:[#allocation3 + $0xaf8] sm:$0xff]  ;;  %v11382_v25 = vld [vmem:[#allocation3 + $0xae0] sm:$0xff] }
0x127b   :  { %11583 = vmatprep.subr.bf16.mxu1 %v11329_v24  ;;  %11747 = vmatprep.subr.bf16.mxu0 %v11331_v39  ;;  %v11384_v24 = vld [vmem:[#allocation3 + $0xaf0] sm:$0xff]  ;;  %v11389_v39 = vld [vmem:[#allocation3 + $0xb18] sm:$0xff] }
0x127c   :  { %11613 = vmatprep.mubr.bf16.mxu1 %v18187_v5  ;;  %11777 = vmatprep.mubr.bf16.mxu0 %v18187_v5 }
0x127e   :  { %11584 = vmatpush1.bf16.msra.mxu1 %v11328_v3  ;;  %11748 = vmatpush1.bf16.msra.mxu0 %v11330_v36  ;;  %v11391_v3 = vld [vmem:[#allocation3 + $0xb28] sm:$0xff]  ;;  %v11388_v36 = vld [vmem:[#allocation3 + $0xb10] sm:$0xff] }
0x127f   :  { %11585 = vmatprep.subr.bf16.mxu1 %v11335_v8  ;;  %11749 = vmatprep.subr.bf16.mxu0 %v11337_v43  ;;  %v11390_v8 = vld [vmem:[#allocation3 + $0xb20] sm:$0xff]  ;;  %v11395_v43 = vld [vmem:[#allocation3 + $0xb48] sm:$0xff] }
0x1282   :  { %11586 = vmatpush1.bf16.msra.mxu1 %v11334_v48  ;;  %11750 = vmatpush1.bf16.msra.mxu0 %v11336_v7  ;;  %v11397_v48 = vld [vmem:[#allocation3 + $0xb58] sm:$0xff]  ;;  %v11394_v7 = vld [vmem:[#allocation3 + $0xb40] sm:$0xff] }
0x1283   :  { %11587 = vmatprep.subr.bf16.mxu1 %v11341_v56  ;;  %11751 = vmatprep.subr.bf16.mxu0 %v11343_v40  ;;  %v11396_v56 = vld [vmem:[#allocation3 + $0xb50] sm:$0xff]  ;;  %v11401_v40 = vld [vmem:[#allocation3 + $0xb78] sm:$0xff] }
0x1286   :  { %11588 = vmatpush1.bf16.msra.mxu1 %v11340_v22  ;;  %11752 = vmatpush1.bf16.msra.mxu0 %v11342_v10  ;;  %v11403_v22 = vld [vmem:[#allocation3 + $0xb88] sm:$0xff]  ;;  %v11400_v10 = vld [vmem:[#allocation3 + $0xb70] sm:$0xff] }
0x1287   :  { %11589 = vmatprep.subr.bf16.mxu1 %v11347_v21  ;;  %11753 = vmatprep.subr.bf16.mxu0 %v11349_v15  ;;  %v11402_v21 = vld [vmem:[#allocation3 + $0xb80] sm:$0xff]  ;;  %v11407_v15 = vld [vmem:[#allocation3 + $0xba8] sm:$0xff] }
0x128a   :  { %11590 = vmatpush1.bf16.msra.mxu1 %v11346_v31  ;;  %11754 = vmatpush1.bf16.msra.mxu0 %v11348_v29  ;;  %v11409_v31 = vld [vmem:[#allocation3 + $0xbb8] sm:$0xff]  ;;  %v11406_v29 = vld [vmem:[#allocation3 + $0xba0] sm:$0xff] }
0x128b   :  { %11591 = vmatprep.subr.bf16.mxu1 %v11353_v57  ;;  %11755 = vmatprep.subr.bf16.mxu0 %v11355_v1  ;;  %v11408_v57 = vld [vmem:[#allocation3 + $0xbb0] sm:$0xff]  ;;  %v11413_v1 = vld [vmem:[#allocation3 + $0xbd8] sm:$0xff] }
0x128e   :  { %11592 = vmatpush1.bf16.msra.mxu1 %v11352_v0  ;;  %11756 = vmatpush1.bf16.msra.mxu0 %v11354_v17  ;;  %v11415_v0 = vld [vmem:[#allocation3 + $0xbe8] sm:$0xff]  ;;  %v11412_v17 = vld [vmem:[#allocation3 + $0xbd0] sm:$0xff] }
0x128f   :  { %11593 = vmatprep.subr.bf16.mxu1 %v11359_v37  ;;  %11757 = vmatprep.subr.bf16.mxu0 %v11361_v28  ;;  %v11414_v37 = vld [vmem:[#allocation3 + $0xbe0] sm:$0xff]  ;;  %v11039_v28 = vld [vmem:[#allocation3 + $0x28] sm:$0xff] }
0x1292   :  { %11594 = vmatpush1.bf16.msra.mxu1 %v11358_v38  ;;  %11758 = vmatpush1.bf16.msra.mxu0 %v11360_v6  ;;  %v18196_v38 = vpack.c.bf16 %v11028_v9, %v11028_v9  ;;  %v11038_v6 = vld [vmem:[#allocation3 + $0x20] sm:$0xff]  ;;  %v11057_v9 = vld [vmem:[#allocation3 + $0xb8] sm:$0xff] }
0x1293   :  { %11595 = vmatprep.subr.bf16.mxu1 %v11365_v27  ;;  %11759 = vmatprep.subr.bf16.mxu0 %v11367_v11  ;;  %v11045_v27 = vld [vmem:[#allocation3 + $0x58] sm:$0xff]  ;;  %v11044_v11 = vld [vmem:[#allocation3 + $0x50] sm:$0xff] }
0x1296   :  { %11596 = vmatpush1.bf16.msra.mxu1 %v11364_v55  ;;  %11760 = vmatpush1.bf16.msra.mxu0 %v11366_v49  ;;  %v11051_v55 = vld [vmem:[#allocation3 + $0x88] sm:$0xff]  ;;  %v11056_v49 = vld [vmem:[#allocation3 + $0xb0] sm:$0xff] }
0x1297   :  { %11597 = vmatprep.subr.bf16.mxu1 %v11371_v13  ;;  %11761 = vmatprep.subr.bf16.mxu0 %v11373_v42  ;;  %v11063_v13 = vld [vmem:[#allocation3 + $0xe8] sm:$0xff]  ;;  %v11062_v42 = vld [vmem:[#allocation3 + $0xe0] sm:$0xff] }
0x129a   :  { %11598 = vmatpush1.bf16.msra.mxu1 %v11370_v18  ;;  %11762 = vmatpush1.bf16.msra.mxu0 %v11372_v33  ;;  %v11069_v18 = vld [vmem:[#allocation3 + $0x118] sm:$0xff]  ;;  %v11068_v33 = vld [vmem:[#allocation3 + $0x110] sm:$0xff] }
0x129b   :  { %11599 = vmatprep.subr.bf16.mxu1 %v11377_v2  ;;  %11763 = vmatprep.subr.bf16.mxu0 %v11379_v45  ;;  %v11075_v2 = vld [vmem:[#allocation3 + $0x148] sm:$0xff]  ;;  %v11074_v45 = vld [vmem:[#allocation3 + $0x140] sm:$0xff] }
0x129e   :  { %11600 = vmatpush1.bf16.msra.mxu1 %v11376_v34  ;;  %11764 = vmatpush1.bf16.msra.mxu0 %v11378_v19  ;;  %v11081_v34 = vld [vmem:[#allocation3 + $0x178] sm:$0xff]  ;;  %v11080_v19 = vld [vmem:[#allocation3 + $0x170] sm:$0xff] }
0x129f   :  { %11601 = vmatprep.subr.bf16.mxu1 %v11383_v16  ;;  %11765 = vmatprep.subr.bf16.mxu0 %v11385_v20  ;;  %v11087_v16 = vld [vmem:[#allocation3 + $0x1a8] sm:$0xff]  ;;  %v11086_v20 = vld [vmem:[#allocation3 + $0x1a0] sm:$0xff] }
0x12a2   :  { %11602 = vmatpush1.bf16.msra.mxu1 %v11382_v25  ;;  %11766 = vmatpush1.bf16.msra.mxu0 %v11384_v24  ;;  %v11093_v25 = vld [vmem:[#allocation3 + $0x1d8] sm:$0xff]  ;;  %v11092_v24 = vld [vmem:[#allocation3 + $0x1d0] sm:$0xff] }
0x12a3   :  { %11603 = vmatprep.subr.bf16.mxu1 %v11389_v39  ;;  %11767 = vmatprep.subr.bf16.mxu0 %v11391_v3  ;;  %v11099_v39 = vld [vmem:[#allocation3 + $0x208] sm:$0xff]  ;;  %v11098_v3 = vld [vmem:[#allocation3 + $0x200] sm:$0xff] }
0x12a6   :  { %11604 = vmatpush1.bf16.msra.mxu1 %v11388_v36  ;;  %11768 = vmatpush1.bf16.msra.mxu0 %v11390_v8  ;;  %v11105_v36 = vld [vmem:[#allocation3 + $0x238] sm:$0xff]  ;;  %v11104_v8 = vld [vmem:[#allocation3 + $0x230] sm:$0xff] }
0x12a7   :  { %11605 = vmatprep.subr.bf16.mxu1 %v11395_v43  ;;  %11769 = vmatprep.subr.bf16.mxu0 %v11397_v48  ;;  %v11111_v43 = vld [vmem:[#allocation3 + $0x268] sm:$0xff]  ;;  %v11110_v48 = vld [vmem:[#allocation3 + $0x260] sm:$0xff] }
0x12aa   :  { %11606 = vmatpush1.bf16.msra.mxu1 %v11394_v7  ;;  %11770 = vmatpush1.bf16.msra.mxu0 %v11396_v56  ;;  %v11117_v7 = vld [vmem:[#allocation3 + $0x298] sm:$0xff]  ;;  %v11116_v56 = vld [vmem:[#allocation3 + $0x290] sm:$0xff] }
0x12ab   :  { %11607 = vmatprep.subr.bf16.mxu1 %v11401_v40  ;;  %11771 = vmatprep.subr.bf16.mxu0 %v11403_v22  ;;  %v11123_v40 = vld [vmem:[#allocation3 + $0x2c8] sm:$0xff]  ;;  %v11122_v22 = vld [vmem:[#allocation3 + $0x2c0] sm:$0xff] }
0x12ae   :  { %11608 = vmatpush1.bf16.msra.mxu1 %v11400_v10  ;;  %11772 = vmatpush1.bf16.msra.mxu0 %v11402_v21  ;;  %v11129_v10 = vld [vmem:[#allocation3 + $0x2f8] sm:$0xff]  ;;  %v11128_v21 = vld [vmem:[#allocation3 + $0x2f0] sm:$0xff] }
0x12af   :  { %11609 = vmatprep.subr.bf16.mxu1 %v11407_v15  ;;  %11773 = vmatprep.subr.bf16.mxu0 %v11409_v31  ;;  %v11135_v15 = vld [vmem:[#allocation3 + $0x328] sm:$0xff]  ;;  %v11134_v31 = vld [vmem:[#allocation3 + $0x320] sm:$0xff] }
0x12b2   :  { %11610 = vmatpush1.bf16.msra.mxu1 %v11406_v29  ;;  %11774 = vmatpush1.bf16.msra.mxu0 %v11408_v57  ;;  %v11141_v29 = vld [vmem:[#allocation3 + $0x358] sm:$0xff]  ;;  %v11140_v57 = vld [vmem:[#allocation3 + $0x350] sm:$0xff] }
0x12b3   :  { %11611 = vmatprep.subr.bf16.mxu1 %v11413_v1  ;;  %11775 = vmatprep.subr.bf16.mxu0 %v11415_v0  ;;  %v11147_v1 = vld [vmem:[#allocation3 + $0x388] sm:$0xff]  ;;  %v11146_v0 = vld [vmem:[#allocation3 + $0x380] sm:$0xff] }
0x12b6   :  { %11612 = vmatpush1.bf16.msra.mxu1 %v11412_v17  ;;  %11776 = vmatpush1.bf16.msra.mxu0 %v11414_v37  ;;  %v11153_v17 = vld [vmem:[#allocation3 + $0x3b8] sm:$0xff]  ;;  %v11152_v37 = vld [vmem:[#allocation3 + $0x3b0] sm:$0xff] }
0x12b7   :  { %11786 = vmatprep.subr.bf16.mxu1 %v11039_v28  ;;  %v11159_v28 = vld [vmem:[#allocation3 + $0x3e8] sm:$0xff]  ;;  %12757 = vmatprep.subr.bf16.mxu0 %v16478_v58 }
0x12b9   :  { %11614 = vmatmul.mubr.bf16.vlgmr.msra.gmra.mrb[36].mxu1 %v18196_v38  ;;  %11778 = vmatmul.mubr.bf16.vlgmr.msra.gmra.mrb[76].mxu0 %v18196_v38 }
0x12ba   :  { %11787 = vmatpush1.bf16.msra.mxu1 %v11038_v6  ;;  %11818 = vmatprep.mubr.bf16.mxu1 %v18147_v32  ;;  %v11158_v6 = vld [vmem:[#allocation3 + $0x3e0] sm:$0xff] }
0x12bb   :  { %11788 = vmatprep.subr.bf16.mxu1 %v11045_v27  ;;  %v11165_v27 = vld [vmem:[#allocation3 + $0x418] sm:$0xff]  ;;  %12097 = vmatprep.mubr.bf16.mxu0 %v18147_v32 }
0x12be   :  { %11789 = vmatpush1.bf16.msra.mxu1 %v11044_v11  ;;  %v11164_v11 = vld [vmem:[#allocation3 + $0x410] sm:$0xff] }
0x12bf   :  { %11790 = vmatprep.subr.bf16.mxu1 %v11051_v55  ;;  %v11171_v55 = vld [vmem:[#allocation3 + $0x448] sm:$0xff] }
0x12c2   :  { %11791 = vmatpush1.bf16.msra.mxu1 %v11050_v12  ;;  %v11170_v12 = vld [vmem:[#allocation3 + $0x440] sm:$0xff] }
0x12c3   :  { %11792 = vmatprep.subr.bf16.mxu1 %v11057_v9  ;;  %v11177_v9 = vld [vmem:[#allocation3 + $0x478] sm:$0xff] }
0x12c6   :  { %11793 = vmatpush1.bf16.msra.mxu1 %v11056_v49  ;;  %v11176_v49 = vld [vmem:[#allocation3 + $0x470] sm:$0xff] }
0x12c7   :  { %11794 = vmatprep.subr.bf16.mxu1 %v11063_v13  ;;  %v11183_v13 = vld [vmem:[#allocation3 + $0x4a8] sm:$0xff] }
0x12ca   :  { %11795 = vmatpush1.bf16.msra.mxu1 %v11062_v42  ;;  %v11182_v42 = vld [vmem:[#allocation3 + $0x4a0] sm:$0xff] }
0x12cb   :  { %11796 = vmatprep.subr.bf16.mxu1 %v11069_v18  ;;  %v11189_v18 = vld [vmem:[#allocation3 + $0x4d8] sm:$0xff] }
0x12ce   :  { %11797 = vmatpush1.bf16.msra.mxu1 %v11068_v33  ;;  %v11188_v33 = vld [vmem:[#allocation3 + $0x4d0] sm:$0xff] }
0x12cf   :  { %11798 = vmatprep.subr.bf16.mxu1 %v11075_v2  ;;  %v11195_v2 = vld [vmem:[#allocation3 + $0x508] sm:$0xff] }
0x12d2   :  { %11799 = vmatpush1.bf16.msra.mxu1 %v11074_v45  ;;  %v11194_v45 = vld [vmem:[#allocation3 + $0x500] sm:$0xff] }
0x12d3   :  { %11800 = vmatprep.subr.bf16.mxu1 %v11081_v34  ;;  %v11201_v34 = vld [vmem:[#allocation3 + $0x538] sm:$0xff] }
0x12d6   :  { %11801 = vmatpush1.bf16.msra.mxu1 %v11080_v19  ;;  %v11200_v19 = vld [vmem:[#allocation3 + $0x530] sm:$0xff] }
0x12d7   :  { %11802 = vmatprep.subr.bf16.mxu1 %v11087_v16  ;;  %v11207_v16 = vld [vmem:[#allocation3 + $0x568] sm:$0xff] }
0x12da   :  { %11803 = vmatpush1.bf16.msra.mxu1 %v11086_v20  ;;  %v11206_v20 = vld [vmem:[#allocation3 + $0x560] sm:$0xff] }
0x12db   :  { %11804 = vmatprep.subr.bf16.mxu1 %v11093_v25  ;;  %v11213_v25 = vld [vmem:[#allocation3 + $0x598] sm:$0xff] }
0x12de   :  { %11805 = vmatpush1.bf16.msra.mxu1 %v11092_v24  ;;  %v11212_v24 = vld [vmem:[#allocation3 + $0x590] sm:$0xff] }
0x12df   :  { %11806 = vmatprep.subr.bf16.mxu1 %v11099_v39  ;;  %v11219_v39 = vld [vmem:[#allocation3 + $0x5c8] sm:$0xff] }
0x12e2   :  { %11807 = vmatpush1.bf16.msra.mxu1 %v11098_v3  ;;  %v11218_v3 = vld [vmem:[#allocation3 + $0x5c0] sm:$0xff] }
0x12e3   :  { %11808 = vmatprep.subr.bf16.mxu1 %v11105_v36  ;;  %v11225_v36 = vld [vmem:[#allocation3 + $0x5f8] sm:$0xff] }
0x12e6   :  { %11809 = vmatpush1.bf16.msra.mxu1 %v11104_v8  ;;  %v11224_v8 = vld [vmem:[#allocation3 + $0x5f0] sm:$0xff] }
0x12e7   :  { %11810 = vmatprep.subr.bf16.mxu1 %v11111_v43  ;;  %v11231_v43 = vld [vmem:[#allocation3 + $0x628] sm:$0xff] }
0x12ea   :  { %11811 = vmatpush1.bf16.msra.mxu1 %v11110_v48  ;;  %v11230_v48 = vld [vmem:[#allocation3 + $0x620] sm:$0xff] }
0x12eb   :  { %11812 = vmatprep.subr.bf16.mxu1 %v11117_v7  ;;  %v11237_v7 = vld [vmem:[#allocation3 + $0x658] sm:$0xff] }
0x12ee   :  { %11813 = vmatpush1.bf16.msra.mxu1 %v11116_v56  ;;  %v11236_v56 = vld [vmem:[#allocation3 + $0x650] sm:$0xff] }
0x12ef   :  { %11814 = vmatprep.subr.bf16.mxu1 %v11123_v40  ;;  %v11243_v40 = vld [vmem:[#allocation3 + $0x688] sm:$0xff] }
0x12f2   :  { %11815 = vmatpush1.bf16.msra.mxu1 %v11122_v22  ;;  %v11242_v22 = vld [vmem:[#allocation3 + $0x680] sm:$0xff] }
0x12f3   :  { %11816 = vmatprep.subr.bf16.mxu1 %v11129_v10  ;;  %v11249_v10 = vld [vmem:[#allocation3 + $0x6b8] sm:$0xff] }
0x12f6   :  { %11817 = vmatpush1.bf16.msra.mxu1 %v11128_v21  ;;  %v11248_v21 = vld [vmem:[#allocation3 + $0x6b0] sm:$0xff] }
0x12f7   :  { %11827 = vmatprep.subr.bf16.mxu1 %v11135_v15  ;;  %v11255_v15 = vld [vmem:[#allocation3 + $0x6e8] sm:$0xff] }
0x12f9   :  { %11819 = vmatmul.mubr.bf16.vlgmr.msra.gmra.mrb[40].mxu1 %v18154_v4 }
0x12fa   :  { %11828 = vmatpush1.bf16.msra.mxu1 %v11134_v31  ;;  %11859 = vmatprep.mubr.bf16.mxu1 %v18159_v63  ;;  %v11254_v31 = vld [vmem:[#allocation3 + $0x6e0] sm:$0xff] }
0x12fb   :  { %11829 = vmatprep.subr.bf16.mxu1 %v11141_v29  ;;  %v11261_v29 = vld [vmem:[#allocation3 + $0x718] sm:$0xff] }
0x12fe   :  { %11830 = vmatpush1.bf16.msra.mxu1 %v11140_v57  ;;  %v11260_v57 = vld [vmem:[#allocation3 + $0x710] sm:$0xff] }
0x12ff   :  { %11831 = vmatprep.subr.bf16.mxu1 %v11147_v1  ;;  %v11267_v1 = vld [vmem:[#allocation3 + $0x748] sm:$0xff] }
0x1302   :  { %11832 = vmatpush1.bf16.msra.mxu1 %v11146_v0  ;;  %v11266_v0 = vld [vmem:[#allocation3 + $0x740] sm:$0xff] }
0x1303   :  { %11833 = vmatprep.subr.bf16.mxu1 %v11153_v17  ;;  %v11273_v17 = vld [vmem:[#allocation3 + $0x778] sm:$0xff] }
0x1306   :  { %11834 = vmatpush1.bf16.msra.mxu1 %v11152_v37  ;;  %v11272_v37 = vld [vmem:[#allocation3 + $0x770] sm:$0xff] }
0x1307   :  { %11835 = vmatprep.subr.bf16.mxu1 %v11159_v28  ;;  %v11279_v28 = vld [vmem:[#allocation3 + $0x7a8] sm:$0xff] }
0x130a   :  { %11836 = vmatpush1.bf16.msra.mxu1 %v11158_v6  ;;  %v11278_v6 = vld [vmem:[#allocation3 + $0x7a0] sm:$0xff] }
0x130b   :  { %11837 = vmatprep.subr.bf16.mxu1 %v11165_v27  ;;  %v11285_v27 = vld [vmem:[#allocation3 + $0x7d8] sm:$0xff] }
0x130e   :  { %11838 = vmatpush1.bf16.msra.mxu1 %v11164_v11  ;;  %v11284_v11 = vld [vmem:[#allocation3 + $0x7d0] sm:$0xff] }
0x130f   :  { %11839 = vmatprep.subr.bf16.mxu1 %v11171_v55  ;;  %v11291_v55 = vld [vmem:[#allocation3 + $0x808] sm:$0xff] }
0x1312   :  { %11840 = vmatpush1.bf16.msra.mxu1 %v11170_v12  ;;  %v11290_v12 = vld [vmem:[#allocation3 + $0x800] sm:$0xff] }
0x1313   :  { %11841 = vmatprep.subr.bf16.mxu1 %v11177_v9  ;;  %v11297_v9 = vld [vmem:[#allocation3 + $0x838] sm:$0xff] }
0x1316   :  { %11842 = vmatpush1.bf16.msra.mxu1 %v11176_v49  ;;  %v11296_v49 = vld [vmem:[#allocation3 + $0x830] sm:$0xff] }
0x1317   :  { %11843 = vmatprep.subr.bf16.mxu1 %v11183_v13  ;;  %v11303_v13 = vld [vmem:[#allocation3 + $0x868] sm:$0xff] }
0x131a   :  { %11844 = vmatpush1.bf16.msra.mxu1 %v11182_v42  ;;  %v11302_v42 = vld [vmem:[#allocation3 + $0x860] sm:$0xff] }
0x131b   :  { %11845 = vmatprep.subr.bf16.mxu1 %v11189_v18  ;;  %v11309_v18 = vld [vmem:[#allocation3 + $0x898] sm:$0xff] }
0x131e   :  { %11846 = vmatpush1.bf16.msra.mxu1 %v11188_v33  ;;  %v11308_v33 = vld [vmem:[#allocation3 + $0x890] sm:$0xff] }
0x131f   :  { %11847 = vmatprep.subr.bf16.mxu1 %v11195_v2  ;;  %v11315_v2 = vld [vmem:[#allocation3 + $0x8c8] sm:$0xff] }
0x1322   :  { %11848 = vmatpush1.bf16.msra.mxu1 %v11194_v45  ;;  %v11314_v45 = vld [vmem:[#allocation3 + $0x8c0] sm:$0xff] }
0x1323   :  { %11849 = vmatprep.subr.bf16.mxu1 %v11201_v34  ;;  %v11321_v34 = vld [vmem:[#allocation3 + $0x8f8] sm:$0xff] }
0x1326   :  { %11850 = vmatpush1.bf16.msra.mxu1 %v11200_v19  ;;  %v11320_v19 = vld [vmem:[#allocation3 + $0x8f0] sm:$0xff] }
0x1327   :  { %11851 = vmatprep.subr.bf16.mxu1 %v11207_v16  ;;  %v11327_v16 = vld [vmem:[#allocation3 + $0x928] sm:$0xff] }
0x132a   :  { %11852 = vmatpush1.bf16.msra.mxu1 %v11206_v20  ;;  %v11326_v20 = vld [vmem:[#allocation3 + $0x920] sm:$0xff] }
0x132b   :  { %11853 = vmatprep.subr.bf16.mxu1 %v11213_v25  ;;  %v11333_v25 = vld [vmem:[#allocation3 + $0x958] sm:$0xff] }
0x132e   :  { %11854 = vmatpush1.bf16.msra.mxu1 %v11212_v24  ;;  %v11332_v24 = vld [vmem:[#allocation3 + $0x950] sm:$0xff] }
0x132f   :  { %11855 = vmatprep.subr.bf16.mxu1 %v11219_v39  ;;  %v11339_v39 = vld [vmem:[#allocation3 + $0x988] sm:$0xff] }
0x1332   :  { %11856 = vmatpush1.bf16.msra.mxu1 %v11218_v3  ;;  %v11338_v3 = vld [vmem:[#allocation3 + $0x980] sm:$0xff] }
0x1333   :  { %11857 = vmatprep.subr.bf16.mxu1 %v11225_v36  ;;  %v11345_v36 = vld [vmem:[#allocation3 + $0x9b8] sm:$0xff] }
0x1336   :  { %11858 = vmatpush1.bf16.msra.mxu1 %v11224_v8  ;;  %v11344_v8 = vld [vmem:[#allocation3 + $0x9b0] sm:$0xff] }
0x1337   :  { %11868 = vmatprep.subr.bf16.mxu1 %v11231_v43  ;;  %v11351_v43 = vld [vmem:[#allocation3 + $0x9e8] sm:$0xff] }
0x1339   :  { %11860 = vmatmul.mubr.bf16.vlgmr.msra.gmra.mrb[40].mxu1 %v18168_v30 }
0x133a   :  { %11869 = vmatpush1.bf16.msra.mxu1 %v11230_v48  ;;  %11900 = vmatprep.mubr.bf16.mxu1 %v18173_v41  ;;  %v18210_v48 = vld [vmem:[%s18364_s2 + $0x24] sm:$0x3f] }
0x133b   :  { %11870 = vmatprep.subr.bf16.mxu1 %v11237_v7  ;;  %v11350_v7 = vld [vmem:[#allocation3 + $0x9e0] sm:$0xff] }
0x133e   :  { %11871 = vmatpush1.bf16.msra.mxu1 %v11236_v56  ;;  %v13524_v56 = vmov 1983009808  }
0x133f   :  { %11872 = vmatprep.subr.bf16.mxu1 %v11243_v40  ;;  %v11965_v40 = vunpack.c.l.s4 %v13524_v56  ;;  %v11398_v56 = vld [vmem:[#allocation3 + $0xb60] sm:$0xff] }
0x1342   :  { %11873 = vmatpush1.bf16.msra.mxu1 %v11242_v22  ;;  %v11357_v22 = vld [vmem:[#allocation3 + $0xa18] sm:$0xff] }
0x1343   :  { %11874 = vmatprep.subr.bf16.mxu1 %v11249_v10  ;;  %v11431_v10 = vrot.slane %v18210_v48, %v16788_v47 }
0x1346   :  { %11875 = vmatpush1.bf16.msra.mxu1 %v11248_v21  ;;  %v11439_v21 = vrot.slane %v18210_v48, %v17189_v26 }
0x1347   :  { %11876 = vmatprep.subr.bf16.mxu1 %v11255_v15  ;;  %v11435_v15 = vrot.slane %v18210_v48, %v16794_v46 }
0x134a   :  { %11877 = vmatpush1.bf16.msra.mxu1 %v11254_v31  ;;  %v11443_v31 = vrot.slane %v18210_v48, %v17195_v23  ;;  %v11362_v23 = vld [vmem:[#allocation3 + $0xa40] sm:$0xff] }
0x134b   :  { %11878 = vmatprep.subr.bf16.mxu1 %v11261_v29  ;;  %v11356_v29 = vld [vmem:[#allocation3 + $0xa10] sm:$0xff] }
0x134e   :  { %11879 = vmatpush1.bf16.msra.mxu1 %v11260_v57 }
0x134f   :  { %11880 = vmatprep.subr.bf16.mxu1 %v11267_v1 }
0x1352   :  { %11881 = vmatpush1.bf16.msra.mxu1 %v11266_v0  ;;  %v11966_v0 = vunpack.c.0.s8 %v11965_v40  ;;  %v11405_v40 = vld [vmem:[#allocation3 + $0xb98] sm:$0xff] }
0x1353   :  { %11882 = vmatprep.subr.bf16.mxu1 %v11273_v17  ;;  %v11363_v17 = vld [vmem:[#allocation3 + $0xa48] sm:$0xff] }
0x1356   :  { %11883 = vmatpush1.bf16.msra.mxu1 %v11272_v37 }
0x1357   :  { %11884 = vmatprep.subr.bf16.mxu1 %v11279_v28 }
0x135a   :  { %11885 = vmatpush1.bf16.msra.mxu1 %v11278_v6 }
0x135b   :  { %11886 = vmatprep.subr.bf16.mxu1 %v11285_v27 }
0x135e   :  { %11887 = vmatpush1.bf16.msra.mxu1 %v11284_v11 }
0x135f   :  { %11888 = vmatprep.subr.bf16.mxu1 %v11291_v55 }
0x1362   :  { %11889 = vmatpush1.bf16.msra.mxu1 %v11290_v12 }
0x1363   :  { %11890 = vmatprep.subr.bf16.mxu1 %v11297_v9 }
0x1366   :  { %11891 = vmatpush1.bf16.msra.mxu1 %v11296_v49 }
0x1367   :  { %11892 = vmatprep.subr.bf16.mxu1 %v11303_v13 }
0x136a   :  { %11893 = vmatpush1.bf16.msra.mxu1 %v11302_v42  ;;  %v11969_v42 = vsub.s32 %v11966_v0, %v16785_v44  ;;  %v11387_v44 = vld [vmem:[#allocation3 + $0xb08] sm:$0xff] }
0x136b   :  { %11894 = vmatprep.subr.bf16.mxu1 %v11309_v18 }
0x136e   :  { %11895 = vmatpush1.bf16.msra.mxu1 %v11308_v33  ;;  %v11369_v33 = vld [vmem:[#allocation3 + $0xa78] sm:$0xff] }
0x136f   :  { %11896 = vmatprep.subr.bf16.mxu1 %v11315_v2 }
0x1372   :  { %11897 = vmatpush1.bf16.msra.mxu1 %v11314_v45 }
0x1373   :  { %11898 = vmatprep.subr.bf16.mxu1 %v11321_v34  ;;  %v11368_v34 = vld [vmem:[#allocation3 + $0xa70] sm:$0xff] }
0x1376   :  { %11899 = vmatpush1.bf16.msra.mxu1 %v11320_v19 }
0x1377   :  { %11909 = vmatprep.subr.bf16.mxu1 %v11327_v16 }
0x1379   :  { %11901 = vmatmul.mubr.bf16.vlgmr.msra.gmra.mrb[40].mxu1 %v18182_v54 }
0x137a   :  { %11910 = vmatpush1.bf16.msra.mxu1 %v11326_v20  ;;  %11941 = vmatprep.mubr.bf16.mxu1 %v18187_v5  ;;  %v11375_v20 = vld [vmem:[#allocation3 + $0xaa8] sm:$0xff] }
0x137b   :  { %11911 = vmatprep.subr.bf16.mxu1 %v11333_v25 }
0x137e   :  { %11912 = vmatpush1.bf16.msra.mxu1 %v11332_v24  ;;  %v11374_v24 = vld [vmem:[#allocation3 + $0xaa0] sm:$0xff] }
0x137f   :  { %11913 = vmatprep.subr.bf16.mxu1 %v11339_v39  ;;  %v11381_v39 = vld [vmem:[#allocation3 + $0xad8] sm:$0xff] }
0x1382   :  { %11914 = vmatpush1.bf16.msra.mxu1 %v11338_v3  ;;  %v11380_v3 = vld [vmem:[#allocation3 + $0xad0] sm:$0xff] }
0x1383   :  { %11915 = vmatprep.subr.bf16.mxu1 %v11345_v36  ;;  %v11386_v36 = vld [vmem:[#allocation3 + $0xb00] sm:$0xff] }
0x1386   :  { %11916 = vmatpush1.bf16.msra.mxu1 %v11344_v8  ;;  %v11393_v8 = vld [vmem:[#allocation3 + $0xb38] sm:$0xff] }
0x1387   :  { %11917 = vmatprep.subr.bf16.mxu1 %v11351_v43  ;;  %v11392_v43 = vld [vmem:[#allocation3 + $0xb30] sm:$0xff] }
0x138a   :  { %11918 = vmatpush1.bf16.msra.mxu1 %v11350_v7  ;;  %v11399_v7 = vld [vmem:[#allocation3 + $0xb68] sm:$0xff] }
0x138b   :  { %11919 = vmatprep.subr.bf16.mxu1 %v11357_v22  ;;  %v11404_v22 = vld [vmem:[#allocation3 + $0xb90] sm:$0xff] }
0x138c   :  { %v11615_v57 = vpop.f32.mrb[36].mxu1  ;;  %v11779_v1 = vpop.f32.mrb[76].mxu0 }
0x138d   :  { %v12922_v37 = vadd.f32 %v11615_v57, %v11431_v10  ;;  %v12924_v28 = vadd.f32 %v11779_v1, %v11439_v21  ;;  %v11617_v6 = vpop.f32.mrb[37].mxu1  ;;  %v11781_v47 = vpop.f32.mrb[77].mxu0  ;;  %v11411_v10 = vld [vmem:[#allocation3 + $0xbc8] sm:$0xff]  ;;  %v11410_v21 = vld [vmem:[#allocation3 + $0xbc0] sm:$0xff]  ;;  %v11451_v57 = vrot.slane %v18210_v48, %v17235_v35 }
0x138e   :  { %v12923_v27 = vadd.f32 %v11617_v6, %v11435_v15  ;;  %v12925_v11 = vadd.f32 %v11781_v47, %v11443_v31  ;;  %v11619_v26 = vpop.f32.mrb[38].mxu1  ;;  %11920 = vmatpush1.bf16.msra.mxu1 %v11356_v29  ;;  %v11783_v55 = vpop.f32.mrb[78].mxu0  ;;  %v11417_v15 = vld [vmem:[#allocation3 + $0xbf8] sm:$0xff]  ;;  %v11416_v31 = vld [vmem:[#allocation3 + $0xbf0] sm:$0xff]  ;;  %v11447_v29 = vrot.slane %v18210_v48, %v17232_v14 }
0x138f   :  { %v11950_v12 = vmax.f32 %v12922_v37, 0.0  ;;  %v11952_v46 = vmax.f32 %v12924_v28, 0.0  ;;  %v11620_v9 = vpop.f32.mrb[39].mxu1  ;;  %11921 = vmatprep.subr.bf16.mxu1 %v11363_v17  ;;  %v11784_v49 = vpop.f32.mrb[79].mxu0 }
0x1390   :  { %v11951_v13 = vmax.f32 %v12923_v27, 0.0  ;;  %v11953_v18 = vmax.f32 %v12925_v11, 0.0 }
0x1392   :  { %v11962_v2 = vcombine.low %v11950_v12, %v11951_v13  ;;  %v11963_v45 = vcombine.low %v11952_v46, %v11953_v18  ;;  %11922 = vmatpush1.bf16.msra.mxu1 %v11362_v23 }
0x1393   :  { %11923 = vmatprep.subr.bf16.mxu1 %v11369_v33 }
0x1394   :  { %v11970_v19 = vrot.slane %v11962_v2, %v11969_v42  ;;  %v11977_v16 = vrot.slane %v11963_v45, %v11969_v42 }
0x1396   :  { %v11978_v25 = vcombine.low %v11970_v19, %v11977_v16  ;;  %11924 = vmatpush1.bf16.msra.mxu1 %v11368_v34 }
0x1397   :  { %11925 = vmatprep.subr.bf16.mxu1 %v11375_v20 }
0x1398   :  { %11989 = vst [vmem:[#allocation8] sm:$0xff] %v11978_v25 }
0x139a   :  { %11926 = vmatpush1.bf16.msra.mxu1 %v11374_v24 }
0x139b   :  { %11927 = vmatprep.subr.bf16.mxu1 %v11381_v39 }
0x139e   :  { %11928 = vmatpush1.bf16.msra.mxu1 %v11380_v3 }
0x139f   :  { %11929 = vmatprep.subr.bf16.mxu1 %v11387_v44 }
0x13a2   :  { %11930 = vmatpush1.bf16.msra.mxu1 %v11386_v36 }
0x13a3   :  { %11931 = vmatprep.subr.bf16.mxu1 %v11393_v8 }
0x13a6   :  { %11932 = vmatpush1.bf16.msra.mxu1 %v11392_v43 }
0x13a7   :  { %11933 = vmatprep.subr.bf16.mxu1 %v11399_v7 }
0x13aa   :  { %11934 = vmatpush1.bf16.msra.mxu1 %v11398_v56 }
0x13ab   :  { %11935 = vmatprep.subr.bf16.mxu1 %v11405_v40 }
0x13ae   :  { %11936 = vmatpush1.bf16.msra.mxu1 %v11404_v22 }
0x13af   :  { %11937 = vmatprep.subr.bf16.mxu1 %v11411_v10 }
0x13b2   :  { %11938 = vmatpush1.bf16.msra.mxu1 %v11410_v21 }
0x13b3   :  { %11939 = vmatprep.subr.bf16.mxu1 %v11417_v15 }
0x13b6   :  { %11940 = vmatpush1.bf16.msra.mxu1 %v11416_v31 }
0x13b9   :  { %11942 = vmatmul.mubr.bf16.vlgmr.msra.gmra.mrb[40].mxu1 %v18196_v38 }
0x148c   :  { %v11943_v1 = vpop.f32.mrb[40].mxu1 }
0x148d   :  { %v12926_v0 = vadd.f32 %v11943_v1, %v11447_v29  ;;  %v11945_v17 = vpop.f32.mrb[41].mxu1 }
0x148e   :  { %v12927_v37 = vadd.f32 %v11945_v17, %v11451_v57  ;;  %v11947_v28 = vpop.f32.mrb[42].mxu1 }
0x148f   :  { %v11954_v6 = vmax.f32 %v12926_v0, 0.0  ;;  %v11948_v47 = vpop.f32.mrb[43].mxu1 }
0x1490   :  { %v11955_v27 = vmax.f32 %v12927_v37, 0.0 }
0x1492   :  { %v11979_v11 = vcombine.low %v11954_v6, %v11955_v27 }
0x1494   :  { %12727 = vst.sshfl [vmem:[#allocation8 + $0x8] sm:$0x33 pattern:$0x76325410] %v11979_v11 }
0x1495   :  { %13515 = dma.done.wait [#allocation5 + $0x2], 8192 }
0x1496   :  { %13516 = vsyncadd [#allocation5 + $0x2], 4294959104  ;;  %12758 = vmatpush3.bf16.msra.mxu0 %v16438_v50  ;;  %v18442_v58 = vld [vmem:[#allocation18_spill] sm:$0xff]  ;;  %v18444_v35 = vld [vmem:[#allocation19_spill] sm:$0xff]  ;;  %v18497_v0 = vmov 0.0  }
0x1497   :  { %12759 = vmatprep.subr.bf16.mxu0 %v16483_v59  ;;  %v18443_v14 = vld [vmem:[#allocation22_spill] sm:$0xff]  ;;  %v18445_v50 = vld [vmem:[#allocation23_spill] sm:$0xff]  ;;  %v18446_v59 = vld [vmem:[#allocation20_spill] sm:$0xff] }
0x1498   :  { %v18453_v32 = vld [vmem:[#allocation35_spill] sm:$0xff]  ;;  %v18455_v26 = vld [vmem:[#allocation36_spill] sm:$0xff]  ;;  %v18457_v12 = vld [vmem:[#allocation37_spill] sm:$0xff] }
0x1499   :  { %v18454_v48 = vld [vmem:[#allocation27_spill] sm:$0xff]  ;;  %v18456_v55 = vld [vmem:[#allocation28_spill] sm:$0xff]  ;;  %v18458_v46 = vld [vmem:[#allocation29_spill] sm:$0xff] }
0x149a   :  { %12760 = vmatpush3.bf16.msra.mxu0 %v16443_v51  ;;  %v18447_v51 = vld [vmem:[#allocation24_spill] sm:$0xff]  ;;  %v18460_v9 = vld [vmem:[#allocation30_spill] sm:$0xff]  ;;  %v18462_v23 = vld [vmem:[#allocation31_spill] sm:$0xff] }
0x149b   :  { %12761 = vmatprep.subr.bf16.mxu0 %v16488_v60  ;;  %v18448_v60 = vld [vmem:[#allocation21_spill] sm:$0xff]  ;;  %v18463_v49 = vld [vmem:[#allocation40_spill] sm:$0xff]  ;;  %v18467_v33 = vld [vmem:[#allocation50_spill] sm:$0xff] }
0x149c   :  { %v18464_v13 = vld [vmem:[#allocation32_spill] sm:$0xff]  ;;  %v18465_v42 = vld [vmem:[#allocation49_spill] sm:$0xff]  ;;  %v18468_v2 = vld [vmem:[#allocation42_spill] sm:$0xff] }
0x149d   :  { %v18466_v18 = vld [vmem:[#allocation41_spill] sm:$0xff]  ;;  %v18469_v45 = vld [vmem:[#allocation51_spill] sm:$0xff]  ;;  %v18471_v19 = vld [vmem:[#allocation52_spill] sm:$0xff] }
0x149e   :  { %12762 = vmatpush3.bf16.msra.mxu0 %v16448_v52  ;;  %v18449_v52 = vld [vmem:[#allocation33_spill] sm:$0xff]  ;;  %v18470_v34 = vld [vmem:[#allocation43_spill] sm:$0xff]  ;;  %v18472_v16 = vld [vmem:[#allocation44_spill] sm:$0xff] }
0x149f   :  { %12763 = vmatprep.subr.bf16.mxu0 %v16493_v61  ;;  %v18451_v61 = vld [vmem:[#allocation34_spill] sm:$0xff]  ;;  %v18473_v20 = vld [vmem:[#allocation53_spill] sm:$0xff]  ;;  %v18478_v39 = vld [vmem:[#allocation47_spill] sm:$0xff] }
0x14a0   :  { %v18474_v25 = vld [vmem:[#allocation45_spill] sm:$0xff]  ;;  %v18476_v24 = vld [vmem:[#allocation46_spill] sm:$0xff]  ;;  %v18479_v3 = vld [vmem:[#allocation56_spill] sm:$0xff] }
0x14a1   :  { %v18480_v44 = vld [vmem:[#allocation48_spill] sm:$0xff]  ;;  %v18481_v36 = vld [vmem:[#allocation65_spill] sm:$0xff]  ;;  %v18483_v43 = vld [vmem:[#allocation66_spill] sm:$0xff] }
0x14a2   :  { %12764 = vmatpush3.bf16.msra.mxu0 %v16453_v53  ;;  %v18450_v53 = vld [vmem:[#allocation25_spill] sm:$0xff]  ;;  %v18484_v7 = vld [vmem:[#allocation58_spill] sm:$0xff]  ;;  %v18485_v56 = vld [vmem:[#allocation67_spill] sm:$0xff] }
0x14a3   :  { %12765 = vmatprep.subr.bf16.mxu0 %v16498_v62  ;;  %v18452_v62 = vld [vmem:[#allocation26_spill] sm:$0xff]  ;;  %v18482_v8 = vld [vmem:[#allocation57_spill] sm:$0xff]  ;;  %v18486_v40 = vld [vmem:[#allocation59_spill] sm:$0xff] }
0x14a4   :  { %v18487_v22 = vld [vmem:[#allocation68_spill] sm:$0xff]  ;;  %v18489_v21 = vld [vmem:[#allocation69_spill] sm:$0xff]  ;;  %v18492_v31 = vld [vmem:[#allocation62_spill] sm:$0xff] }
0x14a5   :  { %v18488_v10 = vld [vmem:[#allocation60_spill] sm:$0xff]  ;;  %v18490_v15 = vld [vmem:[#allocation61_spill] sm:$0xff]  ;;  %v18494_v29 = vld [vmem:[#allocation63_spill] sm:$0xff] }
0x14a6   :  { %12766 = vmatpush3.bf16.msra.mxu0 %v18442_v58  ;;  %v18495_v57 = vld [vmem:[#allocation72_spill] sm:$0xff]  ;;  %v13460_v37 = vld [vmem:[%s18370_s8 + $0x8] sm:$0xff]   ;;  %v13461_v28 = vld [vmem:[%s18370_s8 + $0x10] sm:$0xff]  }
0x14a7   :  { %12767 = vmatprep.subr.bf16.mxu0 %v18443_v14  ;;  %v18496_v1 = vld [vmem:[#allocation64_spill] sm:$0xff]  ;;  %v13464_v47 = vld [vmem:[%s18370_s8 + $0x28] sm:$0xff]   ;;  %v13465_v27 = vld [vmem:[%s18370_s8 + $0x30] sm:$0xff]  }
0x14a8   :  { %v13459_v17 = vld [vmem:[%s18370_s8] sm:$0xff]   ;;  %v13466_v11 = vld [vmem:[%s18370_s8 + $0x38] sm:$0xff]  }
0x14a9   :  { %v13463_v6 = vld [vmem:[%s18370_s8 + $0x20] sm:$0xff]  }
0x14aa   :  { %12768 = vmatpush3.bf16.msra.mxu0 %v18444_v35 }
0x14ab   :  { %12769 = vmatprep.subr.bf16.mxu0 %v18445_v50 }
0x14ae   :  { %12770 = vmatpush3.bf16.msra.mxu0 %v18446_v59 }
0x14af   :  { %12771 = vmatprep.subr.bf16.mxu0 %v18447_v51  ;;  %v12728_v51 = vld [vmem:[%s18364_s2 + $0x2a] ss:$0 sm:$0xff] }
0x14b2   :  { %12772 = vmatpush3.bf16.msra.mxu0 %v18448_v60 }
0x14b3   :  { %12779 = vmatprep.subr.bf16.mxu0 %v18449_v52 }
0x14b5   :  { %12098 = vmatmul.mubr.bf16.vlgmr.msra.gmra.mrb[80].mxu0 %v18154_v4  ;;  %v18459_v4 = vld [vmem:[#allocation38_spill] sm:$0xff] }
0x14b6   :  { %12780 = vmatpush3.bf16.msra.mxu0 %v18450_v53  ;;  %12137 = vmatprep.mubr.bf16.mxu0 %v18159_v63  ;;  %v18461_v63 = vld [vmem:[#allocation39_spill] sm:$0xff] }
0x14b7   :  { %12781 = vmatprep.subr.bf16.mxu0 %v18451_v61 }
0x14ba   :  { %12782 = vmatpush3.bf16.msra.mxu0 %v18452_v62 }
0x14bb   :  { %12783 = vmatprep.subr.bf16.mxu0 %v18453_v32 }
0x14be   :  { %12784 = vmatpush3.bf16.msra.mxu0 %v18454_v48 }
0x14bf   :  { %12785 = vmatprep.subr.bf16.mxu0 %v18455_v26 }
0x14c2   :  { %12786 = vmatpush3.bf16.msra.mxu0 %v18456_v55 }
0x14c3   :  { %12787 = vmatprep.subr.bf16.mxu0 %v18457_v12 }
0x14c6   :  { %12788 = vmatpush3.bf16.msra.mxu0 %v18458_v46 }
0x14c7   :  { %12789 = vmatprep.subr.bf16.mxu0 %v18459_v4 }
0x14ca   :  { %12790 = vmatpush3.bf16.msra.mxu0 %v18460_v9 }
0x14cb   :  { %12791 = vmatprep.subr.bf16.mxu0 %v18461_v63 }
0x14ce   :  { %12792 = vmatpush3.bf16.msra.mxu0 %v18462_v23 }
0x14cf   :  { %12793 = vmatprep.subr.bf16.mxu0 %v18463_v49 }
0x14d2   :  { %12794 = vmatpush3.bf16.msra.mxu0 %v18464_v13 }
0x14d3   :  { %12801 = vmatprep.subr.bf16.mxu0 %v18465_v42 }
0x14d5   :  { %12138 = vmatmul.mubr.bf16.vlgmr.msra.gmra.mrb[84].mxu0 %v18168_v30  ;;  %v18475_v30 = vld [vmem:[#allocation54_spill] sm:$0xff] }
0x14d6   :  { %12802 = vmatpush3.bf16.msra.mxu0 %v18466_v18  ;;  %12177 = vmatprep.mubr.bf16.mxu0 %v18173_v41  ;;  %v18477_v41 = vld [vmem:[#allocation55_spill] sm:$0xff] }
0x14d7   :  { %12803 = vmatprep.subr.bf16.mxu0 %v18467_v33 }
0x14da   :  { %12804 = vmatpush3.bf16.msra.mxu0 %v18468_v2 }
0x14db   :  { %12805 = vmatprep.subr.bf16.mxu0 %v18469_v45 }
0x14de   :  { %12806 = vmatpush3.bf16.msra.mxu0 %v18470_v34 }
0x14df   :  { %12807 = vmatprep.subr.bf16.mxu0 %v18471_v19 }
0x14e2   :  { %12808 = vmatpush3.bf16.msra.mxu0 %v18472_v16 }
0x14e3   :  { %12809 = vmatprep.subr.bf16.mxu0 %v18473_v20 }
0x14e6   :  { %12810 = vmatpush3.bf16.msra.mxu0 %v18474_v25 }
0x14e7   :  { %12811 = vmatprep.subr.bf16.mxu0 %v18475_v30 }
0x14ea   :  { %12812 = vmatpush3.bf16.msra.mxu0 %v18476_v24 }
0x14eb   :  { %12813 = vmatprep.subr.bf16.mxu0 %v18477_v41 }
0x14ee   :  { %12814 = vmatpush3.bf16.msra.mxu0 %v18478_v39 }
0x14ef   :  { %12815 = vmatprep.subr.bf16.mxu0 %v18479_v3 }
0x14f2   :  { %12816 = vmatpush3.bf16.msra.mxu0 %v18480_v44 }
0x14f3   :  { %12823 = vmatprep.subr.bf16.mxu0 %v18481_v36 }
0x14f5   :  { %12178 = vmatmul.mubr.bf16.vlgmr.msra.gmra.mrb[88].mxu0 %v18182_v54  ;;  %v18491_v54 = vld [vmem:[#allocation70_spill] sm:$0xff] }
0x14f6   :  { %12824 = vmatpush3.bf16.msra.mxu0 %v18482_v8  ;;  %12217 = vmatprep.mubr.bf16.mxu0 %v18187_v5  ;;  %v18493_v5 = vld [vmem:[#allocation71_spill] sm:$0xff] }
0x14f7   :  { %12825 = vmatprep.subr.bf16.mxu0 %v18483_v43 }
0x14fa   :  { %12826 = vmatpush3.bf16.msra.mxu0 %v18484_v7 }
0x14fb   :  { %12827 = vmatprep.subr.bf16.mxu0 %v18485_v56 }
0x14fe   :  { %12828 = vmatpush3.bf16.msra.mxu0 %v18486_v40 }
0x14ff   :  { %12829 = vmatprep.subr.bf16.mxu0 %v18487_v22 }
0x1502   :  { %12830 = vmatpush3.bf16.msra.mxu0 %v18488_v10 }
0x1503   :  { %12831 = vmatprep.subr.bf16.mxu0 %v18489_v21 }
0x1506   :  { %12832 = vmatpush3.bf16.msra.mxu0 %v18490_v15 }
0x1507   :  { %12833 = vmatprep.subr.bf16.mxu0 %v18491_v54 }
0x150a   :  { %12834 = vmatpush3.bf16.msra.mxu0 %v18492_v31 }
0x150b   :  { %12835 = vmatprep.subr.bf16.mxu0 %v18493_v5 }
0x150e   :  { %12836 = vmatpush3.bf16.msra.mxu0 %v18494_v29 }
0x150f   :  { %12837 = vmatprep.subr.bf16.mxu0 %v18495_v57 }
0x1512   :  { %12838 = vmatpush3.bf16.msra.mxu0 %v18496_v1 }
0x1513   :  { %12902 = vmatprep.subr.bf16.mxu0 %v18497_v0 }
0x1515   :  { %12218 = vmatmul.mubr.bf16.vlgmr.msra.gmra.mrb[92].mxu0 %v18196_v38  ;;  %v13462_v38 = vld [vmem:[%s18370_s8 + $0x18] sm:$0xff]   ;;  %s13525_s8 = smov [#allocation8]  }
0x1516   :  { %12918 = vmatprep.mubr.msk.bf16.mxu0 %vm13523_vm1, %v18497_v0  ;;  %12903 = vmatpush3.bf16.msra.mxu0 %v13459_v17  ;;  %s12355_s4 = sshll.u32 %s13525_s8, 4  ;;  %s12356_s4 = int_to_ptr.vmem [resolvable:$true] %s12355_s4 }
0x1517   :  { %12904 = vmatprep.subr.bf16.mxu0 %v18497_v0  ;;  %s13467_s7 = scalar_lea.vmem %s12356_s4, 192  ;;  %p13472_p1 = scmp.lt.s32.totalorder %s12356_s4, %s12356_s4 }
0x1518   :  { %p13468_p0 = scmp.ne.s32.totalorder %s12356_s4, %s13467_s7  ;;  %p13473_p2 = scmp.lt.s32.totalorder %s13467_s7, %s13467_s7 }
0x151a   :  { %12905 = vmatpush3.bf16.msra.mxu0 %v13460_v37  ;;  %p13474_p3 = por %p13473_p2, %p13472_p1 }
0x151b   :  { %12906 = vmatprep.subr.bf16.mxu0 %v18497_v0 }
0x151c   :  { %p13475_p4 = pnand %p13474_p3, %p13468_p0 }
0x151e   :  { %12907 = vmatpush3.bf16.msra.mxu0 %v13461_v28 }
0x151f   :  { %12908 = vmatprep.subr.bf16.mxu0 %v18497_v0 }
0x1522   :  { %12909 = vmatpush3.bf16.msra.mxu0 %v13462_v38 }
0x1523   :  { %12910 = vmatprep.subr.bf16.mxu0 %v18497_v0 }
0x1526   :  { %12911 = vmatpush3.bf16.msra.mxu0 %v13463_v6 }
0x1527   :  { %12912 = vmatprep.subr.bf16.mxu0 %v18497_v0 }
0x152a   :  { %12913 = vmatpush3.bf16.msra.mxu0 %v13464_v47 }
0x152b   :  { %12914 = vmatprep.subr.bf16.mxu0 %v18497_v0 }
0x152e   :  { %12915 = vmatpush3.bf16.msra.mxu0 %v13465_v27 }
0x152f   :  { %12916 = vmatprep.subr.bf16.mxu0 %v18497_v0 }
0x1532   :  { %12917 = vmatpush3.bf16.msra.mxu0 %v13466_v11 }
0x1588   :  { %v12773_v58 = vpop.f32.mrb[80].mxu0 }
0x1589   :  { %v12774_v14 = vpop.f32.mrb[81].mxu0 }
0x158a   :  { %v12775_v35 = vadd.f32 %v12774_v14, %v12773_v58  ;;  %v12776_v50 = vpop.f32.mrb[82].mxu0 }
0x158b   :  { %v12777_v59 = vpop.f32.mrb[83].mxu0 }
0x158c   :  { %v12100_v53 = vadd.f32 %v12775_v35, %v12728_v51 }
0x15a8   :  { %v12795_v60 = vpop.f32.mrb[84].mxu0 }
0x15a9   :  { %v12796_v52 = vpop.f32.mrb[85].mxu0 }
0x15aa   :  { %v12797_v61 = vadd.f32 %v12796_v52, %v12795_v60  ;;  %v12798_v62 = vpop.f32.mrb[86].mxu0 }
0x15ab   :  { %v12799_v32 = vpop.f32.mrb[87].mxu0 }
0x15ac   :  { %v12140_v48 = vadd.f32 %v12797_v61, %v12100_v53 }
0x15c8   :  { %v12817_v26 = vpop.f32.mrb[88].mxu0 }
0x15c9   :  { %v12818_v55 = vpop.f32.mrb[89].mxu0 }
0x15ca   :  { %v12819_v12 = vadd.f32 %v12818_v55, %v12817_v26  ;;  %v12820_v46 = vpop.f32.mrb[90].mxu0 }
0x15cb   :  { %v12821_v4 = vpop.f32.mrb[91].mxu0 }
0x15cc   :  { %v12180_v9 = vadd.f32 %v12819_v12, %v12140_v48 }
0x15e8   :  { %v12839_v63 = vpop.f32.mrb[92].mxu0 }
0x15e9   :  { %v12840_v23 = vpop.f32.mrb[93].mxu0 }
0x15ea   :  { %v12841_v49 = vadd.f32 %v12840_v23, %v12839_v63  ;;  %v12842_v13 = vpop.f32.mrb[94].mxu0 }
0x15eb   :  { %v12843_v42 = vpop.f32.mrb[95].mxu0 }
0x15ec   :  { %v12220_v18 = vadd.f32 %v12841_v49, %v12180_v9 }
0x15ee   :  { %v12225_v33 = vmax.f32 %v12220_v18, 0.0 }
0x15f0   :  { %v12242_v2 = vpack.c.bf16 %v12225_v33, %v12225_v33 }
0x15f2   :  { %12919 = vmatmul.mubr.bf16.vlgmr.msra.gmra.mrb[96].mxu0 %v12242_v2 }
0x15f3   :  { %13478 = shalt.err (!%p13475_p4)
}
0x15f4   :  { %s13479_s16 = scalar_lea.hbm %s18375_s13, 192 }
0x15f5   :  { %p13480_p5 = scmp.ne.s32.totalorder %s18375_s13, %s13479_s16  ;;  %p13483_p6 = scmp.lt.u32.totalorder %s13479_s16, %s18375_s13 }
0x15f7   :  { %p13485_p7 = pnand %p13483_p6, %p13480_p5 }
0x15f9   :  { %13488 = shalt.err (!%p13485_p7)
}
0x15fa   :  { %12358 = dma.vmem_to_hbm [thread:$0]  %s12356_s4, 192, %s18375_s13, [#allocation9]   ;;  %v12729_v45 = vld [vmem:[%s18364_s2 + $0x2b] ss:$0 sm:$0xff] }
0x15fb   :  { %s13526_s22 = smov [#allocation6]  }
0x15fc   :  { %s12345_s23 = sshll.u32 %s13526_s22, 4  ;;  %s12346_s23 = int_to_ptr.vmem [resolvable:$true] %s12345_s23 }
0x15fd   :  { %s13489_s24 = scalar_lea.vmem %s12346_s23, 32  ;;  %p13494_p9 = scmp.lt.s32.totalorder %s12346_s23, %s12346_s23 }
0x15fe   :  { %p13490_p8 = scmp.ne.s32.totalorder %s12346_s23, %s13489_s24  ;;  %p13495_p10 = scmp.lt.s32.totalorder %s13489_s24, %s13489_s24 }
0x1600   :  { %p13496_p11 = por %p13495_p10, %p13494_p9 }
0x1602   :  { %p13497_p12 = pnand %p13496_p11, %p13490_p8 }
0x16c5   :  { %v12332_v34 = vpop.f32.mrb[96].mxu0 }
0x16c6   :  { %v12333_v19 = vadd.f32 %v12729_v45, %v12332_v34  ;;  %v12920_v16 = vpop.f32.mrb[97].mxu0 }
0x16c7   :  { %v12335_v20 = vpop.f32.mrb[98].mxu0 }
0x16c8   :  { %12338 = vst [vmem:[#allocation6] sm:$0x3] %v12333_v19  ;;  %v12921_v25 = vpop.f32.mrb[99].mxu0 }
0x16c9   :  { %13500 = shalt.err (!%p13497_p12)
}
0x16ca   :  { %s13501_s2 = scalar_lea.hbm %s18374_s12, 32 }
0x16cb   :  { %p13502_p13 = scmp.ne.s32.totalorder %s18374_s12, %s13501_s2  ;;  %p13505_p0 = scmp.lt.u32.totalorder %s13501_s2, %s18374_s12 }
0x16cd   :  { %p13507_p1 = pnand %p13505_p0, %p13502_p13 }
0x16cf   :  { %13510 = shalt.err (!%p13507_p1)
}
0x16d0   :  { %12348 = dma.vmem_to_hbm [thread:$0]  %s12346_s23, 32, %s18374_s12, [#allocation7]  }
0x16d1   :  { %13517 = dma.done.wait [#allocation7], 32  }
0x16d2   :  { %13518 = vsyncadd [#allocation7], 4294967264 }
0x16d3   :  { %13519 = dma.done.wait [#allocation9], 192  }
0x16d4   :  { %13520 = vsyncadd [#allocation9], 4294967104 }
0x16d5   :  { %12365 = vsyncpa [#allocation7], 1 }
0x16d6   :  { %12366 = vsyncpa [#allocation9], 1 }
0x16d7   :  { %12367 = vsyncmov [#allocation5] }
0x16da   :  { %s12368_s30 = vpop.sfrf %12367 }
0x16db   :  { %p12738_p2 = scmp.ne.s32.totalorder %s12368_s30, 0 }
0x16dd   :  { %12372 = shalt.err (%p12738_p2)  }
0x16de   :  { %12374 = vsyncmov [#allocation5 + $0x1] }
0x16e1   :  { %s12375_s6 = vpop.sfrf %12374 }
0x16e2   :  { %p12739_p3 = scmp.ne.s32.totalorder %s12375_s6, 0 }
0x16e4   :  { %12379 = shalt.err (%p12739_p3)  }
0x16e5   :  { %12381 = vsyncmov [#allocation5 + $0x2] }
0x16e8   :  { %s12382_s14 = vpop.sfrf %12381 }
0x16e9   :  { %p12740_p4 = scmp.ne.s32.totalorder %s12382_s14, 0 }
0x16eb   :  { %12386 = shalt.err (%p12740_p4)  }

</bundles_post_ra>
